<compile_context>
chip_gen: v6e
topology: v6e:2x2x1
jax: 0.10.0
libtpu: 0.0.40
codegen_flags: <defaults>
</compile_context>

<pallas_src>
import functools

import jax
import jax.numpy as jnp
from jax.experimental import pallas as pl
from jax.experimental.pallas import tpu as pltpu


# ---------------------------------------------------------------------------
# Static shape helpers
# ---------------------------------------------------------------------------
def conv_output_dims(h, w):
    h1, w1 = (h - 8) // 4 + 1, (w - 8) // 4 + 1    # conv1 k=8 s=4
    h2, w2 = (h1 - 4) // 2 + 1, (w1 - 4) // 2 + 1  # conv2 k=4 s=2
    h3, w3 = (h2 - 3) // 1 + 1, (w2 - 3) // 1 + 1  # conv3 k=3 s=1
    return (h1, w1), (h2, w2), (h3, w3)


# ---------------------------------------------------------------------------
# Fused forward kernel: everything stays in VMEM.
# ---------------------------------------------------------------------------
def _fused_dqn_kernel(xs_ref, w1_ref, b1_ref, w2_ref, b2_ref, w3_ref, b3_ref,
                      fw1_ref, fb1_ref, fw2_ref, fb2_ref,
                      out_ref,
                      p1_ref, a1_ref, p2_ref, a2_ref, p3_ref, cf_ref,
                      *, B, oh1, ow1, oh2, ow2, oh3, ow3, c1s):
    # ---- conv1 ------------------------------------------------------------
    # The original 8x8 / stride-4 conv is a 2x2 / stride-1 conv on the
    # space-to-depth input xs (B, oh1+1, ow1+1, c1s).  Build the
    # (B*oh1*ow1, 4*c1s) im2col patch matrix with contiguous row-block copies
    # (one (ow1, c1s) slab per copy), then a single MXU matmul.
    for idx, (ki, kj) in enumerate(((0, 0), (0, 1), (1, 0), (1, 1))):
        for b in range(B):
            for oi in range(oh1):
                r = b * oh1 * ow1 + oi * ow1
                p1_ref[r:r + ow1, idx * c1s:(idx + 1) * c1s] = (
                    xs_ref[b, oi + ki, kj:kj + ow1, :])
    b1 = b1_ref[...]
    act1 = jnp.dot(p1_ref[...], w1_ref[...], preferred_element_type=jnp.float32)
    act1 = jnp.maximum(act1 + b1, 0.0)
    for b in range(B):
        for oi in range(oh1):
            r = b * oh1 * ow1 + oi * ow1
            a1_ref[b, oi, :, :] = act1[r:r + ow1, :]

    # ---- conv2: 4x4 stride-2 ----------------------------------------------
    # Per output pixel: gather the contiguous 4x4x32 window into a (B, 512)
    # patch block with small VMEM copies, then one MXU matmul (K=512).
    b2 = b2_ref[...]
    for oi in range(oh2):
        for oj in range(ow2):
            for ki in range(4):
                for kj in range(4):
                    col = (ki * 4 + kj) * 32
                    p2_ref[:, col:col + 32] = a1_ref[:, 2 * oi + ki, 2 * oj + kj, :]
            act2 = jnp.dot(p2_ref[...], w2_ref[...],
                           preferred_element_type=jnp.float32)
            a2_ref[:, oi, oj, :] = jnp.maximum(act2 + b2, 0.0)

    # ---- conv3: 3x3 stride-1 ----------------------------------------------
    # Same per-pixel scheme; results are written directly in (h, w, c) flatten
    # order, which the pre-permuted fc1 weight expects.
    b3 = b3_ref[...]
    for oi in range(oh3):
        for oj in range(ow3):
            for ki in range(3):
                for kj in range(3):
                    col = (ki * 3 + kj) * 64
                    p3_ref[:, col:col + 64] = a2_ref[:, oi + ki, oj + kj, :]
            act3 = jnp.dot(p3_ref[...], w3_ref[...],
                           preferred_element_type=jnp.float32)
            ccol = (oi * ow3 + oj) * 64
            cf_ref[:, ccol:ccol + 64] = jnp.maximum(act3 + b3, 0.0)

    # ---- fully-connected head ----------------------------------------------
    # PyTorch's NCHW channel-major flatten is already folded into fw1's rows.
    h = jnp.dot(cf_ref[...], fw1_ref[...], preferred_element_type=jnp.float32)
    h = jnp.maximum(h + fb1_ref[...], 0.0)
    q = jnp.dot(h, fw2_ref[...], preferred_element_type=jnp.float32)
    out_ref[...] = (q + fb2_ref[...]).astype(out_ref.dtype)


# ---------------------------------------------------------------------------
# Forward wrapper (builds the fused pallas_call for a fixed architecture).
# ---------------------------------------------------------------------------
def make_dqn_forward(input_shape, n_actions):
    H, W, C = input_shape
    (oh1, ow1), (oh2, ow2), (oh3, ow3) = conv_output_dims(H, W)
    hs, ws = oh1 + 1, ow1 + 1           # spatial dims after space-to-depth(4)
    c1s = 16 * C                        # channels after space-to-depth(4)
    conv_out = 64 * oh3 * ow3
    n_pad = ((n_actions + 127) // 128) * 128   # lane-dense output width

    def forward(prep, x):
        # Matches torch's unsqueeze(0) behaviour for single observations.
        if x.ndim == 3:
            x = x[None]
        B = x.shape[0]

        # Space-to-depth(4) of the input: the only per-call XLA glue
        # (single reshape/transpose of a ~20 KB tensor).
        xc = x[:, :4 * hs, :4 * ws, :]
        xs = xc.reshape(B, hs, 4, ws, 4, C)
        xs = jnp.transpose(xs, (0, 1, 3, 2, 4, 5)).reshape(B, hs, ws, c1s)

        kernel = functools.partial(
            _fused_dqn_kernel, B=B, oh1=oh1, ow1=ow1, oh2=oh2, ow2=ow2,
            oh3=oh3, ow3=ow3, c1s=c1s)
        vmem = pl.BlockSpec(memory_space=pltpu.MemorySpace.VMEM)

        q = pl.pallas_call(
            kernel,
            out_shape=jax.ShapeDtypeStruct((B, n_pad), jnp.float32),
            in_specs=[vmem] * 11,
            out_specs=vmem,
            scratch_shapes=[
                pltpu.VMEM((B * oh1 * ow1, 4 * c1s), jnp.float32),  # conv1 patches
                pltpu.VMEM((B, oh1, ow1, 32), jnp.float32),         # conv1 output
                pltpu.VMEM((B, 4 * 4 * 32), jnp.float32),           # conv2 patch
                pltpu.VMEM((B, oh2, ow2, 64), jnp.float32),         # conv2 output
                pltpu.VMEM((B, 3 * 3 * 64), jnp.float32),           # conv3 patch
                pltpu.VMEM((B, conv_out), jnp.float32),             # flat conv out
            ],
        )(xs, prep["w1"], prep["b1"], prep["w2"], prep["b2"],
          prep["w3"], prep["b3"], prep["fw1"], prep["fb1"],
          prep["fw2"], prep["fb2"])
        return q[:, :n_actions]

    return forward


# ---------------------------------------------------------------------------
# One-time parameter preparation (outside the jitted hot path).
# ---------------------------------------------------------------------------
def prepare_params(params, input_shape, n_actions):
    H, W, C = input_shape
    (_, _), (_, _), (oh3, ow3) = conv_output_dims(H, W)
    n_pad = ((n_actions + 127) // 128) * 128

    # conv1 (O, C, 8, 8) -> im2col matrix for the 2x2 conv on the
    # space-to-depth input; rows ordered (ki2, kj2, di, dj, c).
    w1 = jnp.transpose(params["w1"], (2, 3, 1, 0))      # (8, 8, C, 32) [ki,kj,c,o]
    w1 = w1.reshape(2, 4, 2, 4, C, 32)                  # [ki2, di, kj2, dj, c, o]
    w1 = jnp.transpose(w1, (0, 2, 1, 3, 4, 5))          # [ki2, kj2, di, dj, c, o]
    w1 = w1.reshape(4 * 16 * C, 32)

    # conv2 / conv3: standard (kh, kw, cin)-ordered im2col matrices.
    w2 = jnp.transpose(params["w2"], (2, 3, 1, 0)).reshape(4 * 4 * 32, 64)
    w3 = jnp.transpose(params["w3"], (2, 3, 1, 0)).reshape(3 * 3 * 64, 64)

    # fc1: fold PyTorch's NCHW (channel-major) flatten into the row order of
    # the transposed weight, so the kernel flattens NHWC directly.
    fw1 = params["fc1_w"].reshape(512, 64, oh3, ow3)
    fw1 = jnp.transpose(fw1, (2, 3, 1, 0)).reshape(oh3 * ow3 * 64, 512)

    # fc2: transpose and zero-pad the action dim to a lane-dense 128 multiple.
    fw2 = jnp.pad(params["fc2_w"].T, ((0, 0), (0, n_pad - n_actions)))
    fb2 = jnp.pad(params["fc2_b"], (0, n_pad - n_actions))

    return {
        "w1": w1, "b1": params["b1"].reshape(1, 32),
        "w2": w2, "b2": params["b2"].reshape(1, 64),
        "w3": w3, "b3": params["b3"].reshape(1, 64),
        "fw1": fw1, "fb1": params["fc1_b"].reshape(1, 512),
        "fw2": fw2, "fb2": fb2.reshape(1, n_pad),
    }


# ---------------------------------------------------------------------------
# Deterministic PyTorch-default-like parameter init (same as before).
# ---------------------------------------------------------------------------
def init_dqn_params(key, input_shape, n_actions):
    H, W, C = input_shape
    (_, _), (_, _), (oh3, ow3) = conv_output_dims(H, W)
    conv_out = 64 * oh3 * ow3
    ks = jax.random.split(key, 10)

    def u(k_, shape, fan_in):
        bound = 1.0 / jnp.sqrt(jnp.float32(fan_in))
        return jax.random.uniform(k_, shape, jnp.float32, -bound, bound)

    return {
        "w1": u(ks[0], (32, C, 8, 8), C * 8 * 8),
        "b1": u(ks[1], (32,), C * 8 * 8),
        "w2": u(ks[2], (64, 32, 4, 4), 32 * 4 * 4),
        "b2": u(ks[3], (64,), 32 * 4 * 4),
        "w3": u(ks[4], (64, 64, 3, 3), 64 * 3 * 3),
        "b3": u(ks[5], (64,), 64 * 3 * 3),
        "fc1_w": u(ks[6], (512, conv_out), conv_out),   # PyTorch (out, in)
        "fc1_b": u(ks[7], (512,), conv_out),
        "fc2_w": u(ks[8], (n_actions, 512), 512),
        "fc2_b": u(ks[9], (n_actions,), 512),
    }


# ---------------------------------------------------------------------------
# Pure-JAX reference (for a loose numerical sanity check).
# ---------------------------------------------------------------------------
def dqn_reference(params, x):
    if x.ndim == 3:
        x = x[None]

    def conv(h, w, b, s):
        y = jax.lax.conv_general_dilated(
            h, w, (s, s), "VALID",
            dimension_numbers=("NHWC", "OIHW", "NHWC"),
            precision=jax.lax.Precision.HIGHEST)
        return jax.nn.relu(y + b)

    h = conv(x, params["w1"], params["b1"], 4)
    h = conv(h, params["w2"], params["b2"], 2)
    h = conv(h, params["w3"], params["b3"], 1)
    B = h.shape[0]
    flat = jnp.transpose(h, (0, 3, 1, 2)).reshape(B, -1)   # NCHW flatten
    h = jax.nn.relu(flat @ params["fc1_w"].T + params["fc1_b"])
    return h @ params["fc2_w"].T + params["fc2_b"]


if __name__ == "__main__":
    # input_shape = (H, W, C) = (36, 36, 4): conv stack reduces 36 -> 8 -> 3 -> 1,
    # so conv_out_size = 64.  n_actions = 6, batch = 2.
    input_shape = (36, 36, 4)
    n_actions = 6
    batch = 2

    key = jax.random.PRNGKey(0)
    k_param, k_x = jax.random.split(key)
    params = init_dqn_params(k_param, input_shape, n_actions)
    x = jax.random.normal(k_x, (batch,) + input_shape, jnp.float32)

    prep = prepare_params(params, input_shape, n_actions)   # one-time re-layout
    dqn_forward = jax.jit(make_dqn_forward(input_shape, n_actions))

    q_values = dqn_forward(prep, x)
    jax.block_until_ready(q_values)
    assert q_values.shape == (batch, n_actions), q_values.shape

    q_ref = dqn_reference(params, x)
    max_err = float(jnp.max(jnp.abs(q_values - q_ref)))
    assert jnp.allclose(q_values, q_ref, rtol=2e-2, atol=2e-2), max_err

    print("KERNEL_OK")
</pallas_src>

<mosaic_0001>
module attributes {stable_mosaic.version = 11 : i64} {
  func.func @_fused_dqn_kernel(%arg0: memref<2x9x9x64xf32, #tpu.memory_space<vmem>>, %arg1: memref<256x32xf32, #tpu.memory_space<vmem>>, %arg2: memref<1x32xf32, #tpu.memory_space<vmem>>, %arg3: memref<512x64xf32, #tpu.memory_space<vmem>>, %arg4: memref<1x64xf32, #tpu.memory_space<vmem>>, %arg5: memref<576x64xf32, #tpu.memory_space<vmem>>, %arg6: memref<1x64xf32, #tpu.memory_space<vmem>>, %arg7: memref<64x512xf32, #tpu.memory_space<vmem>>, %arg8: memref<1x512xf32, #tpu.memory_space<vmem>>, %arg9: memref<512x128xf32, #tpu.memory_space<vmem>>, %arg10: memref<1x128xf32, #tpu.memory_space<vmem>>, %arg11: memref<2x128xf32, #tpu.memory_space<vmem>>, %arg12: memref<128x256xf32, #tpu.memory_space<vmem>>, %arg13: memref<2x8x8x32xf32, #tpu.memory_space<vmem>>, %arg14: memref<2x512xf32, #tpu.memory_space<vmem>>, %arg15: memref<2x3x3x64xf32, #tpu.memory_space<vmem>>, %arg16: memref<2x576xf32, #tpu.memory_space<vmem>>, %arg17: memref<2x64xf32, #tpu.memory_space<vmem>>) attributes {dimension_semantics = [], scalar_prefetch = 0 : i64, scratch_operands = 6 : i64, tpu.core_type = #tpu.core_type<tc>} {
    %c0 = arith.constant 0 : index
    %c0_0 = arith.constant 0 : index
    %c0_1 = arith.constant 0 : index
    %c0_2 = arith.constant 0 : index
    %0 = vector.load %arg0[%c0, %c0_0, %c0_1, %c0_2] : memref<2x9x9x64xf32, #tpu.memory_space<vmem>>, vector<1x1x8x64xf32>
    %1 = vector.shape_cast %0 : vector<1x1x8x64xf32> to vector<8x64xf32>
    %c0_3 = arith.constant 0 : index
    %c0_4 = arith.constant 0 : index
    %2 = vector.load %arg12[%c0_3, %c0_4] : memref<128x256xf32, #tpu.memory_space<vmem>>, vector<8x64xf32>
    tpu.vector_store %arg12[%c0_3, %c0_4], %1 {strides = array<i32>} : memref<128x256xf32, #tpu.memory_space<vmem>>, vector<8x64xf32>,
    %c0_5 = arith.constant 0 : index
    %c1 = arith.constant 1 : index
    %c0_6 = arith.constant 0 : index
    %c0_7 = arith.constant 0 : index
    %3 = vector.load %arg0[%c0_5, %c1, %c0_6, %c0_7] : memref<2x9x9x64xf32, #tpu.memory_space<vmem>>, vector<1x1x8x64xf32>
    %4 = vector.shape_cast %3 : vector<1x1x8x64xf32> to vector<8x64xf32>
    %c8 = arith.constant 8 : index
    %c0_8 = arith.constant 0 : index
    %5 = vector.load %arg12[%c8, %c0_8] : memref<128x256xf32, #tpu.memory_space<vmem>>, vector<8x64xf32>
    tpu.vector_store %arg12[%c8, %c0_8], %4 {strides = array<i32>} : memref<128x256xf32, #tpu.memory_space<vmem>>, vector<8x64xf32>,
    %c0_9 = arith.constant 0 : index
    %c2 = arith.constant 2 : index
    %c0_10 = arith.constant 0 : index
    %c0_11 = arith.constant 0 : index
    %6 = vector.load %arg0[%c0_9, %c2, %c0_10, %c0_11] : memref<2x9x9x64xf32, #tpu.memory_space<vmem>>, vector<1x1x8x64xf32>
    %7 = vector.shape_cast %6 : vector<1x1x8x64xf32> to vector<8x64xf32>
    %c16 = arith.constant 16 : index
    %c0_12 = arith.constant 0 : index
    %8 = vector.load %arg12[%c16, %c0_12] : memref<128x256xf32, #tpu.memory_space<vmem>>, vector<8x64xf32>
    tpu.vector_store %arg12[%c16, %c0_12], %7 {strides = array<i32>} : memref<128x256xf32, #tpu.memory_space<vmem>>, vector<8x64xf32>,
    %c0_13 = arith.constant 0 : index
    %c3 = arith.constant 3 : index
    %c0_14 = arith.constant 0 : index
    %c0_15 = arith.constant 0 : index
    %9 = vector.load %arg0[%c0_13, %c3, %c0_14, %c0_15] : memref<2x9x9x64xf32, #tpu.memory_space<vmem>>, vector<1x1x8x64xf32>
    %10 = vector.shape_cast %9 : vector<1x1x8x64xf32> to vector<8x64xf32>
    %c24 = arith.constant 24 : index
    %c0_16 = arith.constant 0 : index
    %11 = vector.load %arg12[%c24, %c0_16] : memref<128x256xf32, #tpu.memory_space<vmem>>, vector<8x64xf32>
    tpu.vector_store %arg12[%c24, %c0_16], %10 {strides = array<i32>} : memref<128x256xf32, #tpu.memory_space<vmem>>, vector<8x64xf32>,
    %c0_17 = arith.constant 0 : index
    %c4 = arith.constant 4 : index
    %c0_18 = arith.constant 0 : index
    %c0_19 = arith.constant 0 : index
    %12 = vector.load %arg0[%c0_17, %c4, %c0_18, %c0_19] : memref<2x9x9x64xf32, #tpu.memory_space<vmem>>, vector<1x1x8x64xf32>
    %13 = vector.shape_cast %12 : vector<1x1x8x64xf32> to vector<8x64xf32>
    %c32 = arith.constant 32 : index
    %c0_20 = arith.constant 0 : index
    %14 = vector.load %arg12[%c32, %c0_20] : memref<128x256xf32, #tpu.memory_space<vmem>>, vector<8x64xf32>
    tpu.vector_store %arg12[%c32, %c0_20], %13 {strides = array<i32>} : memref<128x256xf32, #tpu.memory_space<vmem>>, vector<8x64xf32>,
    %c0_21 = arith.constant 0 : index
    %c5 = arith.constant 5 : index
    %c0_22 = arith.constant 0 : index
    %c0_23 = arith.constant 0 : index
    %15 = vector.load %arg0[%c0_21, %c5, %c0_22, %c0_23] : memref<2x9x9x64xf32, #tpu.memory_space<vmem>>, vector<1x1x8x64xf32>
    %16 = vector.shape_cast %15 : vector<1x1x8x64xf32> to vector<8x64xf32>
    %c40 = arith.constant 40 : index
    %c0_24 = arith.constant 0 : index
    %17 = vector.load %arg12[%c40, %c0_24] : memref<128x256xf32, #tpu.memory_space<vmem>>, vector<8x64xf32>
    tpu.vector_store %arg12[%c40, %c0_24], %16 {strides = array<i32>} : memref<128x256xf32, #tpu.memory_space<vmem>>, vector<8x64xf32>,
    %c0_25 = arith.constant 0 : index
    %c6 = arith.constant 6 : index
    %c0_26 = arith.constant 0 : index
    %c0_27 = arith.constant 0 : index
    %18 = vector.load %arg0[%c0_25, %c6, %c0_26, %c0_27] : memref<2x9x9x64xf32, #tpu.memory_space<vmem>>, vector<1x1x8x64xf32>
    %19 = vector.shape_cast %18 : vector<1x1x8x64xf32> to vector<8x64xf32>
    %c48 = arith.constant 48 : index
    %c0_28 = arith.constant 0 : index
    %20 = vector.load %arg12[%c48, %c0_28] : memref<128x256xf32, #tpu.memory_space<vmem>>, vector<8x64xf32>
    tpu.vector_store %arg12[%c48, %c0_28], %19 {strides = array<i32>} : memref<128x256xf32, #tpu.memory_space<vmem>>, vector<8x64xf32>,
    %c0_29 = arith.constant 0 : index
    %c7 = arith.constant 7 : index
    %c0_30 = arith.constant 0 : index
    %c0_31 = arith.constant 0 : index
    %21 = vector.load %arg0[%c0_29, %c7, %c0_30, %c0_31] : memref<2x9x9x64xf32, #tpu.memory_space<vmem>>, vector<1x1x8x64xf32>
    %22 = vector.shape_cast %21 : vector<1x1x8x64xf32> to vector<8x64xf32>
    %c56 = arith.constant 56 : index
    %c0_32 = arith.constant 0 : index
    %23 = vector.load %arg12[%c56, %c0_32] : memref<128x256xf32, #tpu.memory_space<vmem>>, vector<8x64xf32>
    tpu.vector_store %arg12[%c56, %c0_32], %22 {strides = array<i32>} : memref<128x256xf32, #tpu.memory_space<vmem>>, vector<8x64xf32>,
    %c1_33 = arith.constant 1 : index
    %c0_34 = arith.constant 0 : index
    %c0_35 = arith.constant 0 : index
    %c0_36 = arith.constant 0 : index
    %24 = vector.load %arg0[%c1_33, %c0_34, %c0_35, %c0_36] : memref<2x9x9x64xf32, #tpu.memory_space<vmem>>, vector<1x1x8x64xf32>
    %25 = vector.shape_cast %24 : vector<1x1x8x64xf32> to vector<8x64xf32>
    %c64 = arith.constant 64 : index
    %c0_37 = arith.constant 0 : index
    %26 = vector.load %arg12[%c64, %c0_37] : memref<128x256xf32, #tpu.memory_space<vmem>>, vector<8x64xf32>
    tpu.vector_store %arg12[%c64, %c0_37], %25 {strides = array<i32>} : memref<128x256xf32, #tpu.memory_space<vmem>>, vector<8x64xf32>,
    %c1_38 = arith.constant 1 : index
    %c1_39 = arith.constant 1 : index
    %c0_40 = arith.constant 0 : index
    %c0_41 = arith.constant 0 : index
    %27 = vector.load %arg0[%c1_38, %c1_39, %c0_40, %c0_41] : memref<2x9x9x64xf32, #tpu.memory_space<vmem>>, vector<1x1x8x64xf32>
    %28 = vector.shape_cast %27 : vector<1x1x8x64xf32> to vector<8x64xf32>
    %c72 = arith.constant 72 : index
    %c0_42 = arith.constant 0 : index
    %29 = vector.load %arg12[%c72, %c0_42] : memref<128x256xf32, #tpu.memory_space<vmem>>, vector<8x64xf32>
    tpu.vector_store %arg12[%c72, %c0_42], %28 {strides = array<i32>} : memref<128x256xf32, #tpu.memory_space<vmem>>, vector<8x64xf32>,
    %c1_43 = arith.constant 1 : index
    %c2_44 = arith.constant 2 : index
    %c0_45 = arith.constant 0 : index
    %c0_46 = arith.constant 0 : index
    %30 = vector.load %arg0[%c1_43, %c2_44, %c0_45, %c0_46] : memref<2x9x9x64xf32, #tpu.memory_space<vmem>>, vector<1x1x8x64xf32>
    %31 = vector.shape_cast %30 : vector<1x1x8x64xf32> to vector<8x64xf32>
    %c80 = arith.constant 80 : index
    %c0_47 = arith.constant 0 : index
    %32 = vector.load %arg12[%c80, %c0_47] : memref<128x256xf32, #tpu.memory_space<vmem>>, vector<8x64xf32>
    tpu.vector_store %arg12[%c80, %c0_47], %31 {strides = array<i32>} : memref<128x256xf32, #tpu.memory_space<vmem>>, vector<8x64xf32>,
    %c1_48 = arith.constant 1 : index
    %c3_49 = arith.constant 3 : index
    %c0_50 = arith.constant 0 : index
    %c0_51 = arith.constant 0 : index
    %33 = vector.load %arg0[%c1_48, %c3_49, %c0_50, %c0_51] : memref<2x9x9x64xf32, #tpu.memory_space<vmem>>, vector<1x1x8x64xf32>
    %34 = vector.shape_cast %33 : vector<1x1x8x64xf32> to vector<8x64xf32>
    %c88 = arith.constant 88 : index
    %c0_52 = arith.constant 0 : index
    %35 = vector.load %arg12[%c88, %c0_52] : memref<128x256xf32, #tpu.memory_space<vmem>>, vector<8x64xf32>
    tpu.vector_store %arg12[%c88, %c0_52], %34 {strides = array<i32>} : memref<128x256xf32, #tpu.memory_space<vmem>>, vector<8x64xf32>,
    %c1_53 = arith.constant 1 : index
    %c4_54 = arith.constant 4 : index
    %c0_55 = arith.constant 0 : index
    %c0_56 = arith.constant 0 : index
    %36 = vector.load %arg0[%c1_53, %c4_54, %c0_55, %c0_56] : memref<2x9x9x64xf32, #tpu.memory_space<vmem>>, vector<1x1x8x64xf32>
    %37 = vector.shape_cast %36 : vector<1x1x8x64xf32> to vector<8x64xf32>
    %c96 = arith.constant 96 : index
    %c0_57 = arith.constant 0 : index
    %38 = vector.load %arg12[%c96, %c0_57] : memref<128x256xf32, #tpu.memory_space<vmem>>, vector<8x64xf32>
    tpu.vector_store %arg12[%c96, %c0_57], %37 {strides = array<i32>} : memref<128x256xf32, #tpu.memory_space<vmem>>, vector<8x64xf32>,
    %c1_58 = arith.constant 1 : index
    %c5_59 = arith.constant 5 : index
    %c0_60 = arith.constant 0 : index
    %c0_61 = arith.constant 0 : index
    %39 = vector.load %arg0[%c1_58, %c5_59, %c0_60, %c0_61] : memref<2x9x9x64xf32, #tpu.memory_space<vmem>>, vector<1x1x8x64xf32>
    %40 = vector.shape_cast %39 : vector<1x1x8x64xf32> to vector<8x64xf32>
    %c104 = arith.constant 104 : index
    %c0_62 = arith.constant 0 : index
    %41 = vector.load %arg12[%c104, %c0_62] : memref<128x256xf32, #tpu.memory_space<vmem>>, vector<8x64xf32>
    tpu.vector_store %arg12[%c104, %c0_62], %40 {strides = array<i32>} : memref<128x256xf32, #tpu.memory_space<vmem>>, vector<8x64xf32>,
    %c1_63 = arith.constant 1 : index
    %c6_64 = arith.constant 6 : index
    %c0_65 = arith.constant 0 : index
    %c0_66 = arith.constant 0 : index
    %42 = vector.load %arg0[%c1_63, %c6_64, %c0_65, %c0_66] : memref<2x9x9x64xf32, #tpu.memory_space<vmem>>, vector<1x1x8x64xf32>
    %43 = vector.shape_cast %42 : vector<1x1x8x64xf32> to vector<8x64xf32>
    %c112 = arith.constant 112 : index
    %c0_67 = arith.constant 0 : index
    %44 = vector.load %arg12[%c112, %c0_67] : memref<128x256xf32, #tpu.memory_space<vmem>>, vector<8x64xf32>
    tpu.vector_store %arg12[%c112, %c0_67], %43 {strides = array<i32>} : memref<128x256xf32, #tpu.memory_space<vmem>>, vector<8x64xf32>,
    %c1_68 = arith.constant 1 : index
    %c7_69 = arith.constant 7 : index
    %c0_70 = arith.constant 0 : index
    %c0_71 = arith.constant 0 : index
    %45 = vector.load %arg0[%c1_68, %c7_69, %c0_70, %c0_71] : memref<2x9x9x64xf32, #tpu.memory_space<vmem>>, vector<1x1x8x64xf32>
    %46 = vector.shape_cast %45 : vector<1x1x8x64xf32> to vector<8x64xf32>
    %c120 = arith.constant 120 : index
    %c0_72 = arith.constant 0 : index
    %47 = vector.load %arg12[%c120, %c0_72] : memref<128x256xf32, #tpu.memory_space<vmem>>, vector<8x64xf32>
    tpu.vector_store %arg12[%c120, %c0_72], %46 {strides = array<i32>} : memref<128x256xf32, #tpu.memory_space<vmem>>, vector<8x64xf32>,
    %c0_73 = arith.constant 0 : index
    %c0_74 = arith.constant 0 : index
    %c1_75 = arith.constant 1 : index
    %c0_76 = arith.constant 0 : index
    %48 = vector.load %arg0[%c0_73, %c0_74, %c1_75, %c0_76] : memref<2x9x9x64xf32, #tpu.memory_space<vmem>>, vector<1x1x8x64xf32>
    %49 = vector.shape_cast %48 : vector<1x1x8x64xf32> to vector<8x64xf32>
    %c0_77 = arith.constant 0 : index
    %c64_78 = arith.constant 64 : index
    %50 = vector.load %arg12[%c0_77, %c64_78] : memref<128x256xf32, #tpu.memory_space<vmem>>, vector<8x64xf32>
    tpu.vector_store %arg12[%c0_77, %c64_78], %49 {strides = array<i32>} : memref<128x256xf32, #tpu.memory_space<vmem>>, vector<8x64xf32>,
    %c0_79 = arith.constant 0 : index
    %c1_80 = arith.constant 1 : index
    %c1_81 = arith.constant 1 : index
    %c0_82 = arith.constant 0 : index
    %51 = vector.load %arg0[%c0_79, %c1_80, %c1_81, %c0_82] : memref<2x9x9x64xf32, #tpu.memory_space<vmem>>, vector<1x1x8x64xf32>
    %52 = vector.shape_cast %51 : vector<1x1x8x64xf32> to vector<8x64xf32>
    %c8_83 = arith.constant 8 : index
    %c64_84 = arith.constant 64 : index
    %53 = vector.load %arg12[%c8_83, %c64_84] : memref<128x256xf32, #tpu.memory_space<vmem>>, vector<8x64xf32>
    tpu.vector_store %arg12[%c8_83, %c64_84], %52 {strides = array<i32>} : memref<128x256xf32, #tpu.memory_space<vmem>>, vector<8x64xf32>,
    %c0_85 = arith.constant 0 : index
    %c2_86 = arith.constant 2 : index
    %c1_87 = arith.constant 1 : index
    %c0_88 = arith.constant 0 : index
    %54 = vector.load %arg0[%c0_85, %c2_86, %c1_87, %c0_88] : memref<2x9x9x64xf32, #tpu.memory_space<vmem>>, vector<1x1x8x64xf32>
    %55 = vector.shape_cast %54 : vector<1x1x8x64xf32> to vector<8x64xf32>
    %c16_89 = arith.constant 16 : index
    %c64_90 = arith.constant 64 : index
    %56 = vector.load %arg12[%c16_89, %c64_90] : memref<128x256xf32, #tpu.memory_space<vmem>>, vector<8x64xf32>
    tpu.vector_store %arg12[%c16_89, %c64_90], %55 {strides = array<i32>} : memref<128x256xf32, #tpu.memory_space<vmem>>, vector<8x64xf32>,
    %c0_91 = arith.constant 0 : index
    %c3_92 = arith.constant 3 : index
    %c1_93 = arith.constant 1 : index
    %c0_94 = arith.constant 0 : index
    %57 = vector.load %arg0[%c0_91, %c3_92, %c1_93, %c0_94] : memref<2x9x9x64xf32, #tpu.memory_space<vmem>>, vector<1x1x8x64xf32>
    %58 = vector.shape_cast %57 : vector<1x1x8x64xf32> to vector<8x64xf32>
    %c24_95 = arith.constant 24 : index
    %c64_96 = arith.constant 64 : index
    %59 = vector.load %arg12[%c24_95, %c64_96] : memref<128x256xf32, #tpu.memory_space<vmem>>, vector<8x64xf32>
    tpu.vector_store %arg12[%c24_95, %c64_96], %58 {strides = array<i32>} : memref<128x256xf32, #tpu.memory_space<vmem>>, vector<8x64xf32>,
    %c0_97 = arith.constant 0 : index
    %c4_98 = arith.constant 4 : index
    %c1_99 = arith.constant 1 : index
    %c0_100 = arith.constant 0 : index
    %60 = vector.load %arg0[%c0_97, %c4_98, %c1_99, %c0_100] : memref<2x9x9x64xf32, #tpu.memory_space<vmem>>, vector<1x1x8x64xf32>
    %61 = vector.shape_cast %60 : vector<1x1x8x64xf32> to vector<8x64xf32>
    %c32_101 = arith.constant 32 : index
    %c64_102 = arith.constant 64 : index
    %62 = vector.load %arg12[%c32_101, %c64_102] : memref<128x256xf32, #tpu.memory_space<vmem>>, vector<8x64xf32>
    tpu.vector_store %arg12[%c32_101, %c64_102], %61 {strides = array<i32>} : memref<128x256xf32, #tpu.memory_space<vmem>>, vector<8x64xf32>,
    %c0_103 = arith.constant 0 : index
    %c5_104 = arith.constant 5 : index
    %c1_105 = arith.constant 1 : index
    %c0_106 = arith.constant 0 : index
    %63 = vector.load %arg0[%c0_103, %c5_104, %c1_105, %c0_106] : memref<2x9x9x64xf32, #tpu.memory_space<vmem>>, vector<1x1x8x64xf32>
    %64 = vector.shape_cast %63 : vector<1x1x8x64xf32> to vector<8x64xf32>
    %c40_107 = arith.constant 40 : index
    %c64_108 = arith.constant 64 : index
    %65 = vector.load %arg12[%c40_107, %c64_108] : memref<128x256xf32, #tpu.memory_space<vmem>>, vector<8x64xf32>
    tpu.vector_store %arg12[%c40_107, %c64_108], %64 {strides = array<i32>} : memref<128x256xf32, #tpu.memory_space<vmem>>, vector<8x64xf32>,
    %c0_109 = arith.constant 0 : index
    %c6_110 = arith.constant 6 : index
    %c1_111 = arith.constant 1 : index
    %c0_112 = arith.constant 0 : index
    %66 = vector.load %arg0[%c0_109, %c6_110, %c1_111, %c0_112] : memref<2x9x9x64xf32, #tpu.memory_space<vmem>>, vector<1x1x8x64xf32>
    %67 = vector.shape_cast %66 : vector<1x1x8x64xf32> to vector<8x64xf32>
    %c48_113 = arith.constant 48 : index
    %c64_114 = arith.constant 64 : index
    %68 = vector.load %arg12[%c48_113, %c64_114] : memref<128x256xf32, #tpu.memory_space<vmem>>, vector<8x64xf32>
    tpu.vector_store %arg12[%c48_113, %c64_114], %67 {strides = array<i32>} : memref<128x256xf32, #tpu.memory_space<vmem>>, vector<8x64xf32>,
    %c0_115 = arith.constant 0 : index
    %c7_116 = arith.constant 7 : index
    %c1_117 = arith.constant 1 : index
    %c0_118 = arith.constant 0 : index
    %69 = vector.load %arg0[%c0_115, %c7_116, %c1_117, %c0_118] : memref<2x9x9x64xf32, #tpu.memory_space<vmem>>, vector<1x1x8x64xf32>
    %70 = vector.shape_cast %69 : vector<1x1x8x64xf32> to vector<8x64xf32>
    %c56_119 = arith.constant 56 : index
    %c64_120 = arith.constant 64 : index
    %71 = vector.load %arg12[%c56_119, %c64_120] : memref<128x256xf32, #tpu.memory_space<vmem>>, vector<8x64xf32>
    tpu.vector_store %arg12[%c56_119, %c64_120], %70 {strides = array<i32>} : memref<128x256xf32, #tpu.memory_space<vmem>>, vector<8x64xf32>,
    %c1_121 = arith.constant 1 : index
    %c0_122 = arith.constant 0 : index
    %c1_123 = arith.constant 1 : index
    %c0_124 = arith.constant 0 : index
    %72 = vector.load %arg0[%c1_121, %c0_122, %c1_123, %c0_124] : memref<2x9x9x64xf32, #tpu.memory_space<vmem>>, vector<1x1x8x64xf32>
    %73 = vector.shape_cast %72 : vector<1x1x8x64xf32> to vector<8x64xf32>
    %c64_125 = arith.constant 64 : index
    %c64_126 = arith.constant 64 : index
    %74 = vector.load %arg12[%c64_125, %c64_126] : memref<128x256xf32, #tpu.memory_space<vmem>>, vector<8x64xf32>
    tpu.vector_store %arg12[%c64_125, %c64_126], %73 {strides = array<i32>} : memref<128x256xf32, #tpu.memory_space<vmem>>, vector<8x64xf32>,
    %c1_127 = arith.constant 1 : index
    %c1_128 = arith.constant 1 : index
    %c1_129 = arith.constant 1 : index
    %c0_130 = arith.constant 0 : index
    %75 = vector.load %arg0[%c1_127, %c1_128, %c1_129, %c0_130] : memref<2x9x9x64xf32, #tpu.memory_space<vmem>>, vector<1x1x8x64xf32>
    %76 = vector.shape_cast %75 : vector<1x1x8x64xf32> to vector<8x64xf32>
    %c72_131 = arith.constant 72 : index
    %c64_132 = arith.constant 64 : index
    %77 = vector.load %arg12[%c72_131, %c64_132] : memref<128x256xf32, #tpu.memory_space<vmem>>, vector<8x64xf32>
    tpu.vector_store %arg12[%c72_131, %c64_132], %76 {strides = array<i32>} : memref<128x256xf32, #tpu.memory_space<vmem>>, vector<8x64xf32>,
    %c1_133 = arith.constant 1 : index
    %c2_134 = arith.constant 2 : index
    %c1_135 = arith.constant 1 : index
    %c0_136 = arith.constant 0 : index
    %78 = vector.load %arg0[%c1_133, %c2_134, %c1_135, %c0_136] : memref<2x9x9x64xf32, #tpu.memory_space<vmem>>, vector<1x1x8x64xf32>
    %79 = vector.shape_cast %78 : vector<1x1x8x64xf32> to vector<8x64xf32>
    %c80_137 = arith.constant 80 : index
    %c64_138 = arith.constant 64 : index
    %80 = vector.load %arg12[%c80_137, %c64_138] : memref<128x256xf32, #tpu.memory_space<vmem>>, vector<8x64xf32>
    tpu.vector_store %arg12[%c80_137, %c64_138], %79 {strides = array<i32>} : memref<128x256xf32, #tpu.memory_space<vmem>>, vector<8x64xf32>,
    %c1_139 = arith.constant 1 : index
    %c3_140 = arith.constant 3 : index
    %c1_141 = arith.constant 1 : index
    %c0_142 = arith.constant 0 : index
    %81 = vector.load %arg0[%c1_139, %c3_140, %c1_141, %c0_142] : memref<2x9x9x64xf32, #tpu.memory_space<vmem>>, vector<1x1x8x64xf32>
    %82 = vector.shape_cast %81 : vector<1x1x8x64xf32> to vector<8x64xf32>
    %c88_143 = arith.constant 88 : index
    %c64_144 = arith.constant 64 : index
    %83 = vector.load %arg12[%c88_143, %c64_144] : memref<128x256xf32, #tpu.memory_space<vmem>>, vector<8x64xf32>
    tpu.vector_store %arg12[%c88_143, %c64_144], %82 {strides = array<i32>} : memref<128x256xf32, #tpu.memory_space<vmem>>, vector<8x64xf32>,
    %c1_145 = arith.constant 1 : index
    %c4_146 = arith.constant 4 : index
    %c1_147 = arith.constant 1 : index
    %c0_148 = arith.constant 0 : index
    %84 = vector.load %arg0[%c1_145, %c4_146, %c1_147, %c0_148] : memref<2x9x9x64xf32, #tpu.memory_space<vmem>>, vector<1x1x8x64xf32>
    %85 = vector.shape_cast %84 : vector<1x1x8x64xf32> to vector<8x64xf32>
    %c96_149 = arith.constant 96 : index
    %c64_150 = arith.constant 64 : index
    %86 = vector.load %arg12[%c96_149, %c64_150] : memref<128x256xf32, #tpu.memory_space<vmem>>, vector<8x64xf32>
    tpu.vector_store %arg12[%c96_149, %c64_150], %85 {strides = array<i32>} : memref<128x256xf32, #tpu.memory_space<vmem>>, vector<8x64xf32>,
    %c1_151 = arith.constant 1 : index
    %c5_152 = arith.constant 5 : index
    %c1_153 = arith.constant 1 : index
    %c0_154 = arith.constant 0 : index
    %87 = vector.load %arg0[%c1_151, %c5_152, %c1_153, %c0_154] : memref<2x9x9x64xf32, #tpu.memory_space<vmem>>, vector<1x1x8x64xf32>
    %88 = vector.shape_cast %87 : vector<1x1x8x64xf32> to vector<8x64xf32>
    %c104_155 = arith.constant 104 : index
    %c64_156 = arith.constant 64 : index
    %89 = vector.load %arg12[%c104_155, %c64_156] : memref<128x256xf32, #tpu.memory_space<vmem>>, vector<8x64xf32>
    tpu.vector_store %arg12[%c104_155, %c64_156], %88 {strides = array<i32>} : memref<128x256xf32, #tpu.memory_space<vmem>>, vector<8x64xf32>,
    %c1_157 = arith.constant 1 : index
    %c6_158 = arith.constant 6 : index
    %c1_159 = arith.constant 1 : index
    %c0_160 = arith.constant 0 : index
    %90 = vector.load %arg0[%c1_157, %c6_158, %c1_159, %c0_160] : memref<2x9x9x64xf32, #tpu.memory_space<vmem>>, vector<1x1x8x64xf32>
    %91 = vector.shape_cast %90 : vector<1x1x8x64xf32> to vector<8x64xf32>
    %c112_161 = arith.constant 112 : index
    %c64_162 = arith.constant 64 : index
    %92 = vector.load %arg12[%c112_161, %c64_162] : memref<128x256xf32, #tpu.memory_space<vmem>>, vector<8x64xf32>
    tpu.vector_store %arg12[%c112_161, %c64_162], %91 {strides = array<i32>} : memref<128x256xf32, #tpu.memory_space<vmem>>, vector<8x64xf32>,
    %c1_163 = arith.constant 1 : index
    %c7_164 = arith.constant 7 : index
    %c1_165 = arith.constant 1 : index
    %c0_166 = arith.constant 0 : index
    %93 = vector.load %arg0[%c1_163, %c7_164, %c1_165, %c0_166] : memref<2x9x9x64xf32, #tpu.memory_space<vmem>>, vector<1x1x8x64xf32>
    %94 = vector.shape_cast %93 : vector<1x1x8x64xf32> to vector<8x64xf32>
    %c120_167 = arith.constant 120 : index
    %c64_168 = arith.constant 64 : index
    %95 = vector.load %arg12[%c120_167, %c64_168] : memref<128x256xf32, #tpu.memory_space<vmem>>, vector<8x64xf32>
    tpu.vector_store %arg12[%c120_167, %c64_168], %94 {strides = array<i32>} : memref<128x256xf32, #tpu.memory_space<vmem>>, vector<8x64xf32>,
    %c0_169 = arith.constant 0 : index
    %c1_170 = arith.constant 1 : index
    %c0_171 = arith.constant 0 : index
    %c0_172 = arith.constant 0 : index
    %96 = vector.load %arg0[%c0_169, %c1_170, %c0_171, %c0_172] : memref<2x9x9x64xf32, #tpu.memory_space<vmem>>, vector<1x1x8x64xf32>
    %97 = vector.shape_cast %96 : vector<1x1x8x64xf32> to vector<8x64xf32>
    %c0_173 = arith.constant 0 : index
    %c128 = arith.constant 128 : index
    %98 = vector.load %arg12[%c0_173, %c128] : memref<128x256xf32, #tpu.memory_space<vmem>>, vector<8x64xf32>
    tpu.vector_store %arg12[%c0_173, %c128], %97 {strides = array<i32>} : memref<128x256xf32, #tpu.memory_space<vmem>>, vector<8x64xf32>,
    %c0_174 = arith.constant 0 : index
    %c2_175 = arith.constant 2 : index
    %c0_176 = arith.constant 0 : index
    %c0_177 = arith.constant 0 : index
    %99 = vector.load %arg0[%c0_174, %c2_175, %c0_176, %c0_177] : memref<2x9x9x64xf32, #tpu.memory_space<vmem>>, vector<1x1x8x64xf32>
    %100 = vector.shape_cast %99 : vector<1x1x8x64xf32> to vector<8x64xf32>
    %c8_178 = arith.constant 8 : index
    %c128_179 = arith.constant 128 : index
    %101 = vector.load %arg12[%c8_178, %c128_179] : memref<128x256xf32, #tpu.memory_space<vmem>>, vector<8x64xf32>
    tpu.vector_store %arg12[%c8_178, %c128_179], %100 {strides = array<i32>} : memref<128x256xf32, #tpu.memory_space<vmem>>, vector<8x64xf32>,
    %c0_180 = arith.constant 0 : index
    %c3_181 = arith.constant 3 : index
    %c0_182 = arith.constant 0 : index
    %c0_183 = arith.constant 0 : index
    %102 = vector.load %arg0[%c0_180, %c3_181, %c0_182, %c0_183] : memref<2x9x9x64xf32, #tpu.memory_space<vmem>>, vector<1x1x8x64xf32>
    %103 = vector.shape_cast %102 : vector<1x1x8x64xf32> to vector<8x64xf32>
    %c16_184 = arith.constant 16 : index
    %c128_185 = arith.constant 128 : index
    %104 = vector.load %arg12[%c16_184, %c128_185] : memref<128x256xf32, #tpu.memory_space<vmem>>, vector<8x64xf32>
    tpu.vector_store %arg12[%c16_184, %c128_185], %103 {strides = array<i32>} : memref<128x256xf32, #tpu.memory_space<vmem>>, vector<8x64xf32>,
    %c0_186 = arith.constant 0 : index
    %c4_187 = arith.constant 4 : index
    %c0_188 = arith.constant 0 : index
    %c0_189 = arith.constant 0 : index
    %105 = vector.load %arg0[%c0_186, %c4_187, %c0_188, %c0_189] : memref<2x9x9x64xf32, #tpu.memory_space<vmem>>, vector<1x1x8x64xf32>
    %106 = vector.shape_cast %105 : vector<1x1x8x64xf32> to vector<8x64xf32>
    %c24_190 = arith.constant 24 : index
    %c128_191 = arith.constant 128 : index
    %107 = vector.load %arg12[%c24_190, %c128_191] : memref<128x256xf32, #tpu.memory_space<vmem>>, vector<8x64xf32>
    tpu.vector_store %arg12[%c24_190, %c128_191], %106 {strides = array<i32>} : memref<128x256xf32, #tpu.memory_space<vmem>>, vector<8x64xf32>,
    %c0_192 = arith.constant 0 : index
    %c5_193 = arith.constant 5 : index
    %c0_194 = arith.constant 0 : index
    %c0_195 = arith.constant 0 : index
    %108 = vector.load %arg0[%c0_192, %c5_193, %c0_194, %c0_195] : memref<2x9x9x64xf32, #tpu.memory_space<vmem>>, vector<1x1x8x64xf32>
    %109 = vector.shape_cast %108 : vector<1x1x8x64xf32> to vector<8x64xf32>
    %c32_196 = arith.constant 32 : index
    %c128_197 = arith.constant 128 : index
    %110 = vector.load %arg12[%c32_196, %c128_197] : memref<128x256xf32, #tpu.memory_space<vmem>>, vector<8x64xf32>
    tpu.vector_store %arg12[%c32_196, %c128_197], %109 {strides = array<i32>} : memref<128x256xf32, #tpu.memory_space<vmem>>, vector<8x64xf32>,
    %c0_198 = arith.constant 0 : index
    %c6_199 = arith.constant 6 : index
    %c0_200 = arith.constant 0 : index
    %c0_201 = arith.constant 0 : index
    %111 = vector.load %arg0[%c0_198, %c6_199, %c0_200, %c0_201] : memref<2x9x9x64xf32, #tpu.memory_space<vmem>>, vector<1x1x8x64xf32>
    %112 = vector.shape_cast %111 : vector<1x1x8x64xf32> to vector<8x64xf32>
    %c40_202 = arith.constant 40 : index
    %c128_203 = arith.constant 128 : index
    %113 = vector.load %arg12[%c40_202, %c128_203] : memref<128x256xf32, #tpu.memory_space<vmem>>, vector<8x64xf32>
    tpu.vector_store %arg12[%c40_202, %c128_203], %112 {strides = array<i32>} : memref<128x256xf32, #tpu.memory_space<vmem>>, vector<8x64xf32>,
    %c0_204 = arith.constant 0 : index
    %c7_205 = arith.constant 7 : index
    %c0_206 = arith.constant 0 : index
    %c0_207 = arith.constant 0 : index
    %114 = vector.load %arg0[%c0_204, %c7_205, %c0_206, %c0_207] : memref<2x9x9x64xf32, #tpu.memory_space<vmem>>, vector<1x1x8x64xf32>
    %115 = vector.shape_cast %114 : vector<1x1x8x64xf32> to vector<8x64xf32>
    %c48_208 = arith.constant 48 : index
    %c128_209 = arith.constant 128 : index
    %116 = vector.load %arg12[%c48_208, %c128_209] : memref<128x256xf32, #tpu.memory_space<vmem>>, vector<8x64xf32>
    tpu.vector_store %arg12[%c48_208, %c128_209], %115 {strides = array<i32>} : memref<128x256xf32, #tpu.memory_space<vmem>>, vector<8x64xf32>,
    %c0_210 = arith.constant 0 : index
    %c8_211 = arith.constant 8 : index
    %c0_212 = arith.constant 0 : index
    %c0_213 = arith.constant 0 : index
    %117 = vector.load %arg0[%c0_210, %c8_211, %c0_212, %c0_213] : memref<2x9x9x64xf32, #tpu.memory_space<vmem>>, vector<1x1x8x64xf32>
    %118 = vector.shape_cast %117 : vector<1x1x8x64xf32> to vector<8x64xf32>
    %c56_214 = arith.constant 56 : index
    %c128_215 = arith.constant 128 : index
    %119 = vector.load %arg12[%c56_214, %c128_215] : memref<128x256xf32, #tpu.memory_space<vmem>>, vector<8x64xf32>
    tpu.vector_store %arg12[%c56_214, %c128_215], %118 {strides = array<i32>} : memref<128x256xf32, #tpu.memory_space<vmem>>, vector<8x64xf32>,
    %c1_216 = arith.constant 1 : index
    %c1_217 = arith.constant 1 : index
    %c0_218 = arith.constant 0 : index
    %c0_219 = arith.constant 0 : index
    %120 = vector.load %arg0[%c1_216, %c1_217, %c0_218, %c0_219] : memref<2x9x9x64xf32, #tpu.memory_space<vmem>>, vector<1x1x8x64xf32>
    %121 = vector.shape_cast %120 : vector<1x1x8x64xf32> to vector<8x64xf32>
    %c64_220 = arith.constant 64 : index
    %c128_221 = arith.constant 128 : index
    %122 = vector.load %arg12[%c64_220, %c128_221] : memref<128x256xf32, #tpu.memory_space<vmem>>, vector<8x64xf32>
    tpu.vector_store %arg12[%c64_220, %c128_221], %121 {strides = array<i32>} : memref<128x256xf32, #tpu.memory_space<vmem>>, vector<8x64xf32>,
    %c1_222 = arith.constant 1 : index
    %c2_223 = arith.constant 2 : index
    %c0_224 = arith.constant 0 : index
    %c0_225 = arith.constant 0 : index
    %123 = vector.load %arg0[%c1_222, %c2_223, %c0_224, %c0_225] : memref<2x9x9x64xf32, #tpu.memory_space<vmem>>, vector<1x1x8x64xf32>
    %124 = vector.shape_cast %123 : vector<1x1x8x64xf32> to vector<8x64xf32>
    %c72_226 = arith.constant 72 : index
    %c128_227 = arith.constant 128 : index
    %125 = vector.load %arg12[%c72_226, %c128_227] : memref<128x256xf32, #tpu.memory_space<vmem>>, vector<8x64xf32>
    tpu.vector_store %arg12[%c72_226, %c128_227], %124 {strides = array<i32>} : memref<128x256xf32, #tpu.memory_space<vmem>>, vector<8x64xf32>,
    %c1_228 = arith.constant 1 : index
    %c3_229 = arith.constant 3 : index
    %c0_230 = arith.constant 0 : index
    %c0_231 = arith.constant 0 : index
    %126 = vector.load %arg0[%c1_228, %c3_229, %c0_230, %c0_231] : memref<2x9x9x64xf32, #tpu.memory_space<vmem>>, vector<1x1x8x64xf32>
    %127 = vector.shape_cast %126 : vector<1x1x8x64xf32> to vector<8x64xf32>
    %c80_232 = arith.constant 80 : index
    %c128_233 = arith.constant 128 : index
    %128 = vector.load %arg12[%c80_232, %c128_233] : memref<128x256xf32, #tpu.memory_space<vmem>>, vector<8x64xf32>
    tpu.vector_store %arg12[%c80_232, %c128_233], %127 {strides = array<i32>} : memref<128x256xf32, #tpu.memory_space<vmem>>, vector<8x64xf32>,
    %c1_234 = arith.constant 1 : index
    %c4_235 = arith.constant 4 : index
    %c0_236 = arith.constant 0 : index
    %c0_237 = arith.constant 0 : index
    %129 = vector.load %arg0[%c1_234, %c4_235, %c0_236, %c0_237] : memref<2x9x9x64xf32, #tpu.memory_space<vmem>>, vector<1x1x8x64xf32>
    %130 = vector.shape_cast %129 : vector<1x1x8x64xf32> to vector<8x64xf32>
    %c88_238 = arith.constant 88 : index
    %c128_239 = arith.constant 128 : index
    %131 = vector.load %arg12[%c88_238, %c128_239] : memref<128x256xf32, #tpu.memory_space<vmem>>, vector<8x64xf32>
    tpu.vector_store %arg12[%c88_238, %c128_239], %130 {strides = array<i32>} : memref<128x256xf32, #tpu.memory_space<vmem>>, vector<8x64xf32>,
    %c1_240 = arith.constant 1 : index
    %c5_241 = arith.constant 5 : index
    %c0_242 = arith.constant 0 : index
    %c0_243 = arith.constant 0 : index
    %132 = vector.load %arg0[%c1_240, %c5_241, %c0_242, %c0_243] : memref<2x9x9x64xf32, #tpu.memory_space<vmem>>, vector<1x1x8x64xf32>
    %133 = vector.shape_cast %132 : vector<1x1x8x64xf32> to vector<8x64xf32>
    %c96_244 = arith.constant 96 : index
    %c128_245 = arith.constant 128 : index
    %134 = vector.load %arg12[%c96_244, %c128_245] : memref<128x256xf32, #tpu.memory_space<vmem>>, vector<8x64xf32>
    tpu.vector_store %arg12[%c96_244, %c128_245], %133 {strides = array<i32>} : memref<128x256xf32, #tpu.memory_space<vmem>>, vector<8x64xf32>,
    %c1_246 = arith.constant 1 : index
    %c6_247 = arith.constant 6 : index
    %c0_248 = arith.constant 0 : index
    %c0_249 = arith.constant 0 : index
    %135 = vector.load %arg0[%c1_246, %c6_247, %c0_248, %c0_249] : memref<2x9x9x64xf32, #tpu.memory_space<vmem>>, vector<1x1x8x64xf32>
    %136 = vector.shape_cast %135 : vector<1x1x8x64xf32> to vector<8x64xf32>
    %c104_250 = arith.constant 104 : index
    %c128_251 = arith.constant 128 : index
    %137 = vector.load %arg12[%c104_250, %c128_251] : memref<128x256xf32, #tpu.memory_space<vmem>>, vector<8x64xf32>
    tpu.vector_store %arg12[%c104_250, %c128_251], %136 {strides = array<i32>} : memref<128x256xf32, #tpu.memory_space<vmem>>, vector<8x64xf32>,
    %c1_252 = arith.constant 1 : index
    %c7_253 = arith.constant 7 : index
    %c0_254 = arith.constant 0 : index
    %c0_255 = arith.constant 0 : index
    %138 = vector.load %arg0[%c1_252, %c7_253, %c0_254, %c0_255] : memref<2x9x9x64xf32, #tpu.memory_space<vmem>>, vector<1x1x8x64xf32>
    %139 = vector.shape_cast %138 : vector<1x1x8x64xf32> to vector<8x64xf32>
    %c112_256 = arith.constant 112 : index
    %c128_257 = arith.constant 128 : index
    %140 = vector.load %arg12[%c112_256, %c128_257] : memref<128x256xf32, #tpu.memory_space<vmem>>, vector<8x64xf32>
    tpu.vector_store %arg12[%c112_256, %c128_257], %139 {strides = array<i32>} : memref<128x256xf32, #tpu.memory_space<vmem>>, vector<8x64xf32>,
    %c1_258 = arith.constant 1 : index
    %c8_259 = arith.constant 8 : index
    %c0_260 = arith.constant 0 : index
    %c0_261 = arith.constant 0 : index
    %141 = vector.load %arg0[%c1_258, %c8_259, %c0_260, %c0_261] : memref<2x9x9x64xf32, #tpu.memory_space<vmem>>, vector<1x1x8x64xf32>
    %142 = vector.shape_cast %141 : vector<1x1x8x64xf32> to vector<8x64xf32>
    %c120_262 = arith.constant 120 : index
    %c128_263 = arith.constant 128 : index
    %143 = vector.load %arg12[%c120_262, %c128_263] : memref<128x256xf32, #tpu.memory_space<vmem>>, vector<8x64xf32>
    tpu.vector_store %arg12[%c120_262, %c128_263], %142 {strides = array<i32>} : memref<128x256xf32, #tpu.memory_space<vmem>>, vector<8x64xf32>,
    %c0_264 = arith.constant 0 : index
    %c1_265 = arith.constant 1 : index
    %c1_266 = arith.constant 1 : index
    %c0_267 = arith.constant 0 : index
    %144 = vector.load %arg0[%c0_264, %c1_265, %c1_266, %c0_267] : memref<2x9x9x64xf32, #tpu.memory_space<vmem>>, vector<1x1x8x64xf32>
    %145 = vector.shape_cast %144 : vector<1x1x8x64xf32> to vector<8x64xf32>
    %c0_268 = arith.constant 0 : index
    %c192 = arith.constant 192 : index
    %146 = vector.load %arg12[%c0_268, %c192] : memref<128x256xf32, #tpu.memory_space<vmem>>, vector<8x64xf32>
    tpu.vector_store %arg12[%c0_268, %c192], %145 {strides = array<i32>} : memref<128x256xf32, #tpu.memory_space<vmem>>, vector<8x64xf32>,
    %c0_269 = arith.constant 0 : index
    %c2_270 = arith.constant 2 : index
    %c1_271 = arith.constant 1 : index
    %c0_272 = arith.constant 0 : index
    %147 = vector.load %arg0[%c0_269, %c2_270, %c1_271, %c0_272] : memref<2x9x9x64xf32, #tpu.memory_space<vmem>>, vector<1x1x8x64xf32>
    %148 = vector.shape_cast %147 : vector<1x1x8x64xf32> to vector<8x64xf32>
    %c8_273 = arith.constant 8 : index
    %c192_274 = arith.constant 192 : index
    %149 = vector.load %arg12[%c8_273, %c192_274] : memref<128x256xf32, #tpu.memory_space<vmem>>, vector<8x64xf32>
    tpu.vector_store %arg12[%c8_273, %c192_274], %148 {strides = array<i32>} : memref<128x256xf32, #tpu.memory_space<vmem>>, vector<8x64xf32>,
    %c0_275 = arith.constant 0 : index
    %c3_276 = arith.constant 3 : index
    %c1_277 = arith.constant 1 : index
    %c0_278 = arith.constant 0 : index
    %150 = vector.load %arg0[%c0_275, %c3_276, %c1_277, %c0_278] : memref<2x9x9x64xf32, #tpu.memory_space<vmem>>, vector<1x1x8x64xf32>
    %151 = vector.shape_cast %150 : vector<1x1x8x64xf32> to vector<8x64xf32>
    %c16_279 = arith.constant 16 : index
    %c192_280 = arith.constant 192 : index
    %152 = vector.load %arg12[%c16_279, %c192_280] : memref<128x256xf32, #tpu.memory_space<vmem>>, vector<8x64xf32>
    tpu.vector_store %arg12[%c16_279, %c192_280], %151 {strides = array<i32>} : memref<128x256xf32, #tpu.memory_space<vmem>>, vector<8x64xf32>,
    %c0_281 = arith.constant 0 : index
    %c4_282 = arith.constant 4 : index
    %c1_283 = arith.constant 1 : index
    %c0_284 = arith.constant 0 : index
    %153 = vector.load %arg0[%c0_281, %c4_282, %c1_283, %c0_284] : memref<2x9x9x64xf32, #tpu.memory_space<vmem>>, vector<1x1x8x64xf32>
    %154 = vector.shape_cast %153 : vector<1x1x8x64xf32> to vector<8x64xf32>
    %c24_285 = arith.constant 24 : index
    %c192_286 = arith.constant 192 : index
    %155 = vector.load %arg12[%c24_285, %c192_286] : memref<128x256xf32, #tpu.memory_space<vmem>>, vector<8x64xf32>
    tpu.vector_store %arg12[%c24_285, %c192_286], %154 {strides = array<i32>} : memref<128x256xf32, #tpu.memory_space<vmem>>, vector<8x64xf32>,
    %c0_287 = arith.constant 0 : index
    %c5_288 = arith.constant 5 : index
    %c1_289 = arith.constant 1 : index
    %c0_290 = arith.constant 0 : index
    %156 = vector.load %arg0[%c0_287, %c5_288, %c1_289, %c0_290] : memref<2x9x9x64xf32, #tpu.memory_space<vmem>>, vector<1x1x8x64xf32>
    %157 = vector.shape_cast %156 : vector<1x1x8x64xf32> to vector<8x64xf32>
    %c32_291 = arith.constant 32 : index
    %c192_292 = arith.constant 192 : index
    %158 = vector.load %arg12[%c32_291, %c192_292] : memref<128x256xf32, #tpu.memory_space<vmem>>, vector<8x64xf32>
    tpu.vector_store %arg12[%c32_291, %c192_292], %157 {strides = array<i32>} : memref<128x256xf32, #tpu.memory_space<vmem>>, vector<8x64xf32>,
    %c0_293 = arith.constant 0 : index
    %c6_294 = arith.constant 6 : index
    %c1_295 = arith.constant 1 : index
    %c0_296 = arith.constant 0 : index
    %159 = vector.load %arg0[%c0_293, %c6_294, %c1_295, %c0_296] : memref<2x9x9x64xf32, #tpu.memory_space<vmem>>, vector<1x1x8x64xf32>
    %160 = vector.shape_cast %159 : vector<1x1x8x64xf32> to vector<8x64xf32>
    %c40_297 = arith.constant 40 : index
    %c192_298 = arith.constant 192 : index
    %161 = vector.load %arg12[%c40_297, %c192_298] : memref<128x256xf32, #tpu.memory_space<vmem>>, vector<8x64xf32>
    tpu.vector_store %arg12[%c40_297, %c192_298], %160 {strides = array<i32>} : memref<128x256xf32, #tpu.memory_space<vmem>>, vector<8x64xf32>,
    %c0_299 = arith.constant 0 : index
    %c7_300 = arith.constant 7 : index
    %c1_301 = arith.constant 1 : index
    %c0_302 = arith.constant 0 : index
    %162 = vector.load %arg0[%c0_299, %c7_300, %c1_301, %c0_302] : memref<2x9x9x64xf32, #tpu.memory_space<vmem>>, vector<1x1x8x64xf32>
    %163 = vector.shape_cast %162 : vector<1x1x8x64xf32> to vector<8x64xf32>
    %c48_303 = arith.constant 48 : index
    %c192_304 = arith.constant 192 : index
    %164 = vector.load %arg12[%c48_303, %c192_304] : memref<128x256xf32, #tpu.memory_space<vmem>>, vector<8x64xf32>
    tpu.vector_store %arg12[%c48_303, %c192_304], %163 {strides = array<i32>} : memref<128x256xf32, #tpu.memory_space<vmem>>, vector<8x64xf32>,
    %c0_305 = arith.constant 0 : index
    %c8_306 = arith.constant 8 : index
    %c1_307 = arith.constant 1 : index
    %c0_308 = arith.constant 0 : index
    %165 = vector.load %arg0[%c0_305, %c8_306, %c1_307, %c0_308] : memref<2x9x9x64xf32, #tpu.memory_space<vmem>>, vector<1x1x8x64xf32>
    %166 = vector.shape_cast %165 : vector<1x1x8x64xf32> to vector<8x64xf32>
    %c56_309 = arith.constant 56 : index
    %c192_310 = arith.constant 192 : index
    %167 = vector.load %arg12[%c56_309, %c192_310] : memref<128x256xf32, #tpu.memory_space<vmem>>, vector<8x64xf32>
    tpu.vector_store %arg12[%c56_309, %c192_310], %166 {strides = array<i32>} : memref<128x256xf32, #tpu.memory_space<vmem>>, vector<8x64xf32>,
    %c1_311 = arith.constant 1 : index
    %c1_312 = arith.constant 1 : index
    %c1_313 = arith.constant 1 : index
    %c0_314 = arith.constant 0 : index
    %168 = vector.load %arg0[%c1_311, %c1_312, %c1_313, %c0_314] : memref<2x9x9x64xf32, #tpu.memory_space<vmem>>, vector<1x1x8x64xf32>
    %169 = vector.shape_cast %168 : vector<1x1x8x64xf32> to vector<8x64xf32>
    %c64_315 = arith.constant 64 : index
    %c192_316 = arith.constant 192 : index
    %170 = vector.load %arg12[%c64_315, %c192_316] : memref<128x256xf32, #tpu.memory_space<vmem>>, vector<8x64xf32>
    tpu.vector_store %arg12[%c64_315, %c192_316], %169 {strides = array<i32>} : memref<128x256xf32, #tpu.memory_space<vmem>>, vector<8x64xf32>,
    %c1_317 = arith.constant 1 : index
    %c2_318 = arith.constant 2 : index
    %c1_319 = arith.constant 1 : index
    %c0_320 = arith.constant 0 : index
    %171 = vector.load %arg0[%c1_317, %c2_318, %c1_319, %c0_320] : memref<2x9x9x64xf32, #tpu.memory_space<vmem>>, vector<1x1x8x64xf32>
    %172 = vector.shape_cast %171 : vector<1x1x8x64xf32> to vector<8x64xf32>
    %c72_321 = arith.constant 72 : index
    %c192_322 = arith.constant 192 : index
    %173 = vector.load %arg12[%c72_321, %c192_322] : memref<128x256xf32, #tpu.memory_space<vmem>>, vector<8x64xf32>
    tpu.vector_store %arg12[%c72_321, %c192_322], %172 {strides = array<i32>} : memref<128x256xf32, #tpu.memory_space<vmem>>, vector<8x64xf32>,
    %c1_323 = arith.constant 1 : index
    %c3_324 = arith.constant 3 : index
    %c1_325 = arith.constant 1 : index
    %c0_326 = arith.constant 0 : index
    %174 = vector.load %arg0[%c1_323, %c3_324, %c1_325, %c0_326] : memref<2x9x9x64xf32, #tpu.memory_space<vmem>>, vector<1x1x8x64xf32>
    %175 = vector.shape_cast %174 : vector<1x1x8x64xf32> to vector<8x64xf32>
    %c80_327 = arith.constant 80 : index
    %c192_328 = arith.constant 192 : index
    %176 = vector.load %arg12[%c80_327, %c192_328] : memref<128x256xf32, #tpu.memory_space<vmem>>, vector<8x64xf32>
    tpu.vector_store %arg12[%c80_327, %c192_328], %175 {strides = array<i32>} : memref<128x256xf32, #tpu.memory_space<vmem>>, vector<8x64xf32>,
    %c1_329 = arith.constant 1 : index
    %c4_330 = arith.constant 4 : index
    %c1_331 = arith.constant 1 : index
    %c0_332 = arith.constant 0 : index
    %177 = vector.load %arg0[%c1_329, %c4_330, %c1_331, %c0_332] : memref<2x9x9x64xf32, #tpu.memory_space<vmem>>, vector<1x1x8x64xf32>
    %178 = vector.shape_cast %177 : vector<1x1x8x64xf32> to vector<8x64xf32>
    %c88_333 = arith.constant 88 : index
    %c192_334 = arith.constant 192 : index
    %179 = vector.load %arg12[%c88_333, %c192_334] : memref<128x256xf32, #tpu.memory_space<vmem>>, vector<8x64xf32>
    tpu.vector_store %arg12[%c88_333, %c192_334], %178 {strides = array<i32>} : memref<128x256xf32, #tpu.memory_space<vmem>>, vector<8x64xf32>,
    %c1_335 = arith.constant 1 : index
    %c5_336 = arith.constant 5 : index
    %c1_337 = arith.constant 1 : index
    %c0_338 = arith.constant 0 : index
    %180 = vector.load %arg0[%c1_335, %c5_336, %c1_337, %c0_338] : memref<2x9x9x64xf32, #tpu.memory_space<vmem>>, vector<1x1x8x64xf32>
    %181 = vector.shape_cast %180 : vector<1x1x8x64xf32> to vector<8x64xf32>
    %c96_339 = arith.constant 96 : index
    %c192_340 = arith.constant 192 : index
    %182 = vector.load %arg12[%c96_339, %c192_340] : memref<128x256xf32, #tpu.memory_space<vmem>>, vector<8x64xf32>
    tpu.vector_store %arg12[%c96_339, %c192_340], %181 {strides = array<i32>} : memref<128x256xf32, #tpu.memory_space<vmem>>, vector<8x64xf32>,
    %c1_341 = arith.constant 1 : index
    %c6_342 = arith.constant 6 : index
    %c1_343 = arith.constant 1 : index
    %c0_344 = arith.constant 0 : index
    %183 = vector.load %arg0[%c1_341, %c6_342, %c1_343, %c0_344] : memref<2x9x9x64xf32, #tpu.memory_space<vmem>>, vector<1x1x8x64xf32>
    %184 = vector.shape_cast %183 : vector<1x1x8x64xf32> to vector<8x64xf32>
    %c104_345 = arith.constant 104 : index
    %c192_346 = arith.constant 192 : index
    %185 = vector.load %arg12[%c104_345, %c192_346] : memref<128x256xf32, #tpu.memory_space<vmem>>, vector<8x64xf32>
    tpu.vector_store %arg12[%c104_345, %c192_346], %184 {strides = array<i32>} : memref<128x256xf32, #tpu.memory_space<vmem>>, vector<8x64xf32>,
    %c1_347 = arith.constant 1 : index
    %c7_348 = arith.constant 7 : index
    %c1_349 = arith.constant 1 : index
    %c0_350 = arith.constant 0 : index
    %186 = vector.load %arg0[%c1_347, %c7_348, %c1_349, %c0_350] : memref<2x9x9x64xf32, #tpu.memory_space<vmem>>, vector<1x1x8x64xf32>
    %187 = vector.shape_cast %186 : vector<1x1x8x64xf32> to vector<8x64xf32>
    %c112_351 = arith.constant 112 : index
    %c192_352 = arith.constant 192 : index
    %188 = vector.load %arg12[%c112_351, %c192_352] : memref<128x256xf32, #tpu.memory_space<vmem>>, vector<8x64xf32>
    tpu.vector_store %arg12[%c112_351, %c192_352], %187 {strides = array<i32>} : memref<128x256xf32, #tpu.memory_space<vmem>>, vector<8x64xf32>,
    %c1_353 = arith.constant 1 : index
    %c8_354 = arith.constant 8 : index
    %c1_355 = arith.constant 1 : index
    %c0_356 = arith.constant 0 : index
    %189 = vector.load %arg0[%c1_353, %c8_354, %c1_355, %c0_356] : memref<2x9x9x64xf32, #tpu.memory_space<vmem>>, vector<1x1x8x64xf32>
    %190 = vector.shape_cast %189 : vector<1x1x8x64xf32> to vector<8x64xf32>
    %c120_357 = arith.constant 120 : index
    %c192_358 = arith.constant 192 : index
    %191 = vector.load %arg12[%c120_357, %c192_358] : memref<128x256xf32, #tpu.memory_space<vmem>>, vector<8x64xf32>
    tpu.vector_store %arg12[%c120_357, %c192_358], %190 {strides = array<i32>} : memref<128x256xf32, #tpu.memory_space<vmem>>, vector<8x64xf32>,
    %c0_359 = arith.constant 0 : index
    %c0_360 = arith.constant 0 : index
    %192 = vector.load %arg2[%c0_359, %c0_360] : memref<1x32xf32, #tpu.memory_space<vmem>>, vector<1x32xf32>
    %c0_361 = arith.constant 0 : index
    %c0_362 = arith.constant 0 : index
    %193 = vector.load %arg12[%c0_361, %c0_362] : memref<128x256xf32, #tpu.memory_space<vmem>>, vector<128x256xf32>
    %c0_363 = arith.constant 0 : index
    %c0_364 = arith.constant 0 : index
    %194 = vector.load %arg1[%c0_363, %c0_364] : memref<256x32xf32, #tpu.memory_space<vmem>>, vector<256x32xf32>
    %cst = arith.constant dense<0.000000e+00> : vector<128x32xf32>
    %195 = tpu.matmul %193, %194, %cst {dimension_numbers = #tpu.dot_dimension_numbers<[1], [0], [0], [1], [0, 0, 1, 1], [], []>} : vector<128x256xf32>, vector<256x32xf32>, vector<128x32xf32> -> vector<128x32xf32>
    %196 = vector.broadcast %192 : vector<1x32xf32> to vector<128x32xf32>
    %197 = arith.addf %195, %196 : vector<128x32xf32>
    %cst_365 = arith.constant 0.000000e+00 : f32
    %198 = vector.broadcast %cst_365 : f32 to vector<128x32xf32>
    %199 = arith.maximumf %197, %198 : vector<128x32xf32>
    %200 = vector.extract_strided_slice %199 {offsets = [0, 0], sizes = [8, 32], strides = [1, 1]} : vector<128x32xf32> to vector<8x32xf32>
    %c0_366 = arith.constant 0 : index
    %c0_367 = arith.constant 0 : index
    %c0_368 = arith.constant 0 : index
    %c0_369 = arith.constant 0 : index
    %201 = vector.load %arg13[%c0_366, %c0_367, %c0_368, %c0_369] : memref<2x8x8x32xf32, #tpu.memory_space<vmem>>, vector<1x1x8x32xf32>
    %202 = vector.shape_cast %201 : vector<1x1x8x32xf32> to vector<8x32xf32>
    %203 = vector.shape_cast %200 : vector<8x32xf32> to vector<1x1x8x32xf32>
    tpu.vector_store %arg13[%c0_366, %c0_367, %c0_368, %c0_369], %203 {strides = array<i32>} : memref<2x8x8x32xf32, #tpu.memory_space<vmem>>, vector<1x1x8x32xf32>,
    %204 = vector.extract_strided_slice %199 {offsets = [8, 0], sizes = [8, 32], strides = [1, 1]} : vector<128x32xf32> to vector<8x32xf32>
    %c0_370 = arith.constant 0 : index
    %c1_371 = arith.constant 1 : index
    %c0_372 = arith.constant 0 : index
    %c0_373 = arith.constant 0 : index
    %205 = vector.load %arg13[%c0_370, %c1_371, %c0_372, %c0_373] : memref<2x8x8x32xf32, #tpu.memory_space<vmem>>, vector<1x1x8x32xf32>
    %206 = vector.shape_cast %205 : vector<1x1x8x32xf32> to vector<8x32xf32>
    %207 = vector.shape_cast %204 : vector<8x32xf32> to vector<1x1x8x32xf32>
    tpu.vector_store %arg13[%c0_370, %c1_371, %c0_372, %c0_373], %207 {strides = array<i32>} : memref<2x8x8x32xf32, #tpu.memory_space<vmem>>, vector<1x1x8x32xf32>,
    %208 = vector.extract_strided_slice %199 {offsets = [16, 0], sizes = [8, 32], strides = [1, 1]} : vector<128x32xf32> to vector<8x32xf32>
    %c0_374 = arith.constant 0 : index
    %c2_375 = arith.constant 2 : index
    %c0_376 = arith.constant 0 : index
    %c0_377 = arith.constant 0 : index
    %209 = vector.load %arg13[%c0_374, %c2_375, %c0_376, %c0_377] : memref<2x8x8x32xf32, #tpu.memory_space<vmem>>, vector<1x1x8x32xf32>
    %210 = vector.shape_cast %209 : vector<1x1x8x32xf32> to vector<8x32xf32>
    %211 = vector.shape_cast %208 : vector<8x32xf32> to vector<1x1x8x32xf32>
    tpu.vector_store %arg13[%c0_374, %c2_375, %c0_376, %c0_377], %211 {strides = array<i32>} : memref<2x8x8x32xf32, #tpu.memory_space<vmem>>, vector<1x1x8x32xf32>,
    %212 = vector.extract_strided_slice %199 {offsets = [24, 0], sizes = [8, 32], strides = [1, 1]} : vector<128x32xf32> to vector<8x32xf32>
    %c0_378 = arith.constant 0 : index
    %c3_379 = arith.constant 3 : index
    %c0_380 = arith.constant 0 : index
    %c0_381 = arith.constant 0 : index
    %213 = vector.load %arg13[%c0_378, %c3_379, %c0_380, %c0_381] : memref<2x8x8x32xf32, #tpu.memory_space<vmem>>, vector<1x1x8x32xf32>
    %214 = vector.shape_cast %213 : vector<1x1x8x32xf32> to vector<8x32xf32>
    %215 = vector.shape_cast %212 : vector<8x32xf32> to vector<1x1x8x32xf32>
    tpu.vector_store %arg13[%c0_378, %c3_379, %c0_380, %c0_381], %215 {strides = array<i32>} : memref<2x8x8x32xf32, #tpu.memory_space<vmem>>, vector<1x1x8x32xf32>,
    %216 = vector.extract_strided_slice %199 {offsets = [32, 0], sizes = [8, 32], strides = [1, 1]} : vector<128x32xf32> to vector<8x32xf32>
    %c0_382 = arith.constant 0 : index
    %c4_383 = arith.constant 4 : index
    %c0_384 = arith.constant 0 : index
    %c0_385 = arith.constant 0 : index
    %217 = vector.load %arg13[%c0_382, %c4_383, %c0_384, %c0_385] : memref<2x8x8x32xf32, #tpu.memory_space<vmem>>, vector<1x1x8x32xf32>
    %218 = vector.shape_cast %217 : vector<1x1x8x32xf32> to vector<8x32xf32>
    %219 = vector.shape_cast %216 : vector<8x32xf32> to vector<1x1x8x32xf32>
    tpu.vector_store %arg13[%c0_382, %c4_383, %c0_384, %c0_385], %219 {strides = array<i32>} : memref<2x8x8x32xf32, #tpu.memory_space<vmem>>, vector<1x1x8x32xf32>,
    %220 = vector.extract_strided_slice %199 {offsets = [40, 0], sizes = [8, 32], strides = [1, 1]} : vector<128x32xf32> to vector<8x32xf32>
    %c0_386 = arith.constant 0 : index
    %c5_387 = arith.constant 5 : index
    %c0_388 = arith.constant 0 : index
    %c0_389 = arith.constant 0 : index
    %221 = vector.load %arg13[%c0_386, %c5_387, %c0_388, %c0_389] : memref<2x8x8x32xf32, #tpu.memory_space<vmem>>, vector<1x1x8x32xf32>
    %222 = vector.shape_cast %221 : vector<1x1x8x32xf32> to vector<8x32xf32>
    %223 = vector.shape_cast %220 : vector<8x32xf32> to vector<1x1x8x32xf32>
    tpu.vector_store %arg13[%c0_386, %c5_387, %c0_388, %c0_389], %223 {strides = array<i32>} : memref<2x8x8x32xf32, #tpu.memory_space<vmem>>, vector<1x1x8x32xf32>,
    %224 = vector.extract_strided_slice %199 {offsets = [48, 0], sizes = [8, 32], strides = [1, 1]} : vector<128x32xf32> to vector<8x32xf32>
    %c0_390 = arith.constant 0 : index
    %c6_391 = arith.constant 6 : index
    %c0_392 = arith.constant 0 : index
    %c0_393 = arith.constant 0 : index
    %225 = vector.load %arg13[%c0_390, %c6_391, %c0_392, %c0_393] : memref<2x8x8x32xf32, #tpu.memory_space<vmem>>, vector<1x1x8x32xf32>
    %226 = vector.shape_cast %225 : vector<1x1x8x32xf32> to vector<8x32xf32>
    %227 = vector.shape_cast %224 : vector<8x32xf32> to vector<1x1x8x32xf32>
    tpu.vector_store %arg13[%c0_390, %c6_391, %c0_392, %c0_393], %227 {strides = array<i32>} : memref<2x8x8x32xf32, #tpu.memory_space<vmem>>, vector<1x1x8x32xf32>,
    %228 = vector.extract_strided_slice %199 {offsets = [56, 0], sizes = [8, 32], strides = [1, 1]} : vector<128x32xf32> to vector<8x32xf32>
    %c0_394 = arith.constant 0 : index
    %c7_395 = arith.constant 7 : index
    %c0_396 = arith.constant 0 : index
    %c0_397 = arith.constant 0 : index
    %229 = vector.load %arg13[%c0_394, %c7_395, %c0_396, %c0_397] : memref<2x8x8x32xf32, #tpu.memory_space<vmem>>, vector<1x1x8x32xf32>
    %230 = vector.shape_cast %229 : vector<1x1x8x32xf32> to vector<8x32xf32>
    %231 = vector.shape_cast %228 : vector<8x32xf32> to vector<1x1x8x32xf32>
    tpu.vector_store %arg13[%c0_394, %c7_395, %c0_396, %c0_397], %231 {strides = array<i32>} : memref<2x8x8x32xf32, #tpu.memory_space<vmem>>, vector<1x1x8x32xf32>,
    %232 = vector.extract_strided_slice %199 {offsets = [64, 0], sizes = [8, 32], strides = [1, 1]} : vector<128x32xf32> to vector<8x32xf32>
    %c1_398 = arith.constant 1 : index
    %c0_399 = arith.constant 0 : index
    %c0_400 = arith.constant 0 : index
    %c0_401 = arith.constant 0 : index
    %233 = vector.load %arg13[%c1_398, %c0_399, %c0_400, %c0_401] : memref<2x8x8x32xf32, #tpu.memory_space<vmem>>, vector<1x1x8x32xf32>
    %234 = vector.shape_cast %233 : vector<1x1x8x32xf32> to vector<8x32xf32>
    %235 = vector.shape_cast %232 : vector<8x32xf32> to vector<1x1x8x32xf32>
    tpu.vector_store %arg13[%c1_398, %c0_399, %c0_400, %c0_401], %235 {strides = array<i32>} : memref<2x8x8x32xf32, #tpu.memory_space<vmem>>, vector<1x1x8x32xf32>,
    %236 = vector.extract_strided_slice %199 {offsets = [72, 0], sizes = [8, 32], strides = [1, 1]} : vector<128x32xf32> to vector<8x32xf32>
    %c1_402 = arith.constant 1 : index
    %c1_403 = arith.constant 1 : index
    %c0_404 = arith.constant 0 : index
    %c0_405 = arith.constant 0 : index
    %237 = vector.load %arg13[%c1_402, %c1_403, %c0_404, %c0_405] : memref<2x8x8x32xf32, #tpu.memory_space<vmem>>, vector<1x1x8x32xf32>
    %238 = vector.shape_cast %237 : vector<1x1x8x32xf32> to vector<8x32xf32>
    %239 = vector.shape_cast %236 : vector<8x32xf32> to vector<1x1x8x32xf32>
    tpu.vector_store %arg13[%c1_402, %c1_403, %c0_404, %c0_405], %239 {strides = array<i32>} : memref<2x8x8x32xf32, #tpu.memory_space<vmem>>, vector<1x1x8x32xf32>,
    %240 = vector.extract_strided_slice %199 {offsets = [80, 0], sizes = [8, 32], strides = [1, 1]} : vector<128x32xf32> to vector<8x32xf32>
    %c1_406 = arith.constant 1 : index
    %c2_407 = arith.constant 2 : index
    %c0_408 = arith.constant 0 : index
    %c0_409 = arith.constant 0 : index
    %241 = vector.load %arg13[%c1_406, %c2_407, %c0_408, %c0_409] : memref<2x8x8x32xf32, #tpu.memory_space<vmem>>, vector<1x1x8x32xf32>
    %242 = vector.shape_cast %241 : vector<1x1x8x32xf32> to vector<8x32xf32>
    %243 = vector.shape_cast %240 : vector<8x32xf32> to vector<1x1x8x32xf32>
    tpu.vector_store %arg13[%c1_406, %c2_407, %c0_408, %c0_409], %243 {strides = array<i32>} : memref<2x8x8x32xf32, #tpu.memory_space<vmem>>, vector<1x1x8x32xf32>,
    %244 = vector.extract_strided_slice %199 {offsets = [88, 0], sizes = [8, 32], strides = [1, 1]} : vector<128x32xf32> to vector<8x32xf32>
    %c1_410 = arith.constant 1 : index
    %c3_411 = arith.constant 3 : index
    %c0_412 = arith.constant 0 : index
    %c0_413 = arith.constant 0 : index
    %245 = vector.load %arg13[%c1_410, %c3_411, %c0_412, %c0_413] : memref<2x8x8x32xf32, #tpu.memory_space<vmem>>, vector<1x1x8x32xf32>
    %246 = vector.shape_cast %245 : vector<1x1x8x32xf32> to vector<8x32xf32>
    %247 = vector.shape_cast %244 : vector<8x32xf32> to vector<1x1x8x32xf32>
    tpu.vector_store %arg13[%c1_410, %c3_411, %c0_412, %c0_413], %247 {strides = array<i32>} : memref<2x8x8x32xf32, #tpu.memory_space<vmem>>, vector<1x1x8x32xf32>,
    %248 = vector.extract_strided_slice %199 {offsets = [96, 0], sizes = [8, 32], strides = [1, 1]} : vector<128x32xf32> to vector<8x32xf32>
    %c1_414 = arith.constant 1 : index
    %c4_415 = arith.constant 4 : index
    %c0_416 = arith.constant 0 : index
    %c0_417 = arith.constant 0 : index
    %249 = vector.load %arg13[%c1_414, %c4_415, %c0_416, %c0_417] : memref<2x8x8x32xf32, #tpu.memory_space<vmem>>, vector<1x1x8x32xf32>
    %250 = vector.shape_cast %249 : vector<1x1x8x32xf32> to vector<8x32xf32>
    %251 = vector.shape_cast %248 : vector<8x32xf32> to vector<1x1x8x32xf32>
    tpu.vector_store %arg13[%c1_414, %c4_415, %c0_416, %c0_417], %251 {strides = array<i32>} : memref<2x8x8x32xf32, #tpu.memory_space<vmem>>, vector<1x1x8x32xf32>,
    %252 = vector.extract_strided_slice %199 {offsets = [104, 0], sizes = [8, 32], strides = [1, 1]} : vector<128x32xf32> to vector<8x32xf32>
    %c1_418 = arith.constant 1 : index
    %c5_419 = arith.constant 5 : index
    %c0_420 = arith.constant 0 : index
    %c0_421 = arith.constant 0 : index
    %253 = vector.load %arg13[%c1_418, %c5_419, %c0_420, %c0_421] : memref<2x8x8x32xf32, #tpu.memory_space<vmem>>, vector<1x1x8x32xf32>
    %254 = vector.shape_cast %253 : vector<1x1x8x32xf32> to vector<8x32xf32>
    %255 = vector.shape_cast %252 : vector<8x32xf32> to vector<1x1x8x32xf32>
    tpu.vector_store %arg13[%c1_418, %c5_419, %c0_420, %c0_421], %255 {strides = array<i32>} : memref<2x8x8x32xf32, #tpu.memory_space<vmem>>, vector<1x1x8x32xf32>,
    %256 = vector.extract_strided_slice %199 {offsets = [112, 0], sizes = [8, 32], strides = [1, 1]} : vector<128x32xf32> to vector<8x32xf32>
    %c1_422 = arith.constant 1 : index
    %c6_423 = arith.constant 6 : index
    %c0_424 = arith.constant 0 : index
    %c0_425 = arith.constant 0 : index
    %257 = vector.load %arg13[%c1_422, %c6_423, %c0_424, %c0_425] : memref<2x8x8x32xf32, #tpu.memory_space<vmem>>, vector<1x1x8x32xf32>
    %258 = vector.shape_cast %257 : vector<1x1x8x32xf32> to vector<8x32xf32>
    %259 = vector.shape_cast %256 : vector<8x32xf32> to vector<1x1x8x32xf32>
    tpu.vector_store %arg13[%c1_422, %c6_423, %c0_424, %c0_425], %259 {strides = array<i32>} : memref<2x8x8x32xf32, #tpu.memory_space<vmem>>, vector<1x1x8x32xf32>,
    %260 = vector.extract_strided_slice %199 {offsets = [120, 0], sizes = [8, 32], strides = [1, 1]} : vector<128x32xf32> to vector<8x32xf32>
    %c1_426 = arith.constant 1 : index
    %c7_427 = arith.constant 7 : index
    %c0_428 = arith.constant 0 : index
    %c0_429 = arith.constant 0 : index
    %261 = vector.load %arg13[%c1_426, %c7_427, %c0_428, %c0_429] : memref<2x8x8x32xf32, #tpu.memory_space<vmem>>, vector<1x1x8x32xf32>
    %262 = vector.shape_cast %261 : vector<1x1x8x32xf32> to vector<8x32xf32>
    %263 = vector.shape_cast %260 : vector<8x32xf32> to vector<1x1x8x32xf32>
    tpu.vector_store %arg13[%c1_426, %c7_427, %c0_428, %c0_429], %263 {strides = array<i32>} : memref<2x8x8x32xf32, #tpu.memory_space<vmem>>, vector<1x1x8x32xf32>,
    %c0_430 = arith.constant 0 : index
    %c0_431 = arith.constant 0 : index
    %264 = vector.load %arg4[%c0_430, %c0_431] : memref<1x64xf32, #tpu.memory_space<vmem>>, vector<1x64xf32>
    %c0_432 = arith.constant 0 : index
    %c0_433 = arith.constant 0 : index
    %c0_434 = arith.constant 0 : index
    %c0_435 = arith.constant 0 : index
    %265 = vector.load %arg13[%c0_432, %c0_433, %c0_434, %c0_435] : memref<2x8x8x32xf32, #tpu.memory_space<vmem>>, vector<2x1x1x32xf32>
    %266 = vector.shape_cast %265 : vector<2x1x1x32xf32> to vector<2x32xf32>
    %c0_436 = arith.constant 0 : index
    %c0_437 = arith.constant 0 : index
    %267 = vector.load %arg14[%c0_436, %c0_437] : memref<2x512xf32, #tpu.memory_space<vmem>>, vector<2x32xf32>
    tpu.vector_store %arg14[%c0_436, %c0_437], %266 {strides = array<i32>} : memref<2x512xf32, #tpu.memory_space<vmem>>, vector<2x32xf32>,
    %c0_438 = arith.constant 0 : index
    %c0_439 = arith.constant 0 : index
    %c1_440 = arith.constant 1 : index
    %c0_441 = arith.constant 0 : index
    %268 = vector.load %arg13[%c0_438, %c0_439, %c1_440, %c0_441] : memref<2x8x8x32xf32, #tpu.memory_space<vmem>>, vector<2x1x1x32xf32>
    %269 = vector.shape_cast %268 : vector<2x1x1x32xf32> to vector<2x32xf32>
    %c0_442 = arith.constant 0 : index
    %c32_443 = arith.constant 32 : index
    %270 = vector.load %arg14[%c0_442, %c32_443] : memref<2x512xf32, #tpu.memory_space<vmem>>, vector<2x32xf32>
    tpu.vector_store %arg14[%c0_442, %c32_443], %269 {strides = array<i32>} : memref<2x512xf32, #tpu.memory_space<vmem>>, vector<2x32xf32>,
    %c0_444 = arith.constant 0 : index
    %c0_445 = arith.constant 0 : index
    %c2_446 = arith.constant 2 : index
    %c0_447 = arith.constant 0 : index
    %271 = vector.load %arg13[%c0_444, %c0_445, %c2_446, %c0_447] : memref<2x8x8x32xf32, #tpu.memory_space<vmem>>, vector<2x1x1x32xf32>
    %272 = vector.shape_cast %271 : vector<2x1x1x32xf32> to vector<2x32xf32>
    %c0_448 = arith.constant 0 : index
    %c64_449 = arith.constant 64 : index
    %273 = vector.load %arg14[%c0_448, %c64_449] : memref<2x512xf32, #tpu.memory_space<vmem>>, vector<2x32xf32>
    tpu.vector_store %arg14[%c0_448, %c64_449], %272 {strides = array<i32>} : memref<2x512xf32, #tpu.memory_space<vmem>>, vector<2x32xf32>,
    %c0_450 = arith.constant 0 : index
    %c0_451 = arith.constant 0 : index
    %c3_452 = arith.constant 3 : index
    %c0_453 = arith.constant 0 : index
    %274 = vector.load %arg13[%c0_450, %c0_451, %c3_452, %c0_453] : memref<2x8x8x32xf32, #tpu.memory_space<vmem>>, vector<2x1x1x32xf32>
    %275 = vector.shape_cast %274 : vector<2x1x1x32xf32> to vector<2x32xf32>
    %c0_454 = arith.constant 0 : index
    %c96_455 = arith.constant 96 : index
    %276 = vector.load %arg14[%c0_454, %c96_455] : memref<2x512xf32, #tpu.memory_space<vmem>>, vector<2x32xf32>
    tpu.vector_store %arg14[%c0_454, %c96_455], %275 {strides = array<i32>} : memref<2x512xf32, #tpu.memory_space<vmem>>, vector<2x32xf32>,
    %c0_456 = arith.constant 0 : index
    %c1_457 = arith.constant 1 : index
    %c0_458 = arith.constant 0 : index
    %c0_459 = arith.constant 0 : index
    %277 = vector.load %arg13[%c0_456, %c1_457, %c0_458, %c0_459] : memref<2x8x8x32xf32, #tpu.memory_space<vmem>>, vector<2x1x1x32xf32>
    %278 = vector.shape_cast %277 : vector<2x1x1x32xf32> to vector<2x32xf32>
    %c0_460 = arith.constant 0 : index
    %c128_461 = arith.constant 128 : index
    %279 = vector.load %arg14[%c0_460, %c128_461] : memref<2x512xf32, #tpu.memory_space<vmem>>, vector<2x32xf32>
    tpu.vector_store %arg14[%c0_460, %c128_461], %278 {strides = array<i32>} : memref<2x512xf32, #tpu.memory_space<vmem>>, vector<2x32xf32>,
    %c0_462 = arith.constant 0 : index
    %c1_463 = arith.constant 1 : index
    %c1_464 = arith.constant 1 : index
    %c0_465 = arith.constant 0 : index
    %280 = vector.load %arg13[%c0_462, %c1_463, %c1_464, %c0_465] : memref<2x8x8x32xf32, #tpu.memory_space<vmem>>, vector<2x1x1x32xf32>
    %281 = vector.shape_cast %280 : vector<2x1x1x32xf32> to vector<2x32xf32>
    %c0_466 = arith.constant 0 : index
    %c160 = arith.constant 160 : index
    %282 = vector.load %arg14[%c0_466, %c160] : memref<2x512xf32, #tpu.memory_space<vmem>>, vector<2x32xf32>
    tpu.vector_store %arg14[%c0_466, %c160], %281 {strides = array<i32>} : memref<2x512xf32, #tpu.memory_space<vmem>>, vector<2x32xf32>,
    %c0_467 = arith.constant 0 : index
    %c1_468 = arith.constant 1 : index
    %c2_469 = arith.constant 2 : index
    %c0_470 = arith.constant 0 : index
    %283 = vector.load %arg13[%c0_467, %c1_468, %c2_469, %c0_470] : memref<2x8x8x32xf32, #tpu.memory_space<vmem>>, vector<2x1x1x32xf32>
    %284 = vector.shape_cast %283 : vector<2x1x1x32xf32> to vector<2x32xf32>
    %c0_471 = arith.constant 0 : index
    %c192_472 = arith.constant 192 : index
    %285 = vector.load %arg14[%c0_471, %c192_472] : memref<2x512xf32, #tpu.memory_space<vmem>>, vector<2x32xf32>
    tpu.vector_store %arg14[%c0_471, %c192_472], %284 {strides = array<i32>} : memref<2x512xf32, #tpu.memory_space<vmem>>, vector<2x32xf32>,
    %c0_473 = arith.constant 0 : index
    %c1_474 = arith.constant 1 : index
    %c3_475 = arith.constant 3 : index
    %c0_476 = arith.constant 0 : index
    %286 = vector.load %arg13[%c0_473, %c1_474, %c3_475, %c0_476] : memref<2x8x8x32xf32, #tpu.memory_space<vmem>>, vector<2x1x1x32xf32>
    %287 = vector.shape_cast %286 : vector<2x1x1x32xf32> to vector<2x32xf32>
    %c0_477 = arith.constant 0 : index
    %c224 = arith.constant 224 : index
    %288 = vector.load %arg14[%c0_477, %c224] : memref<2x512xf32, #tpu.memory_space<vmem>>, vector<2x32xf32>
    tpu.vector_store %arg14[%c0_477, %c224], %287 {strides = array<i32>} : memref<2x512xf32, #tpu.memory_space<vmem>>, vector<2x32xf32>,
    %c0_478 = arith.constant 0 : index
    %c2_479 = arith.constant 2 : index
    %c0_480 = arith.constant 0 : index
    %c0_481 = arith.constant 0 : index
    %289 = vector.load %arg13[%c0_478, %c2_479, %c0_480, %c0_481] : memref<2x8x8x32xf32, #tpu.memory_space<vmem>>, vector<2x1x1x32xf32>
    %290 = vector.shape_cast %289 : vector<2x1x1x32xf32> to vector<2x32xf32>
    %c0_482 = arith.constant 0 : index
    %c256 = arith.constant 256 : index
    %291 = vector.load %arg14[%c0_482, %c256] : memref<2x512xf32, #tpu.memory_space<vmem>>, vector<2x32xf32>
    tpu.vector_store %arg14[%c0_482, %c256], %290 {strides = array<i32>} : memref<2x512xf32, #tpu.memory_space<vmem>>, vector<2x32xf32>,
    %c0_483 = arith.constant 0 : index
    %c2_484 = arith.constant 2 : index
    %c1_485 = arith.constant 1 : index
    %c0_486 = arith.constant 0 : index
    %292 = vector.load %arg13[%c0_483, %c2_484, %c1_485, %c0_486] : memref<2x8x8x32xf32, #tpu.memory_space<vmem>>, vector<2x1x1x32xf32>
    %293 = vector.shape_cast %292 : vector<2x1x1x32xf32> to vector<2x32xf32>
    %c0_487 = arith.constant 0 : index
    %c288 = arith.constant 288 : index
    %294 = vector.load %arg14[%c0_487, %c288] : memref<2x512xf32, #tpu.memory_space<vmem>>, vector<2x32xf32>
    tpu.vector_store %arg14[%c0_487, %c288], %293 {strides = array<i32>} : memref<2x512xf32, #tpu.memory_space<vmem>>, vector<2x32xf32>,
    %c0_488 = arith.constant 0 : index
    %c2_489 = arith.constant 2 : index
    %c2_490 = arith.constant 2 : index
    %c0_491 = arith.constant 0 : index
    %295 = vector.load %arg13[%c0_488, %c2_489, %c2_490, %c0_491] : memref<2x8x8x32xf32, #tpu.memory_space<vmem>>, vector<2x1x1x32xf32>
    %296 = vector.shape_cast %295 : vector<2x1x1x32xf32> to vector<2x32xf32>
    %c0_492 = arith.constant 0 : index
    %c320 = arith.constant 320 : index
    %297 = vector.load %arg14[%c0_492, %c320] : memref<2x512xf32, #tpu.memory_space<vmem>>, vector<2x32xf32>
    tpu.vector_store %arg14[%c0_492, %c320], %296 {strides = array<i32>} : memref<2x512xf32, #tpu.memory_space<vmem>>, vector<2x32xf32>,
    %c0_493 = arith.constant 0 : index
    %c2_494 = arith.constant 2 : index
    %c3_495 = arith.constant 3 : index
    %c0_496 = arith.constant 0 : index
    %298 = vector.load %arg13[%c0_493, %c2_494, %c3_495, %c0_496] : memref<2x8x8x32xf32, #tpu.memory_space<vmem>>, vector<2x1x1x32xf32>
    %299 = vector.shape_cast %298 : vector<2x1x1x32xf32> to vector<2x32xf32>
    %c0_497 = arith.constant 0 : index
    %c352 = arith.constant 352 : index
    %300 = vector.load %arg14[%c0_497, %c352] : memref<2x512xf32, #tpu.memory_space<vmem>>, vector<2x32xf32>
    tpu.vector_store %arg14[%c0_497, %c352], %299 {strides = array<i32>} : memref<2x512xf32, #tpu.memory_space<vmem>>, vector<2x32xf32>,
    %c0_498 = arith.constant 0 : index
    %c3_499 = arith.constant 3 : index
    %c0_500 = arith.constant 0 : index
    %c0_501 = arith.constant 0 : index
    %301 = vector.load %arg13[%c0_498, %c3_499, %c0_500, %c0_501] : memref<2x8x8x32xf32, #tpu.memory_space<vmem>>, vector<2x1x1x32xf32>
    %302 = vector.shape_cast %301 : vector<2x1x1x32xf32> to vector<2x32xf32>
    %c0_502 = arith.constant 0 : index
    %c384 = arith.constant 384 : index
    %303 = vector.load %arg14[%c0_502, %c384] : memref<2x512xf32, #tpu.memory_space<vmem>>, vector<2x32xf32>
    tpu.vector_store %arg14[%c0_502, %c384], %302 {strides = array<i32>} : memref<2x512xf32, #tpu.memory_space<vmem>>, vector<2x32xf32>,
    %c0_503 = arith.constant 0 : index
    %c3_504 = arith.constant 3 : index
    %c1_505 = arith.constant 1 : index
    %c0_506 = arith.constant 0 : index
    %304 = vector.load %arg13[%c0_503, %c3_504, %c1_505, %c0_506] : memref<2x8x8x32xf32, #tpu.memory_space<vmem>>, vector<2x1x1x32xf32>
    %305 = vector.shape_cast %304 : vector<2x1x1x32xf32> to vector<2x32xf32>
    %c0_507 = arith.constant 0 : index
    %c416 = arith.constant 416 : index
    %306 = vector.load %arg14[%c0_507, %c416] : memref<2x512xf32, #tpu.memory_space<vmem>>, vector<2x32xf32>
    tpu.vector_store %arg14[%c0_507, %c416], %305 {strides = array<i32>} : memref<2x512xf32, #tpu.memory_space<vmem>>, vector<2x32xf32>,
    %c0_508 = arith.constant 0 : index
    %c3_509 = arith.constant 3 : index
    %c2_510 = arith.constant 2 : index
    %c0_511 = arith.constant 0 : index
    %307 = vector.load %arg13[%c0_508, %c3_509, %c2_510, %c0_511] : memref<2x8x8x32xf32, #tpu.memory_space<vmem>>, vector<2x1x1x32xf32>
    %308 = vector.shape_cast %307 : vector<2x1x1x32xf32> to vector<2x32xf32>
    %c0_512 = arith.constant 0 : index
    %c448 = arith.constant 448 : index
    %309 = vector.load %arg14[%c0_512, %c448] : memref<2x512xf32, #tpu.memory_space<vmem>>, vector<2x32xf32>
    tpu.vector_store %arg14[%c0_512, %c448], %308 {strides = array<i32>} : memref<2x512xf32, #tpu.memory_space<vmem>>, vector<2x32xf32>,
    %c0_513 = arith.constant 0 : index
    %c3_514 = arith.constant 3 : index
    %c3_515 = arith.constant 3 : index
    %c0_516 = arith.constant 0 : index
    %310 = vector.load %arg13[%c0_513, %c3_514, %c3_515, %c0_516] : memref<2x8x8x32xf32, #tpu.memory_space<vmem>>, vector<2x1x1x32xf32>
    %311 = vector.shape_cast %310 : vector<2x1x1x32xf32> to vector<2x32xf32>
    %c0_517 = arith.constant 0 : index
    %c480 = arith.constant 480 : index
    %312 = vector.load %arg14[%c0_517, %c480] : memref<2x512xf32, #tpu.memory_space<vmem>>, vector<2x32xf32>
    tpu.vector_store %arg14[%c0_517, %c480], %311 {strides = array<i32>} : memref<2x512xf32, #tpu.memory_space<vmem>>, vector<2x32xf32>,
    %c0_518 = arith.constant 0 : index
    %c0_519 = arith.constant 0 : index
    %313 = vector.load %arg14[%c0_518, %c0_519] : memref<2x512xf32, #tpu.memory_space<vmem>>, vector<2x512xf32>
    %c0_520 = arith.constant 0 : index
    %c0_521 = arith.constant 0 : index
    %314 = vector.load %arg3[%c0_520, %c0_521] : memref<512x64xf32, #tpu.memory_space<vmem>>, vector<512x64xf32>
    %cst_522 = arith.constant dense<0.000000e+00> : vector<2x64xf32>
    %315 = tpu.matmul %313, %314, %cst_522 {dimension_numbers = #tpu.dot_dimension_numbers<[1], [0], [0], [1], [0, 0, 1, 1], [], []>} : vector<2x512xf32>, vector<512x64xf32>, vector<2x64xf32> -> vector<2x64xf32>
    %316 = vector.broadcast %264 : vector<1x64xf32> to vector<2x64xf32>
    %317 = arith.addf %315, %316 : vector<2x64xf32>
    %cst_523 = arith.constant 0.000000e+00 : f32
    %318 = vector.broadcast %cst_523 : f32 to vector<2x64xf32>
    %319 = arith.maximumf %317, %318 : vector<2x64xf32>
    %c0_524 = arith.constant 0 : index
    %c0_525 = arith.constant 0 : index
    %c0_526 = arith.constant 0 : index
    %c0_527 = arith.constant 0 : index
    %320 = vector.load %arg15[%c0_524, %c0_525, %c0_526, %c0_527] : memref<2x3x3x64xf32, #tpu.memory_space<vmem>>, vector<2x1x1x64xf32>
    %321 = vector.shape_cast %320 : vector<2x1x1x64xf32> to vector<2x64xf32>
    %322 = vector.shape_cast %319 : vector<2x64xf32> to vector<2x1x1x64xf32>
    tpu.vector_store %arg15[%c0_524, %c0_525, %c0_526, %c0_527], %322 {strides = array<i32>} : memref<2x3x3x64xf32, #tpu.memory_space<vmem>>, vector<2x1x1x64xf32>,
    %c0_528 = arith.constant 0 : index
    %c0_529 = arith.constant 0 : index
    %c2_530 = arith.constant 2 : index
    %c0_531 = arith.constant 0 : index
    %323 = vector.load %arg13[%c0_528, %c0_529, %c2_530, %c0_531] : memref<2x8x8x32xf32, #tpu.memory_space<vmem>>, vector<2x1x1x32xf32>
    %324 = vector.shape_cast %323 : vector<2x1x1x32xf32> to vector<2x32xf32>
    %c0_532 = arith.constant 0 : index
    %c0_533 = arith.constant 0 : index
    %325 = vector.load %arg14[%c0_532, %c0_533] : memref<2x512xf32, #tpu.memory_space<vmem>>, vector<2x32xf32>
    tpu.vector_store %arg14[%c0_532, %c0_533], %324 {strides = array<i32>} : memref<2x512xf32, #tpu.memory_space<vmem>>, vector<2x32xf32>,
    %c0_534 = arith.constant 0 : index
    %c0_535 = arith.constant 0 : index
    %c3_536 = arith.constant 3 : index
    %c0_537 = arith.constant 0 : index
    %326 = vector.load %arg13[%c0_534, %c0_535, %c3_536, %c0_537] : memref<2x8x8x32xf32, #tpu.memory_space<vmem>>, vector<2x1x1x32xf32>
    %327 = vector.shape_cast %326 : vector<2x1x1x32xf32> to vector<2x32xf32>
    %c0_538 = arith.constant 0 : index
    %c32_539 = arith.constant 32 : index
    %328 = vector.load %arg14[%c0_538, %c32_539] : memref<2x512xf32, #tpu.memory_space<vmem>>, vector<2x32xf32>
    tpu.vector_store %arg14[%c0_538, %c32_539], %327 {strides = array<i32>} : memref<2x512xf32, #tpu.memory_space<vmem>>, vector<2x32xf32>,
    %c0_540 = arith.constant 0 : index
    %c0_541 = arith.constant 0 : index
    %c4_542 = arith.constant 4 : index
    %c0_543 = arith.constant 0 : index
    %329 = vector.load %arg13[%c0_540, %c0_541, %c4_542, %c0_543] : memref<2x8x8x32xf32, #tpu.memory_space<vmem>>, vector<2x1x1x32xf32>
    %330 = vector.shape_cast %329 : vector<2x1x1x32xf32> to vector<2x32xf32>
    %c0_544 = arith.constant 0 : index
    %c64_545 = arith.constant 64 : index
    %331 = vector.load %arg14[%c0_544, %c64_545] : memref<2x512xf32, #tpu.memory_space<vmem>>, vector<2x32xf32>
    tpu.vector_store %arg14[%c0_544, %c64_545], %330 {strides = array<i32>} : memref<2x512xf32, #tpu.memory_space<vmem>>, vector<2x32xf32>,
    %c0_546 = arith.constant 0 : index
    %c0_547 = arith.constant 0 : index
    %c5_548 = arith.constant 5 : index
    %c0_549 = arith.constant 0 : index
    %332 = vector.load %arg13[%c0_546, %c0_547, %c5_548, %c0_549] : memref<2x8x8x32xf32, #tpu.memory_space<vmem>>, vector<2x1x1x32xf32>
    %333 = vector.shape_cast %332 : vector<2x1x1x32xf32> to vector<2x32xf32>
    %c0_550 = arith.constant 0 : index
    %c96_551 = arith.constant 96 : index
    %334 = vector.load %arg14[%c0_550, %c96_551] : memref<2x512xf32, #tpu.memory_space<vmem>>, vector<2x32xf32>
    tpu.vector_store %arg14[%c0_550, %c96_551], %333 {strides = array<i32>} : memref<2x512xf32, #tpu.memory_space<vmem>>, vector<2x32xf32>,
    %c0_552 = arith.constant 0 : index
    %c1_553 = arith.constant 1 : index
    %c2_554 = arith.constant 2 : index
    %c0_555 = arith.constant 0 : index
    %335 = vector.load %arg13[%c0_552, %c1_553, %c2_554, %c0_555] : memref<2x8x8x32xf32, #tpu.memory_space<vmem>>, vector<2x1x1x32xf32>
    %336 = vector.shape_cast %335 : vector<2x1x1x32xf32> to vector<2x32xf32>
    %c0_556 = arith.constant 0 : index
    %c128_557 = arith.constant 128 : index
    %337 = vector.load %arg14[%c0_556, %c128_557] : memref<2x512xf32, #tpu.memory_space<vmem>>, vector<2x32xf32>
    tpu.vector_store %arg14[%c0_556, %c128_557], %336 {strides = array<i32>} : memref<2x512xf32, #tpu.memory_space<vmem>>, vector<2x32xf32>,
    %c0_558 = arith.constant 0 : index
    %c1_559 = arith.constant 1 : index
    %c3_560 = arith.constant 3 : index
    %c0_561 = arith.constant 0 : index
    %338 = vector.load %arg13[%c0_558, %c1_559, %c3_560, %c0_561] : memref<2x8x8x32xf32, #tpu.memory_space<vmem>>, vector<2x1x1x32xf32>
    %339 = vector.shape_cast %338 : vector<2x1x1x32xf32> to vector<2x32xf32>
    %c0_562 = arith.constant 0 : index
    %c160_563 = arith.constant 160 : index
    %340 = vector.load %arg14[%c0_562, %c160_563] : memref<2x512xf32, #tpu.memory_space<vmem>>, vector<2x32xf32>
    tpu.vector_store %arg14[%c0_562, %c160_563], %339 {strides = array<i32>} : memref<2x512xf32, #tpu.memory_space<vmem>>, vector<2x32xf32>,
    %c0_564 = arith.constant 0 : index
    %c1_565 = arith.constant 1 : index
    %c4_566 = arith.constant 4 : index
    %c0_567 = arith.constant 0 : index
    %341 = vector.load %arg13[%c0_564, %c1_565, %c4_566, %c0_567] : memref<2x8x8x32xf32, #tpu.memory_space<vmem>>, vector<2x1x1x32xf32>
    %342 = vector.shape_cast %341 : vector<2x1x1x32xf32> to vector<2x32xf32>
    %c0_568 = arith.constant 0 : index
    %c192_569 = arith.constant 192 : index
    %343 = vector.load %arg14[%c0_568, %c192_569] : memref<2x512xf32, #tpu.memory_space<vmem>>, vector<2x32xf32>
    tpu.vector_store %arg14[%c0_568, %c192_569], %342 {strides = array<i32>} : memref<2x512xf32, #tpu.memory_space<vmem>>, vector<2x32xf32>,
    %c0_570 = arith.constant 0 : index
    %c1_571 = arith.constant 1 : index
    %c5_572 = arith.constant 5 : index
    %c0_573 = arith.constant 0 : index
    %344 = vector.load %arg13[%c0_570, %c1_571, %c5_572, %c0_573] : memref<2x8x8x32xf32, #tpu.memory_space<vmem>>, vector<2x1x1x32xf32>
    %345 = vector.shape_cast %344 : vector<2x1x1x32xf32> to vector<2x32xf32>
    %c0_574 = arith.constant 0 : index
    %c224_575 = arith.constant 224 : index
    %346 = vector.load %arg14[%c0_574, %c224_575] : memref<2x512xf32, #tpu.memory_space<vmem>>, vector<2x32xf32>
    tpu.vector_store %arg14[%c0_574, %c224_575], %345 {strides = array<i32>} : memref<2x512xf32, #tpu.memory_space<vmem>>, vector<2x32xf32>,
    %c0_576 = arith.constant 0 : index
    %c2_577 = arith.constant 2 : index
    %c2_578 = arith.constant 2 : index
    %c0_579 = arith.constant 0 : index
    %347 = vector.load %arg13[%c0_576, %c2_577, %c2_578, %c0_579] : memref<2x8x8x32xf32, #tpu.memory_space<vmem>>, vector<2x1x1x32xf32>
    %348 = vector.shape_cast %347 : vector<2x1x1x32xf32> to vector<2x32xf32>
    %c0_580 = arith.constant 0 : index
    %c256_581 = arith.constant 256 : index
    %349 = vector.load %arg14[%c0_580, %c256_581] : memref<2x512xf32, #tpu.memory_space<vmem>>, vector<2x32xf32>
    tpu.vector_store %arg14[%c0_580, %c256_581], %348 {strides = array<i32>} : memref<2x512xf32, #tpu.memory_space<vmem>>, vector<2x32xf32>,
    %c0_582 = arith.constant 0 : index
    %c2_583 = arith.constant 2 : index
    %c3_584 = arith.constant 3 : index
    %c0_585 = arith.constant 0 : index
    %350 = vector.load %arg13[%c0_582, %c2_583, %c3_584, %c0_585] : memref<2x8x8x32xf32, #tpu.memory_space<vmem>>, vector<2x1x1x32xf32>
    %351 = vector.shape_cast %350 : vector<2x1x1x32xf32> to vector<2x32xf32>
    %c0_586 = arith.constant 0 : index
    %c288_587 = arith.constant 288 : index
    %352 = vector.load %arg14[%c0_586, %c288_587] : memref<2x512xf32, #tpu.memory_space<vmem>>, vector<2x32xf32>
    tpu.vector_store %arg14[%c0_586, %c288_587], %351 {strides = array<i32>} : memref<2x512xf32, #tpu.memory_space<vmem>>, vector<2x32xf32>,
    %c0_588 = arith.constant 0 : index
    %c2_589 = arith.constant 2 : index
    %c4_590 = arith.constant 4 : index
    %c0_591 = arith.constant 0 : index
    %353 = vector.load %arg13[%c0_588, %c2_589, %c4_590, %c0_591] : memref<2x8x8x32xf32, #tpu.memory_space<vmem>>, vector<2x1x1x32xf32>
    %354 = vector.shape_cast %353 : vector<2x1x1x32xf32> to vector<2x32xf32>
    %c0_592 = arith.constant 0 : index
    %c320_593 = arith.constant 320 : index
    %355 = vector.load %arg14[%c0_592, %c320_593] : memref<2x512xf32, #tpu.memory_space<vmem>>, vector<2x32xf32>
    tpu.vector_store %arg14[%c0_592, %c320_593], %354 {strides = array<i32>} : memref<2x512xf32, #tpu.memory_space<vmem>>, vector<2x32xf32>,
    %c0_594 = arith.constant 0 : index
    %c2_595 = arith.constant 2 : index
    %c5_596 = arith.constant 5 : index
    %c0_597 = arith.constant 0 : index
    %356 = vector.load %arg13[%c0_594, %c2_595, %c5_596, %c0_597] : memref<2x8x8x32xf32, #tpu.memory_space<vmem>>, vector<2x1x1x32xf32>
    %357 = vector.shape_cast %356 : vector<2x1x1x32xf32> to vector<2x32xf32>
    %c0_598 = arith.constant 0 : index
    %c352_599 = arith.constant 352 : index
    %358 = vector.load %arg14[%c0_598, %c352_599] : memref<2x512xf32, #tpu.memory_space<vmem>>, vector<2x32xf32>
    tpu.vector_store %arg14[%c0_598, %c352_599], %357 {strides = array<i32>} : memref<2x512xf32, #tpu.memory_space<vmem>>, vector<2x32xf32>,
    %c0_600 = arith.constant 0 : index
    %c3_601 = arith.constant 3 : index
    %c2_602 = arith.constant 2 : index
    %c0_603 = arith.constant 0 : index
    %359 = vector.load %arg13[%c0_600, %c3_601, %c2_602, %c0_603] : memref<2x8x8x32xf32, #tpu.memory_space<vmem>>, vector<2x1x1x32xf32>
    %360 = vector.shape_cast %359 : vector<2x1x1x32xf32> to vector<2x32xf32>
    %c0_604 = arith.constant 0 : index
    %c384_605 = arith.constant 384 : index
    %361 = vector.load %arg14[%c0_604, %c384_605] : memref<2x512xf32, #tpu.memory_space<vmem>>, vector<2x32xf32>
    tpu.vector_store %arg14[%c0_604, %c384_605], %360 {strides = array<i32>} : memref<2x512xf32, #tpu.memory_space<vmem>>, vector<2x32xf32>,
    %c0_606 = arith.constant 0 : index
    %c3_607 = arith.constant 3 : index
    %c3_608 = arith.constant 3 : index
    %c0_609 = arith.constant 0 : index
    %362 = vector.load %arg13[%c0_606, %c3_607, %c3_608, %c0_609] : memref<2x8x8x32xf32, #tpu.memory_space<vmem>>, vector<2x1x1x32xf32>
    %363 = vector.shape_cast %362 : vector<2x1x1x32xf32> to vector<2x32xf32>
    %c0_610 = arith.constant 0 : index
    %c416_611 = arith.constant 416 : index
    %364 = vector.load %arg14[%c0_610, %c416_611] : memref<2x512xf32, #tpu.memory_space<vmem>>, vector<2x32xf32>
    tpu.vector_store %arg14[%c0_610, %c416_611], %363 {strides = array<i32>} : memref<2x512xf32, #tpu.memory_space<vmem>>, vector<2x32xf32>,
    %c0_612 = arith.constant 0 : index
    %c3_613 = arith.constant 3 : index
    %c4_614 = arith.constant 4 : index
    %c0_615 = arith.constant 0 : index
    %365 = vector.load %arg13[%c0_612, %c3_613, %c4_614, %c0_615] : memref<2x8x8x32xf32, #tpu.memory_space<vmem>>, vector<2x1x1x32xf32>
    %366 = vector.shape_cast %365 : vector<2x1x1x32xf32> to vector<2x32xf32>
    %c0_616 = arith.constant 0 : index
    %c448_617 = arith.constant 448 : index
    %367 = vector.load %arg14[%c0_616, %c448_617] : memref<2x512xf32, #tpu.memory_space<vmem>>, vector<2x32xf32>
    tpu.vector_store %arg14[%c0_616, %c448_617], %366 {strides = array<i32>} : memref<2x512xf32, #tpu.memory_space<vmem>>, vector<2x32xf32>,
    %c0_618 = arith.constant 0 : index
    %c3_619 = arith.constant 3 : index
    %c5_620 = arith.constant 5 : index
    %c0_621 = arith.constant 0 : index
    %368 = vector.load %arg13[%c0_618, %c3_619, %c5_620, %c0_621] : memref<2x8x8x32xf32, #tpu.memory_space<vmem>>, vector<2x1x1x32xf32>
    %369 = vector.shape_cast %368 : vector<2x1x1x32xf32> to vector<2x32xf32>
    %c0_622 = arith.constant 0 : index
    %c480_623 = arith.constant 480 : index
    %370 = vector.load %arg14[%c0_622, %c480_623] : memref<2x512xf32, #tpu.memory_space<vmem>>, vector<2x32xf32>
    tpu.vector_store %arg14[%c0_622, %c480_623], %369 {strides = array<i32>} : memref<2x512xf32, #tpu.memory_space<vmem>>, vector<2x32xf32>,
    %c0_624 = arith.constant 0 : index
    %c0_625 = arith.constant 0 : index
    %371 = vector.load %arg14[%c0_624, %c0_625] : memref<2x512xf32, #tpu.memory_space<vmem>>, vector<2x512xf32>
    %c0_626 = arith.constant 0 : index
    %c0_627 = arith.constant 0 : index
    %372 = vector.load %arg3[%c0_626, %c0_627] : memref<512x64xf32, #tpu.memory_space<vmem>>, vector<512x64xf32>
    %cst_628 = arith.constant dense<0.000000e+00> : vector<2x64xf32>
    %373 = tpu.matmul %371, %372, %cst_628 {dimension_numbers = #tpu.dot_dimension_numbers<[1], [0], [0], [1], [0, 0, 1, 1], [], []>} : vector<2x512xf32>, vector<512x64xf32>, vector<2x64xf32> -> vector<2x64xf32>
    %374 = vector.broadcast %264 : vector<1x64xf32> to vector<2x64xf32>
    %375 = arith.addf %373, %374 : vector<2x64xf32>
    %cst_629 = arith.constant 0.000000e+00 : f32
    %376 = vector.broadcast %cst_629 : f32 to vector<2x64xf32>
    %377 = arith.maximumf %375, %376 : vector<2x64xf32>
    %c0_630 = arith.constant 0 : index
    %c0_631 = arith.constant 0 : index
    %c1_632 = arith.constant 1 : index
    %c0_633 = arith.constant 0 : index
    %378 = vector.load %arg15[%c0_630, %c0_631, %c1_632, %c0_633] : memref<2x3x3x64xf32, #tpu.memory_space<vmem>>, vector<2x1x1x64xf32>
    %379 = vector.shape_cast %378 : vector<2x1x1x64xf32> to vector<2x64xf32>
    %380 = vector.shape_cast %377 : vector<2x64xf32> to vector<2x1x1x64xf32>
    tpu.vector_store %arg15[%c0_630, %c0_631, %c1_632, %c0_633], %380 {strides = array<i32>} : memref<2x3x3x64xf32, #tpu.memory_space<vmem>>, vector<2x1x1x64xf32>,
    %c0_634 = arith.constant 0 : index
    %c0_635 = arith.constant 0 : index
    %c4_636 = arith.constant 4 : index
    %c0_637 = arith.constant 0 : index
    %381 = vector.load %arg13[%c0_634, %c0_635, %c4_636, %c0_637] : memref<2x8x8x32xf32, #tpu.memory_space<vmem>>, vector<2x1x1x32xf32>
    %382 = vector.shape_cast %381 : vector<2x1x1x32xf32> to vector<2x32xf32>
    %c0_638 = arith.constant 0 : index
    %c0_639 = arith.constant 0 : index
    %383 = vector.load %arg14[%c0_638, %c0_639] : memref<2x512xf32, #tpu.memory_space<vmem>>, vector<2x32xf32>
    tpu.vector_store %arg14[%c0_638, %c0_639], %382 {strides = array<i32>} : memref<2x512xf32, #tpu.memory_space<vmem>>, vector<2x32xf32>,
    %c0_640 = arith.constant 0 : index
    %c0_641 = arith.constant 0 : index
    %c5_642 = arith.constant 5 : index
    %c0_643 = arith.constant 0 : index
    %384 = vector.load %arg13[%c0_640, %c0_641, %c5_642, %c0_643] : memref<2x8x8x32xf32, #tpu.memory_space<vmem>>, vector<2x1x1x32xf32>
    %385 = vector.shape_cast %384 : vector<2x1x1x32xf32> to vector<2x32xf32>
    %c0_644 = arith.constant 0 : index
    %c32_645 = arith.constant 32 : index
    %386 = vector.load %arg14[%c0_644, %c32_645] : memref<2x512xf32, #tpu.memory_space<vmem>>, vector<2x32xf32>
    tpu.vector_store %arg14[%c0_644, %c32_645], %385 {strides = array<i32>} : memref<2x512xf32, #tpu.memory_space<vmem>>, vector<2x32xf32>,
    %c0_646 = arith.constant 0 : index
    %c0_647 = arith.constant 0 : index
    %c6_648 = arith.constant 6 : index
    %c0_649 = arith.constant 0 : index
    %387 = vector.load %arg13[%c0_646, %c0_647, %c6_648, %c0_649] : memref<2x8x8x32xf32, #tpu.memory_space<vmem>>, vector<2x1x1x32xf32>
    %388 = vector.shape_cast %387 : vector<2x1x1x32xf32> to vector<2x32xf32>
    %c0_650 = arith.constant 0 : index
    %c64_651 = arith.constant 64 : index
    %389 = vector.load %arg14[%c0_650, %c64_651] : memref<2x512xf32, #tpu.memory_space<vmem>>, vector<2x32xf32>
    tpu.vector_store %arg14[%c0_650, %c64_651], %388 {strides = array<i32>} : memref<2x512xf32, #tpu.memory_space<vmem>>, vector<2x32xf32>,
    %c0_652 = arith.constant 0 : index
    %c0_653 = arith.constant 0 : index
    %c7_654 = arith.constant 7 : index
    %c0_655 = arith.constant 0 : index
    %390 = vector.load %arg13[%c0_652, %c0_653, %c7_654, %c0_655] : memref<2x8x8x32xf32, #tpu.memory_space<vmem>>, vector<2x1x1x32xf32>
    %391 = vector.shape_cast %390 : vector<2x1x1x32xf32> to vector<2x32xf32>
    %c0_656 = arith.constant 0 : index
    %c96_657 = arith.constant 96 : index
    %392 = vector.load %arg14[%c0_656, %c96_657] : memref<2x512xf32, #tpu.memory_space<vmem>>, vector<2x32xf32>
    tpu.vector_store %arg14[%c0_656, %c96_657], %391 {strides = array<i32>} : memref<2x512xf32, #tpu.memory_space<vmem>>, vector<2x32xf32>,
    %c0_658 = arith.constant 0 : index
    %c1_659 = arith.constant 1 : index
    %c4_660 = arith.constant 4 : index
    %c0_661 = arith.constant 0 : index
    %393 = vector.load %arg13[%c0_658, %c1_659, %c4_660, %c0_661] : memref<2x8x8x32xf32, #tpu.memory_space<vmem>>, vector<2x1x1x32xf32>
    %394 = vector.shape_cast %393 : vector<2x1x1x32xf32> to vector<2x32xf32>
    %c0_662 = arith.constant 0 : index
    %c128_663 = arith.constant 128 : index
    %395 = vector.load %arg14[%c0_662, %c128_663] : memref<2x512xf32, #tpu.memory_space<vmem>>, vector<2x32xf32>
    tpu.vector_store %arg14[%c0_662, %c128_663], %394 {strides = array<i32>} : memref<2x512xf32, #tpu.memory_space<vmem>>, vector<2x32xf32>,
    %c0_664 = arith.constant 0 : index
    %c1_665 = arith.constant 1 : index
    %c5_666 = arith.constant 5 : index
    %c0_667 = arith.constant 0 : index
    %396 = vector.load %arg13[%c0_664, %c1_665, %c5_666, %c0_667] : memref<2x8x8x32xf32, #tpu.memory_space<vmem>>, vector<2x1x1x32xf32>
    %397 = vector.shape_cast %396 : vector<2x1x1x32xf32> to vector<2x32xf32>
    %c0_668 = arith.constant 0 : index
    %c160_669 = arith.constant 160 : index
    %398 = vector.load %arg14[%c0_668, %c160_669] : memref<2x512xf32, #tpu.memory_space<vmem>>, vector<2x32xf32>
    tpu.vector_store %arg14[%c0_668, %c160_669], %397 {strides = array<i32>} : memref<2x512xf32, #tpu.memory_space<vmem>>, vector<2x32xf32>,
    %c0_670 = arith.constant 0 : index
    %c1_671 = arith.constant 1 : index
    %c6_672 = arith.constant 6 : index
    %c0_673 = arith.constant 0 : index
    %399 = vector.load %arg13[%c0_670, %c1_671, %c6_672, %c0_673] : memref<2x8x8x32xf32, #tpu.memory_space<vmem>>, vector<2x1x1x32xf32>
    %400 = vector.shape_cast %399 : vector<2x1x1x32xf32> to vector<2x32xf32>
    %c0_674 = arith.constant 0 : index
    %c192_675 = arith.constant 192 : index
    %401 = vector.load %arg14[%c0_674, %c192_675] : memref<2x512xf32, #tpu.memory_space<vmem>>, vector<2x32xf32>
    tpu.vector_store %arg14[%c0_674, %c192_675], %400 {strides = array<i32>} : memref<2x512xf32, #tpu.memory_space<vmem>>, vector<2x32xf32>,
    %c0_676 = arith.constant 0 : index
    %c1_677 = arith.constant 1 : index
    %c7_678 = arith.constant 7 : index
    %c0_679 = arith.constant 0 : index
    %402 = vector.load %arg13[%c0_676, %c1_677, %c7_678, %c0_679] : memref<2x8x8x32xf32, #tpu.memory_space<vmem>>, vector<2x1x1x32xf32>
    %403 = vector.shape_cast %402 : vector<2x1x1x32xf32> to vector<2x32xf32>
    %c0_680 = arith.constant 0 : index
    %c224_681 = arith.constant 224 : index
    %404 = vector.load %arg14[%c0_680, %c224_681] : memref<2x512xf32, #tpu.memory_space<vmem>>, vector<2x32xf32>
    tpu.vector_store %arg14[%c0_680, %c224_681], %403 {strides = array<i32>} : memref<2x512xf32, #tpu.memory_space<vmem>>, vector<2x32xf32>,
    %c0_682 = arith.constant 0 : index
    %c2_683 = arith.constant 2 : index
    %c4_684 = arith.constant 4 : index
    %c0_685 = arith.constant 0 : index
    %405 = vector.load %arg13[%c0_682, %c2_683, %c4_684, %c0_685] : memref<2x8x8x32xf32, #tpu.memory_space<vmem>>, vector<2x1x1x32xf32>
    %406 = vector.shape_cast %405 : vector<2x1x1x32xf32> to vector<2x32xf32>
    %c0_686 = arith.constant 0 : index
    %c256_687 = arith.constant 256 : index
    %407 = vector.load %arg14[%c0_686, %c256_687] : memref<2x512xf32, #tpu.memory_space<vmem>>, vector<2x32xf32>
    tpu.vector_store %arg14[%c0_686, %c256_687], %406 {strides = array<i32>} : memref<2x512xf32, #tpu.memory_space<vmem>>, vector<2x32xf32>,
    %c0_688 = arith.constant 0 : index
    %c2_689 = arith.constant 2 : index
    %c5_690 = arith.constant 5 : index
    %c0_691 = arith.constant 0 : index
    %408 = vector.load %arg13[%c0_688, %c2_689, %c5_690, %c0_691] : memref<2x8x8x32xf32, #tpu.memory_space<vmem>>, vector<2x1x1x32xf32>
    %409 = vector.shape_cast %408 : vector<2x1x1x32xf32> to vector<2x32xf32>
    %c0_692 = arith.constant 0 : index
    %c288_693 = arith.constant 288 : index
    %410 = vector.load %arg14[%c0_692, %c288_693] : memref<2x512xf32, #tpu.memory_space<vmem>>, vector<2x32xf32>
    tpu.vector_store %arg14[%c0_692, %c288_693], %409 {strides = array<i32>} : memref<2x512xf32, #tpu.memory_space<vmem>>, vector<2x32xf32>,
    %c0_694 = arith.constant 0 : index
    %c2_695 = arith.constant 2 : index
    %c6_696 = arith.constant 6 : index
    %c0_697 = arith.constant 0 : index
    %411 = vector.load %arg13[%c0_694, %c2_695, %c6_696, %c0_697] : memref<2x8x8x32xf32, #tpu.memory_space<vmem>>, vector<2x1x1x32xf32>
    %412 = vector.shape_cast %411 : vector<2x1x1x32xf32> to vector<2x32xf32>
    %c0_698 = arith.constant 0 : index
    %c320_699 = arith.constant 320 : index
    %413 = vector.load %arg14[%c0_698, %c320_699] : memref<2x512xf32, #tpu.memory_space<vmem>>, vector<2x32xf32>
    tpu.vector_store %arg14[%c0_698, %c320_699], %412 {strides = array<i32>} : memref<2x512xf32, #tpu.memory_space<vmem>>, vector<2x32xf32>,
    %c0_700 = arith.constant 0 : index
    %c2_701 = arith.constant 2 : index
    %c7_702 = arith.constant 7 : index
    %c0_703 = arith.constant 0 : index
    %414 = vector.load %arg13[%c0_700, %c2_701, %c7_702, %c0_703] : memref<2x8x8x32xf32, #tpu.memory_space<vmem>>, vector<2x1x1x32xf32>
    %415 = vector.shape_cast %414 : vector<2x1x1x32xf32> to vector<2x32xf32>
    %c0_704 = arith.constant 0 : index
    %c352_705 = arith.constant 352 : index
    %416 = vector.load %arg14[%c0_704, %c352_705] : memref<2x512xf32, #tpu.memory_space<vmem>>, vector<2x32xf32>
    tpu.vector_store %arg14[%c0_704, %c352_705], %415 {strides = array<i32>} : memref<2x512xf32, #tpu.memory_space<vmem>>, vector<2x32xf32>,
    %c0_706 = arith.constant 0 : index
    %c3_707 = arith.constant 3 : index
    %c4_708 = arith.constant 4 : index
    %c0_709 = arith.constant 0 : index
    %417 = vector.load %arg13[%c0_706, %c3_707, %c4_708, %c0_709] : memref<2x8x8x32xf32, #tpu.memory_space<vmem>>, vector<2x1x1x32xf32>
    %418 = vector.shape_cast %417 : vector<2x1x1x32xf32> to vector<2x32xf32>
    %c0_710 = arith.constant 0 : index
    %c384_711 = arith.constant 384 : index
    %419 = vector.load %arg14[%c0_710, %c384_711] : memref<2x512xf32, #tpu.memory_space<vmem>>, vector<2x32xf32>
    tpu.vector_store %arg14[%c0_710, %c384_711], %418 {strides = array<i32>} : memref<2x512xf32, #tpu.memory_space<vmem>>, vector<2x32xf32>,
    %c0_712 = arith.constant 0 : index
    %c3_713 = arith.constant 3 : index
    %c5_714 = arith.constant 5 : index
    %c0_715 = arith.constant 0 : index
    %420 = vector.load %arg13[%c0_712, %c3_713, %c5_714, %c0_715] : memref<2x8x8x32xf32, #tpu.memory_space<vmem>>, vector<2x1x1x32xf32>
    %421 = vector.shape_cast %420 : vector<2x1x1x32xf32> to vector<2x32xf32>
    %c0_716 = arith.constant 0 : index
    %c416_717 = arith.constant 416 : index
    %422 = vector.load %arg14[%c0_716, %c416_717] : memref<2x512xf32, #tpu.memory_space<vmem>>, vector<2x32xf32>
    tpu.vector_store %arg14[%c0_716, %c416_717], %421 {strides = array<i32>} : memref<2x512xf32, #tpu.memory_space<vmem>>, vector<2x32xf32>,
    %c0_718 = arith.constant 0 : index
    %c3_719 = arith.constant 3 : index
    %c6_720 = arith.constant 6 : index
    %c0_721 = arith.constant 0 : index
    %423 = vector.load %arg13[%c0_718, %c3_719, %c6_720, %c0_721] : memref<2x8x8x32xf32, #tpu.memory_space<vmem>>, vector<2x1x1x32xf32>
    %424 = vector.shape_cast %423 : vector<2x1x1x32xf32> to vector<2x32xf32>
    %c0_722 = arith.constant 0 : index
    %c448_723 = arith.constant 448 : index
    %425 = vector.load %arg14[%c0_722, %c448_723] : memref<2x512xf32, #tpu.memory_space<vmem>>, vector<2x32xf32>
    tpu.vector_store %arg14[%c0_722, %c448_723], %424 {strides = array<i32>} : memref<2x512xf32, #tpu.memory_space<vmem>>, vector<2x32xf32>,
    %c0_724 = arith.constant 0 : index
    %c3_725 = arith.constant 3 : index
    %c7_726 = arith.constant 7 : index
    %c0_727 = arith.constant 0 : index
    %426 = vector.load %arg13[%c0_724, %c3_725, %c7_726, %c0_727] : memref<2x8x8x32xf32, #tpu.memory_space<vmem>>, vector<2x1x1x32xf32>
    %427 = vector.shape_cast %426 : vector<2x1x1x32xf32> to vector<2x32xf32>
    %c0_728 = arith.constant 0 : index
    %c480_729 = arith.constant 480 : index
    %428 = vector.load %arg14[%c0_728, %c480_729] : memref<2x512xf32, #tpu.memory_space<vmem>>, vector<2x32xf32>
    tpu.vector_store %arg14[%c0_728, %c480_729], %427 {strides = array<i32>} : memref<2x512xf32, #tpu.memory_space<vmem>>, vector<2x32xf32>,
    %c0_730 = arith.constant 0 : index
    %c0_731 = arith.constant 0 : index
    %429 = vector.load %arg14[%c0_730, %c0_731] : memref<2x512xf32, #tpu.memory_space<vmem>>, vector<2x512xf32>
    %c0_732 = arith.constant 0 : index
    %c0_733 = arith.constant 0 : index
    %430 = vector.load %arg3[%c0_732, %c0_733] : memref<512x64xf32, #tpu.memory_space<vmem>>, vector<512x64xf32>
    %cst_734 = arith.constant dense<0.000000e+00> : vector<2x64xf32>
    %431 = tpu.matmul %429, %430, %cst_734 {dimension_numbers = #tpu.dot_dimension_numbers<[1], [0], [0], [1], [0, 0, 1, 1], [], []>} : vector<2x512xf32>, vector<512x64xf32>, vector<2x64xf32> -> vector<2x64xf32>
    %432 = vector.broadcast %264 : vector<1x64xf32> to vector<2x64xf32>
    %433 = arith.addf %431, %432 : vector<2x64xf32>
    %cst_735 = arith.constant 0.000000e+00 : f32
    %434 = vector.broadcast %cst_735 : f32 to vector<2x64xf32>
    %435 = arith.maximumf %433, %434 : vector<2x64xf32>
    %c0_736 = arith.constant 0 : index
    %c0_737 = arith.constant 0 : index
    %c2_738 = arith.constant 2 : index
    %c0_739 = arith.constant 0 : index
    %436 = vector.load %arg15[%c0_736, %c0_737, %c2_738, %c0_739] : memref<2x3x3x64xf32, #tpu.memory_space<vmem>>, vector<2x1x1x64xf32>
    %437 = vector.shape_cast %436 : vector<2x1x1x64xf32> to vector<2x64xf32>
    %438 = vector.shape_cast %435 : vector<2x64xf32> to vector<2x1x1x64xf32>
    tpu.vector_store %arg15[%c0_736, %c0_737, %c2_738, %c0_739], %438 {strides = array<i32>} : memref<2x3x3x64xf32, #tpu.memory_space<vmem>>, vector<2x1x1x64xf32>,
    %c0_740 = arith.constant 0 : index
    %c2_741 = arith.constant 2 : index
    %c0_742 = arith.constant 0 : index
    %c0_743 = arith.constant 0 : index
    %439 = vector.load %arg13[%c0_740, %c2_741, %c0_742, %c0_743] : memref<2x8x8x32xf32, #tpu.memory_space<vmem>>, vector<2x1x1x32xf32>
    %440 = vector.shape_cast %439 : vector<2x1x1x32xf32> to vector<2x32xf32>
    %c0_744 = arith.constant 0 : index
    %c0_745 = arith.constant 0 : index
    %441 = vector.load %arg14[%c0_744, %c0_745] : memref<2x512xf32, #tpu.memory_space<vmem>>, vector<2x32xf32>
    tpu.vector_store %arg14[%c0_744, %c0_745], %440 {strides = array<i32>} : memref<2x512xf32, #tpu.memory_space<vmem>>, vector<2x32xf32>,
    %c0_746 = arith.constant 0 : index
    %c2_747 = arith.constant 2 : index
    %c1_748 = arith.constant 1 : index
    %c0_749 = arith.constant 0 : index
    %442 = vector.load %arg13[%c0_746, %c2_747, %c1_748, %c0_749] : memref<2x8x8x32xf32, #tpu.memory_space<vmem>>, vector<2x1x1x32xf32>
    %443 = vector.shape_cast %442 : vector<2x1x1x32xf32> to vector<2x32xf32>
    %c0_750 = arith.constant 0 : index
    %c32_751 = arith.constant 32 : index
    %444 = vector.load %arg14[%c0_750, %c32_751] : memref<2x512xf32, #tpu.memory_space<vmem>>, vector<2x32xf32>
    tpu.vector_store %arg14[%c0_750, %c32_751], %443 {strides = array<i32>} : memref<2x512xf32, #tpu.memory_space<vmem>>, vector<2x32xf32>,
    %c0_752 = arith.constant 0 : index
    %c2_753 = arith.constant 2 : index
    %c2_754 = arith.constant 2 : index
    %c0_755 = arith.constant 0 : index
    %445 = vector.load %arg13[%c0_752, %c2_753, %c2_754, %c0_755] : memref<2x8x8x32xf32, #tpu.memory_space<vmem>>, vector<2x1x1x32xf32>
    %446 = vector.shape_cast %445 : vector<2x1x1x32xf32> to vector<2x32xf32>
    %c0_756 = arith.constant 0 : index
    %c64_757 = arith.constant 64 : index
    %447 = vector.load %arg14[%c0_756, %c64_757] : memref<2x512xf32, #tpu.memory_space<vmem>>, vector<2x32xf32>
    tpu.vector_store %arg14[%c0_756, %c64_757], %446 {strides = array<i32>} : memref<2x512xf32, #tpu.memory_space<vmem>>, vector<2x32xf32>,
    %c0_758 = arith.constant 0 : index
    %c2_759 = arith.constant 2 : index
    %c3_760 = arith.constant 3 : index
    %c0_761 = arith.constant 0 : index
    %448 = vector.load %arg13[%c0_758, %c2_759, %c3_760, %c0_761] : memref<2x8x8x32xf32, #tpu.memory_space<vmem>>, vector<2x1x1x32xf32>
    %449 = vector.shape_cast %448 : vector<2x1x1x32xf32> to vector<2x32xf32>
    %c0_762 = arith.constant 0 : index
    %c96_763 = arith.constant 96 : index
    %450 = vector.load %arg14[%c0_762, %c96_763] : memref<2x512xf32, #tpu.memory_space<vmem>>, vector<2x32xf32>
    tpu.vector_store %arg14[%c0_762, %c96_763], %449 {strides = array<i32>} : memref<2x512xf32, #tpu.memory_space<vmem>>, vector<2x32xf32>,
    %c0_764 = arith.constant 0 : index
    %c3_765 = arith.constant 3 : index
    %c0_766 = arith.constant 0 : index
    %c0_767 = arith.constant 0 : index
    %451 = vector.load %arg13[%c0_764, %c3_765, %c0_766, %c0_767] : memref<2x8x8x32xf32, #tpu.memory_space<vmem>>, vector<2x1x1x32xf32>
    %452 = vector.shape_cast %451 : vector<2x1x1x32xf32> to vector<2x32xf32>
    %c0_768 = arith.constant 0 : index
    %c128_769 = arith.constant 128 : index
    %453 = vector.load %arg14[%c0_768, %c128_769] : memref<2x512xf32, #tpu.memory_space<vmem>>, vector<2x32xf32>
    tpu.vector_store %arg14[%c0_768, %c128_769], %452 {strides = array<i32>} : memref<2x512xf32, #tpu.memory_space<vmem>>, vector<2x32xf32>,
    %c0_770 = arith.constant 0 : index
    %c3_771 = arith.constant 3 : index
    %c1_772 = arith.constant 1 : index
    %c0_773 = arith.constant 0 : index
    %454 = vector.load %arg13[%c0_770, %c3_771, %c1_772, %c0_773] : memref<2x8x8x32xf32, #tpu.memory_space<vmem>>, vector<2x1x1x32xf32>
    %455 = vector.shape_cast %454 : vector<2x1x1x32xf32> to vector<2x32xf32>
    %c0_774 = arith.constant 0 : index
    %c160_775 = arith.constant 160 : index
    %456 = vector.load %arg14[%c0_774, %c160_775] : memref<2x512xf32, #tpu.memory_space<vmem>>, vector<2x32xf32>
    tpu.vector_store %arg14[%c0_774, %c160_775], %455 {strides = array<i32>} : memref<2x512xf32, #tpu.memory_space<vmem>>, vector<2x32xf32>,
    %c0_776 = arith.constant 0 : index
    %c3_777 = arith.constant 3 : index
    %c2_778 = arith.constant 2 : index
    %c0_779 = arith.constant 0 : index
    %457 = vector.load %arg13[%c0_776, %c3_777, %c2_778, %c0_779] : memref<2x8x8x32xf32, #tpu.memory_space<vmem>>, vector<2x1x1x32xf32>
    %458 = vector.shape_cast %457 : vector<2x1x1x32xf32> to vector<2x32xf32>
    %c0_780 = arith.constant 0 : index
    %c192_781 = arith.constant 192 : index
    %459 = vector.load %arg14[%c0_780, %c192_781] : memref<2x512xf32, #tpu.memory_space<vmem>>, vector<2x32xf32>
    tpu.vector_store %arg14[%c0_780, %c192_781], %458 {strides = array<i32>} : memref<2x512xf32, #tpu.memory_space<vmem>>, vector<2x32xf32>,
    %c0_782 = arith.constant 0 : index
    %c3_783 = arith.constant 3 : index
    %c3_784 = arith.constant 3 : index
    %c0_785 = arith.constant 0 : index
    %460 = vector.load %arg13[%c0_782, %c3_783, %c3_784, %c0_785] : memref<2x8x8x32xf32, #tpu.memory_space<vmem>>, vector<2x1x1x32xf32>
    %461 = vector.shape_cast %460 : vector<2x1x1x32xf32> to vector<2x32xf32>
    %c0_786 = arith.constant 0 : index
    %c224_787 = arith.constant 224 : index
    %462 = vector.load %arg14[%c0_786, %c224_787] : memref<2x512xf32, #tpu.memory_space<vmem>>, vector<2x32xf32>
    tpu.vector_store %arg14[%c0_786, %c224_787], %461 {strides = array<i32>} : memref<2x512xf32, #tpu.memory_space<vmem>>, vector<2x32xf32>,
    %c0_788 = arith.constant 0 : index
    %c4_789 = arith.constant 4 : index
    %c0_790 = arith.constant 0 : index
    %c0_791 = arith.constant 0 : index
    %463 = vector.load %arg13[%c0_788, %c4_789, %c0_790, %c0_791] : memref<2x8x8x32xf32, #tpu.memory_space<vmem>>, vector<2x1x1x32xf32>
    %464 = vector.shape_cast %463 : vector<2x1x1x32xf32> to vector<2x32xf32>
    %c0_792 = arith.constant 0 : index
    %c256_793 = arith.constant 256 : index
    %465 = vector.load %arg14[%c0_792, %c256_793] : memref<2x512xf32, #tpu.memory_space<vmem>>, vector<2x32xf32>
    tpu.vector_store %arg14[%c0_792, %c256_793], %464 {strides = array<i32>} : memref<2x512xf32, #tpu.memory_space<vmem>>, vector<2x32xf32>,
    %c0_794 = arith.constant 0 : index
    %c4_795 = arith.constant 4 : index
    %c1_796 = arith.constant 1 : index
    %c0_797 = arith.constant 0 : index
    %466 = vector.load %arg13[%c0_794, %c4_795, %c1_796, %c0_797] : memref<2x8x8x32xf32, #tpu.memory_space<vmem>>, vector<2x1x1x32xf32>
    %467 = vector.shape_cast %466 : vector<2x1x1x32xf32> to vector<2x32xf32>
    %c0_798 = arith.constant 0 : index
    %c288_799 = arith.constant 288 : index
    %468 = vector.load %arg14[%c0_798, %c288_799] : memref<2x512xf32, #tpu.memory_space<vmem>>, vector<2x32xf32>
    tpu.vector_store %arg14[%c0_798, %c288_799], %467 {strides = array<i32>} : memref<2x512xf32, #tpu.memory_space<vmem>>, vector<2x32xf32>,
    %c0_800 = arith.constant 0 : index
    %c4_801 = arith.constant 4 : index
    %c2_802 = arith.constant 2 : index
    %c0_803 = arith.constant 0 : index
    %469 = vector.load %arg13[%c0_800, %c4_801, %c2_802, %c0_803] : memref<2x8x8x32xf32, #tpu.memory_space<vmem>>, vector<2x1x1x32xf32>
    %470 = vector.shape_cast %469 : vector<2x1x1x32xf32> to vector<2x32xf32>
    %c0_804 = arith.constant 0 : index
    %c320_805 = arith.constant 320 : index
    %471 = vector.load %arg14[%c0_804, %c320_805] : memref<2x512xf32, #tpu.memory_space<vmem>>, vector<2x32xf32>
    tpu.vector_store %arg14[%c0_804, %c320_805], %470 {strides = array<i32>} : memref<2x512xf32, #tpu.memory_space<vmem>>, vector<2x32xf32>,
    %c0_806 = arith.constant 0 : index
    %c4_807 = arith.constant 4 : index
    %c3_808 = arith.constant 3 : index
    %c0_809 = arith.constant 0 : index
    %472 = vector.load %arg13[%c0_806, %c4_807, %c3_808, %c0_809] : memref<2x8x8x32xf32, #tpu.memory_space<vmem>>, vector<2x1x1x32xf32>
    %473 = vector.shape_cast %472 : vector<2x1x1x32xf32> to vector<2x32xf32>
    %c0_810 = arith.constant 0 : index
    %c352_811 = arith.constant 352 : index
    %474 = vector.load %arg14[%c0_810, %c352_811] : memref<2x512xf32, #tpu.memory_space<vmem>>, vector<2x32xf32>
    tpu.vector_store %arg14[%c0_810, %c352_811], %473 {strides = array<i32>} : memref<2x512xf32, #tpu.memory_space<vmem>>, vector<2x32xf32>,
    %c0_812 = arith.constant 0 : index
    %c5_813 = arith.constant 5 : index
    %c0_814 = arith.constant 0 : index
    %c0_815 = arith.constant 0 : index
    %475 = vector.load %arg13[%c0_812, %c5_813, %c0_814, %c0_815] : memref<2x8x8x32xf32, #tpu.memory_space<vmem>>, vector<2x1x1x32xf32>
    %476 = vector.shape_cast %475 : vector<2x1x1x32xf32> to vector<2x32xf32>
    %c0_816 = arith.constant 0 : index
    %c384_817 = arith.constant 384 : index
    %477 = vector.load %arg14[%c0_816, %c384_817] : memref<2x512xf32, #tpu.memory_space<vmem>>, vector<2x32xf32>
    tpu.vector_store %arg14[%c0_816, %c384_817], %476 {strides = array<i32>} : memref<2x512xf32, #tpu.memory_space<vmem>>, vector<2x32xf32>,
    %c0_818 = arith.constant 0 : index
    %c5_819 = arith.constant 5 : index
    %c1_820 = arith.constant 1 : index
    %c0_821 = arith.constant 0 : index
    %478 = vector.load %arg13[%c0_818, %c5_819, %c1_820, %c0_821] : memref<2x8x8x32xf32, #tpu.memory_space<vmem>>, vector<2x1x1x32xf32>
    %479 = vector.shape_cast %478 : vector<2x1x1x32xf32> to vector<2x32xf32>
    %c0_822 = arith.constant 0 : index
    %c416_823 = arith.constant 416 : index
    %480 = vector.load %arg14[%c0_822, %c416_823] : memref<2x512xf32, #tpu.memory_space<vmem>>, vector<2x32xf32>
    tpu.vector_store %arg14[%c0_822, %c416_823], %479 {strides = array<i32>} : memref<2x512xf32, #tpu.memory_space<vmem>>, vector<2x32xf32>,
    %c0_824 = arith.constant 0 : index
    %c5_825 = arith.constant 5 : index
    %c2_826 = arith.constant 2 : index
    %c0_827 = arith.constant 0 : index
    %481 = vector.load %arg13[%c0_824, %c5_825, %c2_826, %c0_827] : memref<2x8x8x32xf32, #tpu.memory_space<vmem>>, vector<2x1x1x32xf32>
    %482 = vector.shape_cast %481 : vector<2x1x1x32xf32> to vector<2x32xf32>
    %c0_828 = arith.constant 0 : index
    %c448_829 = arith.constant 448 : index
    %483 = vector.load %arg14[%c0_828, %c448_829] : memref<2x512xf32, #tpu.memory_space<vmem>>, vector<2x32xf32>
    tpu.vector_store %arg14[%c0_828, %c448_829], %482 {strides = array<i32>} : memref<2x512xf32, #tpu.memory_space<vmem>>, vector<2x32xf32>,
    %c0_830 = arith.constant 0 : index
    %c5_831 = arith.constant 5 : index
    %c3_832 = arith.constant 3 : index
    %c0_833 = arith.constant 0 : index
    %484 = vector.load %arg13[%c0_830, %c5_831, %c3_832, %c0_833] : memref<2x8x8x32xf32, #tpu.memory_space<vmem>>, vector<2x1x1x32xf32>
    %485 = vector.shape_cast %484 : vector<2x1x1x32xf32> to vector<2x32xf32>
    %c0_834 = arith.constant 0 : index
    %c480_835 = arith.constant 480 : index
    %486 = vector.load %arg14[%c0_834, %c480_835] : memref<2x512xf32, #tpu.memory_space<vmem>>, vector<2x32xf32>
    tpu.vector_store %arg14[%c0_834, %c480_835], %485 {strides = array<i32>} : memref<2x512xf32, #tpu.memory_space<vmem>>, vector<2x32xf32>,
    %c0_836 = arith.constant 0 : index
    %c0_837 = arith.constant 0 : index
    %487 = vector.load %arg14[%c0_836, %c0_837] : memref<2x512xf32, #tpu.memory_space<vmem>>, vector<2x512xf32>
    %c0_838 = arith.constant 0 : index
    %c0_839 = arith.constant 0 : index
    %488 = vector.load %arg3[%c0_838, %c0_839] : memref<512x64xf32, #tpu.memory_space<vmem>>, vector<512x64xf32>
    %cst_840 = arith.constant dense<0.000000e+00> : vector<2x64xf32>
    %489 = tpu.matmul %487, %488, %cst_840 {dimension_numbers = #tpu.dot_dimension_numbers<[1], [0], [0], [1], [0, 0, 1, 1], [], []>} : vector<2x512xf32>, vector<512x64xf32>, vector<2x64xf32> -> vector<2x64xf32>
    %490 = vector.broadcast %264 : vector<1x64xf32> to vector<2x64xf32>
    %491 = arith.addf %489, %490 : vector<2x64xf32>
    %cst_841 = arith.constant 0.000000e+00 : f32
    %492 = vector.broadcast %cst_841 : f32 to vector<2x64xf32>
    %493 = arith.maximumf %491, %492 : vector<2x64xf32>
    %c0_842 = arith.constant 0 : index
    %c1_843 = arith.constant 1 : index
    %c0_844 = arith.constant 0 : index
    %c0_845 = arith.constant 0 : index
    %494 = vector.load %arg15[%c0_842, %c1_843, %c0_844, %c0_845] : memref<2x3x3x64xf32, #tpu.memory_space<vmem>>, vector<2x1x1x64xf32>
    %495 = vector.shape_cast %494 : vector<2x1x1x64xf32> to vector<2x64xf32>
    %496 = vector.shape_cast %493 : vector<2x64xf32> to vector<2x1x1x64xf32>
    tpu.vector_store %arg15[%c0_842, %c1_843, %c0_844, %c0_845], %496 {strides = array<i32>} : memref<2x3x3x64xf32, #tpu.memory_space<vmem>>, vector<2x1x1x64xf32>,
    %c0_846 = arith.constant 0 : index
    %c2_847 = arith.constant 2 : index
    %c2_848 = arith.constant 2 : index
    %c0_849 = arith.constant 0 : index
    %497 = vector.load %arg13[%c0_846, %c2_847, %c2_848, %c0_849] : memref<2x8x8x32xf32, #tpu.memory_space<vmem>>, vector<2x1x1x32xf32>
    %498 = vector.shape_cast %497 : vector<2x1x1x32xf32> to vector<2x32xf32>
    %c0_850 = arith.constant 0 : index
    %c0_851 = arith.constant 0 : index
    %499 = vector.load %arg14[%c0_850, %c0_851] : memref<2x512xf32, #tpu.memory_space<vmem>>, vector<2x32xf32>
    tpu.vector_store %arg14[%c0_850, %c0_851], %498 {strides = array<i32>} : memref<2x512xf32, #tpu.memory_space<vmem>>, vector<2x32xf32>,
    %c0_852 = arith.constant 0 : index
    %c2_853 = arith.constant 2 : index
    %c3_854 = arith.constant 3 : index
    %c0_855 = arith.constant 0 : index
    %500 = vector.load %arg13[%c0_852, %c2_853, %c3_854, %c0_855] : memref<2x8x8x32xf32, #tpu.memory_space<vmem>>, vector<2x1x1x32xf32>
    %501 = vector.shape_cast %500 : vector<2x1x1x32xf32> to vector<2x32xf32>
    %c0_856 = arith.constant 0 : index
    %c32_857 = arith.constant 32 : index
    %502 = vector.load %arg14[%c0_856, %c32_857] : memref<2x512xf32, #tpu.memory_space<vmem>>, vector<2x32xf32>
    tpu.vector_store %arg14[%c0_856, %c32_857], %501 {strides = array<i32>} : memref<2x512xf32, #tpu.memory_space<vmem>>, vector<2x32xf32>,
    %c0_858 = arith.constant 0 : index
    %c2_859 = arith.constant 2 : index
    %c4_860 = arith.constant 4 : index
    %c0_861 = arith.constant 0 : index
    %503 = vector.load %arg13[%c0_858, %c2_859, %c4_860, %c0_861] : memref<2x8x8x32xf32, #tpu.memory_space<vmem>>, vector<2x1x1x32xf32>
    %504 = vector.shape_cast %503 : vector<2x1x1x32xf32> to vector<2x32xf32>
    %c0_862 = arith.constant 0 : index
    %c64_863 = arith.constant 64 : index
    %505 = vector.load %arg14[%c0_862, %c64_863] : memref<2x512xf32, #tpu.memory_space<vmem>>, vector<2x32xf32>
    tpu.vector_store %arg14[%c0_862, %c64_863], %504 {strides = array<i32>} : memref<2x512xf32, #tpu.memory_space<vmem>>, vector<2x32xf32>,
    %c0_864 = arith.constant 0 : index
    %c2_865 = arith.constant 2 : index
    %c5_866 = arith.constant 5 : index
    %c0_867 = arith.constant 0 : index
    %506 = vector.load %arg13[%c0_864, %c2_865, %c5_866, %c0_867] : memref<2x8x8x32xf32, #tpu.memory_space<vmem>>, vector<2x1x1x32xf32>
    %507 = vector.shape_cast %506 : vector<2x1x1x32xf32> to vector<2x32xf32>
    %c0_868 = arith.constant 0 : index
    %c96_869 = arith.constant 96 : index
    %508 = vector.load %arg14[%c0_868, %c96_869] : memref<2x512xf32, #tpu.memory_space<vmem>>, vector<2x32xf32>
    tpu.vector_store %arg14[%c0_868, %c96_869], %507 {strides = array<i32>} : memref<2x512xf32, #tpu.memory_space<vmem>>, vector<2x32xf32>,
    %c0_870 = arith.constant 0 : index
    %c3_871 = arith.constant 3 : index
    %c2_872 = arith.constant 2 : index
    %c0_873 = arith.constant 0 : index
    %509 = vector.load %arg13[%c0_870, %c3_871, %c2_872, %c0_873] : memref<2x8x8x32xf32, #tpu.memory_space<vmem>>, vector<2x1x1x32xf32>
    %510 = vector.shape_cast %509 : vector<2x1x1x32xf32> to vector<2x32xf32>
    %c0_874 = arith.constant 0 : index
    %c128_875 = arith.constant 128 : index
    %511 = vector.load %arg14[%c0_874, %c128_875] : memref<2x512xf32, #tpu.memory_space<vmem>>, vector<2x32xf32>
    tpu.vector_store %arg14[%c0_874, %c128_875], %510 {strides = array<i32>} : memref<2x512xf32, #tpu.memory_space<vmem>>, vector<2x32xf32>,
    %c0_876 = arith.constant 0 : index
    %c3_877 = arith.constant 3 : index
    %c3_878 = arith.constant 3 : index
    %c0_879 = arith.constant 0 : index
    %512 = vector.load %arg13[%c0_876, %c3_877, %c3_878, %c0_879] : memref<2x8x8x32xf32, #tpu.memory_space<vmem>>, vector<2x1x1x32xf32>
    %513 = vector.shape_cast %512 : vector<2x1x1x32xf32> to vector<2x32xf32>
    %c0_880 = arith.constant 0 : index
    %c160_881 = arith.constant 160 : index
    %514 = vector.load %arg14[%c0_880, %c160_881] : memref<2x512xf32, #tpu.memory_space<vmem>>, vector<2x32xf32>
    tpu.vector_store %arg14[%c0_880, %c160_881], %513 {strides = array<i32>} : memref<2x512xf32, #tpu.memory_space<vmem>>, vector<2x32xf32>,
    %c0_882 = arith.constant 0 : index
    %c3_883 = arith.constant 3 : index
    %c4_884 = arith.constant 4 : index
    %c0_885 = arith.constant 0 : index
    %515 = vector.load %arg13[%c0_882, %c3_883, %c4_884, %c0_885] : memref<2x8x8x32xf32, #tpu.memory_space<vmem>>, vector<2x1x1x32xf32>
    %516 = vector.shape_cast %515 : vector<2x1x1x32xf32> to vector<2x32xf32>
    %c0_886 = arith.constant 0 : index
    %c192_887 = arith.constant 192 : index
    %517 = vector.load %arg14[%c0_886, %c192_887] : memref<2x512xf32, #tpu.memory_space<vmem>>, vector<2x32xf32>
    tpu.vector_store %arg14[%c0_886, %c192_887], %516 {strides = array<i32>} : memref<2x512xf32, #tpu.memory_space<vmem>>, vector<2x32xf32>,
    %c0_888 = arith.constant 0 : index
    %c3_889 = arith.constant 3 : index
    %c5_890 = arith.constant 5 : index
    %c0_891 = arith.constant 0 : index
    %518 = vector.load %arg13[%c0_888, %c3_889, %c5_890, %c0_891] : memref<2x8x8x32xf32, #tpu.memory_space<vmem>>, vector<2x1x1x32xf32>
    %519 = vector.shape_cast %518 : vector<2x1x1x32xf32> to vector<2x32xf32>
    %c0_892 = arith.constant 0 : index
    %c224_893 = arith.constant 224 : index
    %520 = vector.load %arg14[%c0_892, %c224_893] : memref<2x512xf32, #tpu.memory_space<vmem>>, vector<2x32xf32>
    tpu.vector_store %arg14[%c0_892, %c224_893], %519 {strides = array<i32>} : memref<2x512xf32, #tpu.memory_space<vmem>>, vector<2x32xf32>,
    %c0_894 = arith.constant 0 : index
    %c4_895 = arith.constant 4 : index
    %c2_896 = arith.constant 2 : index
    %c0_897 = arith.constant 0 : index
    %521 = vector.load %arg13[%c0_894, %c4_895, %c2_896, %c0_897] : memref<2x8x8x32xf32, #tpu.memory_space<vmem>>, vector<2x1x1x32xf32>
    %522 = vector.shape_cast %521 : vector<2x1x1x32xf32> to vector<2x32xf32>
    %c0_898 = arith.constant 0 : index
    %c256_899 = arith.constant 256 : index
    %523 = vector.load %arg14[%c0_898, %c256_899] : memref<2x512xf32, #tpu.memory_space<vmem>>, vector<2x32xf32>
    tpu.vector_store %arg14[%c0_898, %c256_899], %522 {strides = array<i32>} : memref<2x512xf32, #tpu.memory_space<vmem>>, vector<2x32xf32>,
    %c0_900 = arith.constant 0 : index
    %c4_901 = arith.constant 4 : index
    %c3_902 = arith.constant 3 : index
    %c0_903 = arith.constant 0 : index
    %524 = vector.load %arg13[%c0_900, %c4_901, %c3_902, %c0_903] : memref<2x8x8x32xf32, #tpu.memory_space<vmem>>, vector<2x1x1x32xf32>
    %525 = vector.shape_cast %524 : vector<2x1x1x32xf32> to vector<2x32xf32>
    %c0_904 = arith.constant 0 : index
    %c288_905 = arith.constant 288 : index
    %526 = vector.load %arg14[%c0_904, %c288_905] : memref<2x512xf32, #tpu.memory_space<vmem>>, vector<2x32xf32>
    tpu.vector_store %arg14[%c0_904, %c288_905], %525 {strides = array<i32>} : memref<2x512xf32, #tpu.memory_space<vmem>>, vector<2x32xf32>,
    %c0_906 = arith.constant 0 : index
    %c4_907 = arith.constant 4 : index
    %c4_908 = arith.constant 4 : index
    %c0_909 = arith.constant 0 : index
    %527 = vector.load %arg13[%c0_906, %c4_907, %c4_908, %c0_909] : memref<2x8x8x32xf32, #tpu.memory_space<vmem>>, vector<2x1x1x32xf32>
    %528 = vector.shape_cast %527 : vector<2x1x1x32xf32> to vector<2x32xf32>
    %c0_910 = arith.constant 0 : index
    %c320_911 = arith.constant 320 : index
    %529 = vector.load %arg14[%c0_910, %c320_911] : memref<2x512xf32, #tpu.memory_space<vmem>>, vector<2x32xf32>
    tpu.vector_store %arg14[%c0_910, %c320_911], %528 {strides = array<i32>} : memref<2x512xf32, #tpu.memory_space<vmem>>, vector<2x32xf32>,
    %c0_912 = arith.constant 0 : index
    %c4_913 = arith.constant 4 : index
    %c5_914 = arith.constant 5 : index
    %c0_915 = arith.constant 0 : index
    %530 = vector.load %arg13[%c0_912, %c4_913, %c5_914, %c0_915] : memref<2x8x8x32xf32, #tpu.memory_space<vmem>>, vector<2x1x1x32xf32>
    %531 = vector.shape_cast %530 : vector<2x1x1x32xf32> to vector<2x32xf32>
    %c0_916 = arith.constant 0 : index
    %c352_917 = arith.constant 352 : index
    %532 = vector.load %arg14[%c0_916, %c352_917] : memref<2x512xf32, #tpu.memory_space<vmem>>, vector<2x32xf32>
    tpu.vector_store %arg14[%c0_916, %c352_917], %531 {strides = array<i32>} : memref<2x512xf32, #tpu.memory_space<vmem>>, vector<2x32xf32>,
    %c0_918 = arith.constant 0 : index
    %c5_919 = arith.constant 5 : index
    %c2_920 = arith.constant 2 : index
    %c0_921 = arith.constant 0 : index
    %533 = vector.load %arg13[%c0_918, %c5_919, %c2_920, %c0_921] : memref<2x8x8x32xf32, #tpu.memory_space<vmem>>, vector<2x1x1x32xf32>
    %534 = vector.shape_cast %533 : vector<2x1x1x32xf32> to vector<2x32xf32>
    %c0_922 = arith.constant 0 : index
    %c384_923 = arith.constant 384 : index
    %535 = vector.load %arg14[%c0_922, %c384_923] : memref<2x512xf32, #tpu.memory_space<vmem>>, vector<2x32xf32>
    tpu.vector_store %arg14[%c0_922, %c384_923], %534 {strides = array<i32>} : memref<2x512xf32, #tpu.memory_space<vmem>>, vector<2x32xf32>,
    %c0_924 = arith.constant 0 : index
    %c5_925 = arith.constant 5 : index
    %c3_926 = arith.constant 3 : index
    %c0_927 = arith.constant 0 : index
    %536 = vector.load %arg13[%c0_924, %c5_925, %c3_926, %c0_927] : memref<2x8x8x32xf32, #tpu.memory_space<vmem>>, vector<2x1x1x32xf32>
    %537 = vector.shape_cast %536 : vector<2x1x1x32xf32> to vector<2x32xf32>
    %c0_928 = arith.constant 0 : index
    %c416_929 = arith.constant 416 : index
    %538 = vector.load %arg14[%c0_928, %c416_929] : memref<2x512xf32, #tpu.memory_space<vmem>>, vector<2x32xf32>
    tpu.vector_store %arg14[%c0_928, %c416_929], %537 {strides = array<i32>} : memref<2x512xf32, #tpu.memory_space<vmem>>, vector<2x32xf32>,
    %c0_930 = arith.constant 0 : index
    %c5_931 = arith.constant 5 : index
    %c4_932 = arith.constant 4 : index
    %c0_933 = arith.constant 0 : index
    %539 = vector.load %arg13[%c0_930, %c5_931, %c4_932, %c0_933] : memref<2x8x8x32xf32, #tpu.memory_space<vmem>>, vector<2x1x1x32xf32>
    %540 = vector.shape_cast %539 : vector<2x1x1x32xf32> to vector<2x32xf32>
    %c0_934 = arith.constant 0 : index
    %c448_935 = arith.constant 448 : index
    %541 = vector.load %arg14[%c0_934, %c448_935] : memref<2x512xf32, #tpu.memory_space<vmem>>, vector<2x32xf32>
    tpu.vector_store %arg14[%c0_934, %c448_935], %540 {strides = array<i32>} : memref<2x512xf32, #tpu.memory_space<vmem>>, vector<2x32xf32>,
    %c0_936 = arith.constant 0 : index
    %c5_937 = arith.constant 5 : index
    %c5_938 = arith.constant 5 : index
    %c0_939 = arith.constant 0 : index
    %542 = vector.load %arg13[%c0_936, %c5_937, %c5_938, %c0_939] : memref<2x8x8x32xf32, #tpu.memory_space<vmem>>, vector<2x1x1x32xf32>
    %543 = vector.shape_cast %542 : vector<2x1x1x32xf32> to vector<2x32xf32>
    %c0_940 = arith.constant 0 : index
    %c480_941 = arith.constant 480 : index
    %544 = vector.load %arg14[%c0_940, %c480_941] : memref<2x512xf32, #tpu.memory_space<vmem>>, vector<2x32xf32>
    tpu.vector_store %arg14[%c0_940, %c480_941], %543 {strides = array<i32>} : memref<2x512xf32, #tpu.memory_space<vmem>>, vector<2x32xf32>,
    %c0_942 = arith.constant 0 : index
    %c0_943 = arith.constant 0 : index
    %545 = vector.load %arg14[%c0_942, %c0_943] : memref<2x512xf32, #tpu.memory_space<vmem>>, vector<2x512xf32>
    %c0_944 = arith.constant 0 : index
    %c0_945 = arith.constant 0 : index
    %546 = vector.load %arg3[%c0_944, %c0_945] : memref<512x64xf32, #tpu.memory_space<vmem>>, vector<512x64xf32>
    %cst_946 = arith.constant dense<0.000000e+00> : vector<2x64xf32>
    %547 = tpu.matmul %545, %546, %cst_946 {dimension_numbers = #tpu.dot_dimension_numbers<[1], [0], [0], [1], [0, 0, 1, 1], [], []>} : vector<2x512xf32>, vector<512x64xf32>, vector<2x64xf32> -> vector<2x64xf32>
    %548 = vector.broadcast %264 : vector<1x64xf32> to vector<2x64xf32>
    %549 = arith.addf %547, %548 : vector<2x64xf32>
    %cst_947 = arith.constant 0.000000e+00 : f32
    %550 = vector.broadcast %cst_947 : f32 to vector<2x64xf32>
    %551 = arith.maximumf %549, %550 : vector<2x64xf32>
    %c0_948 = arith.constant 0 : index
    %c1_949 = arith.constant 1 : index
    %c1_950 = arith.constant 1 : index
    %c0_951 = arith.constant 0 : index
    %552 = vector.load %arg15[%c0_948, %c1_949, %c1_950, %c0_951] : memref<2x3x3x64xf32, #tpu.memory_space<vmem>>, vector<2x1x1x64xf32>
    %553 = vector.shape_cast %552 : vector<2x1x1x64xf32> to vector<2x64xf32>
    %554 = vector.shape_cast %551 : vector<2x64xf32> to vector<2x1x1x64xf32>
    tpu.vector_store %arg15[%c0_948, %c1_949, %c1_950, %c0_951], %554 {strides = array<i32>} : memref<2x3x3x64xf32, #tpu.memory_space<vmem>>, vector<2x1x1x64xf32>,
    %c0_952 = arith.constant 0 : index
    %c2_953 = arith.constant 2 : index
    %c4_954 = arith.constant 4 : index
    %c0_955 = arith.constant 0 : index
    %555 = vector.load %arg13[%c0_952, %c2_953, %c4_954, %c0_955] : memref<2x8x8x32xf32, #tpu.memory_space<vmem>>, vector<2x1x1x32xf32>
    %556 = vector.shape_cast %555 : vector<2x1x1x32xf32> to vector<2x32xf32>
    %c0_956 = arith.constant 0 : index
    %c0_957 = arith.constant 0 : index
    %557 = vector.load %arg14[%c0_956, %c0_957] : memref<2x512xf32, #tpu.memory_space<vmem>>, vector<2x32xf32>
    tpu.vector_store %arg14[%c0_956, %c0_957], %556 {strides = array<i32>} : memref<2x512xf32, #tpu.memory_space<vmem>>, vector<2x32xf32>,
    %c0_958 = arith.constant 0 : index
    %c2_959 = arith.constant 2 : index
    %c5_960 = arith.constant 5 : index
    %c0_961 = arith.constant 0 : index
    %558 = vector.load %arg13[%c0_958, %c2_959, %c5_960, %c0_961] : memref<2x8x8x32xf32, #tpu.memory_space<vmem>>, vector<2x1x1x32xf32>
    %559 = vector.shape_cast %558 : vector<2x1x1x32xf32> to vector<2x32xf32>
    %c0_962 = arith.constant 0 : index
    %c32_963 = arith.constant 32 : index
    %560 = vector.load %arg14[%c0_962, %c32_963] : memref<2x512xf32, #tpu.memory_space<vmem>>, vector<2x32xf32>
    tpu.vector_store %arg14[%c0_962, %c32_963], %559 {strides = array<i32>} : memref<2x512xf32, #tpu.memory_space<vmem>>, vector<2x32xf32>,
    %c0_964 = arith.constant 0 : index
    %c2_965 = arith.constant 2 : index
    %c6_966 = arith.constant 6 : index
    %c0_967 = arith.constant 0 : index
    %561 = vector.load %arg13[%c0_964, %c2_965, %c6_966, %c0_967] : memref<2x8x8x32xf32, #tpu.memory_space<vmem>>, vector<2x1x1x32xf32>
    %562 = vector.shape_cast %561 : vector<2x1x1x32xf32> to vector<2x32xf32>
    %c0_968 = arith.constant 0 : index
    %c64_969 = arith.constant 64 : index
    %563 = vector.load %arg14[%c0_968, %c64_969] : memref<2x512xf32, #tpu.memory_space<vmem>>, vector<2x32xf32>
    tpu.vector_store %arg14[%c0_968, %c64_969], %562 {strides = array<i32>} : memref<2x512xf32, #tpu.memory_space<vmem>>, vector<2x32xf32>,
    %c0_970 = arith.constant 0 : index
    %c2_971 = arith.constant 2 : index
    %c7_972 = arith.constant 7 : index
    %c0_973 = arith.constant 0 : index
    %564 = vector.load %arg13[%c0_970, %c2_971, %c7_972, %c0_973] : memref<2x8x8x32xf32, #tpu.memory_space<vmem>>, vector<2x1x1x32xf32>
    %565 = vector.shape_cast %564 : vector<2x1x1x32xf32> to vector<2x32xf32>
    %c0_974 = arith.constant 0 : index
    %c96_975 = arith.constant 96 : index
    %566 = vector.load %arg14[%c0_974, %c96_975] : memref<2x512xf32, #tpu.memory_space<vmem>>, vector<2x32xf32>
    tpu.vector_store %arg14[%c0_974, %c96_975], %565 {strides = array<i32>} : memref<2x512xf32, #tpu.memory_space<vmem>>, vector<2x32xf32>,
    %c0_976 = arith.constant 0 : index
    %c3_977 = arith.constant 3 : index
    %c4_978 = arith.constant 4 : index
    %c0_979 = arith.constant 0 : index
    %567 = vector.load %arg13[%c0_976, %c3_977, %c4_978, %c0_979] : memref<2x8x8x32xf32, #tpu.memory_space<vmem>>, vector<2x1x1x32xf32>
    %568 = vector.shape_cast %567 : vector<2x1x1x32xf32> to vector<2x32xf32>
    %c0_980 = arith.constant 0 : index
    %c128_981 = arith.constant 128 : index
    %569 = vector.load %arg14[%c0_980, %c128_981] : memref<2x512xf32, #tpu.memory_space<vmem>>, vector<2x32xf32>
    tpu.vector_store %arg14[%c0_980, %c128_981], %568 {strides = array<i32>} : memref<2x512xf32, #tpu.memory_space<vmem>>, vector<2x32xf32>,
    %c0_982 = arith.constant 0 : index
    %c3_983 = arith.constant 3 : index
    %c5_984 = arith.constant 5 : index
    %c0_985 = arith.constant 0 : index
    %570 = vector.load %arg13[%c0_982, %c3_983, %c5_984, %c0_985] : memref<2x8x8x32xf32, #tpu.memory_space<vmem>>, vector<2x1x1x32xf32>
    %571 = vector.shape_cast %570 : vector<2x1x1x32xf32> to vector<2x32xf32>
    %c0_986 = arith.constant 0 : index
    %c160_987 = arith.constant 160 : index
    %572 = vector.load %arg14[%c0_986, %c160_987] : memref<2x512xf32, #tpu.memory_space<vmem>>, vector<2x32xf32>
    tpu.vector_store %arg14[%c0_986, %c160_987], %571 {strides = array<i32>} : memref<2x512xf32, #tpu.memory_space<vmem>>, vector<2x32xf32>,
    %c0_988 = arith.constant 0 : index
    %c3_989 = arith.constant 3 : index
    %c6_990 = arith.constant 6 : index
    %c0_991 = arith.constant 0 : index
    %573 = vector.load %arg13[%c0_988, %c3_989, %c6_990, %c0_991] : memref<2x8x8x32xf32, #tpu.memory_space<vmem>>, vector<2x1x1x32xf32>
    %574 = vector.shape_cast %573 : vector<2x1x1x32xf32> to vector<2x32xf32>
    %c0_992 = arith.constant 0 : index
    %c192_993 = arith.constant 192 : index
    %575 = vector.load %arg14[%c0_992, %c192_993] : memref<2x512xf32, #tpu.memory_space<vmem>>, vector<2x32xf32>
    tpu.vector_store %arg14[%c0_992, %c192_993], %574 {strides = array<i32>} : memref<2x512xf32, #tpu.memory_space<vmem>>, vector<2x32xf32>,
    %c0_994 = arith.constant 0 : index
    %c3_995 = arith.constant 3 : index
    %c7_996 = arith.constant 7 : index
    %c0_997 = arith.constant 0 : index
    %576 = vector.load %arg13[%c0_994, %c3_995, %c7_996, %c0_997] : memref<2x8x8x32xf32, #tpu.memory_space<vmem>>, vector<2x1x1x32xf32>
    %577 = vector.shape_cast %576 : vector<2x1x1x32xf32> to vector<2x32xf32>
    %c0_998 = arith.constant 0 : index
    %c224_999 = arith.constant 224 : index
    %578 = vector.load %arg14[%c0_998, %c224_999] : memref<2x512xf32, #tpu.memory_space<vmem>>, vector<2x32xf32>
    tpu.vector_store %arg14[%c0_998, %c224_999], %577 {strides = array<i32>} : memref<2x512xf32, #tpu.memory_space<vmem>>, vector<2x32xf32>,
    %c0_1000 = arith.constant 0 : index
    %c4_1001 = arith.constant 4 : index
    %c4_1002 = arith.constant 4 : index
    %c0_1003 = arith.constant 0 : index
    %579 = vector.load %arg13[%c0_1000, %c4_1001, %c4_1002, %c0_1003] : memref<2x8x8x32xf32, #tpu.memory_space<vmem>>, vector<2x1x1x32xf32>
    %580 = vector.shape_cast %579 : vector<2x1x1x32xf32> to vector<2x32xf32>
    %c0_1004 = arith.constant 0 : index
    %c256_1005 = arith.constant 256 : index
    %581 = vector.load %arg14[%c0_1004, %c256_1005] : memref<2x512xf32, #tpu.memory_space<vmem>>, vector<2x32xf32>
    tpu.vector_store %arg14[%c0_1004, %c256_1005], %580 {strides = array<i32>} : memref<2x512xf32, #tpu.memory_space<vmem>>, vector<2x32xf32>,
    %c0_1006 = arith.constant 0 : index
    %c4_1007 = arith.constant 4 : index
    %c5_1008 = arith.constant 5 : index
    %c0_1009 = arith.constant 0 : index
    %582 = vector.load %arg13[%c0_1006, %c4_1007, %c5_1008, %c0_1009] : memref<2x8x8x32xf32, #tpu.memory_space<vmem>>, vector<2x1x1x32xf32>
    %583 = vector.shape_cast %582 : vector<2x1x1x32xf32> to vector<2x32xf32>
    %c0_1010 = arith.constant 0 : index
    %c288_1011 = arith.constant 288 : index
    %584 = vector.load %arg14[%c0_1010, %c288_1011] : memref<2x512xf32, #tpu.memory_space<vmem>>, vector<2x32xf32>
    tpu.vector_store %arg14[%c0_1010, %c288_1011], %583 {strides = array<i32>} : memref<2x512xf32, #tpu.memory_space<vmem>>, vector<2x32xf32>,
    %c0_1012 = arith.constant 0 : index
    %c4_1013 = arith.constant 4 : index
    %c6_1014 = arith.constant 6 : index
    %c0_1015 = arith.constant 0 : index
    %585 = vector.load %arg13[%c0_1012, %c4_1013, %c6_1014, %c0_1015] : memref<2x8x8x32xf32, #tpu.memory_space<vmem>>, vector<2x1x1x32xf32>
    %586 = vector.shape_cast %585 : vector<2x1x1x32xf32> to vector<2x32xf32>
    %c0_1016 = arith.constant 0 : index
    %c320_1017 = arith.constant 320 : index
    %587 = vector.load %arg14[%c0_1016, %c320_1017] : memref<2x512xf32, #tpu.memory_space<vmem>>, vector<2x32xf32>
    tpu.vector_store %arg14[%c0_1016, %c320_1017], %586 {strides = array<i32>} : memref<2x512xf32, #tpu.memory_space<vmem>>, vector<2x32xf32>,
    %c0_1018 = arith.constant 0 : index
    %c4_1019 = arith.constant 4 : index
    %c7_1020 = arith.constant 7 : index
    %c0_1021 = arith.constant 0 : index
    %588 = vector.load %arg13[%c0_1018, %c4_1019, %c7_1020, %c0_1021] : memref<2x8x8x32xf32, #tpu.memory_space<vmem>>, vector<2x1x1x32xf32>
    %589 = vector.shape_cast %588 : vector<2x1x1x32xf32> to vector<2x32xf32>
    %c0_1022 = arith.constant 0 : index
    %c352_1023 = arith.constant 352 : index
    %590 = vector.load %arg14[%c0_1022, %c352_1023] : memref<2x512xf32, #tpu.memory_space<vmem>>, vector<2x32xf32>
    tpu.vector_store %arg14[%c0_1022, %c352_1023], %589 {strides = array<i32>} : memref<2x512xf32, #tpu.memory_space<vmem>>, vector<2x32xf32>,
    %c0_1024 = arith.constant 0 : index
    %c5_1025 = arith.constant 5 : index
    %c4_1026 = arith.constant 4 : index
    %c0_1027 = arith.constant 0 : index
    %591 = vector.load %arg13[%c0_1024, %c5_1025, %c4_1026, %c0_1027] : memref<2x8x8x32xf32, #tpu.memory_space<vmem>>, vector<2x1x1x32xf32>
    %592 = vector.shape_cast %591 : vector<2x1x1x32xf32> to vector<2x32xf32>
    %c0_1028 = arith.constant 0 : index
    %c384_1029 = arith.constant 384 : index
    %593 = vector.load %arg14[%c0_1028, %c384_1029] : memref<2x512xf32, #tpu.memory_space<vmem>>, vector<2x32xf32>
    tpu.vector_store %arg14[%c0_1028, %c384_1029], %592 {strides = array<i32>} : memref<2x512xf32, #tpu.memory_space<vmem>>, vector<2x32xf32>,
    %c0_1030 = arith.constant 0 : index
    %c5_1031 = arith.constant 5 : index
    %c5_1032 = arith.constant 5 : index
    %c0_1033 = arith.constant 0 : index
    %594 = vector.load %arg13[%c0_1030, %c5_1031, %c5_1032, %c0_1033] : memref<2x8x8x32xf32, #tpu.memory_space<vmem>>, vector<2x1x1x32xf32>
    %595 = vector.shape_cast %594 : vector<2x1x1x32xf32> to vector<2x32xf32>
    %c0_1034 = arith.constant 0 : index
    %c416_1035 = arith.constant 416 : index
    %596 = vector.load %arg14[%c0_1034, %c416_1035] : memref<2x512xf32, #tpu.memory_space<vmem>>, vector<2x32xf32>
    tpu.vector_store %arg14[%c0_1034, %c416_1035], %595 {strides = array<i32>} : memref<2x512xf32, #tpu.memory_space<vmem>>, vector<2x32xf32>,
    %c0_1036 = arith.constant 0 : index
    %c5_1037 = arith.constant 5 : index
    %c6_1038 = arith.constant 6 : index
    %c0_1039 = arith.constant 0 : index
    %597 = vector.load %arg13[%c0_1036, %c5_1037, %c6_1038, %c0_1039] : memref<2x8x8x32xf32, #tpu.memory_space<vmem>>, vector<2x1x1x32xf32>
    %598 = vector.shape_cast %597 : vector<2x1x1x32xf32> to vector<2x32xf32>
    %c0_1040 = arith.constant 0 : index
    %c448_1041 = arith.constant 448 : index
    %599 = vector.load %arg14[%c0_1040, %c448_1041] : memref<2x512xf32, #tpu.memory_space<vmem>>, vector<2x32xf32>
    tpu.vector_store %arg14[%c0_1040, %c448_1041], %598 {strides = array<i32>} : memref<2x512xf32, #tpu.memory_space<vmem>>, vector<2x32xf32>,
    %c0_1042 = arith.constant 0 : index
    %c5_1043 = arith.constant 5 : index
    %c7_1044 = arith.constant 7 : index
    %c0_1045 = arith.constant 0 : index
    %600 = vector.load %arg13[%c0_1042, %c5_1043, %c7_1044, %c0_1045] : memref<2x8x8x32xf32, #tpu.memory_space<vmem>>, vector<2x1x1x32xf32>
    %601 = vector.shape_cast %600 : vector<2x1x1x32xf32> to vector<2x32xf32>
    %c0_1046 = arith.constant 0 : index
    %c480_1047 = arith.constant 480 : index
    %602 = vector.load %arg14[%c0_1046, %c480_1047] : memref<2x512xf32, #tpu.memory_space<vmem>>, vector<2x32xf32>
    tpu.vector_store %arg14[%c0_1046, %c480_1047], %601 {strides = array<i32>} : memref<2x512xf32, #tpu.memory_space<vmem>>, vector<2x32xf32>,
    %c0_1048 = arith.constant 0 : index
    %c0_1049 = arith.constant 0 : index
    %603 = vector.load %arg14[%c0_1048, %c0_1049] : memref<2x512xf32, #tpu.memory_space<vmem>>, vector<2x512xf32>
    %c0_1050 = arith.constant 0 : index
    %c0_1051 = arith.constant 0 : index
    %604 = vector.load %arg3[%c0_1050, %c0_1051] : memref<512x64xf32, #tpu.memory_space<vmem>>, vector<512x64xf32>
    %cst_1052 = arith.constant dense<0.000000e+00> : vector<2x64xf32>
    %605 = tpu.matmul %603, %604, %cst_1052 {dimension_numbers = #tpu.dot_dimension_numbers<[1], [0], [0], [1], [0, 0, 1, 1], [], []>} : vector<2x512xf32>, vector<512x64xf32>, vector<2x64xf32> -> vector<2x64xf32>
    %606 = vector.broadcast %264 : vector<1x64xf32> to vector<2x64xf32>
    %607 = arith.addf %605, %606 : vector<2x64xf32>
    %cst_1053 = arith.constant 0.000000e+00 : f32
    %608 = vector.broadcast %cst_1053 : f32 to vector<2x64xf32>
    %609 = arith.maximumf %607, %608 : vector<2x64xf32>
    %c0_1054 = arith.constant 0 : index
    %c1_1055 = arith.constant 1 : index
    %c2_1056 = arith.constant 2 : index
    %c0_1057 = arith.constant 0 : index
    %610 = vector.load %arg15[%c0_1054, %c1_1055, %c2_1056, %c0_1057] : memref<2x3x3x64xf32, #tpu.memory_space<vmem>>, vector<2x1x1x64xf32>
    %611 = vector.shape_cast %610 : vector<2x1x1x64xf32> to vector<2x64xf32>
    %612 = vector.shape_cast %609 : vector<2x64xf32> to vector<2x1x1x64xf32>
    tpu.vector_store %arg15[%c0_1054, %c1_1055, %c2_1056, %c0_1057], %612 {strides = array<i32>} : memref<2x3x3x64xf32, #tpu.memory_space<vmem>>, vector<2x1x1x64xf32>,
    %c0_1058 = arith.constant 0 : index
    %c4_1059 = arith.constant 4 : index
    %c0_1060 = arith.constant 0 : index
    %c0_1061 = arith.constant 0 : index
    %613 = vector.load %arg13[%c0_1058, %c4_1059, %c0_1060, %c0_1061] : memref<2x8x8x32xf32, #tpu.memory_space<vmem>>, vector<2x1x1x32xf32>
    %614 = vector.shape_cast %613 : vector<2x1x1x32xf32> to vector<2x32xf32>
    %c0_1062 = arith.constant 0 : index
    %c0_1063 = arith.constant 0 : index
    %615 = vector.load %arg14[%c0_1062, %c0_1063] : memref<2x512xf32, #tpu.memory_space<vmem>>, vector<2x32xf32>
    tpu.vector_store %arg14[%c0_1062, %c0_1063], %614 {strides = array<i32>} : memref<2x512xf32, #tpu.memory_space<vmem>>, vector<2x32xf32>,
    %c0_1064 = arith.constant 0 : index
    %c4_1065 = arith.constant 4 : index
    %c1_1066 = arith.constant 1 : index
    %c0_1067 = arith.constant 0 : index
    %616 = vector.load %arg13[%c0_1064, %c4_1065, %c1_1066, %c0_1067] : memref<2x8x8x32xf32, #tpu.memory_space<vmem>>, vector<2x1x1x32xf32>
    %617 = vector.shape_cast %616 : vector<2x1x1x32xf32> to vector<2x32xf32>
    %c0_1068 = arith.constant 0 : index
    %c32_1069 = arith.constant 32 : index
    %618 = vector.load %arg14[%c0_1068, %c32_1069] : memref<2x512xf32, #tpu.memory_space<vmem>>, vector<2x32xf32>
    tpu.vector_store %arg14[%c0_1068, %c32_1069], %617 {strides = array<i32>} : memref<2x512xf32, #tpu.memory_space<vmem>>, vector<2x32xf32>,
    %c0_1070 = arith.constant 0 : index
    %c4_1071 = arith.constant 4 : index
    %c2_1072 = arith.constant 2 : index
    %c0_1073 = arith.constant 0 : index
    %619 = vector.load %arg13[%c0_1070, %c4_1071, %c2_1072, %c0_1073] : memref<2x8x8x32xf32, #tpu.memory_space<vmem>>, vector<2x1x1x32xf32>
    %620 = vector.shape_cast %619 : vector<2x1x1x32xf32> to vector<2x32xf32>
    %c0_1074 = arith.constant 0 : index
    %c64_1075 = arith.constant 64 : index
    %621 = vector.load %arg14[%c0_1074, %c64_1075] : memref<2x512xf32, #tpu.memory_space<vmem>>, vector<2x32xf32>
    tpu.vector_store %arg14[%c0_1074, %c64_1075], %620 {strides = array<i32>} : memref<2x512xf32, #tpu.memory_space<vmem>>, vector<2x32xf32>,
    %c0_1076 = arith.constant 0 : index
    %c4_1077 = arith.constant 4 : index
    %c3_1078 = arith.constant 3 : index
    %c0_1079 = arith.constant 0 : index
    %622 = vector.load %arg13[%c0_1076, %c4_1077, %c3_1078, %c0_1079] : memref<2x8x8x32xf32, #tpu.memory_space<vmem>>, vector<2x1x1x32xf32>
    %623 = vector.shape_cast %622 : vector<2x1x1x32xf32> to vector<2x32xf32>
    %c0_1080 = arith.constant 0 : index
    %c96_1081 = arith.constant 96 : index
    %624 = vector.load %arg14[%c0_1080, %c96_1081] : memref<2x512xf32, #tpu.memory_space<vmem>>, vector<2x32xf32>
    tpu.vector_store %arg14[%c0_1080, %c96_1081], %623 {strides = array<i32>} : memref<2x512xf32, #tpu.memory_space<vmem>>, vector<2x32xf32>,
    %c0_1082 = arith.constant 0 : index
    %c5_1083 = arith.constant 5 : index
    %c0_1084 = arith.constant 0 : index
    %c0_1085 = arith.constant 0 : index
    %625 = vector.load %arg13[%c0_1082, %c5_1083, %c0_1084, %c0_1085] : memref<2x8x8x32xf32, #tpu.memory_space<vmem>>, vector<2x1x1x32xf32>
    %626 = vector.shape_cast %625 : vector<2x1x1x32xf32> to vector<2x32xf32>
    %c0_1086 = arith.constant 0 : index
    %c128_1087 = arith.constant 128 : index
    %627 = vector.load %arg14[%c0_1086, %c128_1087] : memref<2x512xf32, #tpu.memory_space<vmem>>, vector<2x32xf32>
    tpu.vector_store %arg14[%c0_1086, %c128_1087], %626 {strides = array<i32>} : memref<2x512xf32, #tpu.memory_space<vmem>>, vector<2x32xf32>,
    %c0_1088 = arith.constant 0 : index
    %c5_1089 = arith.constant 5 : index
    %c1_1090 = arith.constant 1 : index
    %c0_1091 = arith.constant 0 : index
    %628 = vector.load %arg13[%c0_1088, %c5_1089, %c1_1090, %c0_1091] : memref<2x8x8x32xf32, #tpu.memory_space<vmem>>, vector<2x1x1x32xf32>
    %629 = vector.shape_cast %628 : vector<2x1x1x32xf32> to vector<2x32xf32>
    %c0_1092 = arith.constant 0 : index
    %c160_1093 = arith.constant 160 : index
    %630 = vector.load %arg14[%c0_1092, %c160_1093] : memref<2x512xf32, #tpu.memory_space<vmem>>, vector<2x32xf32>
    tpu.vector_store %arg14[%c0_1092, %c160_1093], %629 {strides = array<i32>} : memref<2x512xf32, #tpu.memory_space<vmem>>, vector<2x32xf32>,
    %c0_1094 = arith.constant 0 : index
    %c5_1095 = arith.constant 5 : index
    %c2_1096 = arith.constant 2 : index
    %c0_1097 = arith.constant 0 : index
    %631 = vector.load %arg13[%c0_1094, %c5_1095, %c2_1096, %c0_1097] : memref<2x8x8x32xf32, #tpu.memory_space<vmem>>, vector<2x1x1x32xf32>
    %632 = vector.shape_cast %631 : vector<2x1x1x32xf32> to vector<2x32xf32>
    %c0_1098 = arith.constant 0 : index
    %c192_1099 = arith.constant 192 : index
    %633 = vector.load %arg14[%c0_1098, %c192_1099] : memref<2x512xf32, #tpu.memory_space<vmem>>, vector<2x32xf32>
    tpu.vector_store %arg14[%c0_1098, %c192_1099], %632 {strides = array<i32>} : memref<2x512xf32, #tpu.memory_space<vmem>>, vector<2x32xf32>,
    %c0_1100 = arith.constant 0 : index
    %c5_1101 = arith.constant 5 : index
    %c3_1102 = arith.constant 3 : index
    %c0_1103 = arith.constant 0 : index
    %634 = vector.load %arg13[%c0_1100, %c5_1101, %c3_1102, %c0_1103] : memref<2x8x8x32xf32, #tpu.memory_space<vmem>>, vector<2x1x1x32xf32>
    %635 = vector.shape_cast %634 : vector<2x1x1x32xf32> to vector<2x32xf32>
    %c0_1104 = arith.constant 0 : index
    %c224_1105 = arith.constant 224 : index
    %636 = vector.load %arg14[%c0_1104, %c224_1105] : memref<2x512xf32, #tpu.memory_space<vmem>>, vector<2x32xf32>
    tpu.vector_store %arg14[%c0_1104, %c224_1105], %635 {strides = array<i32>} : memref<2x512xf32, #tpu.memory_space<vmem>>, vector<2x32xf32>,
    %c0_1106 = arith.constant 0 : index
    %c6_1107 = arith.constant 6 : index
    %c0_1108 = arith.constant 0 : index
    %c0_1109 = arith.constant 0 : index
    %637 = vector.load %arg13[%c0_1106, %c6_1107, %c0_1108, %c0_1109] : memref<2x8x8x32xf32, #tpu.memory_space<vmem>>, vector<2x1x1x32xf32>
    %638 = vector.shape_cast %637 : vector<2x1x1x32xf32> to vector<2x32xf32>
    %c0_1110 = arith.constant 0 : index
    %c256_1111 = arith.constant 256 : index
    %639 = vector.load %arg14[%c0_1110, %c256_1111] : memref<2x512xf32, #tpu.memory_space<vmem>>, vector<2x32xf32>
    tpu.vector_store %arg14[%c0_1110, %c256_1111], %638 {strides = array<i32>} : memref<2x512xf32, #tpu.memory_space<vmem>>, vector<2x32xf32>,
    %c0_1112 = arith.constant 0 : index
    %c6_1113 = arith.constant 6 : index
    %c1_1114 = arith.constant 1 : index
    %c0_1115 = arith.constant 0 : index
    %640 = vector.load %arg13[%c0_1112, %c6_1113, %c1_1114, %c0_1115] : memref<2x8x8x32xf32, #tpu.memory_space<vmem>>, vector<2x1x1x32xf32>
    %641 = vector.shape_cast %640 : vector<2x1x1x32xf32> to vector<2x32xf32>
    %c0_1116 = arith.constant 0 : index
    %c288_1117 = arith.constant 288 : index
    %642 = vector.load %arg14[%c0_1116, %c288_1117] : memref<2x512xf32, #tpu.memory_space<vmem>>, vector<2x32xf32>
    tpu.vector_store %arg14[%c0_1116, %c288_1117], %641 {strides = array<i32>} : memref<2x512xf32, #tpu.memory_space<vmem>>, vector<2x32xf32>,
    %c0_1118 = arith.constant 0 : index
    %c6_1119 = arith.constant 6 : index
    %c2_1120 = arith.constant 2 : index
    %c0_1121 = arith.constant 0 : index
    %643 = vector.load %arg13[%c0_1118, %c6_1119, %c2_1120, %c0_1121] : memref<2x8x8x32xf32, #tpu.memory_space<vmem>>, vector<2x1x1x32xf32>
    %644 = vector.shape_cast %643 : vector<2x1x1x32xf32> to vector<2x32xf32>
    %c0_1122 = arith.constant 0 : index
    %c320_1123 = arith.constant 320 : index
    %645 = vector.load %arg14[%c0_1122, %c320_1123] : memref<2x512xf32, #tpu.memory_space<vmem>>, vector<2x32xf32>
    tpu.vector_store %arg14[%c0_1122, %c320_1123], %644 {strides = array<i32>} : memref<2x512xf32, #tpu.memory_space<vmem>>, vector<2x32xf32>,
    %c0_1124 = arith.constant 0 : index
    %c6_1125 = arith.constant 6 : index
    %c3_1126 = arith.constant 3 : index
    %c0_1127 = arith.constant 0 : index
    %646 = vector.load %arg13[%c0_1124, %c6_1125, %c3_1126, %c0_1127] : memref<2x8x8x32xf32, #tpu.memory_space<vmem>>, vector<2x1x1x32xf32>
    %647 = vector.shape_cast %646 : vector<2x1x1x32xf32> to vector<2x32xf32>
    %c0_1128 = arith.constant 0 : index
    %c352_1129 = arith.constant 352 : index
    %648 = vector.load %arg14[%c0_1128, %c352_1129] : memref<2x512xf32, #tpu.memory_space<vmem>>, vector<2x32xf32>
    tpu.vector_store %arg14[%c0_1128, %c352_1129], %647 {strides = array<i32>} : memref<2x512xf32, #tpu.memory_space<vmem>>, vector<2x32xf32>,
    %c0_1130 = arith.constant 0 : index
    %c7_1131 = arith.constant 7 : index
    %c0_1132 = arith.constant 0 : index
    %c0_1133 = arith.constant 0 : index
    %649 = vector.load %arg13[%c0_1130, %c7_1131, %c0_1132, %c0_1133] : memref<2x8x8x32xf32, #tpu.memory_space<vmem>>, vector<2x1x1x32xf32>
    %650 = vector.shape_cast %649 : vector<2x1x1x32xf32> to vector<2x32xf32>
    %c0_1134 = arith.constant 0 : index
    %c384_1135 = arith.constant 384 : index
    %651 = vector.load %arg14[%c0_1134, %c384_1135] : memref<2x512xf32, #tpu.memory_space<vmem>>, vector<2x32xf32>
    tpu.vector_store %arg14[%c0_1134, %c384_1135], %650 {strides = array<i32>} : memref<2x512xf32, #tpu.memory_space<vmem>>, vector<2x32xf32>,
    %c0_1136 = arith.constant 0 : index
    %c7_1137 = arith.constant 7 : index
    %c1_1138 = arith.constant 1 : index
    %c0_1139 = arith.constant 0 : index
    %652 = vector.load %arg13[%c0_1136, %c7_1137, %c1_1138, %c0_1139] : memref<2x8x8x32xf32, #tpu.memory_space<vmem>>, vector<2x1x1x32xf32>
    %653 = vector.shape_cast %652 : vector<2x1x1x32xf32> to vector<2x32xf32>
    %c0_1140 = arith.constant 0 : index
    %c416_1141 = arith.constant 416 : index
    %654 = vector.load %arg14[%c0_1140, %c416_1141] : memref<2x512xf32, #tpu.memory_space<vmem>>, vector<2x32xf32>
    tpu.vector_store %arg14[%c0_1140, %c416_1141], %653 {strides = array<i32>} : memref<2x512xf32, #tpu.memory_space<vmem>>, vector<2x32xf32>,
    %c0_1142 = arith.constant 0 : index
    %c7_1143 = arith.constant 7 : index
    %c2_1144 = arith.constant 2 : index
    %c0_1145 = arith.constant 0 : index
    %655 = vector.load %arg13[%c0_1142, %c7_1143, %c2_1144, %c0_1145] : memref<2x8x8x32xf32, #tpu.memory_space<vmem>>, vector<2x1x1x32xf32>
    %656 = vector.shape_cast %655 : vector<2x1x1x32xf32> to vector<2x32xf32>
    %c0_1146 = arith.constant 0 : index
    %c448_1147 = arith.constant 448 : index
    %657 = vector.load %arg14[%c0_1146, %c448_1147] : memref<2x512xf32, #tpu.memory_space<vmem>>, vector<2x32xf32>
    tpu.vector_store %arg14[%c0_1146, %c448_1147], %656 {strides = array<i32>} : memref<2x512xf32, #tpu.memory_space<vmem>>, vector<2x32xf32>,
    %c0_1148 = arith.constant 0 : index
    %c7_1149 = arith.constant 7 : index
    %c3_1150 = arith.constant 3 : index
    %c0_1151 = arith.constant 0 : index
    %658 = vector.load %arg13[%c0_1148, %c7_1149, %c3_1150, %c0_1151] : memref<2x8x8x32xf32, #tpu.memory_space<vmem>>, vector<2x1x1x32xf32>
    %659 = vector.shape_cast %658 : vector<2x1x1x32xf32> to vector<2x32xf32>
    %c0_1152 = arith.constant 0 : index
    %c480_1153 = arith.constant 480 : index
    %660 = vector.load %arg14[%c0_1152, %c480_1153] : memref<2x512xf32, #tpu.memory_space<vmem>>, vector<2x32xf32>
    tpu.vector_store %arg14[%c0_1152, %c480_1153], %659 {strides = array<i32>} : memref<2x512xf32, #tpu.memory_space<vmem>>, vector<2x32xf32>,
    %c0_1154 = arith.constant 0 : index
    %c0_1155 = arith.constant 0 : index
    %661 = vector.load %arg14[%c0_1154, %c0_1155] : memref<2x512xf32, #tpu.memory_space<vmem>>, vector<2x512xf32>
    %c0_1156 = arith.constant 0 : index
    %c0_1157 = arith.constant 0 : index
    %662 = vector.load %arg3[%c0_1156, %c0_1157] : memref<512x64xf32, #tpu.memory_space<vmem>>, vector<512x64xf32>
    %cst_1158 = arith.constant dense<0.000000e+00> : vector<2x64xf32>
    %663 = tpu.matmul %661, %662, %cst_1158 {dimension_numbers = #tpu.dot_dimension_numbers<[1], [0], [0], [1], [0, 0, 1, 1], [], []>} : vector<2x512xf32>, vector<512x64xf32>, vector<2x64xf32> -> vector<2x64xf32>
    %664 = vector.broadcast %264 : vector<1x64xf32> to vector<2x64xf32>
    %665 = arith.addf %663, %664 : vector<2x64xf32>
    %cst_1159 = arith.constant 0.000000e+00 : f32
    %666 = vector.broadcast %cst_1159 : f32 to vector<2x64xf32>
    %667 = arith.maximumf %665, %666 : vector<2x64xf32>
    %c0_1160 = arith.constant 0 : index
    %c2_1161 = arith.constant 2 : index
    %c0_1162 = arith.constant 0 : index
    %c0_1163 = arith.constant 0 : index
    %668 = vector.load %arg15[%c0_1160, %c2_1161, %c0_1162, %c0_1163] : memref<2x3x3x64xf32, #tpu.memory_space<vmem>>, vector<2x1x1x64xf32>
    %669 = vector.shape_cast %668 : vector<2x1x1x64xf32> to vector<2x64xf32>
    %670 = vector.shape_cast %667 : vector<2x64xf32> to vector<2x1x1x64xf32>
    tpu.vector_store %arg15[%c0_1160, %c2_1161, %c0_1162, %c0_1163], %670 {strides = array<i32>} : memref<2x3x3x64xf32, #tpu.memory_space<vmem>>, vector<2x1x1x64xf32>,
    %c0_1164 = arith.constant 0 : index
    %c4_1165 = arith.constant 4 : index
    %c2_1166 = arith.constant 2 : index
    %c0_1167 = arith.constant 0 : index
    %671 = vector.load %arg13[%c0_1164, %c4_1165, %c2_1166, %c0_1167] : memref<2x8x8x32xf32, #tpu.memory_space<vmem>>, vector<2x1x1x32xf32>
    %672 = vector.shape_cast %671 : vector<2x1x1x32xf32> to vector<2x32xf32>
    %c0_1168 = arith.constant 0 : index
    %c0_1169 = arith.constant 0 : index
    %673 = vector.load %arg14[%c0_1168, %c0_1169] : memref<2x512xf32, #tpu.memory_space<vmem>>, vector<2x32xf32>
    tpu.vector_store %arg14[%c0_1168, %c0_1169], %672 {strides = array<i32>} : memref<2x512xf32, #tpu.memory_space<vmem>>, vector<2x32xf32>,
    %c0_1170 = arith.constant 0 : index
    %c4_1171 = arith.constant 4 : index
    %c3_1172 = arith.constant 3 : index
    %c0_1173 = arith.constant 0 : index
    %674 = vector.load %arg13[%c0_1170, %c4_1171, %c3_1172, %c0_1173] : memref<2x8x8x32xf32, #tpu.memory_space<vmem>>, vector<2x1x1x32xf32>
    %675 = vector.shape_cast %674 : vector<2x1x1x32xf32> to vector<2x32xf32>
    %c0_1174 = arith.constant 0 : index
    %c32_1175 = arith.constant 32 : index
    %676 = vector.load %arg14[%c0_1174, %c32_1175] : memref<2x512xf32, #tpu.memory_space<vmem>>, vector<2x32xf32>
    tpu.vector_store %arg14[%c0_1174, %c32_1175], %675 {strides = array<i32>} : memref<2x512xf32, #tpu.memory_space<vmem>>, vector<2x32xf32>,
    %c0_1176 = arith.constant 0 : index
    %c4_1177 = arith.constant 4 : index
    %c4_1178 = arith.constant 4 : index
    %c0_1179 = arith.constant 0 : index
    %677 = vector.load %arg13[%c0_1176, %c4_1177, %c4_1178, %c0_1179] : memref<2x8x8x32xf32, #tpu.memory_space<vmem>>, vector<2x1x1x32xf32>
    %678 = vector.shape_cast %677 : vector<2x1x1x32xf32> to vector<2x32xf32>
    %c0_1180 = arith.constant 0 : index
    %c64_1181 = arith.constant 64 : index
    %679 = vector.load %arg14[%c0_1180, %c64_1181] : memref<2x512xf32, #tpu.memory_space<vmem>>, vector<2x32xf32>
    tpu.vector_store %arg14[%c0_1180, %c64_1181], %678 {strides = array<i32>} : memref<2x512xf32, #tpu.memory_space<vmem>>, vector<2x32xf32>,
    %c0_1182 = arith.constant 0 : index
    %c4_1183 = arith.constant 4 : index
    %c5_1184 = arith.constant 5 : index
    %c0_1185 = arith.constant 0 : index
    %680 = vector.load %arg13[%c0_1182, %c4_1183, %c5_1184, %c0_1185] : memref<2x8x8x32xf32, #tpu.memory_space<vmem>>, vector<2x1x1x32xf32>
    %681 = vector.shape_cast %680 : vector<2x1x1x32xf32> to vector<2x32xf32>
    %c0_1186 = arith.constant 0 : index
    %c96_1187 = arith.constant 96 : index
    %682 = vector.load %arg14[%c0_1186, %c96_1187] : memref<2x512xf32, #tpu.memory_space<vmem>>, vector<2x32xf32>
    tpu.vector_store %arg14[%c0_1186, %c96_1187], %681 {strides = array<i32>} : memref<2x512xf32, #tpu.memory_space<vmem>>, vector<2x32xf32>,
    %c0_1188 = arith.constant 0 : index
    %c5_1189 = arith.constant 5 : index
    %c2_1190 = arith.constant 2 : index
    %c0_1191 = arith.constant 0 : index
    %683 = vector.load %arg13[%c0_1188, %c5_1189, %c2_1190, %c0_1191] : memref<2x8x8x32xf32, #tpu.memory_space<vmem>>, vector<2x1x1x32xf32>
    %684 = vector.shape_cast %683 : vector<2x1x1x32xf32> to vector<2x32xf32>
    %c0_1192 = arith.constant 0 : index
    %c128_1193 = arith.constant 128 : index
    %685 = vector.load %arg14[%c0_1192, %c128_1193] : memref<2x512xf32, #tpu.memory_space<vmem>>, vector<2x32xf32>
    tpu.vector_store %arg14[%c0_1192, %c128_1193], %684 {strides = array<i32>} : memref<2x512xf32, #tpu.memory_space<vmem>>, vector<2x32xf32>,
    %c0_1194 = arith.constant 0 : index
    %c5_1195 = arith.constant 5 : index
    %c3_1196 = arith.constant 3 : index
    %c0_1197 = arith.constant 0 : index
    %686 = vector.load %arg13[%c0_1194, %c5_1195, %c3_1196, %c0_1197] : memref<2x8x8x32xf32, #tpu.memory_space<vmem>>, vector<2x1x1x32xf32>
    %687 = vector.shape_cast %686 : vector<2x1x1x32xf32> to vector<2x32xf32>
    %c0_1198 = arith.constant 0 : index
    %c160_1199 = arith.constant 160 : index
    %688 = vector.load %arg14[%c0_1198, %c160_1199] : memref<2x512xf32, #tpu.memory_space<vmem>>, vector<2x32xf32>
    tpu.vector_store %arg14[%c0_1198, %c160_1199], %687 {strides = array<i32>} : memref<2x512xf32, #tpu.memory_space<vmem>>, vector<2x32xf32>,
    %c0_1200 = arith.constant 0 : index
    %c5_1201 = arith.constant 5 : index
    %c4_1202 = arith.constant 4 : index
    %c0_1203 = arith.constant 0 : index
    %689 = vector.load %arg13[%c0_1200, %c5_1201, %c4_1202, %c0_1203] : memref<2x8x8x32xf32, #tpu.memory_space<vmem>>, vector<2x1x1x32xf32>
    %690 = vector.shape_cast %689 : vector<2x1x1x32xf32> to vector<2x32xf32>
    %c0_1204 = arith.constant 0 : index
    %c192_1205 = arith.constant 192 : index
    %691 = vector.load %arg14[%c0_1204, %c192_1205] : memref<2x512xf32, #tpu.memory_space<vmem>>, vector<2x32xf32>
    tpu.vector_store %arg14[%c0_1204, %c192_1205], %690 {strides = array<i32>} : memref<2x512xf32, #tpu.memory_space<vmem>>, vector<2x32xf32>,
    %c0_1206 = arith.constant 0 : index
    %c5_1207 = arith.constant 5 : index
    %c5_1208 = arith.constant 5 : index
    %c0_1209 = arith.constant 0 : index
    %692 = vector.load %arg13[%c0_1206, %c5_1207, %c5_1208, %c0_1209] : memref<2x8x8x32xf32, #tpu.memory_space<vmem>>, vector<2x1x1x32xf32>
    %693 = vector.shape_cast %692 : vector<2x1x1x32xf32> to vector<2x32xf32>
    %c0_1210 = arith.constant 0 : index
    %c224_1211 = arith.constant 224 : index
    %694 = vector.load %arg14[%c0_1210, %c224_1211] : memref<2x512xf32, #tpu.memory_space<vmem>>, vector<2x32xf32>
    tpu.vector_store %arg14[%c0_1210, %c224_1211], %693 {strides = array<i32>} : memref<2x512xf32, #tpu.memory_space<vmem>>, vector<2x32xf32>,
    %c0_1212 = arith.constant 0 : index
    %c6_1213 = arith.constant 6 : index
    %c2_1214 = arith.constant 2 : index
    %c0_1215 = arith.constant 0 : index
    %695 = vector.load %arg13[%c0_1212, %c6_1213, %c2_1214, %c0_1215] : memref<2x8x8x32xf32, #tpu.memory_space<vmem>>, vector<2x1x1x32xf32>
    %696 = vector.shape_cast %695 : vector<2x1x1x32xf32> to vector<2x32xf32>
    %c0_1216 = arith.constant 0 : index
    %c256_1217 = arith.constant 256 : index
    %697 = vector.load %arg14[%c0_1216, %c256_1217] : memref<2x512xf32, #tpu.memory_space<vmem>>, vector<2x32xf32>
    tpu.vector_store %arg14[%c0_1216, %c256_1217], %696 {strides = array<i32>} : memref<2x512xf32, #tpu.memory_space<vmem>>, vector<2x32xf32>,
    %c0_1218 = arith.constant 0 : index
    %c6_1219 = arith.constant 6 : index
    %c3_1220 = arith.constant 3 : index
    %c0_1221 = arith.constant 0 : index
    %698 = vector.load %arg13[%c0_1218, %c6_1219, %c3_1220, %c0_1221] : memref<2x8x8x32xf32, #tpu.memory_space<vmem>>, vector<2x1x1x32xf32>
    %699 = vector.shape_cast %698 : vector<2x1x1x32xf32> to vector<2x32xf32>
    %c0_1222 = arith.constant 0 : index
    %c288_1223 = arith.constant 288 : index
    %700 = vector.load %arg14[%c0_1222, %c288_1223] : memref<2x512xf32, #tpu.memory_space<vmem>>, vector<2x32xf32>
    tpu.vector_store %arg14[%c0_1222, %c288_1223], %699 {strides = array<i32>} : memref<2x512xf32, #tpu.memory_space<vmem>>, vector<2x32xf32>,
    %c0_1224 = arith.constant 0 : index
    %c6_1225 = arith.constant 6 : index
    %c4_1226 = arith.constant 4 : index
    %c0_1227 = arith.constant 0 : index
    %701 = vector.load %arg13[%c0_1224, %c6_1225, %c4_1226, %c0_1227] : memref<2x8x8x32xf32, #tpu.memory_space<vmem>>, vector<2x1x1x32xf32>
    %702 = vector.shape_cast %701 : vector<2x1x1x32xf32> to vector<2x32xf32>
    %c0_1228 = arith.constant 0 : index
    %c320_1229 = arith.constant 320 : index
    %703 = vector.load %arg14[%c0_1228, %c320_1229] : memref<2x512xf32, #tpu.memory_space<vmem>>, vector<2x32xf32>
    tpu.vector_store %arg14[%c0_1228, %c320_1229], %702 {strides = array<i32>} : memref<2x512xf32, #tpu.memory_space<vmem>>, vector<2x32xf32>,
    %c0_1230 = arith.constant 0 : index
    %c6_1231 = arith.constant 6 : index
    %c5_1232 = arith.constant 5 : index
    %c0_1233 = arith.constant 0 : index
    %704 = vector.load %arg13[%c0_1230, %c6_1231, %c5_1232, %c0_1233] : memref<2x8x8x32xf32, #tpu.memory_space<vmem>>, vector<2x1x1x32xf32>
    %705 = vector.shape_cast %704 : vector<2x1x1x32xf32> to vector<2x32xf32>
    %c0_1234 = arith.constant 0 : index
    %c352_1235 = arith.constant 352 : index
    %706 = vector.load %arg14[%c0_1234, %c352_1235] : memref<2x512xf32, #tpu.memory_space<vmem>>, vector<2x32xf32>
    tpu.vector_store %arg14[%c0_1234, %c352_1235], %705 {strides = array<i32>} : memref<2x512xf32, #tpu.memory_space<vmem>>, vector<2x32xf32>,
    %c0_1236 = arith.constant 0 : index
    %c7_1237 = arith.constant 7 : index
    %c2_1238 = arith.constant 2 : index
    %c0_1239 = arith.constant 0 : index
    %707 = vector.load %arg13[%c0_1236, %c7_1237, %c2_1238, %c0_1239] : memref<2x8x8x32xf32, #tpu.memory_space<vmem>>, vector<2x1x1x32xf32>
    %708 = vector.shape_cast %707 : vector<2x1x1x32xf32> to vector<2x32xf32>
    %c0_1240 = arith.constant 0 : index
    %c384_1241 = arith.constant 384 : index
    %709 = vector.load %arg14[%c0_1240, %c384_1241] : memref<2x512xf32, #tpu.memory_space<vmem>>, vector<2x32xf32>
    tpu.vector_store %arg14[%c0_1240, %c384_1241], %708 {strides = array<i32>} : memref<2x512xf32, #tpu.memory_space<vmem>>, vector<2x32xf32>,
    %c0_1242 = arith.constant 0 : index
    %c7_1243 = arith.constant 7 : index
    %c3_1244 = arith.constant 3 : index
    %c0_1245 = arith.constant 0 : index
    %710 = vector.load %arg13[%c0_1242, %c7_1243, %c3_1244, %c0_1245] : memref<2x8x8x32xf32, #tpu.memory_space<vmem>>, vector<2x1x1x32xf32>
    %711 = vector.shape_cast %710 : vector<2x1x1x32xf32> to vector<2x32xf32>
    %c0_1246 = arith.constant 0 : index
    %c416_1247 = arith.constant 416 : index
    %712 = vector.load %arg14[%c0_1246, %c416_1247] : memref<2x512xf32, #tpu.memory_space<vmem>>, vector<2x32xf32>
    tpu.vector_store %arg14[%c0_1246, %c416_1247], %711 {strides = array<i32>} : memref<2x512xf32, #tpu.memory_space<vmem>>, vector<2x32xf32>,
    %c0_1248 = arith.constant 0 : index
    %c7_1249 = arith.constant 7 : index
    %c4_1250 = arith.constant 4 : index
    %c0_1251 = arith.constant 0 : index
    %713 = vector.load %arg13[%c0_1248, %c7_1249, %c4_1250, %c0_1251] : memref<2x8x8x32xf32, #tpu.memory_space<vmem>>, vector<2x1x1x32xf32>
    %714 = vector.shape_cast %713 : vector<2x1x1x32xf32> to vector<2x32xf32>
    %c0_1252 = arith.constant 0 : index
    %c448_1253 = arith.constant 448 : index
    %715 = vector.load %arg14[%c0_1252, %c448_1253] : memref<2x512xf32, #tpu.memory_space<vmem>>, vector<2x32xf32>
    tpu.vector_store %arg14[%c0_1252, %c448_1253], %714 {strides = array<i32>} : memref<2x512xf32, #tpu.memory_space<vmem>>, vector<2x32xf32>,
    %c0_1254 = arith.constant 0 : index
    %c7_1255 = arith.constant 7 : index
    %c5_1256 = arith.constant 5 : index
    %c0_1257 = arith.constant 0 : index
    %716 = vector.load %arg13[%c0_1254, %c7_1255, %c5_1256, %c0_1257] : memref<2x8x8x32xf32, #tpu.memory_space<vmem>>, vector<2x1x1x32xf32>
    %717 = vector.shape_cast %716 : vector<2x1x1x32xf32> to vector<2x32xf32>
    %c0_1258 = arith.constant 0 : index
    %c480_1259 = arith.constant 480 : index
    %718 = vector.load %arg14[%c0_1258, %c480_1259] : memref<2x512xf32, #tpu.memory_space<vmem>>, vector<2x32xf32>
    tpu.vector_store %arg14[%c0_1258, %c480_1259], %717 {strides = array<i32>} : memref<2x512xf32, #tpu.memory_space<vmem>>, vector<2x32xf32>,
    %c0_1260 = arith.constant 0 : index
    %c0_1261 = arith.constant 0 : index
    %719 = vector.load %arg14[%c0_1260, %c0_1261] : memref<2x512xf32, #tpu.memory_space<vmem>>, vector<2x512xf32>
    %c0_1262 = arith.constant 0 : index
    %c0_1263 = arith.constant 0 : index
    %720 = vector.load %arg3[%c0_1262, %c0_1263] : memref<512x64xf32, #tpu.memory_space<vmem>>, vector<512x64xf32>
    %cst_1264 = arith.constant dense<0.000000e+00> : vector<2x64xf32>
    %721 = tpu.matmul %719, %720, %cst_1264 {dimension_numbers = #tpu.dot_dimension_numbers<[1], [0], [0], [1], [0, 0, 1, 1], [], []>} : vector<2x512xf32>, vector<512x64xf32>, vector<2x64xf32> -> vector<2x64xf32>
    %722 = vector.broadcast %264 : vector<1x64xf32> to vector<2x64xf32>
    %723 = arith.addf %721, %722 : vector<2x64xf32>
    %cst_1265 = arith.constant 0.000000e+00 : f32
    %724 = vector.broadcast %cst_1265 : f32 to vector<2x64xf32>
    %725 = arith.maximumf %723, %724 : vector<2x64xf32>
    %c0_1266 = arith.constant 0 : index
    %c2_1267 = arith.constant 2 : index
    %c1_1268 = arith.constant 1 : index
    %c0_1269 = arith.constant 0 : index
    %726 = vector.load %arg15[%c0_1266, %c2_1267, %c1_1268, %c0_1269] : memref<2x3x3x64xf32, #tpu.memory_space<vmem>>, vector<2x1x1x64xf32>
    %727 = vector.shape_cast %726 : vector<2x1x1x64xf32> to vector<2x64xf32>
    %728 = vector.shape_cast %725 : vector<2x64xf32> to vector<2x1x1x64xf32>
    tpu.vector_store %arg15[%c0_1266, %c2_1267, %c1_1268, %c0_1269], %728 {strides = array<i32>} : memref<2x3x3x64xf32, #tpu.memory_space<vmem>>, vector<2x1x1x64xf32>,
    %c0_1270 = arith.constant 0 : index
    %c4_1271 = arith.constant 4 : index
    %c4_1272 = arith.constant 4 : index
    %c0_1273 = arith.constant 0 : index
    %729 = vector.load %arg13[%c0_1270, %c4_1271, %c4_1272, %c0_1273] : memref<2x8x8x32xf32, #tpu.memory_space<vmem>>, vector<2x1x1x32xf32>
    %730 = vector.shape_cast %729 : vector<2x1x1x32xf32> to vector<2x32xf32>
    %c0_1274 = arith.constant 0 : index
    %c0_1275 = arith.constant 0 : index
    %731 = vector.load %arg14[%c0_1274, %c0_1275] : memref<2x512xf32, #tpu.memory_space<vmem>>, vector<2x32xf32>
    tpu.vector_store %arg14[%c0_1274, %c0_1275], %730 {strides = array<i32>} : memref<2x512xf32, #tpu.memory_space<vmem>>, vector<2x32xf32>,
    %c0_1276 = arith.constant 0 : index
    %c4_1277 = arith.constant 4 : index
    %c5_1278 = arith.constant 5 : index
    %c0_1279 = arith.constant 0 : index
    %732 = vector.load %arg13[%c0_1276, %c4_1277, %c5_1278, %c0_1279] : memref<2x8x8x32xf32, #tpu.memory_space<vmem>>, vector<2x1x1x32xf32>
    %733 = vector.shape_cast %732 : vector<2x1x1x32xf32> to vector<2x32xf32>
    %c0_1280 = arith.constant 0 : index
    %c32_1281 = arith.constant 32 : index
    %734 = vector.load %arg14[%c0_1280, %c32_1281] : memref<2x512xf32, #tpu.memory_space<vmem>>, vector<2x32xf32>
    tpu.vector_store %arg14[%c0_1280, %c32_1281], %733 {strides = array<i32>} : memref<2x512xf32, #tpu.memory_space<vmem>>, vector<2x32xf32>,
    %c0_1282 = arith.constant 0 : index
    %c4_1283 = arith.constant 4 : index
    %c6_1284 = arith.constant 6 : index
    %c0_1285 = arith.constant 0 : index
    %735 = vector.load %arg13[%c0_1282, %c4_1283, %c6_1284, %c0_1285] : memref<2x8x8x32xf32, #tpu.memory_space<vmem>>, vector<2x1x1x32xf32>
    %736 = vector.shape_cast %735 : vector<2x1x1x32xf32> to vector<2x32xf32>
    %c0_1286 = arith.constant 0 : index
    %c64_1287 = arith.constant 64 : index
    %737 = vector.load %arg14[%c0_1286, %c64_1287] : memref<2x512xf32, #tpu.memory_space<vmem>>, vector<2x32xf32>
    tpu.vector_store %arg14[%c0_1286, %c64_1287], %736 {strides = array<i32>} : memref<2x512xf32, #tpu.memory_space<vmem>>, vector<2x32xf32>,
    %c0_1288 = arith.constant 0 : index
    %c4_1289 = arith.constant 4 : index
    %c7_1290 = arith.constant 7 : index
    %c0_1291 = arith.constant 0 : index
    %738 = vector.load %arg13[%c0_1288, %c4_1289, %c7_1290, %c0_1291] : memref<2x8x8x32xf32, #tpu.memory_space<vmem>>, vector<2x1x1x32xf32>
    %739 = vector.shape_cast %738 : vector<2x1x1x32xf32> to vector<2x32xf32>
    %c0_1292 = arith.constant 0 : index
    %c96_1293 = arith.constant 96 : index
    %740 = vector.load %arg14[%c0_1292, %c96_1293] : memref<2x512xf32, #tpu.memory_space<vmem>>, vector<2x32xf32>
    tpu.vector_store %arg14[%c0_1292, %c96_1293], %739 {strides = array<i32>} : memref<2x512xf32, #tpu.memory_space<vmem>>, vector<2x32xf32>,
    %c0_1294 = arith.constant 0 : index
    %c5_1295 = arith.constant 5 : index
    %c4_1296 = arith.constant 4 : index
    %c0_1297 = arith.constant 0 : index
    %741 = vector.load %arg13[%c0_1294, %c5_1295, %c4_1296, %c0_1297] : memref<2x8x8x32xf32, #tpu.memory_space<vmem>>, vector<2x1x1x32xf32>
    %742 = vector.shape_cast %741 : vector<2x1x1x32xf32> to vector<2x32xf32>
    %c0_1298 = arith.constant 0 : index
    %c128_1299 = arith.constant 128 : index
    %743 = vector.load %arg14[%c0_1298, %c128_1299] : memref<2x512xf32, #tpu.memory_space<vmem>>, vector<2x32xf32>
    tpu.vector_store %arg14[%c0_1298, %c128_1299], %742 {strides = array<i32>} : memref<2x512xf32, #tpu.memory_space<vmem>>, vector<2x32xf32>,
    %c0_1300 = arith.constant 0 : index
    %c5_1301 = arith.constant 5 : index
    %c5_1302 = arith.constant 5 : index
    %c0_1303 = arith.constant 0 : index
    %744 = vector.load %arg13[%c0_1300, %c5_1301, %c5_1302, %c0_1303] : memref<2x8x8x32xf32, #tpu.memory_space<vmem>>, vector<2x1x1x32xf32>
    %745 = vector.shape_cast %744 : vector<2x1x1x32xf32> to vector<2x32xf32>
    %c0_1304 = arith.constant 0 : index
    %c160_1305 = arith.constant 160 : index
    %746 = vector.load %arg14[%c0_1304, %c160_1305] : memref<2x512xf32, #tpu.memory_space<vmem>>, vector<2x32xf32>
    tpu.vector_store %arg14[%c0_1304, %c160_1305], %745 {strides = array<i32>} : memref<2x512xf32, #tpu.memory_space<vmem>>, vector<2x32xf32>,
    %c0_1306 = arith.constant 0 : index
    %c5_1307 = arith.constant 5 : index
    %c6_1308 = arith.constant 6 : index
    %c0_1309 = arith.constant 0 : index
    %747 = vector.load %arg13[%c0_1306, %c5_1307, %c6_1308, %c0_1309] : memref<2x8x8x32xf32, #tpu.memory_space<vmem>>, vector<2x1x1x32xf32>
    %748 = vector.shape_cast %747 : vector<2x1x1x32xf32> to vector<2x32xf32>
    %c0_1310 = arith.constant 0 : index
    %c192_1311 = arith.constant 192 : index
    %749 = vector.load %arg14[%c0_1310, %c192_1311] : memref<2x512xf32, #tpu.memory_space<vmem>>, vector<2x32xf32>
    tpu.vector_store %arg14[%c0_1310, %c192_1311], %748 {strides = array<i32>} : memref<2x512xf32, #tpu.memory_space<vmem>>, vector<2x32xf32>,
    %c0_1312 = arith.constant 0 : index
    %c5_1313 = arith.constant 5 : index
    %c7_1314 = arith.constant 7 : index
    %c0_1315 = arith.constant 0 : index
    %750 = vector.load %arg13[%c0_1312, %c5_1313, %c7_1314, %c0_1315] : memref<2x8x8x32xf32, #tpu.memory_space<vmem>>, vector<2x1x1x32xf32>
    %751 = vector.shape_cast %750 : vector<2x1x1x32xf32> to vector<2x32xf32>
    %c0_1316 = arith.constant 0 : index
    %c224_1317 = arith.constant 224 : index
    %752 = vector.load %arg14[%c0_1316, %c224_1317] : memref<2x512xf32, #tpu.memory_space<vmem>>, vector<2x32xf32>
    tpu.vector_store %arg14[%c0_1316, %c224_1317], %751 {strides = array<i32>} : memref<2x512xf32, #tpu.memory_space<vmem>>, vector<2x32xf32>,
    %c0_1318 = arith.constant 0 : index
    %c6_1319 = arith.constant 6 : index
    %c4_1320 = arith.constant 4 : index
    %c0_1321 = arith.constant 0 : index
    %753 = vector.load %arg13[%c0_1318, %c6_1319, %c4_1320, %c0_1321] : memref<2x8x8x32xf32, #tpu.memory_space<vmem>>, vector<2x1x1x32xf32>
    %754 = vector.shape_cast %753 : vector<2x1x1x32xf32> to vector<2x32xf32>
    %c0_1322 = arith.constant 0 : index
    %c256_1323 = arith.constant 256 : index
    %755 = vector.load %arg14[%c0_1322, %c256_1323] : memref<2x512xf32, #tpu.memory_space<vmem>>, vector<2x32xf32>
    tpu.vector_store %arg14[%c0_1322, %c256_1323], %754 {strides = array<i32>} : memref<2x512xf32, #tpu.memory_space<vmem>>, vector<2x32xf32>,
    %c0_1324 = arith.constant 0 : index
    %c6_1325 = arith.constant 6 : index
    %c5_1326 = arith.constant 5 : index
    %c0_1327 = arith.constant 0 : index
    %756 = vector.load %arg13[%c0_1324, %c6_1325, %c5_1326, %c0_1327] : memref<2x8x8x32xf32, #tpu.memory_space<vmem>>, vector<2x1x1x32xf32>
    %757 = vector.shape_cast %756 : vector<2x1x1x32xf32> to vector<2x32xf32>
    %c0_1328 = arith.constant 0 : index
    %c288_1329 = arith.constant 288 : index
    %758 = vector.load %arg14[%c0_1328, %c288_1329] : memref<2x512xf32, #tpu.memory_space<vmem>>, vector<2x32xf32>
    tpu.vector_store %arg14[%c0_1328, %c288_1329], %757 {strides = array<i32>} : memref<2x512xf32, #tpu.memory_space<vmem>>, vector<2x32xf32>,
    %c0_1330 = arith.constant 0 : index
    %c6_1331 = arith.constant 6 : index
    %c6_1332 = arith.constant 6 : index
    %c0_1333 = arith.constant 0 : index
    %759 = vector.load %arg13[%c0_1330, %c6_1331, %c6_1332, %c0_1333] : memref<2x8x8x32xf32, #tpu.memory_space<vmem>>, vector<2x1x1x32xf32>
    %760 = vector.shape_cast %759 : vector<2x1x1x32xf32> to vector<2x32xf32>
    %c0_1334 = arith.constant 0 : index
    %c320_1335 = arith.constant 320 : index
    %761 = vector.load %arg14[%c0_1334, %c320_1335] : memref<2x512xf32, #tpu.memory_space<vmem>>, vector<2x32xf32>
    tpu.vector_store %arg14[%c0_1334, %c320_1335], %760 {strides = array<i32>} : memref<2x512xf32, #tpu.memory_space<vmem>>, vector<2x32xf32>,
    %c0_1336 = arith.constant 0 : index
    %c6_1337 = arith.constant 6 : index
    %c7_1338 = arith.constant 7 : index
    %c0_1339 = arith.constant 0 : index
    %762 = vector.load %arg13[%c0_1336, %c6_1337, %c7_1338, %c0_1339] : memref<2x8x8x32xf32, #tpu.memory_space<vmem>>, vector<2x1x1x32xf32>
    %763 = vector.shape_cast %762 : vector<2x1x1x32xf32> to vector<2x32xf32>
    %c0_1340 = arith.constant 0 : index
    %c352_1341 = arith.constant 352 : index
    %764 = vector.load %arg14[%c0_1340, %c352_1341] : memref<2x512xf32, #tpu.memory_space<vmem>>, vector<2x32xf32>
    tpu.vector_store %arg14[%c0_1340, %c352_1341], %763 {strides = array<i32>} : memref<2x512xf32, #tpu.memory_space<vmem>>, vector<2x32xf32>,
    %c0_1342 = arith.constant 0 : index
    %c7_1343 = arith.constant 7 : index
    %c4_1344 = arith.constant 4 : index
    %c0_1345 = arith.constant 0 : index
    %765 = vector.load %arg13[%c0_1342, %c7_1343, %c4_1344, %c0_1345] : memref<2x8x8x32xf32, #tpu.memory_space<vmem>>, vector<2x1x1x32xf32>
    %766 = vector.shape_cast %765 : vector<2x1x1x32xf32> to vector<2x32xf32>
    %c0_1346 = arith.constant 0 : index
    %c384_1347 = arith.constant 384 : index
    %767 = vector.load %arg14[%c0_1346, %c384_1347] : memref<2x512xf32, #tpu.memory_space<vmem>>, vector<2x32xf32>
    tpu.vector_store %arg14[%c0_1346, %c384_1347], %766 {strides = array<i32>} : memref<2x512xf32, #tpu.memory_space<vmem>>, vector<2x32xf32>,
    %c0_1348 = arith.constant 0 : index
    %c7_1349 = arith.constant 7 : index
    %c5_1350 = arith.constant 5 : index
    %c0_1351 = arith.constant 0 : index
    %768 = vector.load %arg13[%c0_1348, %c7_1349, %c5_1350, %c0_1351] : memref<2x8x8x32xf32, #tpu.memory_space<vmem>>, vector<2x1x1x32xf32>
    %769 = vector.shape_cast %768 : vector<2x1x1x32xf32> to vector<2x32xf32>
    %c0_1352 = arith.constant 0 : index
    %c416_1353 = arith.constant 416 : index
    %770 = vector.load %arg14[%c0_1352, %c416_1353] : memref<2x512xf32, #tpu.memory_space<vmem>>, vector<2x32xf32>
    tpu.vector_store %arg14[%c0_1352, %c416_1353], %769 {strides = array<i32>} : memref<2x512xf32, #tpu.memory_space<vmem>>, vector<2x32xf32>,
    %c0_1354 = arith.constant 0 : index
    %c7_1355 = arith.constant 7 : index
    %c6_1356 = arith.constant 6 : index
    %c0_1357 = arith.constant 0 : index
    %771 = vector.load %arg13[%c0_1354, %c7_1355, %c6_1356, %c0_1357] : memref<2x8x8x32xf32, #tpu.memory_space<vmem>>, vector<2x1x1x32xf32>
    %772 = vector.shape_cast %771 : vector<2x1x1x32xf32> to vector<2x32xf32>
    %c0_1358 = arith.constant 0 : index
    %c448_1359 = arith.constant 448 : index
    %773 = vector.load %arg14[%c0_1358, %c448_1359] : memref<2x512xf32, #tpu.memory_space<vmem>>, vector<2x32xf32>
    tpu.vector_store %arg14[%c0_1358, %c448_1359], %772 {strides = array<i32>} : memref<2x512xf32, #tpu.memory_space<vmem>>, vector<2x32xf32>,
    %c0_1360 = arith.constant 0 : index
    %c7_1361 = arith.constant 7 : index
    %c7_1362 = arith.constant 7 : index
    %c0_1363 = arith.constant 0 : index
    %774 = vector.load %arg13[%c0_1360, %c7_1361, %c7_1362, %c0_1363] : memref<2x8x8x32xf32, #tpu.memory_space<vmem>>, vector<2x1x1x32xf32>
    %775 = vector.shape_cast %774 : vector<2x1x1x32xf32> to vector<2x32xf32>
    %c0_1364 = arith.constant 0 : index
    %c480_1365 = arith.constant 480 : index
    %776 = vector.load %arg14[%c0_1364, %c480_1365] : memref<2x512xf32, #tpu.memory_space<vmem>>, vector<2x32xf32>
    tpu.vector_store %arg14[%c0_1364, %c480_1365], %775 {strides = array<i32>} : memref<2x512xf32, #tpu.memory_space<vmem>>, vector<2x32xf32>,
    %c0_1366 = arith.constant 0 : index
    %c0_1367 = arith.constant 0 : index
    %777 = vector.load %arg14[%c0_1366, %c0_1367] : memref<2x512xf32, #tpu.memory_space<vmem>>, vector<2x512xf32>
    %c0_1368 = arith.constant 0 : index
    %c0_1369 = arith.constant 0 : index
    %778 = vector.load %arg3[%c0_1368, %c0_1369] : memref<512x64xf32, #tpu.memory_space<vmem>>, vector<512x64xf32>
    %cst_1370 = arith.constant dense<0.000000e+00> : vector<2x64xf32>
    %779 = tpu.matmul %777, %778, %cst_1370 {dimension_numbers = #tpu.dot_dimension_numbers<[1], [0], [0], [1], [0, 0, 1, 1], [], []>} : vector<2x512xf32>, vector<512x64xf32>, vector<2x64xf32> -> vector<2x64xf32>
    %780 = vector.broadcast %264 : vector<1x64xf32> to vector<2x64xf32>
    %781 = arith.addf %779, %780 : vector<2x64xf32>
    %cst_1371 = arith.constant 0.000000e+00 : f32
    %782 = vector.broadcast %cst_1371 : f32 to vector<2x64xf32>
    %783 = arith.maximumf %781, %782 : vector<2x64xf32>
    %c0_1372 = arith.constant 0 : index
    %c2_1373 = arith.constant 2 : index
    %c2_1374 = arith.constant 2 : index
    %c0_1375 = arith.constant 0 : index
    %784 = vector.load %arg15[%c0_1372, %c2_1373, %c2_1374, %c0_1375] : memref<2x3x3x64xf32, #tpu.memory_space<vmem>>, vector<2x1x1x64xf32>
    %785 = vector.shape_cast %784 : vector<2x1x1x64xf32> to vector<2x64xf32>
    %786 = vector.shape_cast %783 : vector<2x64xf32> to vector<2x1x1x64xf32>
    tpu.vector_store %arg15[%c0_1372, %c2_1373, %c2_1374, %c0_1375], %786 {strides = array<i32>} : memref<2x3x3x64xf32, #tpu.memory_space<vmem>>, vector<2x1x1x64xf32>,
    %c0_1376 = arith.constant 0 : index
    %c0_1377 = arith.constant 0 : index
    %787 = vector.load %arg6[%c0_1376, %c0_1377] : memref<1x64xf32, #tpu.memory_space<vmem>>, vector<1x64xf32>
    %c0_1378 = arith.constant 0 : index
    %c0_1379 = arith.constant 0 : index
    %c0_1380 = arith.constant 0 : index
    %c0_1381 = arith.constant 0 : index
    %788 = vector.load %arg15[%c0_1378, %c0_1379, %c0_1380, %c0_1381] : memref<2x3x3x64xf32, #tpu.memory_space<vmem>>, vector<2x1x1x64xf32>
    %789 = vector.shape_cast %788 : vector<2x1x1x64xf32> to vector<2x64xf32>
    %c0_1382 = arith.constant 0 : index
    %c0_1383 = arith.constant 0 : index
    %790 = vector.load %arg16[%c0_1382, %c0_1383] : memref<2x576xf32, #tpu.memory_space<vmem>>, vector<2x64xf32>
    tpu.vector_store %arg16[%c0_1382, %c0_1383], %789 {strides = array<i32>} : memref<2x576xf32, #tpu.memory_space<vmem>>, vector<2x64xf32>,
    %c0_1384 = arith.constant 0 : index
    %c0_1385 = arith.constant 0 : index
    %c1_1386 = arith.constant 1 : index
    %c0_1387 = arith.constant 0 : index
    %791 = vector.load %arg15[%c0_1384, %c0_1385, %c1_1386, %c0_1387] : memref<2x3x3x64xf32, #tpu.memory_space<vmem>>, vector<2x1x1x64xf32>
    %792 = vector.shape_cast %791 : vector<2x1x1x64xf32> to vector<2x64xf32>
    %c0_1388 = arith.constant 0 : index
    %c64_1389 = arith.constant 64 : index
    %793 = vector.load %arg16[%c0_1388, %c64_1389] : memref<2x576xf32, #tpu.memory_space<vmem>>, vector<2x64xf32>
    tpu.vector_store %arg16[%c0_1388, %c64_1389], %792 {strides = array<i32>} : memref<2x576xf32, #tpu.memory_space<vmem>>, vector<2x64xf32>,
    %c0_1390 = arith.constant 0 : index
    %c0_1391 = arith.constant 0 : index
    %c2_1392 = arith.constant 2 : index
    %c0_1393 = arith.constant 0 : index
    %794 = vector.load %arg15[%c0_1390, %c0_1391, %c2_1392, %c0_1393] : memref<2x3x3x64xf32, #tpu.memory_space<vmem>>, vector<2x1x1x64xf32>
    %795 = vector.shape_cast %794 : vector<2x1x1x64xf32> to vector<2x64xf32>
    %c0_1394 = arith.constant 0 : index
    %c128_1395 = arith.constant 128 : index
    %796 = vector.load %arg16[%c0_1394, %c128_1395] : memref<2x576xf32, #tpu.memory_space<vmem>>, vector<2x64xf32>
    tpu.vector_store %arg16[%c0_1394, %c128_1395], %795 {strides = array<i32>} : memref<2x576xf32, #tpu.memory_space<vmem>>, vector<2x64xf32>,
    %c0_1396 = arith.constant 0 : index
    %c1_1397 = arith.constant 1 : index
    %c0_1398 = arith.constant 0 : index
    %c0_1399 = arith.constant 0 : index
    %797 = vector.load %arg15[%c0_1396, %c1_1397, %c0_1398, %c0_1399] : memref<2x3x3x64xf32, #tpu.memory_space<vmem>>, vector<2x1x1x64xf32>
    %798 = vector.shape_cast %797 : vector<2x1x1x64xf32> to vector<2x64xf32>
    %c0_1400 = arith.constant 0 : index
    %c192_1401 = arith.constant 192 : index
    %799 = vector.load %arg16[%c0_1400, %c192_1401] : memref<2x576xf32, #tpu.memory_space<vmem>>, vector<2x64xf32>
    tpu.vector_store %arg16[%c0_1400, %c192_1401], %798 {strides = array<i32>} : memref<2x576xf32, #tpu.memory_space<vmem>>, vector<2x64xf32>,
    %c0_1402 = arith.constant 0 : index
    %c1_1403 = arith.constant 1 : index
    %c1_1404 = arith.constant 1 : index
    %c0_1405 = arith.constant 0 : index
    %800 = vector.load %arg15[%c0_1402, %c1_1403, %c1_1404, %c0_1405] : memref<2x3x3x64xf32, #tpu.memory_space<vmem>>, vector<2x1x1x64xf32>
    %801 = vector.shape_cast %800 : vector<2x1x1x64xf32> to vector<2x64xf32>
    %c0_1406 = arith.constant 0 : index
    %c256_1407 = arith.constant 256 : index
    %802 = vector.load %arg16[%c0_1406, %c256_1407] : memref<2x576xf32, #tpu.memory_space<vmem>>, vector<2x64xf32>
    tpu.vector_store %arg16[%c0_1406, %c256_1407], %801 {strides = array<i32>} : memref<2x576xf32, #tpu.memory_space<vmem>>, vector<2x64xf32>,
    %c0_1408 = arith.constant 0 : index
    %c1_1409 = arith.constant 1 : index
    %c2_1410 = arith.constant 2 : index
    %c0_1411 = arith.constant 0 : index
    %803 = vector.load %arg15[%c0_1408, %c1_1409, %c2_1410, %c0_1411] : memref<2x3x3x64xf32, #tpu.memory_space<vmem>>, vector<2x1x1x64xf32>
    %804 = vector.shape_cast %803 : vector<2x1x1x64xf32> to vector<2x64xf32>
    %c0_1412 = arith.constant 0 : index
    %c320_1413 = arith.constant 320 : index
    %805 = vector.load %arg16[%c0_1412, %c320_1413] : memref<2x576xf32, #tpu.memory_space<vmem>>, vector<2x64xf32>
    tpu.vector_store %arg16[%c0_1412, %c320_1413], %804 {strides = array<i32>} : memref<2x576xf32, #tpu.memory_space<vmem>>, vector<2x64xf32>,
    %c0_1414 = arith.constant 0 : index
    %c2_1415 = arith.constant 2 : index
    %c0_1416 = arith.constant 0 : index
    %c0_1417 = arith.constant 0 : index
    %806 = vector.load %arg15[%c0_1414, %c2_1415, %c0_1416, %c0_1417] : memref<2x3x3x64xf32, #tpu.memory_space<vmem>>, vector<2x1x1x64xf32>
    %807 = vector.shape_cast %806 : vector<2x1x1x64xf32> to vector<2x64xf32>
    %c0_1418 = arith.constant 0 : index
    %c384_1419 = arith.constant 384 : index
    %808 = vector.load %arg16[%c0_1418, %c384_1419] : memref<2x576xf32, #tpu.memory_space<vmem>>, vector<2x64xf32>
    tpu.vector_store %arg16[%c0_1418, %c384_1419], %807 {strides = array<i32>} : memref<2x576xf32, #tpu.memory_space<vmem>>, vector<2x64xf32>,
    %c0_1420 = arith.constant 0 : index
    %c2_1421 = arith.constant 2 : index
    %c1_1422 = arith.constant 1 : index
    %c0_1423 = arith.constant 0 : index
    %809 = vector.load %arg15[%c0_1420, %c2_1421, %c1_1422, %c0_1423] : memref<2x3x3x64xf32, #tpu.memory_space<vmem>>, vector<2x1x1x64xf32>
    %810 = vector.shape_cast %809 : vector<2x1x1x64xf32> to vector<2x64xf32>
    %c0_1424 = arith.constant 0 : index
    %c448_1425 = arith.constant 448 : index
    %811 = vector.load %arg16[%c0_1424, %c448_1425] : memref<2x576xf32, #tpu.memory_space<vmem>>, vector<2x64xf32>
    tpu.vector_store %arg16[%c0_1424, %c448_1425], %810 {strides = array<i32>} : memref<2x576xf32, #tpu.memory_space<vmem>>, vector<2x64xf32>,
    %c0_1426 = arith.constant 0 : index
    %c2_1427 = arith.constant 2 : index
    %c2_1428 = arith.constant 2 : index
    %c0_1429 = arith.constant 0 : index
    %812 = vector.load %arg15[%c0_1426, %c2_1427, %c2_1428, %c0_1429] : memref<2x3x3x64xf32, #tpu.memory_space<vmem>>, vector<2x1x1x64xf32>
    %813 = vector.shape_cast %812 : vector<2x1x1x64xf32> to vector<2x64xf32>
    %c0_1430 = arith.constant 0 : index
    %c512 = arith.constant 512 : index
    %814 = vector.load %arg16[%c0_1430, %c512] : memref<2x576xf32, #tpu.memory_space<vmem>>, vector<2x64xf32>
    tpu.vector_store %arg16[%c0_1430, %c512], %813 {strides = array<i32>} : memref<2x576xf32, #tpu.memory_space<vmem>>, vector<2x64xf32>,
    %c0_1431 = arith.constant 0 : index
    %c0_1432 = arith.constant 0 : index
    %815 = vector.load %arg16[%c0_1431, %c0_1432] : memref<2x576xf32, #tpu.memory_space<vmem>>, vector<2x576xf32>
    %c0_1433 = arith.constant 0 : index
    %c0_1434 = arith.constant 0 : index
    %816 = vector.load %arg5[%c0_1433, %c0_1434] : memref<576x64xf32, #tpu.memory_space<vmem>>, vector<576x64xf32>
    %cst_1435 = arith.constant dense<0.000000e+00> : vector<2x64xf32>
    %817 = tpu.matmul %815, %816, %cst_1435 {dimension_numbers = #tpu.dot_dimension_numbers<[1], [0], [0], [1], [0, 0, 1, 1], [], []>} : vector<2x576xf32>, vector<576x64xf32>, vector<2x64xf32> -> vector<2x64xf32>
    %818 = vector.broadcast %787 : vector<1x64xf32> to vector<2x64xf32>
    %819 = arith.addf %817, %818 : vector<2x64xf32>
    %cst_1436 = arith.constant 0.000000e+00 : f32
    %820 = vector.broadcast %cst_1436 : f32 to vector<2x64xf32>
    %821 = arith.maximumf %819, %820 : vector<2x64xf32>
    %c0_1437 = arith.constant 0 : index
    %c0_1438 = arith.constant 0 : index
    %822 = vector.load %arg17[%c0_1437, %c0_1438] : memref<2x64xf32, #tpu.memory_space<vmem>>, vector<2x64xf32>
    tpu.vector_store %arg17[%c0_1437, %c0_1438], %821 {strides = array<i32>} : memref<2x64xf32, #tpu.memory_space<vmem>>, vector<2x64xf32>,
    %c0_1439 = arith.constant 0 : index
    %c0_1440 = arith.constant 0 : index
    %823 = vector.load %arg17[%c0_1439, %c0_1440] : memref<2x64xf32, #tpu.memory_space<vmem>>, vector<2x64xf32>
    %c0_1441 = arith.constant 0 : index
    %c0_1442 = arith.constant 0 : index
    %824 = vector.load %arg7[%c0_1441, %c0_1442] : memref<64x512xf32, #tpu.memory_space<vmem>>, vector<64x512xf32>
    %cst_1443 = arith.constant dense<0.000000e+00> : vector<2x512xf32>
    %825 = tpu.matmul %823, %824, %cst_1443 {dimension_numbers = #tpu.dot_dimension_numbers<[1], [0], [0], [1], [0, 0, 1, 1], [], []>} : vector<2x64xf32>, vector<64x512xf32>, vector<2x512xf32> -> vector<2x512xf32>
    %c0_1444 = arith.constant 0 : index
    %c0_1445 = arith.constant 0 : index
    %826 = vector.load %arg8[%c0_1444, %c0_1445] : memref<1x512xf32, #tpu.memory_space<vmem>>, vector<1x512xf32>
    %827 = vector.broadcast %826 : vector<1x512xf32> to vector<2x512xf32>
    %828 = arith.addf %825, %827 : vector<2x512xf32>
    %cst_1446 = arith.constant 0.000000e+00 : f32
    %829 = vector.broadcast %cst_1446 : f32 to vector<2x512xf32>
    %830 = arith.maximumf %828, %829 : vector<2x512xf32>
    %c0_1447 = arith.constant 0 : index
    %c0_1448 = arith.constant 0 : index
    %831 = vector.load %arg9[%c0_1447, %c0_1448] : memref<512x128xf32, #tpu.memory_space<vmem>>, vector<512x128xf32>
    %cst_1449 = arith.constant dense<0.000000e+00> : vector<2x128xf32>
    %832 = tpu.matmul %830, %831, %cst_1449 {dimension_numbers = #tpu.dot_dimension_numbers<[1], [0], [0], [1], [0, 0, 1, 1], [], []>} : vector<2x512xf32>, vector<512x128xf32>, vector<2x128xf32> -> vector<2x128xf32>
    %c0_1450 = arith.constant 0 : index
    %c0_1451 = arith.constant 0 : index
    %833 = vector.load %arg10[%c0_1450, %c0_1451] : memref<1x128xf32, #tpu.memory_space<vmem>>, vector<1x128xf32>
    %834 = vector.broadcast %833 : vector<1x128xf32> to vector<2x128xf32>
    %835 = arith.addf %832, %834 : vector<2x128xf32>
    %c0_1452 = arith.constant 0 : index
    %c0_1453 = arith.constant 0 : index
    %836 = vector.load %arg11[%c0_1452, %c0_1453] : memref<2x128xf32, #tpu.memory_space<vmem>>, vector<2x128xf32>
    tpu.vector_store %arg11[%c0_1452, %c0_1453], %835 {strides = array<i32>} : memref<2x128xf32, #tpu.memory_space<vmem>>, vector<2x128xf32>,
    return
  }
}

</mosaic_0001>

<bundles_post_ra>
// kernel: forward.1
= control target key start
LH: loop header
LB: loop body
LE: loop exit
PB: predicated region body
PF: predicated region fallthrough
CT: control target
= control target key end

     0   :  { %s9294_s21 = smov 64   ;;  %vm40_vm0 = vcmask 523264   ;;  %s13069_s0 = inlined_call_operand.vmem [shape: f32[2,9,9,64], index: 0, kind: input, shape index: {}]   ;;  %s13070_s1 = inlined_call_operand.vmem [shape: f32[256,32], index: 1, kind: input, shape index: {}]   ;;  %s13071_s2 = inlined_call_operand.vmem [shape: f32[1,32], index: 2, kind: input, shape index: {}]   ;;  %s13072_s3 = inlined_call_operand.vmem [shape: f32[512,64], index: 3, kind: input, shape index: {}]   ;;  %s13073_s4 = inlined_call_operand.vmem [shape: f32[1,64], index: 4, kind: input, shape index: {}]   ;;  %s13074_s5 = inlined_call_operand.vmem [shape: f32[576,64], index: 5, kind: input, shape index: {}]   ;;  %s13075_s6 = inlined_call_operand.vmem [shape: f32[1,64], index: 6, kind: input, shape index: {}]   ;;  %s13076_s7 = inlined_call_operand.vmem [shape: f32[64,512], index: 7, kind: input, shape index: {}]   ;;  %s13077_s8 = inlined_call_operand.vmem [shape: f32[1,512], index: 8, kind: input, shape index: {}]   ;;  %s13078_s9 = inlined_call_operand.vmem [shape: f32[512,128], index: 9, kind: input, shape index: {}]   ;;  %s13079_s10 = inlined_call_operand.vmem [shape: f32[1,128], index: 10, kind: input, shape index: {}]   ;;  %s13080_s11 = inlined_call_operand.hbm [shape: f32[2,128], index: 11, kind: output, shape index: {}]  }
   0x1   :  { %v8051_v0 = vld [vmem:[%s13069_s0 + $0x11] sm:$0xff]  ;;  %v8052_v1 = vld [vmem:[%s13069_s0 + $0x21] sm:$0xff] }
   0x2   :  { %220 = vrot.lane.b32.xlu0 %v8051_v0, %s9294_s21  ;;  %226 = vrot.lane.b32.xlu1 %v8052_v1, %s9294_s21  ;;  %v87_v2 = vld [vmem:[%s13069_s0 + $0x1] sm:$0xff]  ;;  %v8053_v3 = vld [vmem:[%s13069_s0 + $0x31] sm:$0xff] }
   0x3   :  { %v378_v4 = vld [vmem:[%s13070_s1 + $0xf8] sm:$0xff]  ;;  %v377_v6 = vld [vmem:[%s13070_s1 + $0xf0] sm:$0xff]  ;;  %v376_v8 = vld [vmem:[%s13070_s1 + $0xe8] sm:$0xff] }
   0x4   :  { %8381 = vmatprep.subr.mxu0 %v378_v4  ;;  %v362_v5 = vld [vmem:[%s13070_s1 + $0x78] sm:$0xff]  ;;  %v361_v7 = vld [vmem:[%s13070_s1 + $0x70] sm:$0xff]  ;;  %v8054_v9 = vld [vmem:[%s13069_s0 + $0x41] sm:$0xff] }
   0x5   :  { %8382 = vmatpush3.msra.mxu0 %v362_v5  ;;  %v360_v10 = vld [vmem:[%s13070_s1 + $0x68] sm:$0xff]  ;;  %v375_v11 = vld [vmem:[%s13070_s1 + $0xe0] sm:$0xff]  ;;  %v8055_v13 = vld [vmem:[%s13069_s0 + $0x51] sm:$0xff] }
   0x6   :  { %89 = vrot.lane.b32.xlu0 %v87_v2, %s9294_s21  ;;  %96 = vrot.lane.b32.xlu1 %v8051_v0, %s9294_s21  ;;  %v359_v12 = vld [vmem:[%s13070_s1 + $0x60] sm:$0xff]  ;;  %v8035_v14 = vld [vmem:[%s13069_s0 + $0x10] sm:$0xff] }
   0x7   :  { %8383 = vmatprep.subr.mxu0 %v377_v6  ;;  %v374_v15 = vld [vmem:[%s13070_s1 + $0xd8] sm:$0xff]  ;;  %185 = vst.msk [vmem:[#allocation2 + $0x8] sm:$0xff] %vm40_vm0, %v8035_v14  ;;  %v8036_v16 = vld [vmem:[%s13069_s0 + $0x20] sm:$0xff]  ;;  %44 = vst.msk [vmem:[#allocation2 + $0x10] sm:$0xff] %vm40_vm0, %v8035_v14 }
   0x8   :  { %8384 = vmatpush3.msra.mxu0 %v361_v7  ;;  %v358_v17 = vld [vmem:[%s13070_s1 + $0x58] sm:$0xff]  ;;  %187 = vst.msk [vmem:[#allocation2 + $0x18] sm:$0xff] %vm40_vm0, %v8036_v16  ;;  %v39_v18 = vld [vmem:[%s13069_s0] sm:$0xff]  ;;  %47 = vst.msk [vmem:[#allocation2 + $0x20] sm:$0xff] %vm40_vm0, %v8036_v16 }
   0x9   :  { %8385 = vmatprep.subr.mxu0 %v376_v8  ;;  %v373_v19 = vld [vmem:[%s13070_s1 + $0xd0] sm:$0xff]  ;;  %41 = vst.msk [vmem:[#allocation2] sm:$0xff] %vm40_vm0, %v39_v18  ;;  %v8056_v20 = vld [vmem:[%s13069_s0 + $0x61] sm:$0xff] }
   0xa   :  { %232 = vrot.lane.b32.xlu0 %v8053_v3, %s9294_s21  ;;  %102 = vrot.lane.b32.xlu1 %v8052_v1, %s9294_s21  ;;  %v357_v21 = vld [vmem:[%s13070_s1 + $0x50] sm:$0xff]  ;;  %v372_v22 = vld [vmem:[%s13070_s1 + $0xc8] sm:$0xff] }
   0xb   :  { %8386 = vmatpush3.msra.mxu0 %v360_v10  ;;  %v356_v23 = vld [vmem:[%s13070_s1 + $0x48] sm:$0xff]  ;;  %v8037_v24 = vld [vmem:[%s13069_s0 + $0x30] sm:$0xff]  ;;  %v8038_v25 = vld [vmem:[%s13069_s0 + $0x40] sm:$0xff] }
   0xc   :  { %8387 = vmatprep.subr.mxu0 %v375_v11  ;;  %189 = vst.msk [vmem:[#allocation2 + $0x28] sm:$0xff] %vm40_vm0, %v8037_v24  ;;  %191 = vst.msk [vmem:[#allocation2 + $0x38] sm:$0xff] %vm40_vm0, %v8038_v25  ;;  %v8039_v26 = vld [vmem:[%s13069_s0 + $0x50] sm:$0xff]  ;;  %v8040_v27 = vld [vmem:[%s13069_s0 + $0x60] sm:$0xff] }
   0xd   :  { %8388 = vmatpush3.msra.mxu0 %v359_v12  ;;  %50 = vst.msk [vmem:[#allocation2 + $0x30] sm:$0xff] %vm40_vm0, %v8037_v24  ;;  %53 = vst.msk [vmem:[#allocation2 + $0x40] sm:$0xff] %vm40_vm0, %v8038_v25  ;;  %v8041_v28 = vld [vmem:[%s13069_s0 + $0x70] sm:$0xff]  ;;  %v8042_v29 = vld [vmem:[%s13069_s0 + $0x80] sm:$0xff] }
   0xe   :  { %238 = vrot.lane.b32.xlu0 %v8054_v9, %s9294_s21  ;;  %108 = vrot.lane.b32.xlu1 %v8053_v3, %s9294_s21  ;;  %193 = vst.msk [vmem:[#allocation2 + $0x48] sm:$0xff] %vm40_vm0, %v8039_v26  ;;  %195 = vst.msk [vmem:[#allocation2 + $0x58] sm:$0xff] %vm40_vm0, %v8040_v27  ;;  %v8043_v30 = vld [vmem:[%s13069_s0 + $0xa0] sm:$0xff]  ;;  %v8057_v31 = vld [vmem:[%s13069_s0 + $0x71] sm:$0xff] }
   0xf   :  { %8389 = vmatprep.subr.mxu0 %v374_v15  ;;  %56 = vst.msk [vmem:[#allocation2 + $0x50] sm:$0xff] %vm40_vm0, %v8039_v26  ;;  %197 = vst.msk [vmem:[#allocation2 + $0x68] sm:$0xff] %vm40_vm0, %v8041_v28  ;;  %v8012_v32 = vld [vmem:[%s13069_s0 + $0x90] sm:$0xff] }
  0x10   :  { %8390 = vmatpush3.msra.mxu0 %v358_v17  ;;  %59 = vst.msk [vmem:[#allocation2 + $0x60] sm:$0xff] %vm40_vm0, %v8040_v27  ;;  %62 = vst.msk [vmem:[#allocation2 + $0x70] sm:$0xff] %vm40_vm0, %v8041_v28 }
  0x11   :  { %8391 = vmatprep.subr.mxu0 %v373_v19  ;;  %200 = vst.msk [vmem:[#allocation2 + $0x78] sm:$0xff] %vm40_vm0, %v8042_v29  ;;  %202 = vst.msk [vmem:[#allocation2 + $0x88] sm:$0xff] %vm40_vm0, %v8043_v30 }
  0x12   :  { %244 = vrot.lane.b32.xlu0 %v8055_v13, %s9294_s21  ;;  %114 = vrot.lane.b32.xlu1 %v8054_v9, %s9294_s21  ;;  %68 = vst.msk [vmem:[#allocation2 + $0x90] sm:$0xff] %vm40_vm0, %v8043_v30 }
  0x13   :  { %8392 = vmatpush3.msra.mxu0 %v357_v21 }
  0x16   :  { %250 = vrot.lane.b32.xlu0 %v8056_v20, %s9294_s21  ;;  %120 = vrot.lane.b32.xlu1 %v8055_v13, %s9294_s21 }
  0x17   :  { %16 = vsyncpa [#allocation9], 0  ;;  %8393 = vmatprep.subr.mxu0 %v372_v22  ;;  %v371_v33 = vld [vmem:[%s13070_s1 + $0xc0] sm:$0xff]  ;;  %65 = vst.msk [vmem:[#allocation2 + $0x80] sm:$0xff] %vm40_vm0, %v8012_v32  ;;  %v8044_v35 = vld [vmem:[%s13069_s0 + $0xb0] sm:$0xff]  ;;  %vm92_vm1 = vcmask 1048064  }
  0x18   :  { %8394 = vmatpush3.msra.mxu0 %v356_v23  ;;  %v355_v34 = vld [vmem:[%s13070_s1 + $0x40] sm:$0xff]  ;;  %v370_v36 = vld [vmem:[%s13070_s1 + $0xb8] sm:$0xff]  ;;  %204 = vst.msk [vmem:[#allocation2 + $0x98] sm:$0xff] %vm40_vm0, %v8044_v35  ;;  %71 = vst.msk [vmem:[#allocation2 + $0xa0] sm:$0xff] %vm40_vm0, %v8044_v35  ;;  %vm546_vm2 = vcmask 261120   ;;  %vm602_vm3 = vcmask 1041409  }
  0x19   :  { %v8058_v37 = vld [vmem:[%s13069_s0 + $0x81] sm:$0xff]  ;;  %8395 = vmatprep.subr.mxu0 %v371_v33  ;;  %v354_v38 = vld [vmem:[%s13070_s1 + $0x38] sm:$0xff]  ;;  %v369_v39 = vld [vmem:[%s13070_s1 + $0xb0] sm:$0xff]  ;;  %vm604_vm4 = vcmask 1043459   ;;  %vm606_vm5 = vcmask 1045509   ;;  %vm608_vm6 = vcmask 1047559  }
  0x1a   :  { %256 = vrot.lane.b32.xlu0 %v8057_v31, %s9294_s21  ;;  %126 = vrot.lane.b32.xlu1 %v8056_v20, %s9294_s21  ;;  %v8045_v40 = vld [vmem:[%s13069_s0 + $0xc0] sm:$0xff]  ;;  %v353_v41 = vld [vmem:[%s13070_s1 + $0x30] sm:$0xff]  ;;  %s9296_s17 = smov 96   ;;  %vm611_vm7 = vcmask 254976   ;;  %vm641_vm8 = vcmask 517376   ;;  %vm671_vm9 = vcmask 779776  }
  0x1b   :  { %8396 = vmatpush3.msra.mxu0 %v355_v34  ;;  %206 = vst.msk [vmem:[#allocation2 + $0xa8] sm:$0xff] %vm40_vm0, %v8045_v40  ;;  %74 = vst.msk [vmem:[#allocation2 + $0xb0] sm:$0xff] %vm40_vm0, %v8045_v40  ;;  %v8059_v42 = vld [vmem:[%s13069_s0 + $0xa1] sm:$0xff]  ;;  %v8027_v43 = vld [vmem:[%s13069_s0 + $0x91] sm:$0xff]  ;;  %vm701_vm10 = vcmask 1042176   ;;  %vm1304_vm11 = vcmask 516096  }
  0x1c   :  { %8397 = vmatprep.subr.mxu0 %v370_v36  ;;  %v368_v44 = vld [vmem:[%s13070_s1 + $0xa8] sm:$0xff]  ;;  %v8046_v46 = vld [vmem:[%s13069_s0 + $0xd0] sm:$0xff]  ;;  %v367_v47 = vld [vmem:[%s13070_s1 + $0xa0] sm:$0xff]  ;;  %vm7024_vm12 = vcmask 517120   ;;  %vm7054_vm13 = vcmask 1041920   ;;  %vm9300_vm14 = vmmov 0  }
  0x1d   :  { %8398 = vmatpush3.msra.mxu0 %v354_v38  ;;  %v352_v45 = vld [vmem:[%s13070_s1 + $0x28] sm:$0xff]  ;;  %208 = vst.msk [vmem:[#allocation2 + $0xb8] sm:$0xff] %vm40_vm0, %v8046_v46  ;;  %77 = vst.msk [vmem:[#allocation2 + $0xc0] sm:$0xff] %vm40_vm0, %v8046_v46  ;;  %v8060_v48 = vld [vmem:[%s13069_s0 + $0xb1] sm:$0xff]  ;;  %s9301_s27 = smov [#allocation8]  }
  0x1e   :  { %262 = vrot.lane.b32.xlu0 %v8058_v37, %s9294_s21  ;;  %132 = vrot.lane.b32.xlu1 %v8057_v31, %s9294_s21  ;;  %v351_v49 = vld [vmem:[%s13070_s1 + $0x20] sm:$0xff]  ;;  %v366_v50 = vld [vmem:[%s13070_s1 + $0x98] sm:$0xff]  ;;  %s7997_s28 = sshll.u32 %s9301_s27, 4  ;;  %s7998_s28 = int_to_ptr.vmem [resolvable:$true] %s7997_s28 }
  0x1f   :  { %8399 = vmatprep.subr.mxu0 %v369_v39  ;;  %v8047_v51 = vld [vmem:[%s13069_s0 + $0xe0] sm:$0xff]  ;;  %v350_v52 = vld [vmem:[%s13070_s1 + $0x18] sm:$0xff]  ;;  %v365_v54 = vld [vmem:[%s13070_s1 + $0x90] sm:$0xff]  ;;  %s9272_s29 = scalar_lea.vmem %s7998_s28, 32  ;;  %p9277_p1 = scmp.lt.s32.totalorder %s7998_s28, %s7998_s28 }
  0x20   :  { %8400 = vmatpush3.msra.mxu0 %v353_v41  ;;  %210 = vst.msk [vmem:[#allocation2 + $0xc8] sm:$0xff] %vm40_vm0, %v8047_v51  ;;  %80 = vst.msk [vmem:[#allocation2 + $0xd0] sm:$0xff] %vm40_vm0, %v8047_v51  ;;  %v8061_v53 = vld [vmem:[%s13069_s0 + $0xc1] sm:$0xff]  ;;  %v349_v55 = vld [vmem:[%s13070_s1 + $0x10] sm:$0xff]  ;;  %p9273_p0 = scmp.ne.s32.totalorder %s7998_s28, %s9272_s29  ;;  %p9278_p2 = scmp.lt.s32.totalorder %s9272_s29, %s9272_s29 }
  0x21   :  { %8401 = vmatprep.subr.mxu0 %v368_v44  ;;  %v8048_v56 = vld [vmem:[%s13069_s0 + $0xf0] sm:$0xff]  ;;  %v364_v57 = vld [vmem:[%s13070_s1 + $0x88] sm:$0xff]  ;;  %v363_v60 = vld [vmem:[%s13070_s1 + $0x80] sm:$0xff] }
  0x22   :  { %268 = vrot.lane.b32.xlu0 %v8059_v42, %s9294_s21  ;;  %138 = vrot.lane.b32.xlu1 %v8027_v43, %s9294_s21  ;;  %212 = vst.msk [vmem:[#allocation2 + $0xd8] sm:$0xff] %vm40_vm0, %v8048_v56  ;;  %83 = vst.msk [vmem:[#allocation2 + $0xe0] sm:$0xff] %vm40_vm0, %v8048_v56  ;;  %v8062_v58 = vld [vmem:[%s13069_s0 + $0xd1] sm:$0xff]  ;;  %v348_v59 = vld [vmem:[%s13070_s1 + $0x8] sm:$0xff]  ;;  %p9279_p3 = por %p9278_p2, %p9277_p1 }
  0x23   :  { %8402 = vmatpush3.msra.mxu0 %v352_v45  ;;  %v8049_v61 = vld [vmem:[%s13069_s0 + $0x100] sm:$0xff]  ;;  %v8050_v0 = vld [vmem:[%s13069_s0 + $0x110] sm:$0xff] }
  0x24   :  { %8403 = vmatprep.subr.mxu0 %v367_v47  ;;  %v347_v62 = vld [vmem:[%s13070_s1] sm:$0xff]  ;;  %214 = vst.msk [vmem:[#allocation2 + $0xe8] sm:$0xff] %vm40_vm0, %v8049_v61  ;;  %86 = vst.msk [vmem:[#allocation2 + $0xf0] sm:$0xff] %vm40_vm0, %v8049_v61  ;;  %v8064_v1 = vld [vmem:[%s13069_s0 + $0xf1] sm:$0xff]  ;;  %p9280_p4 = pnand %p9279_p3, %p9273_p0 }
  0x25   :  { %8404 = vmatpush3.msra.mxu0 %v351_v49  ;;  %v8063_v63 = vld [vmem:[%s13069_s0 + $0xe1] sm:$0xff]  ;;  %217 = vst.msk [vmem:[#allocation2 + $0xf8] sm:$0xff] %vm40_vm0, %v8050_v0  ;;  %v8066_v3 = vld [vmem:[%s13069_s0 + $0x111] sm:$0xff] }
  0x26   :  { %274 = vrot.lane.b32.xlu0 %v8060_v48, %s9294_s21  ;;  %144 = vrot.lane.b32.xlu1 %v8059_v42, %s9294_s21  ;;  %v8065_v2 = vld [vmem:[%s13069_s0 + $0x101] sm:$0xff] }
  0x27   :  { %8405 = vmatprep.subr.mxu0 %v366_v50 }
  0x28   :  { %8406 = vmatpush3.msra.mxu0 %v350_v52 }
  0x29   :  { %8407 = vmatprep.subr.mxu0 %v365_v54 }
  0x2a   :  { %280 = vrot.lane.b32.xlu0 %v8061_v53, %s9294_s21  ;;  %150 = vrot.lane.b32.xlu1 %v8060_v48, %s9294_s21 }
  0x2b   :  { %8408 = vmatpush3.msra.mxu0 %v349_v55 }
  0x2c   :  { %8409 = vmatprep.subr.mxu0 %v364_v57 }
  0x2d   :  { %8410 = vmatpush3.msra.mxu0 %v348_v59 }
  0x2e   :  { %286 = vrot.lane.b32.xlu0 %v8062_v58, %s9294_s21  ;;  %156 = vrot.lane.b32.xlu1 %v8061_v53, %s9294_s21 }
  0x2f   :  { %8411 = vmatprep.subr.mxu0 %v363_v60 }
  0x30   :  { %8412 = vmatpush3.msra.mxu0 %v347_v62 }
  0x32   :  { %292 = vrot.lane.b32.xlu0 %v8063_v63, %s9294_s21  ;;  %162 = vrot.lane.b32.xlu1 %v8062_v58, %s9294_s21 }
  0x36   :  { %298 = vrot.lane.b32.xlu0 %v8064_v1, %s9294_s21  ;;  %168 = vrot.lane.b32.xlu1 %v8063_v63, %s9294_s21 }
  0x3a   :  { %304 = vrot.lane.b32.xlu0 %v8065_v2, %s9294_s21  ;;  %174 = vrot.lane.b32.xlu1 %v8064_v1, %s9294_s21 }
  0x3e   :  { %310 = vrot.lane.b32.xlu0 %v8066_v3, %s9294_s21  ;;  %180 = vrot.lane.b32.xlu1 %v8065_v2, %s9294_s21 }
  0x74   :  { %v221_v4 = vpop.permute.xlu0 %220  ;;  %v227_v5 = vpop.permute.xlu1 %226 }
  0x75   :  { %223 = vst.msk [vmem:[#allocation2 + $0x8] sm:$0xff] %vm92_vm1, %v221_v4  ;;  %229 = vst.msk [vmem:[#allocation2 + $0x18] sm:$0xff] %vm92_vm1, %v227_v5  ;;  %v9665_v5 = vld [vmem:[%s13071_s2] ss:$0 sm:$0xff]  ;;  %s9295_s2 = smov 32  }
  0x78   :  { %v90_v6 = vpop.permute.xlu0 %89  ;;  %v97_v7 = vpop.permute.xlu1 %96 }
  0x79   :  { %93 = vst.msk [vmem:[#allocation2] sm:$0xff] %vm92_vm1, %v90_v6  ;;  %99 = vst.msk [vmem:[#allocation2 + $0x10] sm:$0xff] %vm92_vm1, %v97_v7 }
  0x7c   :  { %v316_v8 = vld [vmem:[#allocation2 + $0x8] sm:$0xff]  ;;  %v233_v9 = vpop.permute.xlu0 %232  ;;  %v103_v10 = vpop.permute.xlu1 %102  ;;  %v318_v11 = vld [vmem:[#allocation2 + $0x18] sm:$0xff] }
  0x7d   :  { %449 = vmatprep.mubr.f32.mxu0 %v316_v8  ;;  %235 = vst.msk [vmem:[#allocation2 + $0x28] sm:$0xff] %vm92_vm1, %v233_v9  ;;  %105 = vst.msk [vmem:[#allocation2 + $0x20] sm:$0xff] %vm92_vm1, %v103_v10 }
  0x80   :  { %v315_v12 = vld [vmem:[#allocation2] sm:$0xff]  ;;  %v239_v13 = vpop.permute.xlu0 %238  ;;  %v109_v14 = vpop.permute.xlu1 %108  ;;  %v317_v15 = vld [vmem:[#allocation2 + $0x10] sm:$0xff] }
  0x81   :  { %450 = vmatmul.mubr.f32.vlgmr.msra.gmra.mxu0 %v315_v12  ;;  %241 = vst.msk [vmem:[#allocation2 + $0x38] sm:$0xff] %vm92_vm1, %v239_v13  ;;  %111 = vst.msk [vmem:[#allocation2 + $0x30] sm:$0xff] %vm92_vm1, %v109_v14 }
  0x82   :  { %454 = vmatprep.mubr.f32.mxu0 %v318_v11 }
  0x84   :  { %v245_v16 = vpop.permute.xlu0 %244  ;;  %v115_v17 = vpop.permute.xlu1 %114  ;;  %v320_v18 = vld [vmem:[#allocation2 + $0x28] sm:$0xff]  ;;  %v319_v19 = vld [vmem:[#allocation2 + $0x20] sm:$0xff] }
  0x85   :  { %455 = vmatmul.mubr.f32.gmra.mxu0 %v317_v15  ;;  %247 = vst.msk [vmem:[#allocation2 + $0x48] sm:$0xff] %vm92_vm1, %v245_v16  ;;  %117 = vst.msk [vmem:[#allocation2 + $0x40] sm:$0xff] %vm92_vm1, %v115_v17 }
  0x86   :  { %459 = vmatprep.mubr.f32.mxu0 %v320_v18 }
  0x88   :  { %v251_v20 = vpop.permute.xlu0 %250  ;;  %v121_v21 = vpop.permute.xlu1 %120  ;;  %v322_v22 = vld [vmem:[#allocation2 + $0x38] sm:$0xff]  ;;  %v321_v23 = vld [vmem:[#allocation2 + $0x30] sm:$0xff] }
  0x89   :  { %460 = vmatmul.mubr.f32.gmra.mxu0 %v319_v19  ;;  %253 = vst.msk [vmem:[#allocation2 + $0x58] sm:$0xff] %vm92_vm1, %v251_v20  ;;  %123 = vst.msk [vmem:[#allocation2 + $0x50] sm:$0xff] %vm92_vm1, %v121_v21 }
  0x8a   :  { %464 = vmatprep.mubr.f32.mxu0 %v322_v22 }
  0x8c   :  { %v257_v24 = vpop.permute.xlu0 %256  ;;  %v127_v25 = vpop.permute.xlu1 %126  ;;  %v324_v26 = vld [vmem:[#allocation2 + $0x48] sm:$0xff]  ;;  %v323_v27 = vld [vmem:[#allocation2 + $0x40] sm:$0xff] }
  0x8d   :  { %465 = vmatmul.mubr.f32.gmra.mxu0 %v321_v23  ;;  %259 = vst.msk [vmem:[#allocation2 + $0x68] sm:$0xff] %vm92_vm1, %v257_v24  ;;  %129 = vst.msk [vmem:[#allocation2 + $0x60] sm:$0xff] %vm92_vm1, %v127_v25 }
  0x8e   :  { %469 = vmatprep.mubr.f32.mxu0 %v324_v26 }
  0x90   :  { %v263_v28 = vpop.permute.xlu0 %262  ;;  %v133_v29 = vpop.permute.xlu1 %132  ;;  %v326_v30 = vld [vmem:[#allocation2 + $0x58] sm:$0xff]  ;;  %v325_v31 = vld [vmem:[#allocation2 + $0x50] sm:$0xff] }
  0x91   :  { %470 = vmatmul.mubr.f32.gmra.mxu0 %v323_v27  ;;  %265 = vst.msk [vmem:[#allocation2 + $0x78] sm:$0xff] %vm92_vm1, %v263_v28  ;;  %135 = vst.msk [vmem:[#allocation2 + $0x70] sm:$0xff] %vm92_vm1, %v133_v29 }
  0x92   :  { %474 = vmatprep.mubr.f32.mxu0 %v326_v30 }
  0x94   :  { %v269_v32 = vpop.permute.xlu0 %268  ;;  %v139_v33 = vpop.permute.xlu1 %138  ;;  %v328_v34 = vld [vmem:[#allocation2 + $0x68] sm:$0xff]  ;;  %v327_v35 = vld [vmem:[#allocation2 + $0x60] sm:$0xff] }
  0x95   :  { %475 = vmatmul.mubr.f32.gmra.mxu0 %v325_v31  ;;  %271 = vst.msk [vmem:[#allocation2 + $0x88] sm:$0xff] %vm92_vm1, %v269_v32  ;;  %141 = vst.msk [vmem:[#allocation2 + $0x80] sm:$0xff] %vm92_vm1, %v139_v33 }
  0x96   :  { %479 = vmatprep.mubr.f32.mxu0 %v328_v34 }
  0x98   :  { %v275_v36 = vpop.permute.xlu0 %274  ;;  %v145_v37 = vpop.permute.xlu1 %144  ;;  %v330_v38 = vld [vmem:[#allocation2 + $0x78] sm:$0xff]  ;;  %v329_v39 = vld [vmem:[#allocation2 + $0x70] sm:$0xff] }
  0x99   :  { %480 = vmatmul.mubr.f32.gmra.mxu0 %v327_v35  ;;  %277 = vst.msk [vmem:[#allocation2 + $0x98] sm:$0xff] %vm92_vm1, %v275_v36  ;;  %147 = vst.msk [vmem:[#allocation2 + $0x90] sm:$0xff] %vm92_vm1, %v145_v37 }
  0x9a   :  { %484 = vmatprep.mubr.f32.mxu0 %v330_v38 }
  0x9c   :  { %v281_v40 = vpop.permute.xlu0 %280  ;;  %v151_v41 = vpop.permute.xlu1 %150  ;;  %v332_v42 = vld [vmem:[#allocation2 + $0x88] sm:$0xff]  ;;  %v331_v43 = vld [vmem:[#allocation2 + $0x80] sm:$0xff] }
  0x9d   :  { %485 = vmatmul.mubr.f32.gmra.mxu0 %v329_v39  ;;  %283 = vst.msk [vmem:[#allocation2 + $0xa8] sm:$0xff] %vm92_vm1, %v281_v40  ;;  %153 = vst.msk [vmem:[#allocation2 + $0xa0] sm:$0xff] %vm92_vm1, %v151_v41 }
  0x9e   :  { %489 = vmatprep.mubr.f32.mxu0 %v332_v42 }
  0xa0   :  { %v287_v44 = vpop.permute.xlu0 %286  ;;  %v157_v45 = vpop.permute.xlu1 %156  ;;  %v334_v46 = vld [vmem:[#allocation2 + $0x98] sm:$0xff]  ;;  %v333_v47 = vld [vmem:[#allocation2 + $0x90] sm:$0xff] }
  0xa1   :  { %490 = vmatmul.mubr.f32.gmra.mxu0 %v331_v43  ;;  %289 = vst.msk [vmem:[#allocation2 + $0xb8] sm:$0xff] %vm92_vm1, %v287_v44  ;;  %159 = vst.msk [vmem:[#allocation2 + $0xb0] sm:$0xff] %vm92_vm1, %v157_v45 }
  0xa2   :  { %494 = vmatprep.mubr.f32.mxu0 %v334_v46 }
  0xa4   :  { %v293_v48 = vpop.permute.xlu0 %292  ;;  %v163_v49 = vpop.permute.xlu1 %162  ;;  %v336_v50 = vld [vmem:[#allocation2 + $0xa8] sm:$0xff]  ;;  %v335_v51 = vld [vmem:[#allocation2 + $0xa0] sm:$0xff] }
  0xa5   :  { %495 = vmatmul.mubr.f32.gmra.mxu0 %v333_v47  ;;  %295 = vst.msk [vmem:[#allocation2 + $0xc8] sm:$0xff] %vm92_vm1, %v293_v48  ;;  %165 = vst.msk [vmem:[#allocation2 + $0xc0] sm:$0xff] %vm92_vm1, %v163_v49 }
  0xa6   :  { %499 = vmatprep.mubr.f32.mxu0 %v336_v50 }
  0xa8   :  { %v299_v52 = vpop.permute.xlu0 %298  ;;  %v169_v53 = vpop.permute.xlu1 %168  ;;  %v338_v54 = vld [vmem:[#allocation2 + $0xb8] sm:$0xff]  ;;  %v337_v55 = vld [vmem:[#allocation2 + $0xb0] sm:$0xff] }
  0xa9   :  { %500 = vmatmul.mubr.f32.gmra.mxu0 %v335_v51  ;;  %301 = vst.msk [vmem:[#allocation2 + $0xd8] sm:$0xff] %vm92_vm1, %v299_v52  ;;  %171 = vst.msk [vmem:[#allocation2 + $0xd0] sm:$0xff] %vm92_vm1, %v169_v53 }
  0xaa   :  { %504 = vmatprep.mubr.f32.mxu0 %v338_v54 }
  0xac   :  { %v305_v56 = vpop.permute.xlu0 %304  ;;  %v175_v57 = vpop.permute.xlu1 %174  ;;  %v340_v58 = vld [vmem:[#allocation2 + $0xc8] sm:$0xff]  ;;  %v339_v59 = vld [vmem:[#allocation2 + $0xc0] sm:$0xff] }
  0xad   :  { %505 = vmatmul.mubr.f32.gmra.mxu0 %v337_v55  ;;  %307 = vst.msk [vmem:[#allocation2 + $0xe8] sm:$0xff] %vm92_vm1, %v305_v56  ;;  %177 = vst.msk [vmem:[#allocation2 + $0xe0] sm:$0xff] %vm92_vm1, %v175_v57 }
  0xae   :  { %509 = vmatprep.mubr.f32.mxu0 %v340_v58 }
  0xb0   :  { %v311_v60 = vpop.permute.xlu0 %310  ;;  %v181_v61 = vpop.permute.xlu1 %180  ;;  %v342_v62 = vld [vmem:[#allocation2 + $0xd8] sm:$0xff]  ;;  %v341_v63 = vld [vmem:[#allocation2 + $0xd0] sm:$0xff] }
  0xb1   :  { %510 = vmatmul.mubr.f32.gmra.mxu0 %v339_v59  ;;  %313 = vst.msk [vmem:[#allocation2 + $0xf8] sm:$0xff] %vm92_vm1, %v311_v60  ;;  %183 = vst.msk [vmem:[#allocation2 + $0xf0] sm:$0xff] %vm92_vm1, %v181_v61 }
  0xb2   :  { %514 = vmatprep.mubr.f32.mxu0 %v342_v62 }
  0xb4   :  { %v344_v0 = vld [vmem:[#allocation2 + $0xe8] sm:$0xff]  ;;  %v343_v1 = vld [vmem:[#allocation2 + $0xe0] sm:$0xff] }
  0xb5   :  { %515 = vmatmul.mubr.f32.gmra.mxu0 %v341_v63 }
  0xb6   :  { %519 = vmatprep.mubr.f32.mxu0 %v344_v0 }
  0xb8   :  { %v346_v2 = vld [vmem:[#allocation2 + $0xf8] sm:$0xff]  ;;  %v345_v3 = vld [vmem:[#allocation2 + $0xf0] sm:$0xff] }
  0xb9   :  { %520 = vmatmul.mubr.f32.gmra.mxu0 %v343_v1 }
  0xba   :  { %524 = vmatprep.mubr.f32.mxu0 %v346_v2 }
  0xbd   :  { %525 = vmatmul.mubr.f32.gmra.mxu0 %v345_v3 }
 0x141   :  { %v8413_v4 = vpop.f32.mrf.mxu0 }
 0x143   :  { %v8414_v6 = vpop.f32.mrf.mxu0 }
 0x144   :  { %v8415_v7 = vadd.f32 %v8414_v6, %v8413_v4 }
 0x145   :  { %v8416_v8 = vpop.f32.mrf.mxu0 }
 0x146   :  { %v452_v9 = vadd.f32 %v8415_v7, %v9665_v5 }
 0x147   :  { %v8417_v10 = vpop.f32.mrf.mxu0 }
 0x148   :  { %v530_v11 = vmax.f32 %v452_v9, 0.0  ;;  %v8418_v12 = vadd.f32 %v8417_v10, %v8416_v8 }
 0x149   :  { %v8419_v13 = vpop.f32.mrf.mxu0 }
 0x14a   :  { %547 = vst.msk [vmem:[#allocation3] sm:$0xff] %vm546_vm2, %v530_v11  ;;  %v457_v14 = vadd.f32 %v8418_v12, %v9665_v5 }
 0x14b   :  { %v8420_v15 = vpop.f32.mrf.mxu0 }
 0x14c   :  { %v531_v16 = vmax.f32 %v457_v14, 0.0  ;;  %v8421_v17 = vadd.f32 %v8420_v15, %v8419_v13 }
 0x14d   :  { %v8422_v18 = vpop.f32.mrf.mxu0 }
 0x14e   :  { %549 = vst.msk [vmem:[#allocation3 + $0x8] sm:$0xff] %vm546_vm2, %v531_v16  ;;  %v462_v19 = vadd.f32 %v8421_v17, %v9665_v5 }
 0x14f   :  { %v8423_v20 = vpop.f32.mrf.mxu0 }
 0x150   :  { %v532_v21 = vmax.f32 %v462_v19, 0.0  ;;  %v8424_v22 = vadd.f32 %v8423_v20, %v8422_v18 }
 0x151   :  { %v8425_v23 = vpop.f32.mrf.mxu0  ;;  %v8070_v0 = vld.sshfl [vmem:[#allocation3 + $0x1] sm:$0x1 pattern:$0x76325410] }
 0x152   :  { %551 = vst.msk [vmem:[#allocation3 + $0x10] sm:$0xff] %vm546_vm2, %v532_v21  ;;  %v467_v24 = vadd.f32 %v8424_v22, %v9665_v5  ;;  %v8072_v4 = vld.sshfl [vmem:[#allocation3 + $0x2] sm:$0x1 pattern:$0x76325410] }
 0x153   :  { %v8426_v25 = vpop.f32.mrf.mxu0  ;;  %v8074_v13 = vld.sshfl [vmem:[#allocation3 + $0x3] sm:$0x1 pattern:$0x76325410] }
 0x154   :  { %v533_v26 = vmax.f32 %v467_v24, 0.0  ;;  %v8427_v27 = vadd.f32 %v8426_v25, %v8425_v23 }
 0x155   :  { %v8428_v28 = vpop.f32.mrf.mxu0  ;;  %v8078_v17 = vld.sshfl [vmem:[#allocation3 + $0x9] sm:$0x1 pattern:$0x76325410] }
 0x156   :  { %553 = vst.msk [vmem:[#allocation3 + $0x18] sm:$0xff] %vm546_vm2, %v533_v26  ;;  %v472_v29 = vadd.f32 %v8427_v27, %v9665_v5 }
 0x157   :  { %v8429_v30 = vpop.f32.mrf.mxu0 }
 0x158   :  { %v534_v31 = vmax.f32 %v472_v29, 0.0  ;;  %v8430_v32 = vadd.f32 %v8429_v30, %v8428_v28 }
 0x159   :  { %v8431_v33 = vpop.f32.mrf.mxu0 }
 0x15a   :  { %555 = vst.msk [vmem:[#allocation3 + $0x20] sm:$0xff] %vm546_vm2, %v534_v31  ;;  %v477_v34 = vadd.f32 %v8430_v32, %v9665_v5 }
 0x15b   :  { %v8432_v35 = vpop.f32.mrf.mxu0 }
 0x15c   :  { %v535_v36 = vmax.f32 %v477_v34, 0.0  ;;  %v8433_v37 = vadd.f32 %v8432_v35, %v8431_v33  ;;  %v8080_v34 = vld.sshfl [vmem:[#allocation3 + $0xa] sm:$0x1 pattern:$0x76325410] }
 0x15d   :  { %v8434_v38 = vpop.f32.mrf.mxu0 }
 0x15e   :  { %557 = vst.msk [vmem:[#allocation3 + $0x28] sm:$0xff] %vm546_vm2, %v535_v36  ;;  %v482_v39 = vadd.f32 %v8433_v37, %v9665_v5 }
 0x15f   :  { %v8435_v40 = vpop.f32.mrf.mxu0 }
 0x160   :  { %v536_v41 = vmax.f32 %v482_v39, 0.0  ;;  %v8436_v42 = vadd.f32 %v8435_v40, %v8434_v38 }
 0x161   :  { %v8437_v43 = vpop.f32.mrf.mxu0 }
 0x162   :  { %559 = vst.msk [vmem:[#allocation3 + $0x30] sm:$0xff] %vm546_vm2, %v536_v41  ;;  %v487_v44 = vadd.f32 %v8436_v42, %v9665_v5 }
 0x163   :  { %v8438_v45 = vpop.f32.mrf.mxu0 }
 0x164   :  { %v537_v46 = vmax.f32 %v487_v44, 0.0  ;;  %v8439_v47 = vadd.f32 %v8438_v45, %v8437_v43  ;;  %v1077_v45 = vld [vmem:[%s13072_s3 + $0xf8] sm:$0xff] }
 0x165   :  { %v8440_v48 = vpop.f32.mrf.mxu0  ;;  %8461 = vmatprep.subr.mxu1 %v1077_v45  ;;  %8531 = vmatprep.subr.mxu0 %v1077_v45  ;;  %v1072_v45 = vld [vmem:[%s13072_s3 + $0xd0] sm:$0xff] }
 0x166   :  { %561 = vst.msk [vmem:[#allocation3 + $0x38] sm:$0xff] %vm546_vm2, %v537_v46  ;;  %v492_v49 = vadd.f32 %v8439_v47, %v9665_v5 }
 0x167   :  { %v8441_v50 = vpop.f32.mrf.mxu0 }
 0x168   :  { %v538_v51 = vmax.f32 %v492_v49, 0.0  ;;  %v8442_v52 = vadd.f32 %v8441_v50, %v8440_v48  ;;  %v1061_v50 = vld [vmem:[%s13072_s3 + $0x78] sm:$0xff] }
 0x169   :  { %v8443_v53 = vpop.f32.mrf.mxu0  ;;  %8462 = vmatpush3.msra.mxu1 %v1061_v50  ;;  %8532 = vmatpush3.msra.mxu0 %v1061_v50 }
 0x16a   :  { %563 = vst.msk [vmem:[#allocation3 + $0x40] sm:$0xff] %vm546_vm2, %v538_v51  ;;  %v497_v54 = vadd.f32 %v8442_v52, %v9665_v5 }
 0x16b   :  { %v8444_v55 = vpop.f32.mrf.mxu0 }
 0x16c   :  { %v539_v56 = vmax.f32 %v497_v54, 0.0  ;;  %v8445_v57 = vadd.f32 %v8444_v55, %v8443_v53  ;;  %v8082_v55 = vld.sshfl [vmem:[#allocation3 + $0xb] sm:$0x1 pattern:$0x76325410] }
 0x16d   :  { %v8446_v58 = vpop.f32.mrf.mxu0 }
 0x16e   :  { %565 = vst.msk [vmem:[#allocation3 + $0x48] sm:$0xff] %vm546_vm2, %v539_v56  ;;  %v502_v59 = vadd.f32 %v8445_v57, %v9665_v5  ;;  %v8197_v56 = vld.sshfl [vmem:[#allocation3 + $0x12] sm:$0x1 pattern:$0x76325410] }
 0x16f   :  { %v8447_v60 = vpop.f32.mrf.mxu0 }
 0x170   :  { %v540_v61 = vmax.f32 %v502_v59, 0.0  ;;  %v8448_v62 = vadd.f32 %v8447_v60, %v8446_v58 }
 0x171   :  { %v8449_v63 = vpop.f32.mrf.mxu0  ;;  %v8071_v1 = vld.sshfl [vmem:[#allocation3 + $0x41] sm:$0x1 pattern:$0x76325410] }
 0x172   :  { %567 = vst.msk [vmem:[#allocation3 + $0x50] sm:$0xff] %vm546_vm2, %v540_v61  ;;  %v507_v2 = vadd.f32 %v8448_v62, %v9665_v5  ;;  %v633_v3 = vrot.slane %v8071_v1, 7  ;;  %v8073_v6 = vld.sshfl [vmem:[#allocation3 + $0x42] sm:$0x1 pattern:$0x76325410] }
 0x173   :  { %v8450_v7 = vpop.f32.mrf.mxu0  ;;  %v663_v8 = vrot.slane %v8073_v6, 7  ;;  %v8075_v9 = vld.sshfl [vmem:[#allocation3 + $0x43] sm:$0x1 pattern:$0x76325410] }
 0x174   :  { %v541_v10 = vmax.f32 %v507_v2, 0.0  ;;  %v8451_v11 = vadd.f32 %v8450_v7, %v8449_v63  ;;  %v634_v12 = vsel %vm602_vm3, %v633_v3, %v8070_v0  ;;  %v9691_v14 = vrot.slane %v8075_v9, 7  ;;  %v8086_v62 = vld.sshfl [vmem:[#allocation3 + $0x11] sm:$0x1 pattern:$0x76325410] }
 0x175   :  { %v8452_v15 = vpop.f32.mrf.mxu0  ;;  %v635_v16 = vsel %vm604_vm4, %v633_v3, %v634_v12  ;;  %v8079_v18 = vld.sshfl [vmem:[#allocation3 + $0x49] sm:$0x1 pattern:$0x76325410]  ;;  %v664_v19 = vsel %vm602_vm3, %v663_v8, %v8072_v4  ;;  %v1076_v0 = vld [vmem:[%s13072_s3 + $0xf0] sm:$0xff] }
 0x176   :  { %569 = vst.msk [vmem:[#allocation3 + $0x58] sm:$0xff] %vm546_vm2, %v541_v10  ;;  %v512_v20 = vadd.f32 %v8451_v11, %v9665_v5  ;;  %v636_v21 = vsel %vm606_vm5, %v633_v3, %v635_v16  ;;  %v750_v22 = vrot.slane %v8079_v18, 7  ;;  %v665_v23 = vsel %vm604_vm4, %v663_v8, %v664_v19  ;;  %v8081_v24 = vld.sshfl [vmem:[#allocation3 + $0x4a] sm:$0x1 pattern:$0x76325410]  ;;  %8463 = vmatprep.subr.mxu1 %v1076_v0 }
 0x177   :  { %v8453_v25 = vpop.f32.mrf.mxu0  ;;  %v637_v26 = vsel %vm608_vm6, %v633_v3, %v636_v21  ;;  %v779_v27 = vrot.slane %v8081_v24, 7  ;;  %v694_v28 = vsel %vm602_vm3, %v9691_v14, %v8074_v13  ;;  %v8083_v29 = vld.sshfl [vmem:[#allocation3 + $0x4b] sm:$0x1 pattern:$0x76325410]  ;;  %v666_v33 = vsel %vm606_vm5, %v663_v8, %v665_v23  ;;  %v1060_v7 = vld [vmem:[%s13072_s3 + $0x70] sm:$0xff]  ;;  %8533 = vmatprep.subr.mxu0 %v1076_v0 }
 0x178   :  { %v542_v30 = vmax.f32 %v512_v20, 0.0  ;;  %v8454_v31 = vadd.f32 %v8453_v25, %v8452_v15  ;;  %638 = vrot.lane.b32.xlu0 %v637_v26, %s9295_s2  ;;  %v751_v32 = vsel %vm602_vm3, %v750_v22, %v8078_v17  ;;  %v695_v39 = vsel %vm604_vm4, %v9691_v14, %v694_v28  ;;  %v8094_v12 = vld.sshfl [vmem:[#allocation3 + $0x19] sm:$0x1 pattern:$0x76325410]  ;;  %v1075_v13 = vld [vmem:[%s13072_s3 + $0xe8] sm:$0xff]  ;;  %8464 = vmatpush3.msra.mxu1 %v1060_v7 }
 0x179   :  { %v8198_v35 = vld.sshfl [vmem:[#allocation3 + $0x52] sm:$0x1 pattern:$0x76325410]  ;;  %v8455_v36 = vpop.f32.mrf.mxu0  ;;  %v752_v37 = vsel %vm604_vm4, %v750_v22, %v751_v32  ;;  %v780_v38 = vsel %vm602_vm3, %v779_v27, %v8080_v34  ;;  %v9709_v40 = vrot.slane %v8083_v29, 7  ;;  %v667_v48 = vsel %vm608_vm6, %v663_v8, %v666_v33  ;;  %v1059_v18 = vld [vmem:[%s13072_s3 + $0x68] sm:$0xff]  ;;  %8534 = vmatpush3.msra.mxu0 %v1060_v7  ;;  %8465 = vmatprep.subr.mxu1 %v1075_v13 }
 0x17a   :  { %v9711_v41 = vrot.slane %v8198_v35, 7  ;;  %571 = vst.msk [vmem:[#allocation3 + $0x60] sm:$0xff] %vm546_vm2, %v542_v30  ;;  %v517_v42 = vadd.f32 %v8454_v31, %v9665_v5  ;;  %v753_v43 = vsel %vm606_vm5, %v750_v22, %v752_v37  ;;  %v781_v44 = vsel %vm604_vm4, %v779_v27, %v780_v38  ;;  %v8087_v49 = vld.sshfl [vmem:[#allocation3 + $0x51] sm:$0x1 pattern:$0x76325410]  ;;  %8535 = vmatprep.subr.mxu0 %v1075_v13 }
 0x17b   :  { %v8456_v46 = vpop.f32.mrf.mxu0  ;;  %v754_v47 = vsel %vm608_vm6, %v750_v22, %v753_v43  ;;  %v782_v53 = vsel %vm606_vm5, %v779_v27, %v781_v44  ;;  %v696_v54 = vsel %vm606_vm5, %v9691_v14, %v695_v39  ;;  %v809_v58 = vsel %vm602_vm3, %v9709_v40, %v8082_v55  ;;  %v1074_v22 = vld [vmem:[%s13072_s3 + $0xe0] sm:$0xff]  ;;  %8466 = vmatpush3.msra.mxu1 %v1059_v18  ;;  %v8221_v33 = vld.sshfl [vmem:[#allocation3 + $0x2a] sm:$0x1 pattern:$0x76325410]  ;;  %v1073_v37 = vld [vmem:[%s13072_s3 + $0xd8] sm:$0xff] }
 0x17c   :  { %v543_v51 = vmax.f32 %v517_v42, 0.0  ;;  %v8457_v52 = vadd.f32 %v8456_v46, %v8455_v36  ;;  %755 = vrot.lane.b32.xlu1 %v754_v47, %s9295_s2  ;;  %668 = vrot.lane.b32.xlu0 %v667_v48, %s9294_s21  ;;  %v864_v59 = vrot.slane %v8087_v49, 7  ;;  %v810_v61 = vsel %vm604_vm4, %v9709_v40, %v809_v58  ;;  %v8213_v23 = vld.sshfl [vmem:[#allocation3 + $0x22] sm:$0x1 pattern:$0x76325410] }
 0x17d   :  { %v8458_v57 = vpop.f32.mrf.mxu0  ;;  %v894_v63 = vsel %vm602_vm3, %v9711_v41, %v8197_v56  ;;  %v783_v2 = vsel %vm608_vm6, %v779_v27, %v782_v53  ;;  %v9744_v3 = vsel %vm608_vm6, %v9691_v14, %v696_v54  ;;  %v8095_v6 = vld.sshfl [vmem:[#allocation3 + $0x59] sm:$0x1 pattern:$0x76325410]  ;;  %v811_v10 = vsel %vm606_vm5, %v9709_v40, %v810_v61  ;;  %8536 = vmatpush3.msra.mxu0 %v1059_v18  ;;  %v1055_v58 = vld [vmem:[%s13072_s3 + $0x48] sm:$0xff] }
 0x17e   :  { %573 = vst.msk [vmem:[#allocation3 + $0x68] sm:$0xff] %vm546_vm2, %v543_v51  ;;  %v522_v60 = vadd.f32 %v8457_v52, %v9665_v5  ;;  %v865_v4 = vsel %vm602_vm3, %v864_v59, %v8086_v62  ;;  %v978_v16 = vrot.slane %v8095_v6, 7  ;;  %v895_v17 = vsel %vm604_vm4, %v9711_v41, %v894_v63  ;;  %v8245_v28 = vld.sshfl [vmem:[#allocation3 + $0x24] sm:$0x1 pattern:$0x76325410]  ;;  %8467 = vmatprep.subr.mxu1 %v1074_v22 }
 0x17f   :  { %v8459_v1 = vpop.f32.mrf.mxu0  ;;  %v866_v11 = vsel %vm604_vm4, %v864_v59, %v865_v4  ;;  %v9774_v25 = vsel %vm608_vm6, %v9709_v40, %v811_v10  ;;  %v896_v32 = vsel %vm606_vm5, %v9711_v41, %v895_v17  ;;  %v1057_v38 = vld [vmem:[%s13072_s3 + $0x58] sm:$0xff]  ;;  %8537 = vmatprep.subr.mxu0 %v1074_v22  ;;  %v1056_v51 = vld [vmem:[%s13072_s3 + $0x50] sm:$0xff]  ;;  %v8253_v52 = vld.sshfl [vmem:[#allocation3 + $0x2c] sm:$0x1 pattern:$0x76325410] }
 0x180   :  { %v544_v8 = vmax.f32 %v522_v60, 0.0  ;;  %v8460_v9 = vadd.f32 %v8459_v1, %v8458_v57  ;;  %784 = vrot.lane.b32.xlu1 %v783_v2, %s9294_s21  ;;  %698 = vrot.lane.b32.xlu0 %v9744_v3, %s9296_s17  ;;  %v867_v15 = vsel %vm606_vm5, %v864_v59, %v866_v11  ;;  %v979_v27 = vsel %vm602_vm3, %v978_v16, %v8094_v12  ;;  %v8206_v46 = vld.sshfl [vmem:[#allocation3 + $0x5a] sm:$0x1 pattern:$0x76325410]  ;;  %v1070_v62 = vld [vmem:[%s13072_s3 + $0xc0] sm:$0xff] }
 0x181   :  { %v8214_v14 = vld.sshfl [vmem:[#allocation3 + $0x62] sm:$0x1 pattern:$0x76325410]  ;;  %v9777_v26 = vsel %vm608_vm6, %v864_v59, %v867_v15  ;;  %v980_v31 = vsel %vm604_vm4, %v978_v16, %v979_v27  ;;  %v9818_v50 = vsel %vm608_vm6, %v9711_v41, %v896_v32  ;;  %v1071_v41 = vld [vmem:[%s13072_s3 + $0xc8] sm:$0xff]  ;;  %v3575_v59 = vrot.slane %v8206_v46, 7 }
 0x182   :  { %v9765_v19 = vrot.slane %v8214_v14, 7  ;;  %v8246_v20 = vld.sshfl [vmem:[#allocation3 + $0x64] sm:$0x1 pattern:$0x76325410]  ;;  %575 = vst.msk [vmem:[#allocation3 + $0x70] sm:$0xff] %vm546_vm2, %v544_v8  ;;  %v527_v21 = vadd.f32 %v8460_v9, %v9665_v5  ;;  %v981_v44 = vsel %vm606_vm5, %v978_v16, %v980_v31 }
 0x183   :  { %v4400_v24 = vrot.slane %v8246_v20, 7  ;;  %v1058_v5 = vld [vmem:[%s13072_s3 + $0x60] sm:$0xff]  ;;  %v9837_v57 = vsel %vm608_vm6, %v978_v16, %v981_v44  ;;  %v8205_v4 = vld.sshfl [vmem:[#allocation3 + $0x1a] sm:$0x1 pattern:$0x76325410] }
 0x184   :  { %v5596_v29 = vsel %vm602_vm3, %v9765_v19, %v8213_v23  ;;  %v545_v30 = vmax.f32 %v527_v21, 0.0  ;;  %813 = vrot.lane.b32.xlu1 %v9774_v25, %s9296_s17  ;;  %869 = vrot.lane.b32.xlu0 %v9777_v26, %s9295_s2  ;;  %v1054_v1 = vld [vmem:[%s13072_s3 + $0x40] sm:$0xff]  ;;  %v1069_v6 = vld [vmem:[%s13072_s3 + $0xb8] sm:$0xff]  ;;  %v1008_v8 = vsel %vm602_vm3, %v3575_v59, %v8205_v4 }
 0x185   :  { %v4401_v34 = vsel %vm602_vm3, %v4400_v24, %v8245_v28  ;;  %v5597_v35 = vsel %vm604_vm4, %v9765_v19, %v5596_v29  ;;  %v8222_v36 = vld.sshfl [vmem:[#allocation3 + $0x6a] sm:$0x1 pattern:$0x76325410]  ;;  %8468 = vmatpush3.msra.mxu1 %v1058_v5  ;;  %8538 = vmatpush3.msra.mxu0 %v1058_v5  ;;  %v1053_v7 = vld [vmem:[%s13072_s3 + $0x38] sm:$0xff]  ;;  %v1068_v9 = vld [vmem:[%s13072_s3 + $0xb0] sm:$0xff]  ;;  %v1009_v12 = vsel %vm604_vm4, %v3575_v59, %v1008_v8 }
 0x186   :  { %v4402_v39 = vsel %vm604_vm4, %v4400_v24, %v4401_v34  ;;  %v5598_v40 = vsel %vm606_vm5, %v9765_v19, %v5597_v35  ;;  %v9804_v42 = vrot.slane %v8222_v36, 7  ;;  %v8254_v43 = vld.sshfl [vmem:[#allocation3 + $0x6c] sm:$0x1 pattern:$0x76325410]  ;;  %577 = vst.msk [vmem:[#allocation3 + $0x78] sm:$0xff] %vm546_vm2, %v545_v30  ;;  %8469 = vmatprep.subr.mxu1 %v1073_v37  ;;  %8539 = vmatprep.subr.mxu0 %v1073_v37 }
 0x187   :  { %v4403_v47 = vsel %vm606_vm5, %v4400_v24, %v4402_v39  ;;  %v9814_v48 = vsel %vm608_vm6, %v9765_v19, %v5598_v40  ;;  %v4514_v49 = vrot.slane %v8254_v43, 7  ;;  %8470 = vmatpush3.msra.mxu1 %v1057_v38  ;;  %8540 = vmatpush3.msra.mxu0 %v1057_v38  ;;  %v9874_v10 = vld [vmem:[%s13072_s3 + $0x30] sm:$0xff]  ;;  %v8099_v13 = vld.sshfl [vmem:[#allocation3 + $0x5b] sm:$0x1 pattern:$0x76325410]  ;;  %v1010_v14 = vsel %vm606_vm5, %v3575_v59, %v1009_v12 }
 0x188   :  { %13156 = vst [vmem:[#allocation11_spill] sm:$0xff] %v9814_v48  ;;  %v9824_v53 = vsel %vm608_vm6, %v4400_v24, %v4403_v47  ;;  %v5710_v54 = vsel %vm602_vm3, %v9804_v42, %v8221_v33  ;;  %898 = vrot.lane.b32.xlu0 %v9818_v50, %s9294_s21  ;;  %8471 = vmatprep.subr.mxu1 %v1072_v45  ;;  %v8091_v11 = vld.sshfl [vmem:[#allocation3 + $0x53] sm:$0x1 pattern:$0x76325410]  ;;  %v1036_v21 = vrot.slane %v8099_v13, 7 }
 0x189   :  { %13157 = vst [vmem:[#allocation12_spill] sm:$0xff] %v9824_v53  ;;  %v4515_v55 = vsel %vm602_vm3, %v4514_v49, %v8253_v52  ;;  %v5711_v56 = vsel %vm604_vm4, %v9804_v42, %v5710_v54  ;;  %983 = vrot.lane.b32.xlu1 %v9837_v57, %s9295_s2  ;;  %8472 = vmatpush3.msra.mxu1 %v1056_v51  ;;  %v8114_v15 = vld.sshfl [vmem:[#allocation3 + $0x4c] sm:$0x1 pattern:$0x76325410]  ;;  %v922_v20 = vrot.slane %v8091_v11, 7 }
 0x18a   :  { %v4516_v60 = vsel %vm604_vm4, %v4514_v49, %v4515_v55  ;;  %v5712_v61 = vsel %vm606_vm5, %v9804_v42, %v5711_v56  ;;  %8473 = vmatprep.subr.mxu1 %v1071_v41  ;;  %8541 = vmatprep.subr.mxu0 %v1072_v45  ;;  %v9880_v16 = vsel %vm608_vm6, %v3575_v59, %v1010_v14  ;;  %v8090_v17 = vld.sshfl [vmem:[#allocation3 + $0x13] sm:$0x1 pattern:$0x76325410]  ;;  %v1497_v23 = vrot.slane %v8114_v15, 7  ;;  %v9889_v28 = vld [vmem:[%s13072_s3 + $0xa8] sm:$0xff] }
 0x18b   :  { %v4517_v63 = vsel %vm606_vm5, %v4514_v49, %v4516_v60  ;;  %v9853_v0 = vsel %vm608_vm6, %v9804_v42, %v5712_v61  ;;  %8474 = vmatpush3.msra.mxu1 %v1055_v58  ;;  %8542 = vmatpush3.msra.mxu0 %v1056_v51  ;;  %v8098_v18 = vld.sshfl [vmem:[#allocation3 + $0x1b] sm:$0x1 pattern:$0x76325410]  ;;  %v923_v27 = vsel %vm602_vm3, %v922_v20, %v8090_v17  ;;  %v9894_v29 = vld [vmem:[%s13072_s3 + $0x28] sm:$0xff]  ;;  %v9904_v34 = vld [vmem:[%s13072_s3 + $0xa0] sm:$0xff] }
 0x18c   :  { %13158 = vst [vmem:[#allocation13_spill] sm:$0xff] %v9853_v0  ;;  %v9859_v2 = vsel %vm608_vm6, %v4514_v49, %v4517_v63  ;;  %8475 = vmatprep.subr.mxu1 %v1070_v62  ;;  %8543 = vmatprep.subr.mxu0 %v1071_v41  ;;  %v8106_v22 = vld.sshfl [vmem:[#allocation3 + $0x44] sm:$0x1 pattern:$0x76325410]  ;;  %v1037_v5 = vsel %vm602_vm3, %v1036_v21, %v8098_v18  ;;  %v9927_v45 = vld [vmem:[%s13072_s3 + $0x98] sm:$0xff] }
 0x18d   :  { %13159 = vst [vmem:[#allocation14_spill] sm:$0xff] %v9859_v2  ;;  %8476 = vmatpush3.msra.mxu1 %v1054_v1  ;;  %8544 = vmatpush3.msra.mxu0 %v1055_v58  ;;  %v8116_v24 = vld.sshfl [vmem:[#allocation3 + $0x4d] sm:$0x1 pattern:$0x76325410]  ;;  %v924_v30 = vsel %vm604_vm4, %v922_v20, %v923_v27  ;;  %v1038_v31 = vsel %vm604_vm4, %v1036_v21, %v1037_v5  ;;  %v9898_v33 = vrot.slane %v8106_v22, 7 }
 0x18e   :  { %8477 = vmatprep.subr.mxu1 %v1069_v6  ;;  %1012 = vrot.lane.b32.xlu1 %v9880_v16, %s9294_s21  ;;  %v8113_v32 = vld.sshfl [vmem:[#allocation3 + $0xc] sm:$0x1 pattern:$0x76325410]  ;;  %v925_v35 = vsel %vm606_vm5, %v922_v20, %v924_v30  ;;  %v1039_v36 = vsel %vm606_vm5, %v1036_v21, %v1038_v31  ;;  %v9909_v38 = vrot.slane %v8116_v24, 7  ;;  %v9915_v39 = vld [vmem:[%s13072_s3 + $0x20] sm:$0xff] }
 0x18f   :  { %8478 = vmatpush3.msra.mxu1 %v1053_v7  ;;  %8545 = vmatprep.subr.mxu0 %v1070_v62  ;;  %v1498_v37 = vsel %vm602_vm3, %v1497_v23, %v8113_v32  ;;  %v8230_v40 = vld.sshfl [vmem:[#allocation3 + $0x54] sm:$0x1 pattern:$0x76325410]  ;;  %v9918_v43 = vsel %vm608_vm6, %v922_v20, %v925_v35  ;;  %v9921_v44 = vsel %vm608_vm6, %v1036_v21, %v1039_v36  ;;  %v9936_v47 = vld [vmem:[%s13072_s3 + $0x18] sm:$0xff]  ;;  %v9964_v61 = vld [vmem:[%s13072_s3 + $0x88] sm:$0xff] }
 0x190   :  { %8479 = vmatprep.subr.mxu1 %v1068_v9  ;;  %8546 = vmatpush3.msra.mxu0 %v1054_v1  ;;  %v8105_v46 = vld.sshfl [vmem:[#allocation3 + $0x4] sm:$0x1 pattern:$0x76325410]  ;;  %v1499_v49 = vsel %vm604_vm4, %v1497_v23, %v1498_v37  ;;  %v4172_v52 = vrot.slane %v8230_v40, 7  ;;  %v9948_v56 = vld [vmem:[%s13072_s3 + $0x90] sm:$0xff] }
 0x191   :  { %8480 = vmatpush3.msra.mxu1 %v9874_v10  ;;  %8547 = vmatprep.subr.mxu0 %v1069_v6  ;;  %v8115_v51 = vld.sshfl [vmem:[#allocation3 + $0xd] sm:$0x1 pattern:$0x76325410]  ;;  %v1384_v41 = vsel %vm602_vm3, %v9898_v33, %v8105_v46  ;;  %v9954_v59 = vld [vmem:[%s13072_s3 + $0x10] sm:$0xff]  ;;  %v1500_v60 = vsel %vm606_vm5, %v1497_v23, %v1499_v49  ;;  %v9983_v11 = vld [vmem:[%s13072_s3 + $0x80] sm:$0xff] }
 0x192   :  { %8481 = vmatprep.subr.mxu1 %v9889_v28  ;;  %927 = vrot.lane.b32.xlu0 %v9918_v43, %s9296_s17  ;;  %v8238_v54 = vld.sshfl [vmem:[#allocation3 + $0x5c] sm:$0x1 pattern:$0x76325410]  ;;  %v1527_v55 = vsel %vm602_vm3, %v9909_v38, %v8115_v51  ;;  %v1385_v1 = vsel %vm604_vm4, %v9898_v33, %v1384_v41  ;;  %v1501_v8 = vsel %vm608_vm6, %v1497_v23, %v1500_v60  ;;  %v9995_v15 = vld [vmem:[%s13072_s3] sm:$0xff] }
 0x193   :  { %8482 = vmatpush3.msra.mxu1 %v9894_v29  ;;  %1041 = vrot.lane.b32.xlu1 %v9921_v44, %s9296_s17  ;;  %v8108_v58 = vld.sshfl [vmem:[#allocation3 + $0x45] sm:$0x1 pattern:$0x76325410]  ;;  %v4286_v63 = vrot.slane %v8238_v54, 7  ;;  %v1528_v4 = vsel %vm604_vm4, %v9909_v38, %v1527_v55  ;;  %v1386_v13 = vsel %vm606_vm5, %v9898_v33, %v1385_v1  ;;  %v1109_v24 = vld [vmem:[%s13072_s3 + $0x1f8] sm:$0xff] }
 0x194   :  { %8483 = vmatprep.subr.mxu1 %v9904_v34  ;;  %8548 = vmatpush3.msra.mxu0 %v1053_v7  ;;  %v8229_v62 = vld.sshfl [vmem:[#allocation3 + $0x14] sm:$0x1 pattern:$0x76325410]  ;;  %v9976_v7 = vld [vmem:[%s13072_s3 + $0x8] sm:$0xff]  ;;  %v1529_v14 = vsel %vm606_vm5, %v9909_v38, %v1528_v4  ;;  %v1387_v27 = vsel %vm608_vm6, %v9898_v33, %v1386_v13 }
 0x195   :  { %8484 = vmatpush3.msra.mxu1 %v9915_v39  ;;  %8549 = vmatprep.subr.mxu0 %v1068_v9  ;;  %v8124_v6 = vld.sshfl [vmem:[#allocation3 + $0x55] sm:$0x1 pattern:$0x76325410] }
 0x196   :  { %8485 = vmatprep.subr.mxu1 %v9927_v45  ;;  %1359 = vrot.lane.b32.xlu0 %v9744_v3, %s9295_s2  ;;  %v4173_v3 = vsel %vm602_vm3, %v4172_v52, %v8229_v62  ;;  %v8132_v9 = vld.sshfl [vmem:[#allocation3 + $0x5d] sm:$0x1 pattern:$0x76325410]  ;;  %v1640_v22 = vrot.slane %v8124_v6, 7 }
 0x197   :  { %8486 = vmatpush3.msra.mxu1 %v9936_v47  ;;  %1473 = vrot.lane.b32.xlu1 %v9774_v25, %s9295_s2  ;;  %v1412_v25 = vrot.slane %v8108_v58, 7  ;;  %v8237_v12 = vld.sshfl [vmem:[#allocation3 + $0x1c] sm:$0x1 pattern:$0x76325410]  ;;  %v4174_v17 = vsel %vm604_vm4, %v4172_v52, %v4173_v3  ;;  %v1754_v23 = vrot.slane %v8132_v9, 7 }
 0x198   :  { %8487 = vmatprep.subr.mxu1 %v9948_v56  ;;  %v8107_v18 = vld.sshfl [vmem:[#allocation3 + $0x5] sm:$0x1 pattern:$0x76325410]  ;;  %8550 = vmatpush3.msra.mxu0 %v9874_v10  ;;  %v4287_v20 = vsel %vm602_vm3, %v4286_v63, %v8237_v12  ;;  %v1530_v10 = vsel %vm608_vm6, %v9909_v38, %v1529_v14  ;;  %v4175_v5 = vsel %vm606_vm5, %v4172_v52, %v4174_v17 }
 0x199   :  { %8488 = vmatpush3.msra.mxu1 %v9954_v59  ;;  %v1413_v21 = vsel %vm602_vm3, %v1412_v25, %v8107_v18  ;;  %8551 = vmatprep.subr.mxu0 %v9889_v28  ;;  %v8123_v30 = vld.sshfl [vmem:[#allocation3 + $0x15] sm:$0x1 pattern:$0x76325410]  ;;  %v4288_v31 = vsel %vm604_vm4, %v4286_v63, %v4287_v20 }
 0x19a   :  { %8489 = vmatprep.subr.mxu1 %v9964_v61  ;;  %1587 = vrot.lane.b32.xlu0 %v9918_v43, %s9295_s2  ;;  %v1414_v28 = vsel %vm604_vm4, %v1412_v25, %v1413_v21  ;;  %v8131_v32 = vld.sshfl [vmem:[#allocation3 + $0x1d] sm:$0x1 pattern:$0x76325410]  ;;  %v1641_v33 = vsel %vm602_vm3, %v1640_v22, %v8123_v30  ;;  %v4289_v37 = vsel %vm606_vm5, %v4286_v63, %v4288_v31 }
 0x19b   :  { %1502 = vrot.lane.b32.xlu1 %v1501_v8, %s9294_s21  ;;  %8490 = vmatpush3.msra.mxu1 %v9976_v7  ;;  %v1755_v35 = vsel %vm602_vm3, %v1754_v23, %v8131_v32  ;;  %v8146_v36 = vld.sshfl [vmem:[#allocation3 + $0x4e] sm:$0x1 pattern:$0x76325410]  ;;  %v1415_v38 = vsel %vm606_vm5, %v1412_v25, %v1414_v28  ;;  %v1642_v40 = vsel %vm604_vm4, %v1640_v22, %v1641_v33 }
 0x19c   :  { %8491 = vmatprep.subr.mxu1 %v9983_v11  ;;  %8552 = vmatpush3.msra.mxu0 %v9894_v29  ;;  %v10022_v29 = vsel %vm608_vm6, %v4172_v52, %v4175_v5  ;;  %v2208_v46 = vrot.slane %v8146_v36, 7  ;;  %v8138_v49 = vld.sshfl [vmem:[#allocation3 + $0x46] sm:$0x1 pattern:$0x76325410]  ;;  %v10037_v51 = vsel %vm608_vm6, %v4286_v63, %v4289_v37  ;;  %v1643_v54 = vsel %vm606_vm5, %v1640_v22, %v1642_v40 }
 0x19d   :  { %8492 = vmatpush3.msra.mxu1 %v9995_v15  ;;  %8553 = vmatprep.subr.mxu0 %v9904_v34  ;;  %13160 = vst [vmem:[#allocation15_spill] sm:$0xff] %v10022_v29  ;;  %v1756_v34 = vsel %vm604_vm4, %v1754_v23, %v1755_v35  ;;  %13161 = vst [vmem:[#allocation16_spill] sm:$0xff] %v10037_v51  ;;  %v8148_v52 = vld.sshfl [vmem:[#allocation3 + $0x4f] sm:$0x1 pattern:$0x76325410] }
 0x19e   :  { %1388 = vrot.lane.b32.xlu0 %v1387_v27, %s9294_s21  ;;  %8496 = vmatprep.subr.mxu1 %v1109_v24  ;;  %v8145_v41 = vld.sshfl [vmem:[#allocation3 + $0xe] sm:$0x1 pattern:$0x76325410]  ;;  %v2094_v55 = vrot.slane %v8138_v49, 7  ;;  %v2237_v58 = vrot.slane %v8148_v52, 7 }
 0x19f   :  { %1531 = vrot.lane.b32.xlu1 %v1530_v10, %s9296_s17  ;;  %8554 = vmatpush3.msra.mxu0 %v9915_v39  ;;  %v1416_v39 = vsel %vm608_vm6, %v1412_v25, %v1415_v38  ;;  %v8137_v62 = vld.sshfl [vmem:[#allocation3 + $0x6] sm:$0x1 pattern:$0x76325410] }
 0x1a0   :  { %8555 = vmatprep.subr.mxu0 %v9927_v45  ;;  %v1757_v45 = vsel %vm606_vm5, %v1754_v23, %v1756_v34  ;;  %v8147_v63 = vld.sshfl [vmem:[#allocation3 + $0xf] sm:$0x1 pattern:$0x76325410]  ;;  %v2095_v25 = vsel %vm602_vm3, %v2094_v55, %v8137_v62 }
 0x1a1   :  { %8556 = vmatpush3.msra.mxu0 %v9936_v47  ;;  %v2209_v47 = vsel %vm602_vm3, %v2208_v46, %v8145_v41  ;;  %v10052_v60 = vsel %vm608_vm6, %v1754_v23, %v1757_v45  ;;  %v8154_v1 = vld.sshfl [vmem:[#allocation3 + $0x56] sm:$0x1 pattern:$0x76325410]  ;;  %v2238_v6 = vsel %vm602_vm3, %v2237_v58, %v8147_v63  ;;  %v2096_v17 = vsel %vm604_vm4, %v2094_v55, %v2095_v25  ;;  %v2506_v45 = vld [vmem:[%s13072_s3 + $0xf8] sm:$0xff] }
 0x1a2   :  { %1616 = vrot.lane.b32.xlu0 %v10022_v29, %s9294_s21  ;;  %8557 = vmatprep.subr.mxu0 %v9948_v56  ;;  %v10049_v56 = vsel %vm608_vm6, %v1640_v22, %v1643_v54  ;;  %v8140_v4 = vld.sshfl [vmem:[#allocation3 + $0x47] sm:$0x1 pattern:$0x76325410]  ;;  %v2322_v8 = vrot.slane %v8154_v1, 7  ;;  %v2239_v18 = vsel %vm604_vm4, %v2237_v58, %v2238_v6  ;;  %v2097_v28 = vsel %vm606_vm5, %v2094_v55, %v2096_v17 }
 0x1a3   :  { %1701 = vrot.lane.b32.xlu1 %v9921_v44, %s9295_s2  ;;  %8558 = vmatpush3.msra.mxu0 %v9954_v59  ;;  %v8069_v59 = vld.sshfl [vmem:[#allocation3 + $0x40] sm:$0x1 pattern:$0x76325410]  ;;  %v2123_v22 = vrot.slane %v8140_v4, 7  ;;  %v2240_v32 = vsel %vm606_vm5, %v2237_v58, %v2239_v18 }
 0x1a4   :  { %8559 = vmatprep.subr.mxu0 %v9964_v61  ;;  %v2210_v61 = vsel %vm604_vm4, %v2208_v46, %v2209_v47  ;;  %v601_v3 = vrot.slane %v8069_v59, 7  ;;  %v8068_v9 = vld.sshfl [vmem:[#allocation3] sm:$0x1 pattern:$0x76325410]  ;;  %v2241_v52 = vsel %vm608_vm6, %v2237_v58, %v2240_v32 }
 0x1a5   :  { %8560 = vmatpush3.msra.mxu0 %v9976_v7  ;;  %v8162_v7 = vld.sshfl [vmem:[#allocation3 + $0x5e] sm:$0x1 pattern:$0x76325410]  ;;  %v2211_v13 = vsel %vm606_vm5, %v2208_v46, %v2210_v61 }
 0x1a6   :  { %1417 = vrot.lane.b32.xlu0 %v1416_v39, %s9296_s17  ;;  %8561 = vmatprep.subr.mxu0 %v9983_v11  ;;  %v603_v12 = vsel %vm602_vm3, %v601_v3, %v8068_v9  ;;  %v8153_v14 = vld.sshfl [vmem:[#allocation3 + $0x16] sm:$0x1 pattern:$0x76325410]  ;;  %v2436_v23 = vrot.slane %v8162_v7, 7 }
 0x1a7   :  { %1730 = vrot.lane.b32.xlu1 %v10037_v51, %s9294_s21  ;;  %8562 = vmatpush3.msra.mxu0 %v9995_v15  ;;  %v605_v11 = vsel %vm604_vm4, %v601_v3, %v603_v12  ;;  %v8156_v20 = vld.sshfl [vmem:[#allocation3 + $0x57] sm:$0x1 pattern:$0x76325410]  ;;  %v2323_v21 = vsel %vm602_vm3, %v2322_v8, %v8153_v14 }
 0x1a8   :  { %v607_v15 = vsel %vm606_vm5, %v601_v3, %v605_v11  ;;  %v8077_v27 = vld.sshfl [vmem:[#allocation3 + $0x48] sm:$0x1 pattern:$0x76325410]  ;;  %v2324_v35 = vsel %vm604_vm4, %v2322_v8, %v2323_v21  ;;  %v2351_v37 = vrot.slane %v8156_v20, 7  ;;  %8601 = vmatprep.subr.mxu0 %v2506_v45 }
 0x1a9   :  { %v609_v24 = vsel %vm608_vm6, %v601_v3, %v607_v15  ;;  %v8139_v5 = vld.sshfl [vmem:[#allocation3 + $0x7] sm:$0x1 pattern:$0x76325410]  ;;  %v723_v31 = vrot.slane %v8077_v27, 7  ;;  %v2325_v41 = vsel %vm606_vm5, %v2322_v8, %v2324_v35 }
 0x1aa   :  { %1645 = vrot.lane.b32.xlu0 %v10049_v56, %s9296_s17  ;;  %v8164_v30 = vld.sshfl [vmem:[#allocation3 + $0x5f] sm:$0x1 pattern:$0x76325410]  ;;  %612 = vst.msk [vmem:[#allocation4] sm:$0x3] %vm611_vm7, %v609_v24  ;;  %v2124_v40 = vsel %vm602_vm3, %v2123_v22, %v8139_v5  ;;  %v10102_v61 = vsel %vm608_vm6, %v2322_v8, %v2325_v41 }
 0x1ab   :  { %1759 = vrot.lane.b32.xlu1 %v10052_v60, %s9296_s17  ;;  %v8076_v33 = vld.sshfl [vmem:[#allocation3 + $0x8] sm:$0x1 pattern:$0x76325410]  ;;  %v2125_v63 = vsel %vm604_vm4, %v2123_v22, %v2124_v40 }
 0x1ac   :  { %v8161_v36 = vld.sshfl [vmem:[#allocation3 + $0x1e] sm:$0x1 pattern:$0x76325410]  ;;  %v724_v38 = vsel %vm602_vm3, %v723_v31, %v8076_v33  ;;  %v2126_v3 = vsel %vm606_vm5, %v2123_v22, %v2125_v63 }
 0x1ad   :  { %v2437_v34 = vsel %vm602_vm3, %v2436_v23, %v8161_v36  ;;  %v725_v49 = vsel %vm604_vm4, %v723_v31, %v724_v38  ;;  %v8155_v47 = vld.sshfl [vmem:[#allocation3 + $0x17] sm:$0x1 pattern:$0x76325410]  ;;  %v2127_v11 = vsel %vm608_vm6, %v2123_v22, %v2126_v3 }
 0x1ae   :  { %2070 = vrot.lane.b32.xlu0 %v1416_v39, %s9295_s2  ;;  %v2098_v39 = vsel %vm608_vm6, %v2094_v55, %v2097_v28  ;;  %v726_v54 = vsel %vm606_vm5, %v723_v31, %v725_v49  ;;  %v2438_v55 = vsel %vm604_vm4, %v2436_v23, %v2437_v34  ;;  %v2352_v58 = vsel %vm602_vm3, %v2351_v37, %v8155_v47  ;;  %v8163_v1 = vld.sshfl [vmem:[#allocation3 + $0x1f] sm:$0x1 pattern:$0x76325410] }
 0x1af   :  { %2184 = vrot.lane.b32.xlu1 %v1530_v10, %s9295_s2  ;;  %v2212_v10 = vsel %vm608_vm6, %v2208_v46, %v2211_v13  ;;  %v2465_v46 = vrot.slane %v8164_v30, 7  ;;  %v727_v62 = vsel %vm608_vm6, %v723_v31, %v726_v54  ;;  %v8085_v4 = vld.sshfl [vmem:[#allocation3 + $0x50] sm:$0x1 pattern:$0x76325410]  ;;  %v2439_v25 = vsel %vm606_vm5, %v2436_v23, %v2438_v55 }
 0x1b0   :  { %729 = vst.msk [vmem:[#allocation4 + $0x2] sm:$0x3] %vm611_vm7, %v727_v62  ;;  %v2353_v6 = vsel %vm604_vm4, %v2351_v37, %v2352_v58  ;;  %v8084_v9 = vld.sshfl [vmem:[#allocation3 + $0x10] sm:$0x1 pattern:$0x76325410]  ;;  %v10115_v17 = vsel %vm608_vm6, %v2436_v23, %v2439_v25 }
 0x1b1   :  { %v2466_v59 = vsel %vm602_vm3, %v2465_v46, %v8163_v1  ;;  %v837_v7 = vrot.slane %v8085_v4, 7  ;;  %v8093_v13 = vld.sshfl [vmem:[#allocation3 + $0x58] sm:$0x1 pattern:$0x76325410]  ;;  %v2354_v18 = vsel %vm606_vm5, %v2351_v37, %v2353_v6 }
 0x1b2   :  { %2298 = vrot.lane.b32.xlu0 %v10049_v56, %s9295_s2  ;;  %v2467_v12 = vsel %vm604_vm4, %v2465_v46, %v2466_v59  ;;  %v951_v14 = vrot.slane %v8093_v13, 7  ;;  %v8092_v15 = vld.sshfl [vmem:[#allocation3 + $0x18] sm:$0x1 pattern:$0x76325410]  ;;  %v10130_v30 = vsel %vm608_vm6, %v2351_v37, %v2354_v18 }
 0x1b3   :  { %2213 = vrot.lane.b32.xlu1 %v2212_v10, %s9294_s21  ;;  %v838_v8 = vsel %vm602_vm3, %v837_v7, %v8084_v9  ;;  %v2468_v21 = vsel %vm606_vm5, %v2465_v46, %v2467_v12  ;;  %v8184_v10 = vld.sshfl [vmem:[#allocation3 + $0x61] sm:$0x1 pattern:$0x76325410] }
 0x1b4   :  { %v839_v20 = vsel %vm604_vm4, %v837_v7, %v838_v8  ;;  %v952_v27 = vsel %vm602_vm3, %v951_v14, %v8092_v15  ;;  %v10133_v31 = vsel %vm608_vm6, %v2465_v46, %v2468_v21  ;;  %v8192_v28 = vld.sshfl [vmem:[#allocation3 + $0x69] sm:$0x1 pattern:$0x76325410]  ;;  %v3004_v33 = vrot.slane %v8184_v10, 7 }
 0x1b5   :  { %v840_v24 = vsel %vm606_vm5, %v837_v7, %v839_v20  ;;  %v953_v23 = vsel %vm604_vm4, %v951_v14, %v952_v27  ;;  %v3118_v35 = vrot.slane %v8192_v28, 7  ;;  %v8183_v36 = vld.sshfl [vmem:[#allocation3 + $0x21] sm:$0x1 pattern:$0x76325410] }
 0x1b6   :  { %2099 = vrot.lane.b32.xlu0 %v2098_v39, %s9294_s21  ;;  %v841_v22 = vsel %vm608_vm6, %v837_v7, %v840_v24  ;;  %v954_v5 = vsel %vm606_vm5, %v951_v14, %v953_v23  ;;  %v8191_v37 = vld.sshfl [vmem:[#allocation3 + $0x29] sm:$0x1 pattern:$0x76325410]  ;;  %v3005_v38 = vsel %vm602_vm3, %v3004_v33, %v8183_v36 }
 0x1b7   :  { %2242 = vrot.lane.b32.xlu1 %v2241_v52, %s9296_s17  ;;  %843 = vst.msk [vmem:[#allocation4 + $0x4] sm:$0x3] %vm611_vm7, %v841_v22  ;;  %v10136_v32 = vsel %vm608_vm6, %v951_v14, %v954_v5  ;;  %v3119_v40 = vsel %vm602_vm3, %v3118_v35, %v8191_v37  ;;  %v8188_v34 = vld.sshfl [vmem:[#allocation3 + $0x63] sm:$0x1 pattern:$0x76325410] }
 0x1b8   :  { %957 = vst.msk [vmem:[#allocation4 + $0x6] sm:$0x3] %vm611_vm7, %v10136_v32  ;;  %v8196_v46 = vld.sshfl [vmem:[#allocation3 + $0x6b] sm:$0x1 pattern:$0x76325410] }
 0x1b9   :  { %v10154_v49 = vld.sshfl [vmem:[#allocation3 + $0x22] sm:$0x1 pattern:$0x76325410]  ;;  %v3062_v45 = vrot.slane %v8188_v34, 7  ;;  %v3176_v41 = vrot.slane %v8196_v46, 7 }
 0x1ba   :  { %2327 = vrot.lane.b32.xlu0 %v10102_v61, %s9294_s21  ;;  %v10158_v39 = vld.sshfl [vmem:[#allocation3 + $0x2a] sm:$0x1 pattern:$0x76325410]  ;;  %v3034_v52 = vsel %vm602_vm3, %v9765_v19, %v10154_v49 }
 0x1bb   :  { %2412 = vrot.lane.b32.xlu1 %v10052_v60, %s9295_s2  ;;  %v3148_v54 = vsel %vm602_vm3, %v9804_v42, %v10158_v39  ;;  %v8187_v63 = vld.sshfl [vmem:[#allocation3 + $0x23] sm:$0x1 pattern:$0x76325410]  ;;  %v3035_v55 = vsel %vm604_vm4, %v9765_v19, %v3034_v52 }
 0x1bc   :  { %v3149_v58 = vsel %vm604_vm4, %v9804_v42, %v3148_v54  ;;  %v8195_v1 = vld.sshfl [vmem:[#allocation3 + $0x2b] sm:$0x1 pattern:$0x76325410]  ;;  %v3063_v59 = vsel %vm602_vm3, %v3062_v45, %v8187_v63  ;;  %v3036_v9 = vsel %vm606_vm5, %v9765_v19, %v3035_v55 }
 0x1bd   :  { %v3177_v4 = vsel %vm602_vm3, %v3176_v41, %v8195_v1  ;;  %v8210_v6 = vld.sshfl [vmem:[#allocation3 + $0x5c] sm:$0x1 pattern:$0x76325410]  ;;  %v3150_v7 = vsel %vm606_vm5, %v9804_v42, %v3149_v58  ;;  %v3064_v12 = vsel %vm604_vm4, %v3062_v45, %v3063_v59  ;;  %v3037_v14 = vsel %vm608_vm6, %v9765_v19, %v3036_v9 }
 0x1be   :  { %2128 = vrot.lane.b32.xlu0 %v2127_v11, %s9296_s17  ;;  %v3178_v13 = vsel %vm604_vm4, %v3176_v41, %v3177_v4  ;;  %v3631_v8 = vrot.slane %v8210_v6, 7  ;;  %v3151_v11 = vsel %vm608_vm6, %v9804_v42, %v3150_v7  ;;  %v8202_v18 = vld.sshfl [vmem:[#allocation3 + $0x54] sm:$0x1 pattern:$0x76325410]  ;;  %v3065_v20 = vsel %vm606_vm5, %v3062_v45, %v3064_v12 }
 0x1bf   :  { %2441 = vrot.lane.b32.xlu1 %v10115_v17, %s9294_s21  ;;  %v3179_v15 = vsel %vm606_vm5, %v3176_v41, %v3178_v13  ;;  %v8209_v21 = vld.sshfl [vmem:[#allocation3 + $0x1c] sm:$0x1 pattern:$0x76325410]  ;;  %v3517_v27 = vrot.slane %v8202_v18, 7  ;;  %v10204_v22 = vsel %vm608_vm6, %v3062_v45, %v3065_v20 }
 0x1c0   :  { %v3632_v24 = vsel %vm602_vm3, %v3631_v8, %v8209_v21  ;;  %v10207_v23 = vsel %vm608_vm6, %v3176_v41, %v3179_v15  ;;  %v8218_v10 = vld.sshfl [vmem:[#allocation3 + $0x64] sm:$0x1 pattern:$0x76325410] }
 0x1c1   :  { %v3633_v5 = vsel %vm604_vm4, %v3631_v8, %v3632_v24  ;;  %v8201_v28 = vld.sshfl [vmem:[#allocation3 + $0x14] sm:$0x1 pattern:$0x76325410] }
 0x1c2   :  { %2356 = vrot.lane.b32.xlu0 %v10130_v30, %s9296_s17  ;;  %v8226_v36 = vld.sshfl [vmem:[#allocation3 + $0x6c] sm:$0x1 pattern:$0x76325410]  ;;  %v3634_v37 = vsel %vm606_vm5, %v3631_v8, %v3633_v5 }
 0x1c3   :  { %2470 = vrot.lane.b32.xlu1 %v10133_v31, %s9296_s17  ;;  %v3859_v46 = vrot.slane %v8226_v36, 7  ;;  %v8228_v52 = vld.sshfl [vmem:[#allocation3 + $0x6d] sm:$0x1 pattern:$0x76325410] }
 0x1c4   :  { %v8225_v45 = vld.sshfl [vmem:[#allocation3 + $0x2c] sm:$0x1 pattern:$0x76325410] }
 0x1c5   :  { %v3860_v41 = vsel %vm602_vm3, %v3859_v46, %v8225_v45  ;;  %v8219_v58 = vld.sshfl [vmem:[#allocation3 + $0x25] sm:$0x1 pattern:$0x76325410] }
 0x1c6   :  { %2781 = vrot.lane.b32.xlu0 %v9777_v26, %s9295_s2  ;;  %v3006_v26 = vsel %vm604_vm4, %v3004_v33, %v3005_v38  ;;  %v3861_v4 = vsel %vm604_vm4, %v3859_v46, %v3860_v41  ;;  %v8227_v6 = vld.sshfl [vmem:[#allocation3 + $0x2d] sm:$0x1 pattern:$0x76325410] }
 0x1c7   :  { %2895 = vrot.lane.b32.xlu1 %v9837_v57, %s9295_s2  ;;  %v3120_v57 = vsel %vm604_vm4, %v3118_v35, %v3119_v40  ;;  %v3007_v47 = vsel %vm606_vm5, %v3004_v33, %v3006_v26  ;;  %v8217_v40 = vld.sshfl [vmem:[#allocation3 + $0x24] sm:$0x1 pattern:$0x76325410]  ;;  %v3862_v13 = vsel %vm606_vm5, %v3859_v46, %v3861_v4 }
 0x1c8   :  { %v3121_v62 = vsel %vm606_vm5, %v3118_v35, %v3120_v57  ;;  %v10179_v3 = vsel %vm608_vm6, %v3004_v33, %v3007_v47  ;;  %v3518_v33 = vsel %vm602_vm3, %v3517_v27, %v8201_v28  ;;  %v8220_v26 = vld.sshfl [vmem:[#allocation3 + $0x65] sm:$0x1 pattern:$0x76325410]  ;;  %v3635_v57 = vsel %vm608_vm6, %v3631_v8, %v3634_v37 }
 0x1c9   :  { %v10182_v25 = vsel %vm608_vm6, %v3118_v35, %v3121_v62  ;;  %v3745_v35 = vrot.slane %v8218_v10, 7  ;;  %v3519_v38 = vsel %vm604_vm4, %v3517_v27, %v3518_v33  ;;  %v3774_v47 = vrot.slane %v8220_v26, 7  ;;  %v8250_v28 = vld.sshfl [vmem:[#allocation3 + $0x66] sm:$0x1 pattern:$0x76325410] }
 0x1ca   :  { %2810 = vrot.lane.b32.xlu0 %v9818_v50, %s9294_s21  ;;  %v3888_v62 = vrot.slane %v8228_v52, 7  ;;  %v3863_v20 = vsel %vm608_vm6, %v3859_v46, %v3862_v13  ;;  %v4456_v36 = vrot.slane %v8250_v28, 7  ;;  %v8258_v37 = vld.sshfl [vmem:[#allocation3 + $0x6e] sm:$0x1 pattern:$0x76325410] }
 0x1cb   :  { %2924 = vrot.lane.b32.xlu1 %v9880_v16, %s9294_s21  ;;  %v3746_v34 = vsel %vm602_vm3, %v3745_v35, %v8217_v40  ;;  %v3775_v9 = vsel %vm602_vm3, %v3774_v47, %v8219_v58  ;;  %v8102_v40 = vld.sshfl [vmem:[#allocation3 + $0x42] sm:$0x1 pattern:$0x76325410]  ;;  %v4570_v46 = vrot.slane %v8258_v37, 7 }
 0x1cc   :  { %v3747_v54 = vsel %vm604_vm4, %v3745_v35, %v3746_v34  ;;  %v3889_v7 = vsel %vm602_vm3, %v3888_v62, %v8227_v6  ;;  %v8252_v26 = vld.sshfl [vmem:[#allocation3 + $0x67] sm:$0x1 pattern:$0x76325410] }
 0x1cd   :  { %v3748_v55 = vsel %vm606_vm5, %v3745_v35, %v3747_v54  ;;  %v3890_v18 = vsel %vm604_vm4, %v3888_v62, %v3889_v7  ;;  %v8260_v52 = vld.sshfl [vmem:[#allocation3 + $0x6f] sm:$0x1 pattern:$0x76325410]  ;;  %v4485_v45 = vrot.slane %v8252_v26, 7 }
 0x1ce   :  { %2839 = vrot.lane.b32.xlu0 %v9918_v43, %s9296_s17  ;;  %v3749_v12 = vsel %vm608_vm6, %v3745_v35, %v3748_v55  ;;  %v3891_v21 = vsel %vm606_vm5, %v3888_v62, %v3890_v18  ;;  %v8126_v54 = vld.sshfl [vmem:[#allocation3 + $0x5a] sm:$0x1 pattern:$0x76325410]  ;;  %v4599_v41 = vrot.slane %v8260_v52, 7 }
 0x1cf   :  { %2953 = vrot.lane.b32.xlu1 %v9921_v44, %s9296_s17  ;;  %v3892_v5 = vsel %vm608_vm6, %v3888_v62, %v3891_v21  ;;  %v8101_v62 = vld.sshfl [vmem:[#allocation3 + $0x2] sm:$0x1 pattern:$0x76325410] }
 0x1d0   :  { %v8109_v4 = vld.sshfl [vmem:[#allocation3 + $0xa] sm:$0x1 pattern:$0x76325410] }
 0x1d1   :  { %v8117_v6 = vld.sshfl [vmem:[#allocation3 + $0x12] sm:$0x1 pattern:$0x76325410] }
 0x1d2   :  { %3009 = vrot.lane.b32.xlu0 %v10179_v3, %s9295_s2  ;;  %v8181_v48 = vld.sshfl [vmem:[#allocation3 + $0x20] sm:$0x1 pattern:$0x76325410] }
 0x1d3   :  { %3123 = vrot.lane.b32.xlu1 %v10182_v25, %s9295_s2  ;;  %v8324_v2 = vld.sshfl [vmem:[#allocation3 + $0x7d] sm:$0x1 pattern:$0x76325410] }
 0x1d6   :  { %3038 = vrot.lane.b32.xlu0 %v3037_v14, %s9294_s21 }
 0x1d7   :  { %3152 = vrot.lane.b32.xlu1 %v3151_v11, %s9294_s21  ;;  %v3776_v11 = vsel %vm604_vm4, %v3774_v47, %v3775_v9  ;;  %v1669_v9 = vrot.slane %v8126_v54, 7 }
 0x1d8   :  { %v3777_v15 = vsel %vm606_vm5, %v3774_v47, %v3776_v11  ;;  %v1121_v11 = vlaneseq }
 0x1d9   :  { %v3778_v10 = vsel %vm608_vm6, %v3774_v47, %v3777_v15  ;;  %v10276_v47 = vrot.slane %v8102_v40, 7  ;;  %v8274_v15 = vld.sshfl [vmem:[#allocation3 + $0x6a] sm:$0x1 pattern:$0x76325410] }
 0x1da   :  { %3067 = vrot.lane.b32.xlu0 %v10204_v22, %s9296_s17  ;;  %v10308_v26 = vrot.slane %v8274_v15, 7  ;;  %v8282_v15 = vld.sshfl [vmem:[#allocation3 + $0x72] sm:$0x1 pattern:$0x76325410] }
 0x1db   :  { %3181 = vrot.lane.b32.xlu1 %v10207_v23, %s9296_s17  ;;  %v1328_v18 = vsel %vm602_vm3, %v10276_v47, %v8101_v62 }
 0x1de   :  { %3493 = vrot.lane.b32.xlu0 %v9918_v43, %s9295_s2  ;;  %v3520_v43 = vsel %vm606_vm5, %v3517_v27, %v3519_v38  ;;  %v8249_v38 = vld.sshfl [vmem:[#allocation3 + $0x26] sm:$0x1 pattern:$0x76325410] }
 0x1df   :  { %3607 = vrot.lane.b32.xlu1 %v9921_v44, %s9295_s2  ;;  %v10231_v63 = vsel %vm608_vm6, %v3517_v27, %v3520_v43  ;;  %v4457_v34 = vsel %vm602_vm3, %v4456_v36, %v8249_v38  ;;  %v8118_v43 = vld.sshfl [vmem:[#allocation3 + $0x52] sm:$0x1 pattern:$0x76325410] }
 0x1e2   :  { %3721 = vrot.lane.b32.xlu0 %v10204_v22, %s9295_s2 }
 0x1e3   :  { %3636 = vrot.lane.b32.xlu1 %v3635_v57, %s9294_s21  ;;  %v8110_v57 = vld.sshfl [vmem:[#allocation3 + $0x4a] sm:$0x1 pattern:$0x76325410] }
 0x1e4   :  { %v10278_v55 = vrot.slane %v8110_v57, 7 }
 0x1e6   :  { %3522 = vrot.lane.b32.xlu0 %v10231_v63, %s9294_s21  ;;  %v1442_v21 = vsel %vm602_vm3, %v10278_v55, %v8109_v4 }
 0x1e7   :  { %3665 = vrot.lane.b32.xlu1 %v10052_v60, %s9296_s17  ;;  %v1443_v57 = vsel %vm604_vm4, %v10278_v55, %v1442_v21 }
 0x1ea   :  { %v639_v44 = vpop.permute.xlu0 %638  ;;  %3750 = vrot.lane.b32.xlu0 %v3749_v12, %s9294_s21  ;;  %v8259_v12 = vld.sshfl [vmem:[#allocation3 + $0x2f] sm:$0x1 pattern:$0x76325410] }
 0x1eb   :  { %642 = vst.msk [vmem:[#allocation4] sm:$0x3] %vm641_vm8, %v639_v44  ;;  %3835 = vrot.lane.b32.xlu1 %v10207_v23, %s9295_s2  ;;  %v4458_v44 = vsel %vm604_vm4, %v4456_v36, %v4457_v34  ;;  %v10306_v34 = vshrl.u32 %v1121_v11, 7 }
 0x1ed   :  { %13162 = vst [vmem:[#allocation17_spill] sm:$0xff] %v10306_v34 }
 0x1ee   :  { %v756_v1 = vpop.permute.xlu1 %755  ;;  %v669_v59 = vpop.permute.xlu0 %668  ;;  %3551 = vrot.lane.b32.xlu0 %v10049_v56, %s9296_s17 }
 0x1ef   :  { %758 = vst.msk [vmem:[#allocation4 + $0x2] sm:$0x3] %vm641_vm8, %v756_v1  ;;  %3864 = vrot.lane.b32.xlu1 %v3863_v20, %s9294_s21  ;;  %v10285_v1 = vrot.slane %v8118_v43, 7 }
 0x1f0   :  { %672 = vst.msk [vmem:[#allocation4] sm:$0x3] %vm671_vm9, %v669_v59  ;;  %v8251_v59 = vld.sshfl [vmem:[#allocation3 + $0x27] sm:$0x1 pattern:$0x76325410] }
 0x1f1   :  { %v4486_v13 = vsel %vm602_vm3, %v4485_v45, %v8251_v59  ;;  %v5054_v59 = vsel %vm602_vm3, %v10308_v26, %v10158_v39 }
 0x1f2   :  { %v785_v8 = vpop.permute.xlu1 %784  ;;  %v699_v14 = vpop.permute.xlu0 %698  ;;  %3779 = vrot.lane.b32.xlu0 %v3778_v10, %s9296_s17 }
 0x1f3   :  { %787 = vst.msk [vmem:[#allocation4 + $0x2] sm:$0x3] %vm671_vm9, %v785_v8  ;;  %3893 = vrot.lane.b32.xlu1 %v3892_v5, %s9296_s17  ;;  %v8266_v8 = vld.sshfl [vmem:[#allocation3 + $0x62] sm:$0x1 pattern:$0x76325410] }
 0x1f4   :  { %702 = vst.msk [vmem:[#allocation4] sm:$0x3] %vm701_vm10, %v699_v14 }
 0x1f6   :  { %v814_v24 = vpop.permute.xlu1 %813  ;;  %v870_v27 = vpop.permute.xlu0 %869  ;;  %4204 = vrot.lane.b32.xlu0 %v10049_v56, %s9295_s2  ;;  %v8257_v56 = vld.sshfl [vmem:[#allocation3 + $0x2e] sm:$0x1 pattern:$0x76325410] }
 0x1f7   :  { %816 = vst.msk [vmem:[#allocation4 + $0x2] sm:$0x3] %vm701_vm10, %v814_v24  ;;  %4318 = vrot.lane.b32.xlu1 %v10052_v60, %s9295_s2  ;;  %v4571_v60 = vsel %vm602_vm3, %v4570_v46, %v8257_v56  ;;  %v1556_v24 = vsel %vm602_vm3, %v10285_v1, %v8117_v6 }
 0x1f8   :  { %872 = vst.msk [vmem:[#allocation4 + $0x4] sm:$0x3] %vm641_vm8, %v870_v27  ;;  %v4572_v7 = vsel %vm604_vm4, %v4570_v46, %v4571_v60  ;;  %v8125_v27 = vld.sshfl [vmem:[#allocation3 + $0x1a] sm:$0x1 pattern:$0x76325410]  ;;  %v1557_v52 = vsel %vm604_vm4, %v10285_v1, %v1556_v24 }
 0x1f9   :  { %v1670_v28 = vsel %vm602_vm3, %v1669_v9, %v8125_v27  ;;  %v1558_v4 = vsel %vm606_vm5, %v10285_v1, %v1557_v52  ;;  %v8290_v24 = vld.sshfl [vmem:[#allocation3 + $0x7a] sm:$0x1 pattern:$0x76325410] }
 0x1fa   :  { %v899_v33 = vpop.permute.xlu0 %898  ;;  %4432 = vrot.lane.b32.xlu0 %v3778_v10, %s9295_s2  ;;  %v4573_v10 = vsel %vm606_vm5, %v4570_v46, %v4572_v7  ;;  %v8134_v52 = vld.sshfl [vmem:[#allocation3 + $0x44] sm:$0x1 pattern:$0x76325410] }
 0x1fb   :  { %901 = vst.msk [vmem:[#allocation4 + $0x4] sm:$0x3] %vm671_vm9, %v899_v33  ;;  %v984_v35 = vpop.permute.xlu1 %983  ;;  %4347 = vrot.lane.b32.xlu1 %v10115_v17, %s9294_s21  ;;  %v4459_v17 = vsel %vm606_vm5, %v4456_v36, %v4458_v44  ;;  %v4487_v33 = vsel %vm604_vm4, %v4485_v45, %v4486_v13  ;;  %v4574_v43 = vsel %vm608_vm6, %v4570_v46, %v4573_v10 }
 0x1fc   :  { %986 = vst.msk [vmem:[#allocation4 + $0x6] sm:$0x3] %vm641_vm8, %v984_v35  ;;  %v4460_v20 = vsel %vm608_vm6, %v4456_v36, %v4459_v17  ;;  %v10304_v36 = vrot.slane %v8266_v8, 7  ;;  %v1671_v44 = vsel %vm604_vm4, %v1669_v9, %v1670_v28  ;;  %v4488_v56 = vsel %vm606_vm5, %v4485_v45, %v4487_v33 }
 0x1fd   :  { %v1444_v46 = vsel %vm606_vm5, %v10278_v55, %v1443_v57  ;;  %v4489_v6 = vsel %vm608_vm6, %v4485_v45, %v4488_v56  ;;  %v5055_v8 = vsel %vm604_vm4, %v10308_v26, %v5054_v59  ;;  %v8279_v28 = vld.sshfl [vmem:[#allocation3 + $0x31] sm:$0x1 pattern:$0x76325410]  ;;  %v10399_v56 = vrot.slane %v8290_v24, 7 }
 0x1fe   :  { %4233 = vrot.lane.b32.xlu0 %v10102_v61, %s9294_s21  ;;  %v4600_v61 = vsel %vm602_vm3, %v4599_v41, %v8259_v12  ;;  %v4940_v60 = vsel %vm602_vm3, %v10304_v36, %v10154_v49  ;;  %v1672_v49 = vsel %vm606_vm5, %v1669_v9, %v1671_v44  ;;  %v8280_v12 = vld.sshfl [vmem:[#allocation3 + $0x71] sm:$0x1 pattern:$0x76325410]  ;;  %v1445_v45 = vsel %vm608_vm6, %v10278_v55, %v1444_v46  ;;  %v10416_v46 = vld [vmem:[%s13072_s3 + $0x1e8] sm:$0xff] }
 0x1ff   :  { %4376 = vrot.lane.b32.xlu1 %v10133_v31, %s9296_s17  ;;  %v9297_v31 = vmov 1983009808   ;;  %v4601_v35 = vsel %vm604_vm4, %v4599_v41, %v4600_v61  ;;  %v4941_v13 = vsel %vm604_vm4, %v10304_v36, %v4940_v60  ;;  %v8288_v61 = vld.sshfl [vmem:[#allocation3 + $0x79] sm:$0x1 pattern:$0x76325410]  ;;  %v5056_v21 = vsel %vm606_vm5, %v10308_v26, %v5055_v8 }
 0x200   :  { %v1013_v58 = vpop.permute.xlu1 %1012  ;;  %v1119_v14 = vunpack.c.l.s4 %v9297_v31  ;;  %v4602_v54 = vsel %vm606_vm5, %v4599_v41, %v4601_v35  ;;  %v1673_v31 = vsel %vm608_vm6, %v1669_v9, %v1672_v49  ;;  %v10365_v9 = vrot.slane %v8288_v61, 7  ;;  %v8281_v44 = vld.sshfl [vmem:[#allocation3 + $0x32] sm:$0x1 pattern:$0x76325410]  ;;  %v10424_v49 = vld [vmem:[%s13072_s3 + $0x168] sm:$0xff] }
 0x201   :  { %1015 = vst.msk [vmem:[#allocation4 + $0x6] sm:$0x3] %vm671_vm9, %v1013_v58  ;;  %v4603_v7 = vsel %vm608_vm6, %v4599_v41, %v4602_v54  ;;  %v1559_v41 = vsel %vm608_vm6, %v10285_v1, %v1558_v4  ;;  %v8284_v54 = vld.sshfl [vmem:[#allocation3 + $0x73] sm:$0x1 pattern:$0x76325410] }
 0x202   :  { %4461 = vrot.lane.b32.xlu0 %v4460_v20, %s9294_s21  ;;  %v1120_v40 = vunpack.c.0.s8 %v1119_v14  ;;  %v10356_v20 = vrot.slane %v8280_v12, 7  ;;  %v8292_v60 = vld.sshfl [vmem:[#allocation3 + $0x7b] sm:$0x1 pattern:$0x76325410] }
 0x203   :  { %4546 = vrot.lane.b32.xlu1 %v3892_v5, %s9295_s2  ;;  %v1329_v5 = vsel %vm604_vm4, %v10276_v47, %v1328_v18  ;;  %v8289_v12 = vld.sshfl [vmem:[#allocation3 + $0x3a] sm:$0x1 pattern:$0x76325410]  ;;  %v10439_v8 = vrot.slane %v8292_v60, 7 }
 0x204   :  { %v928_v37 = vpop.permute.xlu0 %927  ;;  %v1330_v62 = vsel %vm606_vm5, %v10276_v47, %v1329_v5  ;;  %v10333_v58 = vsub.s32 %v1120_v40, %v10306_v34  ;;  %v10384_v40 = vrot.slane %v8282_v15, 7  ;;  %v5057_v5 = vsel %vm608_vm6, %v10308_v26, %v5056_v21  ;;  %v10406_v26 = vld [vmem:[%s13072_s3 + $0x1f0] sm:$0xff]  ;;  %v8157_v60 = vld.sshfl [vmem:[#allocation3 + $0x1c] sm:$0x1 pattern:$0x76325410] }
 0x205   :  { %v1042_v38 = vpop.permute.xlu1 %1041  ;;  %930 = vst.msk [vmem:[#allocation4 + $0x4] sm:$0x3] %vm701_vm10, %v928_v37  ;;  %v1331_v39 = vsel %vm608_vm6, %v10276_v47, %v1330_v62  ;;  %v4942_v47 = vsel %vm606_vm5, %v10304_v36, %v4941_v13  ;;  %v8142_v37 = vld.sshfl [vmem:[#allocation3 + $0x4c] sm:$0x1 pattern:$0x76325410] }
 0x206   :  { %1044 = vst.msk [vmem:[#allocation4 + $0x6] sm:$0x3] %vm701_vm10, %v1042_v38  ;;  %4262 = vrot.lane.b32.xlu0 %v10130_v30, %s9296_s17  ;;  %v4943_v35 = vsel %vm608_vm6, %v10304_v36, %v4942_v47  ;;  %v8287_v38 = vld.sshfl [vmem:[#allocation3 + $0x39] sm:$0x1 pattern:$0x76325410] }
 0x207   :  { %4575 = vrot.lane.b32.xlu1 %v4574_v43, %s9294_s21  ;;  %v10393_v36 = vld [vmem:[%s13072_s3 + $0x178] sm:$0xff]  ;;  %v5253_v43 = vsel %vm602_vm3, %v10365_v9, %v8287_v38  ;;  %v10411_v62 = vld [vmem:[%s13072_s3 + $0x170] sm:$0xff]  ;;  %v10430_v13 = vrot.slane %v8284_v54, 7  ;;  %v10432_v61 = vrot.slane %v8142_v37, 7 }
 0x208   :  { %v1360_v17 = vpop.permute.xlu0 %1359  ;;  %v8133_v47 = vld.sshfl [vmem:[#allocation3 + $0x4] sm:$0x1 pattern:$0x76325410]  ;;  %v10489_v38 = vld [vmem:[%s13072_s3 + $0x158] sm:$0xff]  ;;  %v10506_v54 = vld [vmem:[%s13072_s3 + $0x1d0] sm:$0xff] }
 0x209   :  { %v1474_v30 = vpop.permute.xlu1 %1473  ;;  %v8283_v21 = vld.sshfl [vmem:[#allocation3 + $0x33] sm:$0x1 pattern:$0x76325410] }
 0x20a   :  { %4490 = vrot.lane.b32.xlu0 %v4489_v6, %s9296_s17  ;;  %v5254_v6 = vsel %vm604_vm4, %v10365_v9, %v5253_v43 }
 0x20b   :  { %4604 = vrot.lane.b32.xlu1 %v4603_v7, %s9296_s17  ;;  %v5168_v7 = vsel %vm602_vm3, %v10384_v40, %v8281_v44 }
 0x20c   :  { %v1588_v11 = vpop.permute.xlu0 %1587 }
 0x20d   :  { %v1045_v14 = vld [vmem:[#allocation4] sm:$0xff]  ;;  %v1503_v18 = vpop.permute.xlu1 %1502 }
 0x20e   :  { %1675 = vst.msk [vmem:[#allocation4 + $0x6] sm:$0x3] %vm611_vm7, %v1673_v31  ;;  %1333 = vst.msk [vmem:[#allocation4] sm:$0x3] %vm611_vm7, %v1331_v39  ;;  %v1124_v55 = vrot.slane %v1045_v14, %v10333_v58  ;;  %v1117_v1 = vcombine.high %v1045_v14, %v1045_v14  ;;  %4915 = vrot.lane.b32.xlu0 %v10179_v3, %s9295_s2  ;;  %v5282_v39 = vsel %vm602_vm3, %v10399_v56, %v8289_v12  ;;  %v10525_v12 = vld [vmem:[%s13072_s3 + $0x1c8] sm:$0xff] }
 0x20f   :  { %1447 = vst.msk [vmem:[#allocation4 + $0x2] sm:$0x3] %vm611_vm7, %v1445_v45  ;;  %1561 = vst.msk [vmem:[#allocation4 + $0x4] sm:$0x3] %vm611_vm7, %v1559_v41  ;;  %5029 = vrot.lane.b32.xlu1 %v10182_v25, %s9295_s2  ;;  %v5139_v25 = vsel %vm602_vm3, %v10356_v20, %v8279_v28  ;;  %v10443_v31 = vrot.slane %v8134_v52, 7  ;;  %v5283_v28 = vsel %vm604_vm4, %v10399_v56, %v5282_v39 }
 0x210   :  { %1362 = vst.msk [vmem:[#allocation4] sm:$0x3] %vm641_vm8, %v1360_v17  ;;  %1476 = vst.msk [vmem:[#allocation4 + $0x2] sm:$0x3] %vm641_vm8, %v1474_v30  ;;  %v1132_v27 = vcombine.high %v1124_v55, %v1124_v55  ;;  %v10378_v10 = vrot.slane %v1117_v1, %v10333_v58  ;;  %v1389_v33 = vpop.permute.xlu0 %1388  ;;  %v5140_v17 = vsel %vm604_vm4, %v10356_v20, %v5139_v25 }
 0x211   :  { %1590 = vst.msk [vmem:[#allocation4 + $0x4] sm:$0x3] %vm641_vm8, %v1588_v11  ;;  %v1532_v3 = vpop.permute.xlu1 %1531  ;;  %v8158_v30 = vld.sshfl [vmem:[#allocation3 + $0x5c] sm:$0x1 pattern:$0x76325410]  ;;  %v5141_v14 = vsel %vm606_vm5, %v10356_v20, %v5140_v17  ;;  %v5169_v1 = vsel %vm604_vm4, %v10384_v40, %v5168_v7  ;;  %v2039_v43 = vsel %vm602_vm3, %v10443_v31, %v8133_v47 }
 0x212   :  { %1505 = vst.msk [vmem:[#allocation4 + $0x2] sm:$0x3] %vm671_vm9, %v1503_v18  ;;  %1391 = vst.msk [vmem:[#allocation4] sm:$0x3] %vm671_vm9, %v1389_v33  ;;  %1202 = vmatprep.mubr.f32.mxu1 %v1132_v27  ;;  %v1133_v57 = vcombine.high %v10378_v10, %v10378_v10  ;;  %4944 = vrot.lane.b32.xlu0 %v4943_v35, %s9294_s21  ;;  %v10451_v11 = vld [vmem:[%s13072_s3 + $0x1e0] sm:$0xff]  ;;  %v10465_v15 = vrot.slane %v8158_v30, 7  ;;  %v5197_v33 = vsel %vm602_vm3, %v10430_v13, %v8283_v21 }
 0x213   :  { %1534 = vst.msk [vmem:[#allocation4 + $0x2] sm:$0x3] %vm701_vm10, %v1532_v3  ;;  %5058 = vrot.lane.b32.xlu1 %v5057_v5, %s9294_s21  ;;  %1203 = vmatmul.mubr.f32.vlgmr.msra.gmra.mxu1 %v1124_v55  ;;  %v8296_v45 = vld.sshfl [vmem:[#allocation3 + $0x63] sm:$0x1 pattern:$0x76325410]  ;;  %v5255_v55 = vsel %vm606_vm5, %v10365_v9, %v5254_v6  ;;  %v5142_v25 = vsel %vm608_vm6, %v10356_v20, %v5141_v14 }
 0x214   :  { %v1617_v59 = vpop.permute.xlu0 %1616  ;;  %8497 = vmatpush3.msra.mxu1 %v10393_v36  ;;  %1272 = vmatprep.mubr.f32.mxu1 %v1133_v57  ;;  %v8141_v41 = vld.sshfl [vmem:[#allocation3 + $0xc] sm:$0x1 pattern:$0x76325410]  ;;  %v10477_v37 = vrot.slane %v8296_v45, 7  ;;  %v5256_v20 = vsel %vm608_vm6, %v10365_v9, %v5255_v55  ;;  %v5170_v44 = vsel %vm606_vm5, %v10384_v40, %v5169_v1  ;;  %v2381_v17 = vsel %vm602_vm3, %v10465_v15, %v8157_v60  ;;  %v10515_v9 = vld [vmem:[%s13072_s3 + $0x150] sm:$0xff] }
 0x215   :  { %v1702_v4 = vpop.permute.xlu1 %1701  ;;  %1619 = vst.msk [vmem:[#allocation4 + $0x4] sm:$0x3] %vm671_vm9, %v1617_v59  ;;  %8498 = vmatprep.subr.mxu1 %v10406_v26  ;;  %v8304_v18 = vld.sshfl [vmem:[#allocation3 + $0x6b] sm:$0x1 pattern:$0x76325410]  ;;  %v2153_v3 = vsel %vm602_vm3, %v10432_v61, %v8141_v41  ;;  %v5284_v30 = vsel %vm606_vm5, %v10399_v56, %v5283_v28  ;;  %v5198_v59 = vsel %vm604_vm4, %v10430_v13, %v5197_v33 }
 0x216   :  { %1704 = vst.msk [vmem:[#allocation4 + $0x6] sm:$0x3] %vm641_vm8, %v1702_v4  ;;  %4973 = vrot.lane.b32.xlu0 %v10204_v22, %s9296_s17  ;;  %8499 = vmatpush3.msra.mxu1 %v10411_v62  ;;  %v10459_v22 = vld [vmem:[%s13072_s3 + $0x160] sm:$0xff]  ;;  %v10493_v57 = vrot.slane %v8304_v18, 7  ;;  %v2154_v18 = vsel %vm604_vm4, %v10432_v61, %v2153_v3  ;;  %v2040_v47 = vsel %vm604_vm4, %v10443_v31, %v2039_v43  ;;  %v10545_v1 = vld [vmem:[%s13072_s3 + $0x148] sm:$0xff] }
 0x217   :  { %8500 = vmatprep.subr.mxu1 %v10416_v46  ;;  %5087 = vrot.lane.b32.xlu1 %v10207_v23, %s9296_s17  ;;  %v10471_v23 = vld [vmem:[%s13072_s3 + $0x1d8] sm:$0xff]  ;;  %v8306_v52 = vld.sshfl [vmem:[#allocation3 + $0x6c] sm:$0x1 pattern:$0x76325410]  ;;  %v5171_v55 = vsel %vm608_vm6, %v10384_v40, %v5170_v44  ;;  %v5285_v40 = vsel %vm608_vm6, %v10399_v56, %v5284_v30  ;;  %v5199_v28 = vsel %vm606_vm5, %v10430_v13, %v5198_v59  ;;  %v10560_v33 = vld [vmem:[%s13072_s3 + $0x1c0] sm:$0xff] }
 0x218   :  { %v1418_v24 = vpop.permute.xlu0 %1417  ;;  %8501 = vmatpush3.msra.mxu1 %v10424_v49  ;;  %v8291_v35 = vld.sshfl [vmem:[#allocation3 + $0x3b] sm:$0x1 pattern:$0x76325410]  ;;  %v10531_v14 = vrot.slane %v8306_v52, 7  ;;  %v2041_v59 = vsel %vm606_vm5, %v10443_v31, %v2040_v47 }
 0x219   :  { %v1731_v27 = vpop.permute.xlu1 %1730  ;;  %1420 = vst.msk [vmem:[#allocation4] sm:$0x3] %vm701_vm10, %v1418_v24  ;;  %8502 = vmatprep.subr.mxu1 %v10451_v11  ;;  %v5311_v5 = vsel %vm602_vm3, %v10439_v8, %v8291_v35  ;;  %v8295_v4 = vld.sshfl [vmem:[#allocation3 + $0x23] sm:$0x1 pattern:$0x76325410] }
 0x21a   :  { %1733 = vst.msk [vmem:[#allocation4 + $0x6] sm:$0x3] %vm671_vm9, %v1731_v27  ;;  %5143 = vrot.lane.b32.xlu0 %v5142_v25, %s9295_s2  ;;  %8503 = vmatpush3.msra.mxu1 %v10459_v22  ;;  %v5312_v39 = vsel %vm604_vm4, %v10439_v8, %v5311_v5  ;;  %v5623_v45 = vsel %vm602_vm3, %v10477_v37, %v8295_v4  ;;  %v8303_v41 = vld.sshfl [vmem:[#allocation3 + $0x2b] sm:$0x1 pattern:$0x76325410] }
 0x21b   :  { %8504 = vmatprep.subr.mxu1 %v10471_v23  ;;  %5257 = vrot.lane.b32.xlu1 %v5256_v20, %s9295_s2  ;;  %v5737_v21 = vsel %vm602_vm3, %v10493_v57, %v8303_v41  ;;  %v8298_v24 = vld.sshfl [vmem:[#allocation3 + $0x64] sm:$0x1 pattern:$0x76325410]  ;;  %v2382_v27 = vsel %vm604_vm4, %v10465_v15, %v2381_v17  ;;  %v5313_v56 = vsel %vm606_vm5, %v10439_v8, %v5312_v39  ;;  %v10579_v20 = vld [vmem:[%s13072_s3 + $0x1b8] sm:$0xff]  ;;  %v10613_v41 = vld [vmem:[%s13072_s3 + $0x1b0] sm:$0xff] }
 0x21c   :  { %v1646_v6 = vpop.permute.xlu0 %1645  ;;  %8505 = vmatpush3.msra.mxu1 %v10489_v38  ;;  %v10567_v35 = vld [vmem:[%s13072_s3 + $0x140] sm:$0xff]  ;;  %v5624_v3 = vsel %vm604_vm4, %v10477_v37, %v5623_v45  ;;  %v8305_v25 = vld.sshfl [vmem:[#allocation3 + $0x2c] sm:$0x1 pattern:$0x76325410]  ;;  %v2155_v5 = vsel %vm606_vm5, %v10432_v61, %v2154_v18  ;;  %v5738_v44 = vsel %vm604_vm4, %v10493_v57, %v5737_v21  ;;  %v10585_v17 = vrot.slane %v8298_v24, 7 }
 0x21d   :  { %v1760_v7 = vpop.permute.xlu1 %1759  ;;  %1648 = vst.msk [vmem:[#allocation4 + $0x4] sm:$0x3] %vm701_vm10, %v1646_v6  ;;  %8506 = vmatprep.subr.mxu1 %v10506_v54  ;;  %v5766_v60 = vsel %vm602_vm3, %v10531_v14, %v8305_v25  ;;  %v8308_v30 = vld.sshfl [vmem:[#allocation3 + $0x6d] sm:$0x1 pattern:$0x76325410]  ;;  %v2383_v4 = vsel %vm606_vm5, %v10465_v15, %v2382_v27  ;;  %v10593_v6 = vsel %vm608_vm6, %v10430_v13, %v5199_v28 }
 0x21e   :  { %1762 = vst.msk [vmem:[#allocation4 + $0x6] sm:$0x3] %vm701_vm10, %v1760_v7  ;;  %5172 = vrot.lane.b32.xlu0 %v5171_v55, %s9294_s21  ;;  %8507 = vmatpush3.msra.mxu1 %v10515_v9  ;;  %v10599_v7 = vld [vmem:[%s13072_s3 + $0x138] sm:$0xff]  ;;  %v10606_v45 = vsel %vm608_vm6, %v10439_v8, %v5313_v56  ;;  %v5625_v13 = vsel %vm606_vm5, %v10477_v37, %v5624_v3  ;;  %v10623_v8 = vld [vmem:[%s13072_s3 + $0x130] sm:$0xff]  ;;  %v10629_v24 = vrot.slane %v8308_v30, 7  ;;  %v10641_v3 = vld [vmem:[%s13072_s3 + $0x1a8] sm:$0xff] }
 0x21f   :  { %8508 = vmatprep.subr.mxu1 %v10525_v12  ;;  %5286 = vrot.lane.b32.xlu1 %v5285_v40, %s9294_s21  ;;  %v8314_v39 = vld.sshfl [vmem:[#allocation3 + $0x74] sm:$0x1 pattern:$0x76325410]  ;;  %v2156_v18 = vsel %vm608_vm6, %v10432_v61, %v2155_v5  ;;  %v5739_v47 = vsel %vm606_vm5, %v10493_v57, %v5738_v44  ;;  %v5767_v55 = vsel %vm604_vm4, %v10531_v14, %v5766_v60 }
 0x220   :  { %v2071_v52 = vpop.permute.xlu0 %2070  ;;  %8509 = vmatpush3.msra.mxu1 %v10545_v1  ;;  %v8297_v21 = vld.sshfl [vmem:[#allocation3 + $0x24] sm:$0x1 pattern:$0x76325410]  ;;  %v2042_v61 = vsel %vm608_vm6, %v10443_v31, %v2041_v59  ;;  %v2384_v27 = vsel %vm608_vm6, %v10465_v15, %v2383_v4  ;;  %v10645_v5 = vrot.slane %v8314_v39, 7  ;;  %v5626_v31 = vsel %vm608_vm6, %v10477_v37, %v5625_v13  ;;  %v10658_v15 = vld [vmem:[%s13072_s3 + $0x128] sm:$0xff] }
 0x221   :  { %v2185_v43 = vpop.permute.xlu1 %2184  ;;  %8510 = vmatprep.subr.mxu1 %v10560_v33  ;;  %v5652_v25 = vsel %vm602_vm3, %v10585_v17, %v8297_v21  ;;  %v8307_v60 = vld.sshfl [vmem:[#allocation3 + $0x2d] sm:$0x1 pattern:$0x76325410]  ;;  %v10672_v37 = vld [vmem:[%s13072_s3 + $0x1a0] sm:$0xff]  ;;  %v5768_v30 = vsel %vm606_vm5, %v10531_v14, %v5767_v55 }
 0x222   :  { %5201 = vrot.lane.b32.xlu0 %v10593_v6, %s9296_s17  ;;  %8511 = vmatpush3.msra.mxu1 %v10567_v35  ;;  %v5653_v59 = vsel %vm604_vm4, %v10585_v17, %v5652_v25  ;;  %v5795_v4 = vsel %vm602_vm3, %v10629_v24, %v8307_v60  ;;  %v8313_v39 = vld.sshfl [vmem:[#allocation3 + $0x34] sm:$0x1 pattern:$0x76325410] }
 0x223   :  { %8512 = vmatprep.subr.mxu1 %v10579_v20  ;;  %5315 = vrot.lane.b32.xlu1 %v10606_v45, %s9296_s17  ;;  %v8166_v55 = vld.sshfl [vmem:[#allocation3 + $0x50] sm:$0x1 pattern:$0x76325410]  ;;  %v5880_v21 = vsel %vm602_vm3, %v10645_v5, %v8313_v39  ;;  %v5654_v25 = vsel %vm606_vm5, %v10585_v17, %v5653_v59 }
 0x224   :  { %v2299_v28 = vpop.permute.xlu0 %2298  ;;  %8513 = vmatpush3.msra.mxu1 %v10599_v7  ;;  %v10721_v60 = vld [vmem:[%s13072_s3 + $0x190] sm:$0xff]  ;;  %v5655_v34 = vsel %vm608_vm6, %v10585_v17, %v5654_v25  ;;  %v10768_v17 = vld [vmem:[%s13072_s3 + $0x108] sm:$0xff] }
 0x225   :  { %v10635_v40 = vld [vmem:[#allocation4] sm:$0xff]  ;;  %v2214_v56 = vpop.permute.xlu1 %2213  ;;  %8514 = vmatprep.subr.mxu1 %v10613_v41  ;;  %v8316_v59 = vld.sshfl [vmem:[#allocation3 + $0x75] sm:$0x1 pattern:$0x76325410]  ;;  %13164 = vst [vmem:[#allocation19_spill] sm:$0xff] %v10768_v17 }
 0x226   :  { %2386 = vst.msk [vmem:[#allocation4 + $0x6] sm:$0x3] %vm611_vm7, %v2384_v27  ;;  %2044 = vst.msk [vmem:[#allocation4] sm:$0x3] %vm611_vm7, %v2042_v61  ;;  %v1836_v44 = vrot.slane %v10635_v40, %v10333_v58  ;;  %5627 = vrot.lane.b32.xlu0 %v5626_v31, %s9295_s2  ;;  %8515 = vmatpush3.msra.mxu1 %v10623_v8  ;;  %v10702_v61 = vld [vmem:[%s13072_s3 + $0x118] sm:$0xff]  ;;  %v10782_v51 = vrot.slane %v8316_v59, 7 }
 0x227   :  { %2158 = vst.msk [vmem:[#allocation4 + $0x2] sm:$0x3] %vm611_vm7, %v2156_v18  ;;  %2272 = vst.msk [vmem:[#allocation4 + $0x4] sm:$0x3] %vm611_vm7, %v10231_v63  ;;  %v5740_v63 = vsel %vm608_vm6, %v10493_v57, %v5739_v47  ;;  %8516 = vmatprep.subr.mxu1 %v10641_v3  ;;  %v10692_v47 = vld [vmem:[%s13072_s3 + $0x198] sm:$0xff]  ;;  %v10807_v59 = vld [vmem:[%s13072_s3 + $0xe0] sm:$0xff] }
 0x228   :  { %2073 = vst.msk [vmem:[#allocation4] sm:$0x3] %vm641_vm8, %v2071_v52  ;;  %2187 = vst.msk [vmem:[#allocation4 + $0x2] sm:$0x3] %vm641_vm8, %v2185_v43  ;;  %5741 = vrot.lane.b32.xlu1 %v5740_v63, %s9295_s2  ;;  %v10682_v43 = vld [vmem:[%s13072_s3 + $0x120] sm:$0xff]  ;;  %v1844_v57 = vcombine.high %v1836_v44, %v1836_v44  ;;  %v2100_v13 = vpop.permute.xlu0 %2099  ;;  %8517 = vmatpush3.msra.mxu1 %v10658_v15  ;;  %v10716_v31 = vld [vmem:[%s13072_s3 + $0x78] sm:$0xff] }
 0x229   :  { %2301 = vst.msk [vmem:[#allocation4 + $0x4] sm:$0x3] %vm641_vm8, %v2299_v28  ;;  %v8300_v52 = vld.sshfl [vmem:[#allocation3 + $0x65] sm:$0x1 pattern:$0x76325410]  ;;  %v2243_v18 = vpop.permute.xlu1 %2242  ;;  %8518 = vmatprep.subr.mxu1 %v10672_v37 }
 0x22a   :  { %2216 = vst.msk [vmem:[#allocation4 + $0x2] sm:$0x3] %vm671_vm9, %v2214_v56  ;;  %2102 = vst.msk [vmem:[#allocation4] sm:$0x3] %vm671_vm9, %v2100_v13  ;;  %1914 = vmatprep.mubr.f32.mxu0 %v1844_v57  ;;  %v10704_v28 = vrot.slane %v8300_v52, 7  ;;  %5855 = vrot.lane.b32.xlu0 %v10593_v6, %s9295_s2  ;;  %v5769_v56 = vsel %vm608_vm6, %v10531_v14, %v5768_v30  ;;  %v5796_v6 = vsel %vm604_vm4, %v10629_v24, %v5795_v4  ;;  %v10730_v14 = vld [vmem:[%s13072_s3 + $0xf0] sm:$0xff] }
 0x22b   :  { %2245 = vst.msk [vmem:[#allocation4 + $0x2] sm:$0x3] %vm701_vm10, %v2243_v18  ;;  %v8182_v27 = vld.sshfl [vmem:[#allocation3 + $0x60] sm:$0x1 pattern:$0x76325410]  ;;  %8519 = vmatpush3.msra.mxu1 %v10682_v43  ;;  %v5881_v57 = vsel %vm604_vm4, %v10645_v5, %v5880_v21  ;;  %1915 = vmatmul.mubr.f32.vlgmr.msra.gmra.mxu0 %v1836_v44  ;;  %v5797_v21 = vsel %vm606_vm5, %v10629_v24, %v5796_v6 }
 0x22c   :  { %v8299_v63 = vld.sshfl [vmem:[#allocation3 + $0x25] sm:$0x1 pattern:$0x76325410]  ;;  %8520 = vmatprep.subr.mxu1 %v10692_v47  ;;  %5770 = vrot.lane.b32.xlu1 %v5769_v56, %s9294_s21  ;;  %v10735_v30 = vld [vmem:[%s13072_s3 + $0x110] sm:$0xff]  ;;  %v2328_v4 = vpop.permute.xlu0 %2327  ;;  %v10740_v13 = vrot.slane %v8166_v55, 7  ;;  %v5882_v0 = vsel %vm606_vm5, %v10645_v5, %v5881_v57  ;;  %v1829_v6 = vcombine.high %v10635_v40, %v10635_v40  ;;  %v10797_v40 = vsel %vm608_vm6, %v10629_v24, %v5797_v21 }
 0x22d   :  { %v8322_v52 = vld.sshfl [vmem:[#allocation3 + $0x7c] sm:$0x1 pattern:$0x76325410]  ;;  %8521 = vmatpush3.msra.mxu1 %v10702_v61  ;;  %v2413_v39 = vpop.permute.xlu1 %2412  ;;  %v10745_v18 = vld [vmem:[%s13072_s3 + $0x70] sm:$0xff]  ;;  %8602 = vmatpush3.msra.mxu0 %v10716_v31  ;;  %v10756_v44 = vld [vmem:[%s13072_s3 + $0x188] sm:$0xff]  ;;  %v5883_v24 = vsel %vm608_vm6, %v10645_v5, %v5882_v0 }
 0x22e   :  { %v8190_v56 = vld.sshfl [vmem:[#allocation3 + $0x68] sm:$0x1 pattern:$0x76325410]  ;;  %2330 = vst.msk [vmem:[#allocation4 + $0x4] sm:$0x3] %vm671_vm9, %v2328_v4  ;;  %8522 = vmatprep.subr.mxu1 %v10721_v60  ;;  %v5681_v4 = vsel %vm602_vm3, %v10704_v28, %v8299_v63  ;;  %5656 = vrot.lane.b32.xlu0 %v5655_v34, %s9294_s21  ;;  %v10835_v0 = vrot.slane %v1829_v6, %v10333_v58 }
 0x22f   :  { %2415 = vst.msk [vmem:[#allocation4 + $0x6] sm:$0x3] %vm641_vm8, %v2413_v39  ;;  %v10761_v55 = vld [vmem:[%s13072_s3 + $0xe8] sm:$0xff]  ;;  %v10770_v25 = vrot.slane %v8182_v27, 7  ;;  %8603 = vmatprep.subr.mxu0 %v10730_v14  ;;  %v10780_v53 = vrot.slane %v8322_v52, 7  ;;  %8523 = vmatpush3.msra.mxu1 %v10735_v30  ;;  %v10791_v27 = vrot.slane %v8190_v56, 7  ;;  %v5682_v29 = vsel %vm604_vm4, %v10704_v28, %v5681_v4 }
 0x230   :  { %13163 = vst [vmem:[#allocation18_spill] sm:$0xff] %v10761_v55  ;;  %v8165_v39 = vld.sshfl [vmem:[#allocation3 + $0x10] sm:$0x1 pattern:$0x76325410]  ;;  %8604 = vmatpush3.msra.mxu0 %v10745_v18  ;;  %v10789_v34 = vld [vmem:[%s13072_s3 + $0x68] sm:$0xff]  ;;  %v2129_v57 = vpop.permute.xlu0 %2128  ;;  %8524 = vmatprep.subr.mxu1 %v10756_v44  ;;  %v5683_v6 = vsel %vm606_vm5, %v10704_v28, %v5682_v29 }
 0x231   :  { %13165 = vst [vmem:[#allocation20_spill] sm:$0xff] %v10789_v34  ;;  %v8321_v63 = vld.sshfl [vmem:[#allocation3 + $0x3c] sm:$0x1 pattern:$0x76325410]  ;;  %8605 = vmatprep.subr.mxu0 %v10761_v55  ;;  %v10802_v52 = vld [vmem:[%s13072_s3 + $0x180] sm:$0xff]  ;;  %v2442_v56 = vpop.permute.xlu1 %2441  ;;  %v2750_v55 = vsel %vm602_vm3, %v10740_v13, %v8165_v39  ;;  %5799 = vrot.lane.b32.xlu1 %v10797_v40, %s9296_s17  ;;  %v2978_v21 = vsel %vm602_vm3, %v10770_v25, %v8181_v48 }
 0x232   :  { %13166 = vst [vmem:[#allocation21_spill] sm:$0xff] %v10802_v52  ;;  %13167 = vst [vmem:[#allocation22_spill] sm:$0xff] %v10807_v59  ;;  %8525 = vmatpush3.msra.mxu1 %v10768_v17  ;;  %v10825_v4 = vld [vmem:[%s13072_s3 + $0x100] sm:$0xff]  ;;  %5884 = vrot.lane.b32.xlu0 %v5883_v24, %s9294_s21  ;;  %v5994_v48 = vsel %vm602_vm3, %v10780_v53, %v8321_v63  ;;  %v10846_v24 = vld [vmem:[%s13072_s3 + $0xd8] sm:$0xff]  ;;  %v10852_v17 = vrot.slane %v8324_v2, 7  ;;  %v2751_v63 = vsel %vm604_vm4, %v10740_v13, %v2750_v55 }
 0x233   :  { %2131 = vst.msk [vmem:[#allocation4] sm:$0x3] %vm701_vm10, %v2129_v57  ;;  %v10830_v39 = vld [vmem:[%s13072_s3 + $0x60] sm:$0xff]  ;;  %8606 = vmatpush3.msra.mxu0 %v10789_v34  ;;  %8526 = vmatprep.subr.mxu1 %v10802_v52  ;;  %13168 = vst [vmem:[#allocation23_spill] sm:$0xff] %v10846_v24  ;;  %v2979_v52 = vsel %vm604_vm4, %v10770_v25, %v2978_v21  ;;  %v9268_v2 = vld [vmem:[%s13072_s3 + $0x1f8] sm:$0xff]  ;;  %v5995_v55 = vsel %vm604_vm4, %v10780_v53, %v5994_v48 }
 0x234   :  { %2444 = vst.msk [vmem:[#allocation4 + $0x6] sm:$0x3] %vm671_vm9, %v2442_v56  ;;  %v8315_v57 = vld.sshfl [vmem:[#allocation3 + $0x35] sm:$0x1 pattern:$0x76325410]  ;;  %8607 = vmatprep.subr.mxu0 %v10807_v59  ;;  %8527 = vmatpush3.msra.mxu1 %v10825_v4 }
 0x235   :  { %v8189_v5 = vld.sshfl [vmem:[#allocation3 + $0x28] sm:$0x1 pattern:$0x76325410]  ;;  %v5909_v56 = vsel %vm602_vm3, %v10782_v51, %v8315_v57  ;;  %v2357_v57 = vpop.permute.xlu0 %2356  ;;  %8608 = vmatpush3.msra.mxu0 %v10830_v39  ;;  %v2471_v59 = vpop.permute.xlu1 %2470  ;;  %1273 = vmatmul.mubr.f32.vlgmr.msra.gmra.mxu1 %v10378_v10  ;;  %v10868_v29 = vld [vmem:[%s13072_s3 + $0x58] sm:$0xff]  ;;  %v10880_v10 = vsel %vm608_vm6, %v10704_v28, %v5683_v6 }
 0x236   :  { %v3092_v34 = vsel %vm602_vm3, %v10791_v27, %v8189_v5  ;;  %2359 = vst.msk [vmem:[#allocation4 + $0x4] sm:$0x3] %vm701_vm10, %v2357_v57  ;;  %8566 = vmatprep.subr.mxu1 %v9268_v2  ;;  %2473 = vst.msk [vmem:[#allocation4 + $0x6] sm:$0x3] %vm701_vm10, %v2471_v59  ;;  %v5910_v21 = vsel %vm604_vm4, %v10782_v51, %v5909_v56  ;;  %8609 = vmatprep.subr.mxu0 %v10846_v24  ;;  %v10887_v59 = vld [vmem:[%s13072_s3 + $0xd0] sm:$0xff] }
 0x237   :  { %5969 = vrot.lane.b32.xlu1 %v10606_v45, %s9295_s2  ;;  %v1845_v5 = vcombine.high %v10835_v0, %v10835_v0  ;;  %v3093_v48 = vsel %vm604_vm4, %v10791_v27, %v3092_v34  ;;  %v8323_v56 = vld.sshfl [vmem:[#allocation3 + $0x3d] sm:$0x1 pattern:$0x76325410]  ;;  %5685 = vrot.lane.b32.xlu0 %v10880_v10, %s9296_s17  ;;  %v10897_v45 = vld [vmem:[%s13072_s3 + $0x50] sm:$0xff]  ;;  %v10905_v34 = vld [vmem:[%s13072_s3 + $0xc8] sm:$0xff]  ;;  %v5911_v57 = vsel %vm606_vm5, %v10782_v51, %v5910_v21 }
 0x238   :  { %8567 = vmatpush3.msra.mxu1 %v10393_v36  ;;  %v6023_v28 = vsel %vm602_vm3, %v10852_v17, %v8323_v56  ;;  %8610 = vmatpush3.msra.mxu0 %v10868_v29  ;;  %13169 = vst [vmem:[#allocation24_spill] sm:$0xff] %v10905_v34  ;;  %v5996_v36 = vsel %vm606_vm5, %v10780_v53, %v5995_v55  ;;  %v10924_v55 = vld [vmem:[%s13072_s3 + $0x48] sm:$0xff]  ;;  %v10939_v21 = vld [vmem:[%s13072_s3 + $0xc0] sm:$0xff] }
 0x239   :  { %1984 = vmatprep.mubr.f32.mxu1 %v1845_v5  ;;  %v2782_v6 = vpop.permute.xlu0 %2781  ;;  %v2896_v2 = vpop.permute.xlu1 %2895  ;;  %v2752_v24 = vsel %vm606_vm5, %v10740_v13, %v2751_v63  ;;  %v2980_v5 = vsel %vm606_vm5, %v10770_v25, %v2979_v52  ;;  %8568 = vmatprep.subr.mxu1 %v10406_v26  ;;  %v3094_v56 = vsel %vm606_vm5, %v10791_v27, %v3093_v48  ;;  %v8338_v52 = vld.sshfl [vmem:[#allocation3 + $0x6e] sm:$0x1 pattern:$0x76325410] }
 0x23a   :  { %8611 = vmatprep.subr.mxu0 %v10887_v59  ;;  %8569 = vmatpush3.msra.mxu1 %v10411_v62  ;;  %v6024_v63 = vsel %vm604_vm4, %v10852_v17, %v6023_v28  ;;  %v5997_v26 = vsel %vm608_vm6, %v10780_v53, %v5996_v36  ;;  %v10934_v62 = vsel %vm608_vm6, %v10782_v51, %v5911_v57  ;;  %v8330_v48 = vld.sshfl [vmem:[#allocation3 + $0x66] sm:$0x1 pattern:$0x76325410] }
 0x23b   :  { %8612 = vmatpush3.msra.mxu0 %v10897_v45  ;;  %8570 = vmatprep.subr.mxu1 %v10416_v46  ;;  %v2753_v28 = vsel %vm608_vm6, %v10740_v13, %v2752_v24  ;;  %v2981_v46 = vsel %vm608_vm6, %v10770_v25, %v2980_v5  ;;  %v10955_v36 = vld [vmem:[%s13072_s3 + $0x40] sm:$0xff]  ;;  %v10967_v25 = vld [vmem:[%s13072_s3 + $0xb8] sm:$0xff]  ;;  %v10971_v24 = vrot.slane %v8338_v52, 7 }
 0x23c   :  { %8613 = vmatprep.subr.mxu0 %v10905_v34  ;;  %v3095_v34 = vsel %vm608_vm6, %v10791_v27, %v3094_v56  ;;  %5998 = vrot.lane.b32.xlu1 %v5997_v26, %s9294_s21  ;;  %v6025_v27 = vsel %vm606_vm5, %v10852_v17, %v6024_v63  ;;  %v8346_v5 = vld.sshfl [vmem:[#allocation3 + $0x76] sm:$0x1 pattern:$0x76325410] }
 0x23d   :  { %v10947_v53 = vld [vmem:[#allocation4] sm:$0xff]  ;;  %5913 = vrot.lane.b32.xlu0 %v10934_v62, %s9296_s17  ;;  %v2811_v51 = vpop.permute.xlu0 %2810  ;;  %v2925_v13 = vpop.permute.xlu1 %2924  ;;  %8571 = vmatpush3.msra.mxu1 %v10424_v49  ;;  %v10977_v49 = vrot.slane %v8330_v48, 7  ;;  %v11036_v48 = vld [vmem:[%s13072_s3 + $0x28] sm:$0xff] }
 0x23e   :  { %3097 = vst.msk [vmem:[#allocation4 + $0x6] sm:$0x3] %vm611_vm7, %v3095_v34  ;;  %2755 = vst.msk [vmem:[#allocation4] sm:$0x3] %vm611_vm7, %v2753_v28  ;;  %8614 = vmatpush3.msra.mxu0 %v10924_v55  ;;  %8572 = vmatprep.subr.mxu1 %v10451_v11  ;;  %v10985_v34 = vld [vmem:[%s13072_s3 + $0x38] sm:$0xff]  ;;  %v11027_v26 = vrot.slane %v10947_v53, %v10333_v58 }
 0x23f   :  { %2869 = vst.msk [vmem:[#allocation4 + $0x2] sm:$0x3] %vm611_vm7, %v10136_v32  ;;  %2983 = vst.msk [vmem:[#allocation4 + $0x4] sm:$0x3] %vm611_vm7, %v2981_v46  ;;  %8615 = vmatprep.subr.mxu0 %v10939_v21  ;;  %8573 = vmatpush3.msra.mxu1 %v10459_v22  ;;  %v10997_v22 = vld [vmem:[%s13072_s3 + $0xb0] sm:$0xff] }
 0x240   :  { %2784 = vst.msk [vmem:[#allocation4] sm:$0x3] %vm641_vm8, %v2782_v6  ;;  %2898 = vst.msk [vmem:[#allocation4 + $0x2] sm:$0x3] %vm641_vm8, %v2896_v2  ;;  %8616 = vmatpush3.msra.mxu0 %v10955_v36  ;;  %8574 = vmatprep.subr.mxu1 %v10471_v23  ;;  %v10992_v6 = vsel %vm608_vm6, %v10852_v17, %v6025_v27  ;;  %v11007_v23 = vld [vmem:[%s13072_s3 + $0x30] sm:$0xff] }
 0x241   :  { %v8337_v32 = vld.sshfl [vmem:[#allocation3 + $0x2e] sm:$0x1 pattern:$0x76325410]  ;;  %2813 = vst.msk [vmem:[#allocation4] sm:$0x3] %vm671_vm9, %v2811_v51  ;;  %8617 = vmatprep.subr.mxu0 %v10967_v25  ;;  %v2840_v57 = vpop.permute.xlu0 %2839  ;;  %v2954_v2 = vpop.permute.xlu1 %2953  ;;  %6027 = vrot.lane.b32.xlu1 %v10992_v6, %s9296_s17 }
 0x242   :  { %2927 = vst.msk [vmem:[#allocation4 + $0x2] sm:$0x3] %vm671_vm9, %v2925_v13  ;;  %v8340_v11 = vld.sshfl [vmem:[#allocation3 + $0x6f] sm:$0x1 pattern:$0x76325410]  ;;  %6338 = vrot.lane.b32.xlu0 %v10880_v10, %s9295_s2  ;;  %v6477_v17 = vsel %vm602_vm3, %v10971_v24, %v8337_v32  ;;  %8575 = vmatpush3.msra.mxu1 %v10489_v38 }
 0x243   :  { %2842 = vst.msk [vmem:[#allocation4] sm:$0x3] %vm701_vm10, %v2840_v57  ;;  %2956 = vst.msk [vmem:[#allocation4 + $0x2] sm:$0x3] %vm701_vm10, %v2954_v2  ;;  %8618 = vmatpush3.msra.mxu0 %v10985_v34  ;;  %v11017_v10 = vld [vmem:[%s13072_s3 + $0xa8] sm:$0xff]  ;;  %v11021_v52 = vrot.slane %v8340_v11, 7  ;;  %8576 = vmatprep.subr.mxu1 %v10506_v54  ;;  %v6478_v54 = vsel %vm604_vm4, %v10971_v24, %v6477_v17 }
 0x244   :  { %v8329_v56 = vld.sshfl [vmem:[#allocation3 + $0x26] sm:$0x1 pattern:$0x76325410]  ;;  %8619 = vmatprep.subr.mxu0 %v10997_v22  ;;  %v11029_v38 = vrot.slane %v8346_v5, 7  ;;  %8577 = vmatpush3.msra.mxu1 %v10515_v9  ;;  %v6479_v57 = vsel %vm606_vm5, %v10971_v24, %v6478_v54 }
 0x245   :  { %v6363_v63 = vsel %vm602_vm3, %v10977_v49, %v8329_v56  ;;  %8620 = vmatpush3.msra.mxu0 %v11007_v23  ;;  %v3010_v28 = vpop.permute.xlu0 %3009  ;;  %v3124_v46 = vpop.permute.xlu1 %3123  ;;  %v8339_v51 = vld.sshfl [vmem:[#allocation3 + $0x2f] sm:$0x1 pattern:$0x76325410]  ;;  %8578 = vmatprep.subr.mxu1 %v10525_v12  ;;  %v11045_v9 = vld [vmem:[%s13072_s3 + $0xa0] sm:$0xff] }
 0x246   :  { %8621 = vmatprep.subr.mxu0 %v11017_v10  ;;  %3012 = vst.msk [vmem:[#allocation4 + $0x4] sm:$0x3] %vm641_vm8, %v3010_v28  ;;  %v6364_v13 = vsel %vm604_vm4, %v10977_v49, %v6363_v63  ;;  %3126 = vst.msk [vmem:[#allocation4 + $0x6] sm:$0x3] %vm641_vm8, %v3124_v46  ;;  %6452 = vrot.lane.b32.xlu1 %v10797_v40, %s9295_s2  ;;  %v11058_v12 = vld [vmem:[%s13072_s3 + $0x20] sm:$0xff]  ;;  %v6506_v32 = vsel %vm602_vm3, %v11021_v52, %v8339_v51  ;;  %v11067_v40 = vld [vmem:[%s13072_s3 + $0x98] sm:$0xff] }
 0x247   :  { %v8332_v27 = vld.sshfl [vmem:[#allocation3 + $0x67] sm:$0x1 pattern:$0x76325410]  ;;  %6566 = vrot.lane.b32.xlu0 %v10934_v62, %s9295_s2  ;;  %8579 = vmatpush3.msra.mxu1 %v10545_v1  ;;  %v2555_v62 = vcombine.high %v11027_v26, %v11027_v26  ;;  %v6365_v1 = vsel %vm606_vm5, %v10977_v49, %v6364_v13  ;;  %v6507_v63 = vsel %vm604_vm4, %v11021_v52, %v6506_v32 }
 0x248   :  { %v8345_v11 = vld.sshfl [vmem:[#allocation3 + $0x36] sm:$0x1 pattern:$0x76325410]  ;;  %8622 = vmatpush3.msra.mxu0 %v11036_v48  ;;  %8580 = vmatprep.subr.mxu1 %v10560_v33  ;;  %v11079_v56 = vrot.slane %v8332_v27, 7  ;;  %v6480_v28 = vsel %vm608_vm6, %v10971_v24, %v6479_v57 }
 0x249   :  { %v6591_v2 = vsel %vm602_vm3, %v11029_v38, %v8345_v11  ;;  %8623 = vmatprep.subr.mxu0 %v11045_v9  ;;  %v3039_v5 = vpop.permute.xlu0 %3038  ;;  %v3153_v17 = vpop.permute.xlu1 %3152  ;;  %8581 = vmatpush3.msra.mxu1 %v10567_v35  ;;  %v8354_v33 = vld.sshfl [vmem:[#allocation3 + $0x7e] sm:$0x1 pattern:$0x76325410]  ;;  %v11106_v24 = vld [vmem:[%s13072_s3 + $0x90] sm:$0xff] }
 0x24a   :  { %8624 = vmatpush3.msra.mxu0 %v11058_v12  ;;  %3041 = vst.msk [vmem:[#allocation4 + $0x4] sm:$0x3] %vm671_vm9, %v3039_v5  ;;  %3155 = vst.msk [vmem:[#allocation4 + $0x6] sm:$0x3] %vm671_vm9, %v3153_v17  ;;  %8582 = vmatprep.subr.mxu1 %v10579_v20  ;;  %v11094_v35 = vld [vmem:[%s13072_s3 + $0x18] sm:$0xff]  ;;  %v6592_v54 = vsel %vm604_vm4, %v11029_v38, %v6591_v2  ;;  %v6366_v20 = vsel %vm608_vm6, %v10977_v49, %v6365_v1 }
 0x24b   :  { %8625 = vmatprep.subr.mxu0 %v11067_v40  ;;  %v9269_v46 = vld.sshfl [vmem:[#allocation3 + $0x22] sm:$0x1 pattern:$0x76325410]  ;;  %2625 = vmatprep.mubr.f32.mxu0 %v2555_v62  ;;  %v11115_v62 = vld [vmem:[%s13072_s3 + $0x10] sm:$0xff]  ;;  %v6508_v49 = vsel %vm606_vm5, %v11021_v52, %v6507_v63  ;;  %v6593_v5 = vsel %vm606_vm5, %v11029_v38, %v6592_v54  ;;  %v11134_v63 = vrot.slane %v8354_v33, 7 }
 0x24c   :  { %v3690_v51 = vsel %vm602_vm3, %v9765_v19, %v9269_v46  ;;  %v8348_v13 = vld.sshfl [vmem:[#allocation3 + $0x77] sm:$0x1 pattern:$0x76325410]  ;;  %6481 = vrot.lane.b32.xlu1 %v6480_v28, %s9294_s21  ;;  %6367 = vrot.lane.b32.xlu0 %v6366_v20, %s9294_s21  ;;  %v6509_v54 = vsel %vm608_vm6, %v11021_v52, %v6508_v49  ;;  %v11149_v33 = vld [vmem:[%s13072_s3 + $0x8] sm:$0xff] }
 0x24d   :  { %v8331_v27 = vld.sshfl [vmem:[#allocation3 + $0x27] sm:$0x1 pattern:$0x76325410]  ;;  %8583 = vmatpush3.msra.mxu1 %v10599_v7  ;;  %v3068_v57 = vpop.permute.xlu0 %3067  ;;  %v3182_v1 = vpop.permute.xlu1 %3181  ;;  %8626 = vmatpush3.msra.mxu0 %v11094_v35  ;;  %v11126_v7 = vld [vmem:[%s13072_s3 + $0x88] sm:$0xff]  ;;  %v3691_v17 = vsel %vm604_vm4, %v9765_v19, %v3690_v51  ;;  %v11136_v28 = vrot.slane %v8348_v13, 7  ;;  %v6594_v13 = vsel %vm608_vm6, %v11029_v38, %v6593_v5 }
 0x24e   :  { %v9270_v32 = vld.sshfl [vmem:[#allocation3 + $0x2a] sm:$0x1 pattern:$0x76325410]  ;;  %v6392_v2 = vsel %vm602_vm3, %v11079_v56, %v8331_v27  ;;  %8584 = vmatprep.subr.mxu1 %v10613_v41  ;;  %13170 = vst [vmem:[#allocation25_spill] sm:$0xff] %v11126_v7  ;;  %8627 = vmatprep.subr.mxu0 %v11106_v24  ;;  %13171 = vst [vmem:[#allocation26_spill] sm:$0xff] %v11149_v33  ;;  %v3692_v52 = vsel %vm606_vm5, %v9765_v19, %v3691_v17 }
 0x24f   :  { %v3804_v11 = vsel %vm602_vm3, %v9804_v42, %v9270_v32  ;;  %3070 = vst.msk [vmem:[#allocation4 + $0x4] sm:$0x3] %vm701_vm10, %v3068_v57  ;;  %3184 = vst.msk [vmem:[#allocation4 + $0x6] sm:$0x3] %vm701_vm10, %v3182_v1  ;;  %8585 = vmatpush3.msra.mxu1 %v10623_v8  ;;  %8628 = vmatpush3.msra.mxu0 %v11115_v62  ;;  %v6393_v51 = vsel %vm604_vm4, %v11079_v56, %v6392_v2 }
 0x250   :  { %v3805_v41 = vsel %vm604_vm4, %v9804_v42, %v3804_v11  ;;  %v8353_v46 = vld.sshfl [vmem:[#allocation3 + $0x3e] sm:$0x1 pattern:$0x76325410]  ;;  %8586 = vmatprep.subr.mxu1 %v10641_v3  ;;  %8629 = vmatprep.subr.mxu0 %v11126_v7  ;;  %v11160_v3 = vld [vmem:[%s13072_s3 + $0x80] sm:$0xff]  ;;  %v3693_v1 = vsel %vm608_vm6, %v9765_v19, %v3692_v52 }
 0x251   :  { %v8356_v8 = vld.sshfl [vmem:[#allocation3 + $0x7f] sm:$0x1 pattern:$0x76325410]  ;;  %6510 = vrot.lane.b32.xlu1 %v6509_v54, %s9296_s17  ;;  %13172 = vst [vmem:[#allocation27_spill] sm:$0xff] %v11160_v3  ;;  %v3494_v20 = vpop.permute.xlu0 %3493  ;;  %v3608_v32 = vpop.permute.xlu1 %3607  ;;  %6595 = vrot.lane.b32.xlu0 %v6594_v13, %s9294_s21  ;;  %v11169_v11 = vld [vmem:[%s13072_s3] sm:$0xff]  ;;  %v3806_v38 = vsel %vm606_vm5, %v9804_v42, %v3805_v41  ;;  %v6705_v49 = vsel %vm602_vm3, %v11134_v63, %v8353_v46 }
 0x252   :  { %v8347_v27 = vld.sshfl [vmem:[#allocation3 + $0x37] sm:$0x1 pattern:$0x76325410]  ;;  %8587 = vmatpush3.msra.mxu1 %v10658_v15  ;;  %13173 = vst [vmem:[#allocation28_spill] sm:$0xff] %v11169_v11  ;;  %8630 = vmatpush3.msra.mxu0 %v11149_v33  ;;  %v6394_v15 = vsel %vm606_vm5, %v11079_v56, %v6393_v51  ;;  %v11181_v2 = vrot.slane %v8356_v8, 7  ;;  %v3807_v5 = vsel %vm608_vm6, %v9804_v42, %v3806_v38 }
 0x253   :  { %v6620_v57 = vsel %vm602_vm3, %v11136_v28, %v8347_v27  ;;  %8588 = vmatprep.subr.mxu1 %v10672_v37  ;;  %8631 = vmatprep.subr.mxu0 %v11160_v3  ;;  %v6706_v17 = vsel %vm604_vm4, %v11134_v63, %v6705_v49  ;;  %v9271_v19 = vld [vmem:[%s13072_s3 + $0xf8] sm:$0xff]  ;;  %v6395_v42 = vsel %vm608_vm6, %v11079_v56, %v6394_v15  ;;  %v13179_v13 = vld [vmem:[#allocation22_spill] sm:$0xff] }
 0x254   :  { %8589 = vmatpush3.msra.mxu1 %v10682_v43  ;;  %8632 = vmatpush3.msra.mxu0 %v11169_v11  ;;  %v6621_v41 = vsel %vm604_vm4, %v11136_v28, %v6620_v57  ;;  %v8355_v43 = vld.sshfl [vmem:[#allocation3 + $0x3f] sm:$0x1 pattern:$0x76325410]  ;;  %v11287_v49 = vld [vmem:[%s13072_s3 + $0x1e8] sm:$0xff] }
 0x255   :  { %8590 = vmatprep.subr.mxu1 %v10692_v47  ;;  %v3722_v46 = vpop.permute.xlu0 %3721  ;;  %v3637_v54 = vpop.permute.xlu1 %3636  ;;  %2626 = vmatmul.mubr.f32.vlgmr.msra.gmra.mxu0 %v11027_v26  ;;  %v6622_v47 = vsel %vm606_vm5, %v11136_v28, %v6621_v41  ;;  %v13178_v8 = vld [vmem:[#allocation21_spill] sm:$0xff]  ;;  %v11300_v15 = vld [vmem:[%s13072_s3 + $0x168] sm:$0xff]  ;;  %v13181_v41 = vld [vmem:[#allocation24_spill] sm:$0xff] }
 0x256   :  { %v11191_v37 = vld [vmem:[#allocation4] sm:$0xff]  ;;  %8671 = vmatprep.subr.mxu0 %v9271_v19  ;;  %6680 = vrot.lane.b32.xlu1 %v10992_v6, %s9295_s2  ;;  %v2540_v6 = vcombine.high %v10947_v53, %v10947_v53  ;;  %v13176_v53 = vld [vmem:[#allocation20_spill] sm:$0xff] }
 0x257   :  { %3809 = vst.msk [vmem:[#allocation4 + $0x6] sm:$0x3] %vm611_vm7, %v3807_v5  ;;  %3467 = vst.msk [vmem:[#allocation4] sm:$0x3] %vm611_vm7, %v9818_v50  ;;  %6396 = vrot.lane.b32.xlu0 %v6395_v42, %s9296_s17  ;;  %v6734_v50 = vsel %vm602_vm3, %v11181_v2, %v8355_v43  ;;  %8591 = vmatpush3.msra.mxu1 %v10702_v61  ;;  %v11263_v52 = vld [vmem:[%s13072_s3 + $0x178] sm:$0xff]  ;;  %v11291_v57 = vrot.slane %v11191_v37, %v10333_v58  ;;  %v11341_v42 = vld [vmem:[%s13072_s3 + $0x1d0] sm:$0xff] }
 0x258   :  { %3581 = vst.msk [vmem:[#allocation4 + $0x2] sm:$0x3] %vm611_vm7, %v9880_v16  ;;  %3695 = vst.msk [vmem:[#allocation4 + $0x4] sm:$0x3] %vm611_vm7, %v3693_v1  ;;  %8672 = vmatpush3.msra.mxu0 %v10716_v31  ;;  %v6707_v16 = vsel %vm606_vm5, %v11134_v63, %v6706_v17  ;;  %8592 = vmatprep.subr.mxu1 %v10721_v60  ;;  %v6735_v61 = vsel %vm604_vm4, %v11181_v2, %v6734_v50  ;;  %v13174_v31 = vld [vmem:[#allocation18_spill] sm:$0xff]  ;;  %v11334_v19 = vld [vmem:[%s13072_s3 + $0x158] sm:$0xff] }
 0x259   :  { %3496 = vst.msk [vmem:[#allocation4] sm:$0x3] %vm641_vm8, %v3494_v20  ;;  %3610 = vst.msk [vmem:[#allocation4 + $0x2] sm:$0x3] %vm641_vm8, %v3608_v32  ;;  %8673 = vmatprep.subr.mxu0 %v10730_v14  ;;  %v3523_v26 = vpop.permute.xlu0 %3522  ;;  %v3666_v56 = vpop.permute.xlu1 %3665  ;;  %8593 = vmatpush3.msra.mxu1 %v10735_v30  ;;  %v6708_v60 = vsel %vm608_vm6, %v11134_v63, %v6707_v16  ;;  %v6623_v14 = vsel %vm608_vm6, %v11136_v28, %v6622_v47  ;;  %v11314_v1 = vld [vmem:[%s13072_s3 + $0x160] sm:$0xff]  ;;  %v11347_v16 = vld [vmem:[%s13072_s3 + $0x150] sm:$0xff] }
 0x25a   :  { %3724 = vst.msk [vmem:[#allocation4 + $0x4] sm:$0x3] %vm641_vm8, %v3722_v46  ;;  %8674 = vmatpush3.msra.mxu0 %v10745_v18  ;;  %8594 = vmatprep.subr.mxu1 %v10756_v44  ;;  %v11243_v30 = vrot.slane %v2540_v6, %v10333_v58  ;;  %v13175_v18 = vld [vmem:[#allocation19_spill] sm:$0xff]  ;;  %v11250_v44 = vld [vmem:[%s13072_s3 + $0x1f8] sm:$0xff]  ;;  %v6736_v63 = vsel %vm606_vm5, %v11181_v2, %v6735_v61 }
 0x25b   :  { %3639 = vst.msk [vmem:[#allocation4 + $0x2] sm:$0x3] %vm671_vm9, %v3637_v54  ;;  %3525 = vst.msk [vmem:[#allocation4] sm:$0x3] %vm671_vm9, %v3523_v26  ;;  %8675 = vmatprep.subr.mxu0 %v13174_v31  ;;  %6709 = vrot.lane.b32.xlu1 %v6708_v60, %s9294_s21  ;;  %v6737_v20 = vsel %vm608_vm6, %v11181_v2, %v6736_v63  ;;  %v11307_v2 = vld [vmem:[%s13072_s3 + $0x1e0] sm:$0xff]  ;;  %v11321_v46 = vld [vmem:[%s13072_s3 + $0x1d8] sm:$0xff]  ;;  %v3266_v54 = vcombine.high %v11291_v57, %v11291_v57 }
 0x25c   :  { %3668 = vst.msk [vmem:[#allocation4 + $0x2] sm:$0x3] %vm701_vm10, %v3666_v56  ;;  %6624 = vrot.lane.b32.xlu0 %v6623_v14, %s9296_s17  ;;  %8595 = vmatpush3.msra.mxu1 %v13175_v18  ;;  %13177 = vst [vmem:[#allocation18_spill] sm:$0xff] %v11250_v44  ;;  %v2556_v27 = vcombine.high %v11243_v30, %v11243_v30  ;;  %v11354_v47 = vld [vmem:[%s13072_s3 + $0x1c8] sm:$0xff]  ;;  %v11368_v26 = vld [vmem:[%s13072_s3 + $0x1c0] sm:$0xff] }
 0x25d   :  { %8676 = vmatpush3.msra.mxu0 %v13176_v53  ;;  %v3751_v28 = vpop.permute.xlu0 %3750  ;;  %v3836_v51 = vpop.permute.xlu1 %3835  ;;  %8596 = vmatprep.subr.mxu1 %v13178_v8  ;;  %v11361_v6 = vld [vmem:[%s13072_s3 + $0x148] sm:$0xff]  ;;  %v11377_v60 = vld [vmem:[%s13072_s3 + $0x140] sm:$0xff]  ;;  %v13185_v53 = vld [vmem:[#allocation16_spill] sm:$0xff] }
 0x25e   :  { %8677 = vmatprep.subr.mxu0 %v13179_v13  ;;  %3753 = vst.msk [vmem:[#allocation4 + $0x4] sm:$0x3] %vm671_vm9, %v3751_v28  ;;  %8597 = vmatpush3.msra.mxu1 %v10825_v4  ;;  %v11274_v4 = vld [vmem:[%s13072_s3 + $0x1f0] sm:$0xff]  ;;  %v13183_v14 = vld [vmem:[#allocation14_spill] sm:$0xff]  ;;  %v11392_v28 = vld [vmem:[%s13072_s3 + $0x1b8] sm:$0xff] }
 0x25f   :  { %3838 = vst.msk [vmem:[#allocation4 + $0x6] sm:$0x3] %vm641_vm8, %v3836_v51  ;;  %8678 = vmatpush3.msra.mxu0 %v10830_v39  ;;  %1985 = vmatmul.mubr.f32.vlgmr.msra.gmra.mxu1 %v10835_v0  ;;  %v13180_v39 = vld [vmem:[#allocation23_spill] sm:$0xff]  ;;  %v13186_v63 = vld [vmem:[#allocation12_spill] sm:$0xff] }
 0x260   :  { %8636 = vmatprep.subr.mxu1 %v11250_v44  ;;  %8679 = vmatprep.subr.mxu0 %v13180_v39  ;;  %v11281_v0 = vld [vmem:[%s13072_s3 + $0x170] sm:$0xff]  ;;  %v11402_v51 = vld [vmem:[%s13072_s3 + $0x138] sm:$0xff] }
 0x261   :  { %6738 = vrot.lane.b32.xlu1 %v6737_v20, %s9296_s17  ;;  %v3552_v32 = vpop.permute.xlu0 %3551  ;;  %v3865_v38 = vpop.permute.xlu1 %3864  ;;  %8637 = vmatpush3.msra.mxu1 %v11263_v52  ;;  %v13184_v18 = vld [vmem:[#allocation15_spill] sm:$0xff] }
 0x262   :  { %2695 = vmatprep.mubr.f32.mxu1 %v2556_v27  ;;  %3554 = vst.msk [vmem:[#allocation4] sm:$0x3] %vm701_vm10, %v3552_v32  ;;  %8680 = vmatpush3.msra.mxu0 %v10868_v29  ;;  %v11410_v8 = vld [vmem:[%s13072_s3 + $0x1b0] sm:$0xff] }
 0x263   :  { %3867 = vst.msk [vmem:[#allocation4 + $0x6] sm:$0x3] %vm671_vm9, %v3865_v38  ;;  %8638 = vmatprep.subr.mxu1 %v11274_v4  ;;  %8681 = vmatprep.subr.mxu0 %v10887_v59  ;;  %v8262_v27 = vld.sshfl [vmem:[#allocation3 + $0x60] sm:$0x1 pattern:$0x76325410] }
 0x264   :  { %8639 = vmatpush3.msra.mxu1 %v11281_v0  ;;  %8682 = vmatpush3.msra.mxu0 %v10897_v45  ;;  %v11417_v39 = vld [vmem:[%s13072_s3 + $0x130] sm:$0xff]  ;;  %v8270_v32 = vld.sshfl [vmem:[#allocation3 + $0x68] sm:$0x1 pattern:$0x76325410] }
 0x265   :  { %8640 = vmatprep.subr.mxu1 %v11287_v49  ;;  %v3780_v5 = vpop.permute.xlu0 %3779  ;;  %v3894_v17 = vpop.permute.xlu1 %3893  ;;  %8683 = vmatprep.subr.mxu0 %v13181_v41  ;;  %v11426_v38 = vld [vmem:[%s13072_s3 + $0x1a8] sm:$0xff] }
 0x266   :  { %8641 = vmatpush3.msra.mxu1 %v11300_v15  ;;  %3782 = vst.msk [vmem:[#allocation4 + $0x4] sm:$0x3] %vm701_vm10, %v3780_v5  ;;  %3896 = vst.msk [vmem:[#allocation4 + $0x6] sm:$0x3] %vm701_vm10, %v3894_v17  ;;  %8684 = vmatpush3.msra.mxu0 %v10924_v55  ;;  %v11433_v17 = vld [vmem:[%s13072_s3 + $0x128] sm:$0xff] }
 0x267   :  { %8642 = vmatprep.subr.mxu1 %v11307_v2  ;;  %8685 = vmatprep.subr.mxu0 %v10939_v21  ;;  %v8278_v5 = vld.sshfl [vmem:[#allocation3 + $0x70] sm:$0x1 pattern:$0x76325410]  ;;  %13187 = vst [vmem:[#allocation20_spill] sm:$0xff] %v11433_v17 }
 0x268   :  { %8643 = vmatpush3.msra.mxu1 %v11314_v1  ;;  %8686 = vmatpush3.msra.mxu0 %v10955_v36 }
 0x269   :  { %8644 = vmatprep.subr.mxu1 %v11321_v46  ;;  %v4205_v43 = vpop.permute.xlu0 %4204  ;;  %v4319_v50 = vpop.permute.xlu1 %4318  ;;  %8687 = vmatprep.subr.mxu0 %v10967_v25 }
 0x26a   :  { %3336 = vmatprep.mubr.f32.mxu0 %v3266_v54  ;;  %8645 = vmatpush3.msra.mxu1 %v11334_v19  ;;  %v8286_v54 = vld.sshfl [vmem:[#allocation3 + $0x78] sm:$0x1 pattern:$0x76325410] }
 0x26b   :  { %8688 = vmatpush3.msra.mxu0 %v10985_v34  ;;  %8646 = vmatprep.subr.mxu1 %v11341_v42 }
 0x26c   :  { %8689 = vmatprep.subr.mxu0 %v10997_v22  ;;  %8647 = vmatpush3.msra.mxu1 %v11347_v16 }
 0x26d   :  { %8690 = vmatpush3.msra.mxu0 %v11007_v23  ;;  %v11370_v56 = vld [vmem:[#allocation4] sm:$0xff]  ;;  %v4433_v61 = vpop.permute.xlu0 %4432  ;;  %v4348_v31 = vpop.permute.xlu1 %4347  ;;  %8648 = vmatprep.subr.mxu1 %v11354_v47 }
 0x26e   :  { %13182 = vst [vmem:[#allocation19_spill] sm:$0xff] %v11370_v56  ;;  %8691 = vmatprep.subr.mxu0 %v11017_v10  ;;  %4520 = vst.msk [vmem:[#allocation4 + $0x6] sm:$0x3] %vm611_vm7, %v13183_v14  ;;  %8649 = vmatpush3.msra.mxu1 %v11361_v6  ;;  %v11462_v14 = vrot.slane %v8278_v5, 7  ;;  %v11483_v5 = vld [vmem:[%s13072_s3 + $0x78] sm:$0xff] }
 0x26f   :  { %4178 = vst.msk [vmem:[#allocation4] sm:$0x3] %vm611_vm7, %v13184_v18  ;;  %4292 = vst.msk [vmem:[#allocation4 + $0x2] sm:$0x3] %vm611_vm7, %v13185_v53  ;;  %8692 = vmatpush3.msra.mxu0 %v11036_v48  ;;  %8650 = vmatprep.subr.mxu1 %v11368_v26  ;;  %v11451_v18 = vrot.slane %v8262_v27, 7  ;;  %v11453_v53 = vrot.slane %v8270_v32, 7 }
 0x270   :  { %4406 = vst.msk [vmem:[#allocation4 + $0x4] sm:$0x3] %vm611_vm7, %v13186_v63  ;;  %8693 = vmatprep.subr.mxu0 %v11045_v9  ;;  %8651 = vmatpush3.msra.mxu1 %v11377_v60  ;;  %v11464_v63 = vrot.slane %v8286_v54, 7  ;;  %v11471_v27 = vld [vmem:[%s13072_s3 + $0xf8] sm:$0xff]  ;;  %13193 = vst [vmem:[#allocation16_spill] sm:$0xff] %v11483_v5  ;;  %v11488_v54 = vld [vmem:[%s13072_s3 + $0x190] sm:$0xff] }
 0x271   :  { %4207 = vst.msk [vmem:[#allocation4] sm:$0x3] %vm641_vm8, %v4205_v43  ;;  %4321 = vst.msk [vmem:[#allocation4 + $0x2] sm:$0x3] %vm641_vm8, %v4319_v50  ;;  %8694 = vmatpush3.msra.mxu0 %v11058_v12  ;;  %v4234_v13 = vpop.permute.xlu0 %4233  ;;  %v4377_v20 = vpop.permute.xlu1 %4376  ;;  %8652 = vmatprep.subr.mxu1 %v11392_v28  ;;  %v11440_v43 = vld [vmem:[%s13072_s3 + $0x1a0] sm:$0xff]  ;;  %v11476_v32 = vld [vmem:[%s13072_s3 + $0x118] sm:$0xff] }
 0x272   :  { %4435 = vst.msk [vmem:[#allocation4 + $0x4] sm:$0x3] %vm641_vm8, %v4433_v61  ;;  %8695 = vmatprep.subr.mxu0 %v11067_v40  ;;  %8653 = vmatpush3.msra.mxu1 %v11402_v51  ;;  %13188 = vst [vmem:[#allocation21_spill] sm:$0xff] %v11440_v43 }
 0x273   :  { %4350 = vst.msk [vmem:[#allocation4 + $0x2] sm:$0x3] %vm671_vm9, %v4348_v31  ;;  %4236 = vst.msk [vmem:[#allocation4] sm:$0x3] %vm671_vm9, %v4234_v13  ;;  %8696 = vmatpush3.msra.mxu0 %v11094_v35  ;;  %8654 = vmatprep.subr.mxu1 %v11410_v8  ;;  %v11447_v31 = vld [vmem:[%s13072_s3 + $0x120] sm:$0xff]  ;;  %v11460_v13 = vld [vmem:[%s13072_s3 + $0x198] sm:$0xff] }
 0x274   :  { %4379 = vst.msk [vmem:[#allocation4 + $0x2] sm:$0x3] %vm701_vm10, %v4377_v20  ;;  %8697 = vmatprep.subr.mxu0 %v11106_v24  ;;  %8655 = vmatpush3.msra.mxu1 %v11417_v39  ;;  %13189 = vst [vmem:[#allocation22_spill] sm:$0xff] %v11447_v31 }
 0x275   :  { %8698 = vmatpush3.msra.mxu0 %v11115_v62  ;;  %v4462_v50 = vpop.permute.xlu0 %4461  ;;  %v4547_v61 = vpop.permute.xlu1 %4546  ;;  %8656 = vmatprep.subr.mxu1 %v11426_v38  ;;  %13190 = vst [vmem:[#allocation23_spill] sm:$0xff] %v11460_v13  ;;  %v8261_v20 = vld.sshfl [vmem:[#allocation3 + $0x20] sm:$0x1 pattern:$0x76325410]  ;;  %13191 = vst [vmem:[#allocation24_spill] sm:$0xff] %v11471_v27 }
 0x276   :  { %8699 = vmatprep.subr.mxu0 %v11126_v7  ;;  %4464 = vst.msk [vmem:[#allocation4 + $0x4] sm:$0x3] %vm671_vm9, %v4462_v50  ;;  %8657 = vmatpush3.msra.mxu1 %v11433_v17  ;;  %13192 = vst [vmem:[#allocation15_spill] sm:$0xff] %v11476_v32  ;;  %v11513_v17 = vld [vmem:[%s13072_s3 + $0x70] sm:$0xff]  ;;  %v11568_v7 = vld [vmem:[%s13072_s3 + $0x100] sm:$0xff] }
 0x277   :  { %4549 = vst.msk [vmem:[#allocation4 + $0x6] sm:$0x3] %vm641_vm8, %v4547_v61  ;;  %8700 = vmatpush3.msra.mxu0 %v11149_v33  ;;  %8658 = vmatprep.subr.mxu1 %v11440_v43  ;;  %v8269_v50 = vld.sshfl [vmem:[#allocation3 + $0x28] sm:$0x1 pattern:$0x76325410] }
 0x278   :  { %8701 = vmatprep.subr.mxu0 %v11160_v3  ;;  %8659 = vmatpush3.msra.mxu1 %v11447_v31  ;;  %13194 = vst [vmem:[#allocation29_spill] sm:$0xff] %v11488_v54  ;;  %v8277_v43 = vld.sshfl [vmem:[#allocation3 + $0x30] sm:$0x1 pattern:$0x76325410]  ;;  %13197 = vst [vmem:[#allocation32_spill] sm:$0xff] %v11513_v17 }
 0x279   :  { %8702 = vmatpush3.msra.mxu0 %v11169_v11  ;;  %v4263_v61 = vpop.permute.xlu0 %4262  ;;  %v4576_v3 = vpop.permute.xlu1 %4575  ;;  %8660 = vmatprep.subr.mxu1 %v11460_v13  ;;  %v11495_v11 = vld [vmem:[%s13072_s3 + $0xf0] sm:$0xff]  ;;  %v8285_v33 = vld.sshfl [vmem:[#allocation3 + $0x38] sm:$0x1 pattern:$0x76325410]  ;;  %v4884_v13 = vsel %vm602_vm3, %v11451_v18, %v8261_v20  ;;  %v3251_v20 = vcombine.high %v11191_v37, %v11191_v37  ;;  %v11540_v37 = vrot.slane %v11370_v56, %v10333_v58 }
 0x27a   :  { %3337 = vmatmul.mubr.f32.vlgmr.msra.gmra.mxu0 %v11291_v57  ;;  %13195 = vst [vmem:[#allocation30_spill] sm:$0xff] %v11495_v11  ;;  %v11500_v31 = vld [vmem:[%s13072_s3 + $0x110] sm:$0xff]  ;;  %4265 = vst.msk [vmem:[#allocation4] sm:$0x3] %vm701_vm10, %v4263_v61  ;;  %v4998_v57 = vsel %vm602_vm3, %v11453_v53, %v8269_v50  ;;  %8741 = vmatprep.subr.mxu0 %v11471_v27  ;;  %v5112_v50 = vsel %vm602_vm3, %v11462_v14, %v8277_v43  ;;  %v11536_v27 = vld [vmem:[%s13072_s3 + $0x108] sm:$0xff] }
 0x27b   :  { %13196 = vst [vmem:[#allocation31_spill] sm:$0xff] %v11500_v31  ;;  %4578 = vst.msk [vmem:[#allocation4 + $0x6] sm:$0x3] %vm671_vm9, %v4576_v3  ;;  %8661 = vmatpush3.msra.mxu1 %v11476_v32  ;;  %v11518_v3 = vld [vmem:[%s13072_s3 + $0x188] sm:$0xff]  ;;  %v5226_v61 = vsel %vm602_vm3, %v11464_v63, %v8285_v33  ;;  %8742 = vmatpush3.msra.mxu0 %v11483_v5  ;;  %v11552_v43 = vld [vmem:[%s13072_s3 + $0x180] sm:$0xff]  ;;  %v4885_v56 = vsel %vm604_vm4, %v11451_v18, %v4884_v13 }
 0x27c   :  { %13198 = vst [vmem:[#allocation33_spill] sm:$0xff] %v11518_v3  ;;  %8662 = vmatprep.subr.mxu1 %v11488_v54  ;;  %v11531_v32 = vld [vmem:[%s13072_s3 + $0xe8] sm:$0xff]  ;;  %13199 = vst [vmem:[#allocation34_spill] sm:$0xff] %v11536_v27  ;;  %8743 = vmatprep.subr.mxu0 %v11495_v11  ;;  %v4999_v11 = vsel %vm604_vm4, %v11453_v53, %v4998_v57  ;;  %v5113_v13 = vsel %vm604_vm4, %v11462_v14, %v5112_v50 }
 0x27d   :  { %8663 = vmatpush3.msra.mxu1 %v11500_v31  ;;  %v11547_v33 = vld [vmem:[%s13072_s3 + $0x68] sm:$0xff]  ;;  %13201 = vst [vmem:[#allocation36_spill] sm:$0xff] %v11552_v43  ;;  %v4491_v54 = vpop.permute.xlu0 %4490  ;;  %v4605_v5 = vpop.permute.xlu1 %4604  ;;  %8744 = vmatpush3.msra.mxu0 %v11513_v17  ;;  %v11563_v31 = vld [vmem:[%s13072_s3 + $0xe0] sm:$0xff]  ;;  %v5227_v57 = vsel %vm604_vm4, %v11464_v63, %v5226_v61  ;;  %v11584_v17 = vrot.slane %v3251_v20, %v10333_v58 }
 0x27e   :  { %13200 = vst [vmem:[#allocation35_spill] sm:$0xff] %v11547_v33  ;;  %8664 = vmatprep.subr.mxu1 %v11518_v3  ;;  %4493 = vst.msk [vmem:[#allocation4 + $0x4] sm:$0x3] %vm701_vm10, %v4491_v54  ;;  %8745 = vmatprep.subr.mxu0 %v11531_v32  ;;  %v11581_v3 = vld [vmem:[%s13072_s3 + $0x60] sm:$0xff]  ;;  %v3978_v54 = vcombine.high %v11540_v37, %v11540_v37  ;;  %v4886_v50 = vsel %vm606_vm5, %v11451_v18, %v4885_v56 }
 0x27f   :  { %4607 = vst.msk [vmem:[#allocation4 + $0x6] sm:$0x3] %vm701_vm10, %v4605_v5  ;;  %8665 = vmatpush3.msra.mxu1 %v11536_v27  ;;  %13202 = vst [vmem:[#allocation37_spill] sm:$0xff] %v11584_v17  ;;  %8746 = vmatpush3.msra.mxu0 %v11547_v33  ;;  %v11591_v5 = vld [vmem:[%s13072_s3 + $0xd8] sm:$0xff]  ;;  %v5114_v33 = vsel %vm606_vm5, %v11462_v14, %v5113_v13  ;;  %v5228_v27 = vsel %vm606_vm5, %v11464_v63, %v5227_v57 }
 0x280   :  { %8666 = vmatprep.subr.mxu1 %v11552_v43  ;;  %13203 = vst [vmem:[#allocation38_spill] sm:$0xff] %v11591_v5  ;;  %8747 = vmatprep.subr.mxu0 %v11563_v31  ;;  %v5000_v43 = vsel %vm606_vm5, %v11453_v53, %v4999_v11  ;;  %v3267_v56 = vcombine.high %v11584_v17, %v11584_v17 }
 0x281   :  { %8667 = vmatpush3.msra.mxu1 %v11568_v7  ;;  %v4916_v20 = vpop.permute.xlu0 %4915  ;;  %v5030_v61 = vpop.permute.xlu1 %5029  ;;  %8748 = vmatpush3.msra.mxu0 %v11581_v3  ;;  %v4887_v11 = vsel %vm608_vm6, %v11451_v18, %v4886_v50  ;;  %v5001_v13 = vsel %vm608_vm6, %v11453_v53, %v5000_v43  ;;  %v5115_v57 = vsel %vm608_vm6, %v11462_v14, %v5114_v33  ;;  %v13207_v53 = vld [vmem:[#allocation21_spill] sm:$0xff]  ;;  %v13209_v50 = vld [vmem:[#allocation22_spill] sm:$0xff] }
 0x282   :  { %2696 = vmatmul.mubr.f32.vlgmr.msra.gmra.mxu1 %v11243_v30  ;;  %8706 = vmatprep.subr.mxu1 %v11250_v44  ;;  %v5229_v30 = vsel %vm608_vm6, %v11464_v63, %v5228_v27  ;;  %v13205_v63 = vld [vmem:[#allocation20_spill] sm:$0xff]  ;;  %v13208_v27 = vld [vmem:[#allocation27_spill] sm:$0xff] }
 0x283   :  { %8749 = vmatprep.subr.mxu0 %v11591_v5  ;;  %4048 = vmatprep.mubr.f32.mxu0 %v3978_v54 }
 0x284   :  { %8707 = vmatpush3.msra.mxu1 %v11263_v52  ;;  %3406 = vmatprep.mubr.f32.mxu1 %v3267_v56  ;;  %v13212_v56 = vld [vmem:[#allocation24_spill] sm:$0xff] }
 0x285   :  { %8750 = vmatpush3.msra.mxu0 %v10868_v29  ;;  %v4945_v44 = vpop.permute.xlu0 %4944  ;;  %v5059_v17 = vpop.permute.xlu1 %5058  ;;  %8708 = vmatprep.subr.mxu1 %v11274_v4 }
 0x286   :  { %v11621_v5 = vld [vmem:[#allocation4] sm:$0xff]  ;;  %8751 = vmatprep.subr.mxu0 %v10887_v59  ;;  %8709 = vmatpush3.msra.mxu1 %v11281_v0 }
 0x287   :  { %5231 = vst.msk [vmem:[#allocation4 + $0x6] sm:$0x3] %vm611_vm7, %v5229_v30  ;;  %4889 = vst.msk [vmem:[#allocation4] sm:$0x3] %vm611_vm7, %v4887_v11  ;;  %8752 = vmatpush3.msra.mxu0 %v10897_v45  ;;  %8710 = vmatprep.subr.mxu1 %v11287_v49  ;;  %v13213_v11 = vld [vmem:[#allocation15_spill] sm:$0xff] }
 0x288   :  { %5003 = vst.msk [vmem:[#allocation4 + $0x2] sm:$0x3] %vm611_vm7, %v5001_v13  ;;  %5117 = vst.msk [vmem:[#allocation4 + $0x4] sm:$0x3] %vm611_vm7, %v5115_v57  ;;  %8753 = vmatprep.subr.mxu0 %v13181_v41  ;;  %8711 = vmatpush3.msra.mxu1 %v11300_v15  ;;  %v13214_v13 = vld [vmem:[#allocation19_spill] sm:$0xff] }
 0x289   :  { %4918 = vst.msk [vmem:[#allocation4] sm:$0x3] %vm641_vm8, %v4916_v20  ;;  %5032 = vst.msk [vmem:[#allocation4 + $0x2] sm:$0x3] %vm641_vm8, %v5030_v61  ;;  %8754 = vmatpush3.msra.mxu0 %v10924_v55  ;;  %v4974_v29 = vpop.permute.xlu0 %4973  ;;  %8712 = vmatprep.subr.mxu1 %v11307_v2  ;;  %v5088_v59 = vpop.permute.xlu1 %5087  ;;  %v13210_v20 = vld [vmem:[#allocation28_spill] sm:$0xff]  ;;  %v13211_v61 = vld [vmem:[#allocation23_spill] sm:$0xff]  ;;  %v3963_v57 = vcombine.high %v13214_v13, %v13214_v13 }
 0x28a   :  { %4947 = vst.msk [vmem:[#allocation4] sm:$0x3] %vm671_vm9, %v4945_v44  ;;  %5061 = vst.msk [vmem:[#allocation4 + $0x2] sm:$0x3] %vm671_vm9, %v5059_v17  ;;  %8755 = vmatprep.subr.mxu0 %v10939_v21  ;;  %8713 = vmatpush3.msra.mxu1 %v11314_v1  ;;  %v13206_v17 = vld [vmem:[#allocation26_spill] sm:$0xff] }
 0x28b   :  { %4976 = vst.msk [vmem:[#allocation4] sm:$0x3] %vm701_vm10, %v4974_v29  ;;  %8756 = vmatpush3.msra.mxu0 %v10955_v36  ;;  %5090 = vst.msk [vmem:[#allocation4 + $0x2] sm:$0x3] %vm701_vm10, %v5088_v59  ;;  %8714 = vmatprep.subr.mxu1 %v11321_v46 }
 0x28c   :  { %8757 = vmatprep.subr.mxu0 %v10967_v25  ;;  %v8310_v45 = vld.sshfl [vmem:[#allocation3 + $0x72] sm:$0x1 pattern:$0x76325410]  ;;  %8715 = vmatpush3.msra.mxu1 %v11334_v19 }
 0x28d   :  { %8758 = vmatpush3.msra.mxu0 %v10985_v34  ;;  %v5144_v55 = vpop.permute.xlu0 %5143  ;;  %v8318_v21 = vld.sshfl [vmem:[#allocation3 + $0x7a] sm:$0x1 pattern:$0x76325410]  ;;  %8716 = vmatprep.subr.mxu1 %v11341_v42  ;;  %v5258_v36 = vpop.permute.xlu1 %5257  ;;  %v5823_v25 = vrot.slane %v8310_v45, 7 }
 0x28e   :  { %8759 = vmatprep.subr.mxu0 %v10997_v22  ;;  %5146 = vst.msk [vmem:[#allocation4 + $0x4] sm:$0x3] %vm641_vm8, %v5144_v55  ;;  %8717 = vmatpush3.msra.mxu1 %v11347_v16  ;;  %5260 = vst.msk [vmem:[#allocation4 + $0x6] sm:$0x3] %vm641_vm8, %v5258_v36  ;;  %v5937_v34 = vrot.slane %v8318_v21, 7  ;;  %v13215_v45 = vld [vmem:[#allocation16_spill] sm:$0xff] }
 0x28f   :  { %8760 = vmatpush3.msra.mxu0 %v11007_v23  ;;  %8718 = vmatprep.subr.mxu1 %v11354_v47  ;;  %v8309_v44 = vld.sshfl [vmem:[#allocation3 + $0x32] sm:$0x1 pattern:$0x76325410]  ;;  %v13216_v36 = vld [vmem:[#allocation29_spill] sm:$0xff] }
 0x290   :  { %8761 = vmatprep.subr.mxu0 %v11017_v10  ;;  %8719 = vmatpush3.msra.mxu1 %v11361_v6  ;;  %v8317_v10 = vld.sshfl [vmem:[#allocation3 + $0x3a] sm:$0x1 pattern:$0x76325410] }
 0x291   :  { %8762 = vmatpush3.msra.mxu0 %v11036_v48  ;;  %v5173_v22 = vpop.permute.xlu0 %5172  ;;  %8720 = vmatprep.subr.mxu1 %v11368_v26  ;;  %v5287_v23 = vpop.permute.xlu1 %5286  ;;  %v5824_v48 = vsel %vm602_vm3, %v5823_v25, %v8309_v44  ;;  %v5938_v41 = vsel %vm602_vm3, %v5937_v34, %v8317_v10  ;;  %v13222_v44 = vld [vmem:[#allocation33_spill] sm:$0xff]  ;;  %v11722_v10 = vrot.slane %v3963_v57, %v10333_v58  ;;  %v8342_v57 = vld.sshfl [vmem:[#allocation3 + $0x74] sm:$0x1 pattern:$0x76325410] }
 0x292   :  { %8763 = vmatprep.subr.mxu0 %v11045_v9  ;;  %5175 = vst.msk [vmem:[#allocation4 + $0x4] sm:$0x3] %vm671_vm9, %v5173_v22  ;;  %8721 = vmatpush3.msra.mxu1 %v11377_v60  ;;  %5289 = vst.msk [vmem:[#allocation4 + $0x6] sm:$0x3] %vm671_vm9, %v5287_v23  ;;  %v5939_v14 = vsel %vm604_vm4, %v5937_v34, %v5938_v41  ;;  %v13218_v22 = vld [vmem:[#allocation11_spill] sm:$0xff]  ;;  %v13219_v23 = vld [vmem:[#allocation13_spill] sm:$0xff] }
 0x293   :  { %8764 = vmatpush3.msra.mxu0 %v11058_v12  ;;  %8722 = vmatprep.subr.mxu1 %v11392_v28  ;;  %v11675_v12 = vrot.slane %v11621_v5, %v10333_v58  ;;  %v5940_v54 = vsel %vm606_vm5, %v5937_v34, %v5939_v14  ;;  %v13223_v41 = vld [vmem:[#allocation34_spill] sm:$0xff] }
 0x294   :  { %8765 = vmatprep.subr.mxu0 %v11067_v40  ;;  %8723 = vmatpush3.msra.mxu1 %v11402_v51  ;;  %v5941_v59 = vsel %vm608_vm6, %v5937_v34, %v5940_v54  ;;  %v13221_v34 = vld [vmem:[#allocation32_spill] sm:$0xff]  ;;  %v11759_v54 = vld [vmem:[%s13072_s3 + $0xc8] sm:$0xff] }
 0x295   :  { %8766 = vmatpush3.msra.mxu0 %v11094_v35  ;;  %v5202_v9 = vpop.permute.xlu0 %5201  ;;  %8724 = vmatprep.subr.mxu1 %v11410_v8  ;;  %v5316_v40 = vpop.permute.xlu1 %5315  ;;  %v5825_v35 = vsel %vm604_vm4, %v5823_v25, %v5824_v48 }
 0x296   :  { %8767 = vmatprep.subr.mxu0 %v11106_v24  ;;  %5204 = vst.msk [vmem:[#allocation4 + $0x4] sm:$0x3] %vm701_vm10, %v5202_v9  ;;  %8725 = vmatpush3.msra.mxu1 %v11417_v39  ;;  %5318 = vst.msk [vmem:[#allocation4 + $0x6] sm:$0x3] %vm701_vm10, %v5316_v40  ;;  %v13204_v24 = vld [vmem:[#allocation25_spill] sm:$0xff]  ;;  %v5826_v43 = vsel %vm606_vm5, %v5823_v25, %v5825_v35  ;;  %v13224_v9 = vld [vmem:[#allocation35_spill] sm:$0xff] }
 0x297   :  { %8768 = vmatpush3.msra.mxu0 %v11115_v62  ;;  %8726 = vmatprep.subr.mxu1 %v11426_v38  ;;  %v4689_v62 = vcombine.high %v11675_v12, %v11675_v12  ;;  %v5827_v29 = vsel %vm608_vm6, %v5823_v25, %v5826_v43  ;;  %v13220_v25 = vld [vmem:[#allocation31_spill] sm:$0xff]  ;;  %v13225_v40 = vld [vmem:[#allocation36_spill] sm:$0xff] }
 0x298   :  { %8769 = vmatprep.subr.mxu0 %v13204_v24  ;;  %8727 = vmatpush3.msra.mxu1 %v13205_v63  ;;  %v11735_v35 = vld [vmem:[%s13072_s3 + $0x58] sm:$0xff]  ;;  %v11752_v43 = vld [vmem:[%s13072_s3 + $0x50] sm:$0xff] }
 0x299   :  { %8770 = vmatpush3.msra.mxu0 %v13206_v17  ;;  %v5628_v18 = vpop.permute.xlu0 %5627  ;;  %8728 = vmatprep.subr.mxu1 %v13207_v53  ;;  %v13226_v24 = vld [vmem:[#allocation37_spill] sm:$0xff]  ;;  %v13227_v17 = vld [vmem:[#allocation18_spill] sm:$0xff] }
 0x29a   :  { %8771 = vmatprep.subr.mxu0 %v13208_v27  ;;  %v5742_v33 = vpop.permute.xlu1 %5741  ;;  %8729 = vmatpush3.msra.mxu1 %v13209_v50  ;;  %v11744_v27 = vld [vmem:[%s13072_s3 + $0xd0] sm:$0xff] }
 0x29b   :  { %8772 = vmatpush3.msra.mxu0 %v13210_v20  ;;  %8730 = vmatprep.subr.mxu1 %v13211_v61  ;;  %v11773_v20 = vld [vmem:[%s13072_s3 + $0xc0] sm:$0xff] }
 0x29c   :  { %4049 = vmatmul.mubr.f32.vlgmr.msra.gmra.mxu0 %v11540_v37  ;;  %8811 = vmatprep.subr.mxu0 %v13212_v56  ;;  %v13217_v37 = vld [vmem:[#allocation30_spill] sm:$0xff] }
 0x29d   :  { %8731 = vmatpush3.msra.mxu1 %v13213_v11  ;;  %v5856_v30 = vpop.permute.xlu0 %5855  ;;  %8812 = vmatpush3.msra.mxu0 %v13215_v45  ;;  %v11704_v55 = vld [vmem:[#allocation4] sm:$0xff] }
 0x29e   :  { %4759 = vmatprep.mubr.f32.mxu0 %v4689_v62  ;;  %v5771_v21 = vpop.permute.xlu1 %5770  ;;  %8732 = vmatprep.subr.mxu1 %v13216_v36  ;;  %5943 = vst.msk [vmem:[#allocation4 + $0x6] sm:$0x3] %vm611_vm7, %v5941_v59  ;;  %5601 = vst.msk [vmem:[#allocation4] sm:$0x3] %vm611_vm7, %v13218_v22  ;;  %v6534_v59 = vrot.slane %v8342_v57, 7 }
 0x29f   :  { %8813 = vmatprep.subr.mxu0 %v13217_v37  ;;  %5715 = vst.msk [vmem:[#allocation4 + $0x2] sm:$0x3] %vm611_vm7, %v13219_v23  ;;  %5829 = vst.msk [vmem:[#allocation4 + $0x4] sm:$0x3] %vm611_vm7, %v5827_v29  ;;  %8733 = vmatpush3.msra.mxu1 %v13220_v25  ;;  %v11796_v29 = vld [vmem:[%s13072_s3 + $0x38] sm:$0xff]  ;;  %v11824_v23 = vld [vmem:[%s13072_s3 + $0x28] sm:$0xff] }
 0x2a0   :  { %8814 = vmatpush3.msra.mxu0 %v13221_v34  ;;  %5630 = vst.msk [vmem:[#allocation4] sm:$0x3] %vm641_vm8, %v5628_v18  ;;  %5744 = vst.msk [vmem:[#allocation4 + $0x2] sm:$0x3] %vm641_vm8, %v5742_v33  ;;  %8734 = vmatprep.subr.mxu1 %v13222_v44  ;;  %v3979_v18 = vcombine.high %v11722_v10, %v11722_v10  ;;  %v13228_v33 = vld [vmem:[#allocation38_spill] sm:$0xff] }
 0x2a1   :  { %5858 = vst.msk [vmem:[#allocation4 + $0x4] sm:$0x3] %vm641_vm8, %v5856_v30  ;;  %8815 = vmatprep.subr.mxu0 %v11531_v32  ;;  %v5657_v48 = vpop.permute.xlu0 %5656  ;;  %8735 = vmatpush3.msra.mxu1 %v13223_v41  ;;  %v11788_v30 = vld [vmem:[%s13072_s3 + $0xb8] sm:$0xff]  ;;  %13229 = vst [vmem:[#allocation25_spill] sm:$0xff] %v11796_v29 }
 0x2a2   :  { %5773 = vst.msk [vmem:[#allocation4 + $0x2] sm:$0x3] %vm671_vm9, %v5771_v21  ;;  %8816 = vmatpush3.msra.mxu0 %v13224_v9  ;;  %5659 = vst.msk [vmem:[#allocation4] sm:$0x3] %vm671_vm9, %v5657_v48  ;;  %8736 = vmatprep.subr.mxu1 %v13225_v40 }
 0x2a3   :  { %8817 = vmatprep.subr.mxu0 %v11563_v31  ;;  %8737 = vmatpush3.msra.mxu1 %v11568_v7  ;;  %v5800_v14 = vpop.permute.xlu1 %5799  ;;  %v8349_v48 = vld.sshfl [vmem:[#allocation3 + $0x3c] sm:$0x1 pattern:$0x76325410] }
 0x2a4   :  { %8818 = vmatpush3.msra.mxu0 %v11581_v3  ;;  %3407 = vmatmul.mubr.f32.vlgmr.msra.gmra.mxu1 %v13226_v24  ;;  %5802 = vst.msk [vmem:[#allocation4 + $0x2] sm:$0x3] %vm701_vm10, %v5800_v14  ;;  %v11840_v14 = vld [vmem:[%s13072_s3 + $0x20] sm:$0xff] }
 0x2a5   :  { %8776 = vmatprep.subr.mxu1 %v13227_v17  ;;  %v5885_v62 = vpop.permute.xlu0 %5884  ;;  %8819 = vmatprep.subr.mxu0 %v13228_v33  ;;  %v11849_v17 = vld [vmem:[%s13072_s3 + $0x98] sm:$0xff] }
 0x2a6   :  { %8777 = vmatpush3.msra.mxu1 %v11263_v52  ;;  %5887 = vst.msk [vmem:[#allocation4 + $0x4] sm:$0x3] %vm671_vm9, %v5885_v62  ;;  %4118 = vmatprep.mubr.f32.mxu1 %v3979_v18  ;;  %v11766_v52 = vld [vmem:[%s13072_s3 + $0x48] sm:$0xff] }
 0x2a7   :  { %8820 = vmatpush3.msra.mxu0 %v11735_v35  ;;  %8778 = vmatprep.subr.mxu1 %v11274_v4  ;;  %v11780_v4 = vld [vmem:[%s13072_s3 + $0x40] sm:$0xff] }
 0x2a8   :  { %8821 = vmatprep.subr.mxu0 %v11744_v27  ;;  %8779 = vmatpush3.msra.mxu1 %v11281_v0 }
 0x2a9   :  { %8822 = vmatpush3.msra.mxu0 %v11752_v43  ;;  %v5970_v13 = vpop.permute.xlu1 %5969  ;;  %8780 = vmatprep.subr.mxu1 %v11287_v49  ;;  %v5686_v0 = vpop.permute.xlu0 %5685  ;;  %v8350_v49 = vld.sshfl [vmem:[#allocation3 + $0x7c] sm:$0x1 pattern:$0x76325410] }
 0x2aa   :  { %8823 = vmatprep.subr.mxu0 %v11759_v54  ;;  %5972 = vst.msk [vmem:[#allocation4 + $0x6] sm:$0x3] %vm641_vm8, %v5970_v13  ;;  %8781 = vmatpush3.msra.mxu1 %v11300_v15  ;;  %v11803_v15 = vld [vmem:[%s13072_s3 + $0xb0] sm:$0xff]  ;;  %v6648_v21 = vrot.slane %v8350_v49, 7  ;;  %v11896_v49 = vld [vmem:[%s13072_s3 + $0x80] sm:$0xff] }
 0x2ab   :  { %8824 = vmatpush3.msra.mxu0 %v11766_v52  ;;  %5688 = vst.msk [vmem:[#allocation4] sm:$0x3] %vm701_vm10, %v5686_v0  ;;  %8782 = vmatprep.subr.mxu1 %v11307_v2  ;;  %v11810_v2 = vld [vmem:[%s13072_s3 + $0x30] sm:$0xff]  ;;  %v11880_v0 = vld [vmem:[%s13072_s3 + $0x88] sm:$0xff] }
 0x2ac   :  { %8825 = vmatprep.subr.mxu0 %v11773_v20  ;;  %8783 = vmatpush3.msra.mxu1 %v11314_v1  ;;  %v11817_v1 = vld [vmem:[%s13072_s3 + $0xa8] sm:$0xff] }
 0x2ad   :  { %8826 = vmatpush3.msra.mxu0 %v11780_v4  ;;  %8784 = vmatprep.subr.mxu1 %v11321_v46 }
 0x2ae   :  { %8827 = vmatprep.subr.mxu0 %v11788_v30  ;;  %8785 = vmatpush3.msra.mxu1 %v11334_v19  ;;  %v5999_v22 = vpop.permute.xlu1 %5998  ;;  %v8341_v19 = vld.sshfl [vmem:[#allocation3 + $0x34] sm:$0x1 pattern:$0x76325410] }
 0x2af   :  { %8828 = vmatpush3.msra.mxu0 %v11796_v29  ;;  %v5914_v46 = vpop.permute.xlu0 %5913  ;;  %8786 = vmatprep.subr.mxu1 %v11341_v42  ;;  %6001 = vst.msk [vmem:[#allocation4 + $0x6] sm:$0x3] %vm671_vm9, %v5999_v22  ;;  %v11833_v42 = vld [vmem:[%s13072_s3 + $0xa0] sm:$0xff]  ;;  %v6535_v24 = vsel %vm602_vm3, %v6534_v59, %v8341_v19 }
 0x2b0   :  { %8829 = vmatprep.subr.mxu0 %v11803_v15  ;;  %5916 = vst.msk [vmem:[#allocation4 + $0x4] sm:$0x3] %vm701_vm10, %v5914_v46  ;;  %8787 = vmatpush3.msra.mxu1 %v11347_v16  ;;  %13230 = vst [vmem:[#allocation20_spill] sm:$0xff] %v11833_v42  ;;  %v6649_v16 = vsel %vm602_vm3, %v6648_v21, %v8349_v48  ;;  %v11903_v46 = vld [vmem:[%s13072_s3] sm:$0xff] }
 0x2b1   :  { %8830 = vmatpush3.msra.mxu0 %v11810_v2  ;;  %8788 = vmatprep.subr.mxu1 %v11354_v47  ;;  %v11856_v47 = vld [vmem:[%s13072_s3 + $0x18] sm:$0xff]  ;;  %v6650_v13 = vsel %vm604_vm4, %v6648_v21, %v6649_v16  ;;  %13231 = vst [vmem:[#allocation26_spill] sm:$0xff] %v11903_v46 }
 0x2b2   :  { %8831 = vmatprep.subr.mxu0 %v11817_v1  ;;  %8789 = vmatpush3.msra.mxu1 %v11361_v6  ;;  %v11863_v6 = vld [vmem:[%s13072_s3 + $0x90] sm:$0xff] }
 0x2b3   :  { %8832 = vmatpush3.msra.mxu0 %v11824_v23  ;;  %8790 = vmatprep.subr.mxu1 %v11368_v26  ;;  %v6028_v18 = vpop.permute.xlu1 %6027  ;;  %v6536_v26 = vsel %vm604_vm4, %v6534_v59, %v6535_v24  ;;  %v13233_v24 = vld [vmem:[#allocation12_spill] sm:$0xff] }
 0x2b4   :  { %8833 = vmatprep.subr.mxu0 %v11833_v42  ;;  %v6339_v62 = vpop.permute.xlu0 %6338  ;;  %8791 = vmatpush3.msra.mxu1 %v11377_v60  ;;  %6030 = vst.msk [vmem:[#allocation4 + $0x6] sm:$0x3] %vm701_vm10, %v6028_v18  ;;  %v11873_v60 = vld [vmem:[%s13072_s3 + $0x10] sm:$0xff]  ;;  %v6537_v57 = vsel %vm606_vm5, %v6534_v59, %v6536_v26  ;;  %v12046_v26 = vld [vmem:[%s13072_s3 + $0x1c8] sm:$0xff] }
 0x2b5   :  { %8834 = vmatpush3.msra.mxu0 %v11840_v14  ;;  %8792 = vmatprep.subr.mxu1 %v11392_v28  ;;  %v11887_v28 = vld [vmem:[%s13072_s3 + $0x8] sm:$0xff]  ;;  %v6538_v19 = vsel %vm608_vm6, %v6534_v59, %v6537_v57  ;;  %v4674_v59 = vcombine.high %v11621_v5, %v11621_v5  ;;  %v12030_v18 = vld [vmem:[%s13072_s3 + $0x1d0] sm:$0xff]  ;;  %13236 = vst [vmem:[#allocation22_spill] sm:$0xff] %v12046_v26  ;;  %v12060_v57 = vld [vmem:[%s13072_s3 + $0x1c0] sm:$0xff] }
 0x2b6   :  { %8835 = vmatprep.subr.mxu0 %v11849_v17  ;;  %8793 = vmatpush3.msra.mxu1 %v11402_v51  ;;  %v6651_v51 = vsel %vm606_vm5, %v6648_v21, %v6650_v13  ;;  %v12053_v13 = vld [vmem:[%s13072_s3 + $0x148] sm:$0xff]  ;;  %13238 = vst [vmem:[#allocation23_spill] sm:$0xff] %v12060_v57 }
 0x2b7   :  { %8836 = vmatpush3.msra.mxu0 %v11856_v47  ;;  %8794 = vmatprep.subr.mxu1 %v11410_v8  ;;  %v6652_v48 = vsel %vm608_vm6, %v6648_v21, %v6651_v51  ;;  %v11946_v5 = vrot.slane %v4674_v59, %v10333_v58  ;;  %13237 = vst [vmem:[#allocation28_spill] sm:$0xff] %v12053_v13  ;;  %v12124_v59 = vld [vmem:[%s13072_s3 + $0x120] sm:$0xff] }
 0x2b8   :  { %8837 = vmatprep.subr.mxu0 %v11863_v6  ;;  %8795 = vmatpush3.msra.mxu1 %v11417_v39  ;;  %v6453_v8 = vpop.permute.xlu1 %6452  ;;  %v11907_v39 = vrot.slane %v11704_v55, %v10333_v58  ;;  %13239 = vst [vmem:[#allocation24_spill] sm:$0xff] %v12124_v59 }
 0x2b9   :  { %8838 = vmatpush3.msra.mxu0 %v11873_v60  ;;  %v6567_v22 = vpop.permute.xlu0 %6566  ;;  %8796 = vmatprep.subr.mxu1 %v11426_v38 }
 0x2ba   :  { %8839 = vmatprep.subr.mxu0 %v11880_v0  ;;  %8797 = vmatpush3.msra.mxu1 %v13205_v63  ;;  %v13234_v63 = vld [vmem:[#allocation14_spill] sm:$0xff] }
 0x2bb   :  { %8840 = vmatpush3.msra.mxu0 %v11887_v28  ;;  %8798 = vmatprep.subr.mxu1 %v13207_v53  ;;  %v11915_v38 = vld [vmem:[#allocation4] sm:$0xff]  ;;  %v5400_v53 = vcombine.high %v11907_v39, %v11907_v39 }
 0x2bc   :  { %8841 = vmatprep.subr.mxu0 %v11896_v49  ;;  %13232 = vst [vmem:[#allocation21_spill] sm:$0xff] %v11915_v38  ;;  %8799 = vmatpush3.msra.mxu1 %v13209_v50  ;;  %6654 = vst.msk [vmem:[#allocation4 + $0x6] sm:$0x3] %vm611_vm7, %v6652_v48  ;;  %v12089_v48 = vld [vmem:[%s13072_s3 + $0x1b0] sm:$0xff] }
 0x2bd   :  { %8842 = vmatpush3.msra.mxu0 %v11903_v46  ;;  %6312 = vst.msk [vmem:[#allocation4] sm:$0x3] %vm611_vm7, %v13233_v24  ;;  %6426 = vst.msk [vmem:[#allocation4 + $0x2] sm:$0x3] %vm611_vm7, %v13234_v63  ;;  %8800 = vmatprep.subr.mxu1 %v13211_v61  ;;  %v12096_v24 = vld [vmem:[%s13072_s3 + $0x130] sm:$0xff]  ;;  %v12103_v63 = vld [vmem:[%s13072_s3 + $0x1a8] sm:$0xff] }
 0x2be   :  { %6540 = vst.msk [vmem:[#allocation4 + $0x4] sm:$0x3] %vm611_vm7, %v6538_v19  ;;  %4760 = vmatmul.mubr.f32.vlgmr.msra.gmra.mxu0 %v11675_v12  ;;  %v6482_v50 = vpop.permute.xlu1 %6481  ;;  %8881 = vmatprep.subr.mxu0 %v13212_v56  ;;  %v6368_v12 = vpop.permute.xlu0 %6367  ;;  %v11953_v56 = vld [vmem:[%s13072_s3 + $0x1f8] sm:$0xff] }
 0x2bf   :  { %6341 = vst.msk [vmem:[#allocation4] sm:$0x3] %vm641_vm8, %v6339_v62  ;;  %6455 = vst.msk [vmem:[#allocation4 + $0x2] sm:$0x3] %vm641_vm8, %v6453_v8  ;;  %8801 = vmatpush3.msra.mxu1 %v13213_v11  ;;  %8882 = vmatpush3.msra.mxu0 %v13215_v45  ;;  %v4690_v45 = vcombine.high %v11946_v5, %v11946_v5  ;;  %v12039_v62 = vld [vmem:[%s13072_s3 + $0x150] sm:$0xff]  ;;  %v12067_v8 = vld [vmem:[%s13072_s3 + $0x140] sm:$0xff] }
 0x2c0   :  { %6569 = vst.msk [vmem:[#allocation4 + $0x4] sm:$0x3] %vm641_vm8, %v6567_v22  ;;  %5470 = vmatprep.mubr.f32.mxu0 %v5400_v53  ;;  %8802 = vmatprep.subr.mxu1 %v13216_v36  ;;  %v11980_v36 = vld [vmem:[%s13072_s3 + $0x170] sm:$0xff]  ;;  %v12075_v22 = vld [vmem:[%s13072_s3 + $0x1b8] sm:$0xff]  ;;  %v12110_v53 = vld [vmem:[%s13072_s3 + $0x128] sm:$0xff] }
 0x2c1   :  { %6484 = vst.msk [vmem:[#allocation4 + $0x2] sm:$0x3] %vm671_vm9, %v6482_v50  ;;  %6370 = vst.msk [vmem:[#allocation4] sm:$0x3] %vm671_vm9, %v6368_v12  ;;  %8883 = vmatprep.subr.mxu0 %v13217_v37  ;;  %8803 = vmatpush3.msra.mxu1 %v13220_v25  ;;  %v11986_v37 = vld [vmem:[%s13072_s3 + $0x1e8] sm:$0xff]  ;;  %v12082_v19 = vld [vmem:[%s13072_s3 + $0x138] sm:$0xff]  ;;  %v12128_v12 = vrot.slane %v11915_v38, %v10333_v58  ;;  %v5385_v38 = vcombine.high %v11704_v55, %v11704_v55 }
 0x2c2   :  { %8884 = vmatpush3.msra.mxu0 %v13221_v34  ;;  %8804 = vmatprep.subr.mxu1 %v13222_v44  ;;  %v11993_v44 = vld [vmem:[%s13072_s3 + $0x168] sm:$0xff]  ;;  %v12117_v50 = vld [vmem:[%s13072_s3 + $0x1a0] sm:$0xff] }
 0x2c3   :  { %8885 = vmatprep.subr.mxu0 %v11531_v32  ;;  %v6511_v61 = vpop.permute.xlu1 %6510  ;;  %8805 = vmatpush3.msra.mxu1 %v13223_v41  ;;  %v6596_v11 = vpop.permute.xlu0 %6595  ;;  %v11961_v32 = vld [vmem:[%s13072_s3 + $0x178] sm:$0xff]  ;;  %v12009_v41 = vld [vmem:[%s13072_s3 + $0x160] sm:$0xff]  ;;  %v12200_v55 = vld [vmem:[%s13072_s3 + $0x108] sm:$0xff] }
 0x2c4   :  { %8886 = vmatpush3.msra.mxu0 %v13224_v9  ;;  %6513 = vst.msk [vmem:[#allocation4 + $0x2] sm:$0x3] %vm701_vm10, %v6511_v61  ;;  %8806 = vmatprep.subr.mxu1 %v13225_v40  ;;  %v12016_v9 = vld [vmem:[%s13072_s3 + $0x1d8] sm:$0xff] }
 0x2c5   :  { %8887 = vmatprep.subr.mxu0 %v11563_v31  ;;  %6598 = vst.msk [vmem:[#allocation4 + $0x4] sm:$0x3] %vm671_vm9, %v6596_v11  ;;  %8807 = vmatpush3.msra.mxu1 %v11568_v7  ;;  %v11973_v31 = vld [vmem:[%s13072_s3 + $0x1f0] sm:$0xff]  ;;  %13235 = vst [vmem:[#allocation27_spill] sm:$0xff] %v12016_v9  ;;  %v12023_v40 = vld [vmem:[%s13072_s3 + $0x158] sm:$0xff] }
 0x2c6   :  { %8888 = vmatpush3.msra.mxu0 %v11581_v3  ;;  %4119 = vmatmul.mubr.f32.vlgmr.msra.gmra.mxu1 %v11722_v10  ;;  %v12002_v10 = vld [vmem:[%s13072_s3 + $0x1e0] sm:$0xff]  ;;  %v12135_v61 = vld [vmem:[%s13072_s3 + $0x198] sm:$0xff] }
 0x2c7   :  { %8846 = vmatprep.subr.mxu1 %v11953_v56  ;;  %8889 = vmatprep.subr.mxu0 %v13228_v33  ;;  %v12142_v11 = vld [vmem:[%s13072_s3 + $0xf8] sm:$0xff] }
 0x2c8   :  { %8847 = vmatpush3.msra.mxu1 %v11961_v32  ;;  %4829 = vmatprep.mubr.f32.mxu1 %v4690_v45  ;;  %v6681_v25 = vpop.permute.xlu1 %6680  ;;  %13240 = vst [vmem:[#allocation15_spill] sm:$0xff] %v12142_v11  ;;  %v12147_v45 = vld [vmem:[%s13072_s3 + $0x118] sm:$0xff] }
 0x2c9   :  { %8890 = vmatpush3.msra.mxu0 %v11735_v35  ;;  %v6397_v34 = vpop.permute.xlu0 %6396  ;;  %8848 = vmatprep.subr.mxu1 %v11973_v31  ;;  %6683 = vst.msk [vmem:[#allocation4 + $0x6] sm:$0x3] %vm641_vm8, %v6681_v25  ;;  %13241 = vst [vmem:[#allocation19_spill] sm:$0xff] %v12147_v45  ;;  %v12154_v25 = vld [vmem:[%s13072_s3 + $0x78] sm:$0xff] }
 0x2ca   :  { %8891 = vmatprep.subr.mxu0 %v11744_v27  ;;  %6399 = vst.msk [vmem:[#allocation4] sm:$0x3] %vm701_vm10, %v6397_v34  ;;  %8849 = vmatpush3.msra.mxu1 %v11980_v36  ;;  %13242 = vst [vmem:[#allocation16_spill] sm:$0xff] %v12154_v25  ;;  %v6112_v34 = vcombine.high %v12128_v12, %v12128_v12 }
 0x2cb   :  { %8892 = vmatpush3.msra.mxu0 %v11752_v43  ;;  %8850 = vmatprep.subr.mxu1 %v11986_v37 }
 0x2cc   :  { %8893 = vmatprep.subr.mxu0 %v11759_v54  ;;  %8851 = vmatpush3.msra.mxu1 %v11993_v44 }
 0x2cd   :  { %8894 = vmatpush3.msra.mxu0 %v11766_v52  ;;  %8852 = vmatprep.subr.mxu1 %v12002_v10  ;;  %v6710_v21 = vpop.permute.xlu1 %6709 }
 0x2ce   :  { %8895 = vmatprep.subr.mxu0 %v11773_v20  ;;  %v6625_v16 = vpop.permute.xlu0 %6624  ;;  %8853 = vmatpush3.msra.mxu1 %v12009_v41  ;;  %6712 = vst.msk [vmem:[#allocation4 + $0x6] sm:$0x3] %vm671_vm9, %v6710_v21  ;;  %v12163_v21 = vld [vmem:[%s13072_s3 + $0x190] sm:$0xff] }
 0x2cf   :  { %8896 = vmatpush3.msra.mxu0 %v11780_v4  ;;  %6627 = vst.msk [vmem:[#allocation4 + $0x4] sm:$0x3] %vm701_vm10, %v6625_v16  ;;  %8854 = vmatprep.subr.mxu1 %v12016_v9  ;;  %13243 = vst [vmem:[#allocation29_spill] sm:$0xff] %v12163_v21  ;;  %v12168_v16 = vld [vmem:[%s13072_s3 + $0xf0] sm:$0xff] }
 0x2d0   :  { %8897 = vmatprep.subr.mxu0 %v11788_v30  ;;  %8855 = vmatpush3.msra.mxu1 %v12023_v40  ;;  %13244 = vst [vmem:[#allocation30_spill] sm:$0xff] %v12168_v16 }
 0x2d1   :  { %8898 = vmatpush3.msra.mxu0 %v11796_v29  ;;  %8856 = vmatprep.subr.mxu1 %v12030_v18 }
 0x2d2   :  { %8899 = vmatprep.subr.mxu0 %v11803_v15  ;;  %8857 = vmatpush3.msra.mxu1 %v12039_v62 }
 0x2d3   :  { %8900 = vmatpush3.msra.mxu0 %v11810_v2  ;;  %v6739_v51 = vpop.permute.xlu1 %6738  ;;  %8858 = vmatprep.subr.mxu1 %v12046_v26 }
 0x2d4   :  { %8901 = vmatprep.subr.mxu0 %v11817_v1  ;;  %6741 = vst.msk [vmem:[#allocation4 + $0x6] sm:$0x3] %vm701_vm10, %v6739_v51  ;;  %8859 = vmatpush3.msra.mxu1 %v12053_v13  ;;  %v12180_v51 = vld [vmem:[%s13072_s3 + $0x70] sm:$0xff] }
 0x2d5   :  { %8902 = vmatpush3.msra.mxu0 %v11824_v23  ;;  %8860 = vmatprep.subr.mxu1 %v12060_v57 }
 0x2d6   :  { %8903 = vmatprep.subr.mxu0 %v11833_v42  ;;  %8861 = vmatpush3.msra.mxu1 %v12067_v8 }
 0x2d7   :  { %8904 = vmatpush3.msra.mxu0 %v11840_v14  ;;  %8862 = vmatprep.subr.mxu1 %v12075_v22 }
 0x2d8   :  { %8905 = vmatprep.subr.mxu0 %v11849_v17  ;;  %8863 = vmatpush3.msra.mxu1 %v12082_v19 }
 0x2d9   :  { %8906 = vmatpush3.msra.mxu0 %v11856_v47  ;;  %8864 = vmatprep.subr.mxu1 %v12089_v48 }
 0x2da   :  { %8907 = vmatprep.subr.mxu0 %v11863_v6  ;;  %8865 = vmatpush3.msra.mxu1 %v12096_v24 }
 0x2db   :  { %8908 = vmatpush3.msra.mxu0 %v11873_v60  ;;  %8866 = vmatprep.subr.mxu1 %v12103_v63 }
 0x2dc   :  { %8909 = vmatprep.subr.mxu0 %v11880_v0  ;;  %8867 = vmatpush3.msra.mxu1 %v12110_v53 }
 0x2dd   :  { %8910 = vmatpush3.msra.mxu0 %v11887_v28  ;;  %8868 = vmatprep.subr.mxu1 %v12117_v50 }
 0x2de   :  { %8911 = vmatprep.subr.mxu0 %v11896_v49  ;;  %8869 = vmatpush3.msra.mxu1 %v12124_v59 }
 0x2df   :  { %8912 = vmatpush3.msra.mxu0 %v11903_v46  ;;  %8870 = vmatprep.subr.mxu1 %v12135_v61 }
 0x2e0   :  { %5471 = vmatmul.mubr.f32.vlgmr.msra.gmra.mxu0 %v11907_v39  ;;  %8951 = vmatprep.subr.mxu0 %v12142_v11  ;;  %v12175_v39 = vld [vmem:[%s13072_s3 + $0x110] sm:$0xff]  ;;  %v12193_v11 = vld [vmem:[%s13072_s3 + $0xe8] sm:$0xff] }
 0x2e1   :  { %8871 = vmatpush3.msra.mxu1 %v12147_v45  ;;  %8952 = vmatpush3.msra.mxu0 %v12154_v25  ;;  %v12188_v45 = vld [vmem:[%s13072_s3 + $0x188] sm:$0xff]  ;;  %v12222_v25 = vrot.slane %v5385_v38, %v10333_v58 }
 0x2e2   :  { %6182 = vmatprep.mubr.f32.mxu0 %v6112_v34  ;;  %8872 = vmatprep.subr.mxu1 %v12163_v21  ;;  %v12205_v34 = vld [vmem:[%s13072_s3 + $0x68] sm:$0xff]  ;;  %v12212_v21 = vld [vmem:[%s13072_s3 + $0x180] sm:$0xff] }
 0x2e3   :  { %8953 = vmatprep.subr.mxu0 %v12168_v16  ;;  %8873 = vmatpush3.msra.mxu1 %v12175_v39  ;;  %v12217_v16 = vld [vmem:[%s13072_s3 + $0xe0] sm:$0xff]  ;;  %v5401_v38 = vcombine.high %v12222_v25, %v12222_v25 }
 0x2e4   :  { %8954 = vmatpush3.msra.mxu0 %v12180_v51  ;;  %8874 = vmatprep.subr.mxu1 %v12188_v45 }
 0x2e5   :  { %8955 = vmatprep.subr.mxu0 %v12193_v11  ;;  %8875 = vmatpush3.msra.mxu1 %v12200_v55 }
 0x2e6   :  { %8956 = vmatpush3.msra.mxu0 %v12205_v34  ;;  %8876 = vmatprep.subr.mxu1 %v12212_v21 }
 0x2e7   :  { %8957 = vmatprep.subr.mxu0 %v12217_v16  ;;  %8877 = vmatpush3.msra.mxu1 %v11568_v7  ;;  %v8493_v7 = vpop.f32.mrf.mxu1 }
 0x2e8   :  { %8958 = vmatpush3.msra.mxu0 %v11581_v3  ;;  %4830 = vmatmul.mubr.f32.vlgmr.msra.gmra.mxu1 %v11946_v5 }
 0x2e9   :  { %8916 = vmatprep.subr.mxu1 %v11953_v56  ;;  %8959 = vmatprep.subr.mxu0 %v13228_v33  ;;  %v8494_v3 = vpop.f32.mrf.mxu1  ;;  %v9298_v33 = vmov 1966171168  }
 0x2ea   :  { %8917 = vmatpush3.msra.mxu1 %v11961_v32  ;;  %5540 = vmatprep.mubr.f32.mxu1 %v5401_v38  ;;  %v1281_v5 = vunpack.c.l.s4 %v9298_v33  ;;  %v8495_v38 = vadd.f32 %v8494_v3, %v8493_v7 }
 0x2eb   :  { %8960 = vmatpush3.msra.mxu0 %v11735_v35  ;;  %8918 = vmatprep.subr.mxu1 %v11973_v31 }
 0x2ec   :  { %8961 = vmatprep.subr.mxu0 %v11744_v27  ;;  %8919 = vmatpush3.msra.mxu1 %v11980_v36 }
 0x2ed   :  { %8962 = vmatpush3.msra.mxu0 %v11752_v43  ;;  %8920 = vmatprep.subr.mxu1 %v11986_v37 }
 0x2ee   :  { %8963 = vmatprep.subr.mxu0 %v11759_v54  ;;  %8921 = vmatpush3.msra.mxu1 %v11993_v44 }
 0x2ef   :  { %8964 = vmatpush3.msra.mxu0 %v11766_v52  ;;  %8922 = vmatprep.subr.mxu1 %v12002_v10 }
 0x2f0   :  { %8965 = vmatprep.subr.mxu0 %v11773_v20  ;;  %8923 = vmatpush3.msra.mxu1 %v12009_v41 }
 0x2f1   :  { %8966 = vmatpush3.msra.mxu0 %v11780_v4  ;;  %8924 = vmatprep.subr.mxu1 %v12016_v9  ;;  %v12260_v9 = vld [vmem:[%s13073_s4] ss:$0 sm:$0xff] }
 0x2f2   :  { %8967 = vmatprep.subr.mxu0 %v11788_v30  ;;  %8925 = vmatpush3.msra.mxu1 %v12023_v40  ;;  %v1205_v3 = vadd.f32 %v8495_v38, %v12260_v9 }
 0x2f3   :  { %8968 = vmatpush3.msra.mxu0 %v11796_v29  ;;  %8926 = vmatprep.subr.mxu1 %v12030_v18  ;;  %v1282_v29 = vunpack.c.0.s8 %v1281_v5  ;;  %v13245_v5 = vld [vmem:[#allocation17_spill] sm:$0xff] }
 0x2f4   :  { %8969 = vmatprep.subr.mxu0 %v11803_v15  ;;  %8927 = vmatpush3.msra.mxu1 %v12039_v62 }
 0x2f5   :  { %8970 = vmatpush3.msra.mxu0 %v11810_v2  ;;  %8928 = vmatprep.subr.mxu1 %v12046_v26  ;;  %v8528_v33 = vpop.f32.mrf.mxu1 }
 0x2f6   :  { %8971 = vmatprep.subr.mxu0 %v11817_v1  ;;  %8929 = vmatpush3.msra.mxu1 %v12053_v13  ;;  %v12274_v13 = vsub.s32 %v1282_v29, %v13245_v5  ;;  %v13249_v5 = vld [vmem:[#allocation21_spill] sm:$0xff] }
 0x2f7   :  { %8972 = vmatpush3.msra.mxu0 %v11824_v23  ;;  %8930 = vmatprep.subr.mxu1 %v12060_v57  ;;  %v8529_v7 = vpop.f32.mrf.mxu1 }
 0x2f8   :  { %8973 = vmatprep.subr.mxu0 %v11833_v42  ;;  %8931 = vmatpush3.msra.mxu1 %v12067_v8  ;;  %v8530_v26 = vadd.f32 %v8529_v7, %v8528_v33  ;;  %v12278_v42 = vld [vmem:[#allocation4] sm:$0xff] }
 0x2f9   :  { %8974 = vmatpush3.msra.mxu0 %v11840_v14  ;;  %8932 = vmatprep.subr.mxu1 %v12075_v22  ;;  %13246 = vst [vmem:[#allocation11_spill] sm:$0xff] %v12278_v42  ;;  %v12288_v29 = vrot.slane %v12278_v42, %v10333_v58  ;;  %v6097_v42 = vcombine.high %v13249_v5, %v13249_v5  ;;  %v12319_v5 = vld [vmem:[%s13072_s3 + $0x100] sm:$0xff] }
 0x2fa   :  { %8975 = vmatprep.subr.mxu0 %v11849_v17  ;;  %8933 = vmatpush3.msra.mxu1 %v12082_v19  ;;  %v1275_v57 = vadd.f32 %v8530_v26, %v1205_v3  ;;  %v13247_v3 = vld [vmem:[#allocation15_spill] sm:$0xff] }
 0x2fb   :  { %8976 = vmatpush3.msra.mxu0 %v11856_v47  ;;  %8934 = vmatprep.subr.mxu1 %v12089_v48  ;;  %v6823_v7 = vcombine.high %v12288_v29, %v12288_v29 }
 0x2fc   :  { %8977 = vmatprep.subr.mxu0 %v11863_v6  ;;  %8935 = vmatpush3.msra.mxu1 %v12096_v24  ;;  %v1278_v38 = vmax.f32 %v1275_v57, 0.0 }
 0x2fd   :  { %8978 = vmatpush3.msra.mxu0 %v11873_v60  ;;  %8936 = vmatprep.subr.mxu1 %v12103_v63 }
 0x2fe   :  { %8979 = vmatprep.subr.mxu0 %v11880_v0  ;;  %8937 = vmatpush3.msra.mxu1 %v12110_v53  ;;  %v1286_v26 = vrot.slane %v1278_v38, %v12274_v13  ;;  %v13248_v38 = vld [vmem:[#allocation19_spill] sm:$0xff] }
 0x2ff   :  { %8980 = vmatpush3.msra.mxu0 %v11887_v28  ;;  %8938 = vmatprep.subr.mxu1 %v12117_v50 }
 0x300   :  { %8981 = vmatprep.subr.mxu0 %v11896_v49  ;;  %8939 = vmatpush3.msra.mxu1 %v12124_v59  ;;  %v1287_v57 = vcombine.high %v1286_v26, %v1286_v26  ;;  %v1294_v33 = vrot.slane %v1286_v26, %v12274_v13  ;;  %v13251_v26 = vld [vmem:[#allocation29_spill] sm:$0xff] }
 0x301   :  { %8982 = vmatpush3.msra.mxu0 %v11903_v46  ;;  %8940 = vmatprep.subr.mxu1 %v12135_v61  ;;  %v13250_v46 = vld [vmem:[#allocation16_spill] sm:$0xff] }
 0x302   :  { %6183 = vmatmul.mubr.f32.vlgmr.msra.gmra.mxu0 %v12128_v12  ;;  %9021 = vmatprep.subr.mxu0 %v13247_v3  ;;  %v1301_v59 = vrot.slane %v1287_v57, %v12274_v13  ;;  %1305 = vst.msk [vmem:[#allocation5] sm:$0x1] %vm1304_vm11, %v1294_v33  ;;  %v13252_v12 = vld [vmem:[#allocation30_spill] sm:$0xff]  ;;  %v12325_v57 = vrot.slane %v6097_v42, %v10333_v58 }
 0x303   :  { %8941 = vmatpush3.msra.mxu1 %v13248_v38  ;;  %9022 = vmatpush3.msra.mxu0 %v13250_v46  ;;  %v6755_v46 = vld [vmem:[%s13072_s3 + $0x60] sm:$0xff] }
 0x304   :  { %6893 = vmatprep.mubr.f32.mxu0 %v6823_v7  ;;  %8942 = vmatprep.subr.mxu1 %v13251_v26  ;;  %1306 = vst.msk [vmem:[#allocation5 + $0xc] sm:$0x1] %vm1304_vm11, %v1301_v59  ;;  %v6770_v59 = vld [vmem:[%s13072_s3 + $0xd8] sm:$0xff]  ;;  %v6113_v42 = vcombine.high %v12325_v57, %v12325_v57 }
 0x305   :  { %9023 = vmatprep.subr.mxu0 %v13252_v12  ;;  %8943 = vmatpush3.msra.mxu1 %v12175_v39 }
 0x306   :  { %9024 = vmatpush3.msra.mxu0 %v12180_v51  ;;  %8944 = vmatprep.subr.mxu1 %v12188_v45 }
 0x307   :  { %9025 = vmatprep.subr.mxu0 %v12193_v11  ;;  %8945 = vmatpush3.msra.mxu1 %v12200_v55 }
 0x308   :  { %9026 = vmatpush3.msra.mxu0 %v12205_v34  ;;  %8946 = vmatprep.subr.mxu1 %v12212_v21 }
 0x309   :  { %9027 = vmatprep.subr.mxu0 %v12217_v16  ;;  %8947 = vmatpush3.msra.mxu1 %v12319_v5  ;;  %v8357_v11 = vld.sshfl [vmem:[#allocation5] sm:$0x1 pattern:$0x76325410] }
 0x30a   :  { %9028 = vmatpush3.msra.mxu0 %v6755_v46  ;;  %5541 = vmatmul.mubr.f32.vlgmr.msra.gmra.mxu1 %v12222_v25 }
 0x30b   :  { %8986 = vmatprep.subr.mxu1 %v11953_v56  ;;  %9029 = vmatprep.subr.mxu0 %v6770_v59 }
 0x30c   :  { %8987 = vmatpush3.msra.mxu1 %v11961_v32  ;;  %6252 = vmatprep.mubr.f32.mxu1 %v6113_v42 }
 0x30d   :  { %9030 = vmatpush3.msra.mxu0 %v11735_v35  ;;  %8988 = vmatprep.subr.mxu1 %v11973_v31  ;;  %v13253_v35 = vld [vmem:[#allocation27_spill] sm:$0xff] }
 0x30e   :  { %9031 = vmatprep.subr.mxu0 %v11744_v27  ;;  %8989 = vmatpush3.msra.mxu1 %v11980_v36  ;;  %v13254_v27 = vld [vmem:[#allocation25_spill] sm:$0xff] }
 0x30f   :  { %9032 = vmatpush3.msra.mxu0 %v11752_v43  ;;  %8990 = vmatprep.subr.mxu1 %v11986_v37  ;;  %v8563_v43 = vpop.f32.mrf.mxu0 }
 0x310   :  { %9033 = vmatprep.subr.mxu0 %v11759_v54  ;;  %8991 = vmatpush3.msra.mxu1 %v11993_v44  ;;  %v13255_v54 = vld [vmem:[#allocation22_spill] sm:$0xff] }
 0x311   :  { %9034 = vmatpush3.msra.mxu0 %v11766_v52  ;;  %8992 = vmatprep.subr.mxu1 %v12002_v10  ;;  %v13256_v52 = vld [vmem:[#allocation28_spill] sm:$0xff] }
 0x312   :  { %9035 = vmatprep.subr.mxu0 %v11773_v20  ;;  %8993 = vmatpush3.msra.mxu1 %v12009_v41  ;;  %v13257_v20 = vld [vmem:[#allocation23_spill] sm:$0xff] }
 0x313   :  { %9036 = vmatpush3.msra.mxu0 %v11780_v4  ;;  %8994 = vmatprep.subr.mxu1 %v13253_v35  ;;  %v13258_v4 = vld [vmem:[#allocation20_spill] sm:$0xff] }
 0x314   :  { %9037 = vmatprep.subr.mxu0 %v11788_v30  ;;  %8995 = vmatpush3.msra.mxu1 %v12023_v40  ;;  %v8564_v30 = vpop.f32.mrf.mxu0 }
 0x315   :  { %9038 = vmatpush3.msra.mxu0 %v13254_v27  ;;  %8996 = vmatprep.subr.mxu1 %v12030_v18 }
 0x316   :  { %9039 = vmatprep.subr.mxu0 %v11803_v15  ;;  %8997 = vmatpush3.msra.mxu1 %v12039_v62  ;;  %v8565_v15 = vadd.f32 %v8564_v30, %v8563_v43 }
 0x317   :  { %9040 = vmatpush3.msra.mxu0 %v11810_v2  ;;  %8998 = vmatprep.subr.mxu1 %v13255_v54 }
 0x318   :  { %9041 = vmatprep.subr.mxu0 %v11817_v1  ;;  %8999 = vmatpush3.msra.mxu1 %v13256_v52 }
 0x319   :  { %9042 = vmatpush3.msra.mxu0 %v11824_v23  ;;  %9000 = vmatprep.subr.mxu1 %v13257_v20  ;;  %v1917_v23 = vadd.f32 %v8565_v15, %v12260_v9 }
 0x31a   :  { %9043 = vmatprep.subr.mxu0 %v13258_v4  ;;  %9001 = vmatpush3.msra.mxu1 %v12067_v8 }
 0x31b   :  { %9044 = vmatpush3.msra.mxu0 %v11840_v14  ;;  %9002 = vmatprep.subr.mxu1 %v12075_v22  ;;  %v13259_v14 = vld [vmem:[#allocation24_spill] sm:$0xff] }
 0x31c   :  { %9045 = vmatprep.subr.mxu0 %v11849_v17  ;;  %9003 = vmatpush3.msra.mxu1 %v12082_v19  ;;  %v13260_v17 = vld [vmem:[#allocation26_spill] sm:$0xff] }
 0x31d   :  { %9046 = vmatpush3.msra.mxu0 %v11856_v47  ;;  %9004 = vmatprep.subr.mxu1 %v12089_v48  ;;  %v13261_v47 = vld [vmem:[#allocation11_spill] sm:$0xff] }
 0x31e   :  { %9047 = vmatprep.subr.mxu0 %v11863_v6  ;;  %9005 = vmatpush3.msra.mxu1 %v12096_v24  ;;  %v6808_v6 = vcombine.high %v13261_v47, %v13261_v47 }
 0x31f   :  { %9048 = vmatpush3.msra.mxu0 %v11873_v60  ;;  %9006 = vmatprep.subr.mxu1 %v12103_v63  ;;  %v8598_v2 = vpop.f32.mrf.mxu1 }
 0x320   :  { %9049 = vmatprep.subr.mxu0 %v11880_v0  ;;  %9007 = vmatpush3.msra.mxu1 %v12110_v53  ;;  %v8358_v0 = vld.sshfl [vmem:[#allocation5 + $0xc] sm:$0x1 pattern:$0x76325410]  ;;  %v12395_v16 = vrot.slane %v6808_v6, %v10333_v58 }
 0x321   :  { %9050 = vmatpush3.msra.mxu0 %v11887_v28  ;;  %9008 = vmatprep.subr.mxu1 %v12117_v50  ;;  %v8599_v1 = vpop.f32.mrf.mxu1  ;;  %v7018_v28 = vrot.slane %v8358_v0, 7 }
 0x322   :  { %9051 = vmatprep.subr.mxu0 %v11896_v49  ;;  %9009 = vmatpush3.msra.mxu1 %v13259_v14  ;;  %v8600_v60 = vadd.f32 %v8599_v1, %v8598_v2  ;;  %v6824_v3 = vcombine.high %v12395_v16, %v12395_v16 }
 0x323   :  { %9052 = vmatpush3.msra.mxu0 %v13260_v17  ;;  %9010 = vmatprep.subr.mxu1 %v12135_v61  ;;  %v7019_v25 = vsel %vm602_vm3, %v7018_v28, %v8357_v11 }
 0x324   :  { %6894 = vmatmul.mubr.f32.vlgmr.msra.gmra.mxu0 %v12288_v29  ;;  %9011 = vmatpush3.msra.mxu1 %v13248_v38  ;;  %v1987_v49 = vadd.f32 %v8600_v60, %v1917_v23  ;;  %v7020_v34 = vsel %vm604_vm4, %v7018_v28, %v7019_v25 }
 0x325   :  { %9012 = vmatprep.subr.mxu1 %v13251_v26  ;;  %v7021_v29 = vsel %vm606_vm5, %v7018_v28, %v7020_v34 }
 0x326   :  { %9013 = vmatpush3.msra.mxu1 %v12175_v39  ;;  %v1990_v51 = vmax.f32 %v1987_v49, 0.0  ;;  %v7022_v7 = vsel %vm608_vm6, %v7018_v28, %v7021_v29 }
 0x327   :  { %9014 = vmatprep.subr.mxu1 %v12188_v45  ;;  %7025 = vst.msk [vmem:[#allocation6] sm:$0x3] %vm7024_vm12, %v7022_v7 }
 0x328   :  { %9015 = vmatpush3.msra.mxu1 %v12200_v55  ;;  %v1998_v33 = vrot.slane %v1990_v51, %v12274_v13 }
 0x329   :  { %9016 = vmatprep.subr.mxu1 %v12212_v21 }
 0x32a   :  { %9017 = vmatpush3.msra.mxu1 %v12319_v5  ;;  %v1999_v12 = vcombine.high %v1998_v33, %v1998_v33  ;;  %v2006_v46 = vrot.slane %v1998_v33, %v12274_v13 }
 0x32b   :  { %6253 = vmatmul.mubr.f32.vlgmr.msra.gmra.mxu1 %v12325_v57  ;;  %9056 = vmatprep.subr.mxu1 %v11953_v56 }
 0x32c   :  { %9057 = vmatpush3.msra.mxu1 %v11961_v32  ;;  %6963 = vmatprep.mubr.f32.mxu1 %v6824_v3  ;;  %v2013_v59 = vrot.slane %v1999_v12, %v12274_v13  ;;  %2016 = vst.msk [vmem:[#allocation5 + $0x1] sm:$0x1] %vm1304_vm11, %v2006_v46 }
 0x32d   :  { %9058 = vmatprep.subr.mxu1 %v11973_v31 }
 0x32e   :  { %2017 = vst.msk [vmem:[#allocation5 + $0xd] sm:$0x1] %vm1304_vm11, %v2013_v59  ;;  %9059 = vmatpush3.msra.mxu1 %v11980_v36 }
 0x32f   :  { %9060 = vmatprep.subr.mxu1 %v11986_v37  ;;  %v8633_v37 = vpop.f32.mrf.mxu0 }
 0x330   :  { %9061 = vmatpush3.msra.mxu1 %v11993_v44 }
 0x331   :  { %9062 = vmatprep.subr.mxu1 %v12002_v10 }
 0x332   :  { %9063 = vmatpush3.msra.mxu1 %v12009_v41 }
 0x333   :  { %9064 = vmatprep.subr.mxu1 %v13253_v35  ;;  %v8359_v31 = vld.sshfl [vmem:[#allocation5 + $0x1] sm:$0x1 pattern:$0x76325410] }
 0x334   :  { %9065 = vmatpush3.msra.mxu1 %v12023_v40  ;;  %v8634_v40 = vpop.f32.mrf.mxu0 }
 0x335   :  { %9066 = vmatprep.subr.mxu1 %v12030_v18  ;;  %v8360_v56 = vld.sshfl [vmem:[#allocation5 + $0xd] sm:$0x1 pattern:$0x76325410]  ;;  %v8635_v18 = vadd.f32 %v8634_v40, %v8633_v37 }
 0x336   :  { %9067 = vmatpush3.msra.mxu1 %v12039_v62  ;;  %v7046_v32 = vrot.slane %v8360_v56, 7 }
 0x337   :  { %9068 = vmatprep.subr.mxu1 %v13255_v54 }
 0x338   :  { %9069 = vmatpush3.msra.mxu1 %v13256_v52  ;;  %v7047_v36 = vsel %vm602_vm3, %v7046_v32, %v8359_v31 }
 0x339   :  { %9070 = vmatprep.subr.mxu1 %v13257_v20  ;;  %v7048_v44 = vsel %vm604_vm4, %v7046_v32, %v7047_v36 }
 0x33a   :  { %9071 = vmatpush3.msra.mxu1 %v12067_v8  ;;  %v7049_v10 = vsel %vm606_vm5, %v7046_v32, %v7048_v44 }
 0x33b   :  { %9072 = vmatprep.subr.mxu1 %v12075_v22  ;;  %v7050_v41 = vsel %vm608_vm6, %v7046_v32, %v7049_v10  ;;  %v2628_v22 = vadd.f32 %v8635_v18, %v12260_v9 }
 0x33c   :  { %9073 = vmatpush3.msra.mxu1 %v12082_v19  ;;  %7051 = vrot.lane.b32.xlu0 %v7050_v41, %s9294_s21 }
 0x33d   :  { %9074 = vmatprep.subr.mxu1 %v12089_v48 }
 0x33e   :  { %9075 = vmatpush3.msra.mxu1 %v12096_v24 }
 0x33f   :  { %9076 = vmatprep.subr.mxu1 %v12103_v63 }
 0x340   :  { %9077 = vmatpush3.msra.mxu1 %v12110_v53 }
 0x341   :  { %9078 = vmatprep.subr.mxu1 %v12117_v50 }
 0x342   :  { %v8668_v62 = vpop.f32.mrf.mxu1  ;;  %9079 = vmatpush3.msra.mxu1 %v13259_v14 }
 0x343   :  { %9080 = vmatprep.subr.mxu1 %v12135_v61 }
 0x344   :  { %v8669_v8 = vpop.f32.mrf.mxu1  ;;  %9081 = vmatpush3.msra.mxu1 %v13248_v38 }
 0x345   :  { %v8670_v19 = vadd.f32 %v8669_v8, %v8668_v62  ;;  %9082 = vmatprep.subr.mxu1 %v13251_v26 }
 0x346   :  { %9083 = vmatpush3.msra.mxu1 %v12175_v39 }
 0x347   :  { %v2698_v48 = vadd.f32 %v8670_v19, %v2628_v22  ;;  %9084 = vmatprep.subr.mxu1 %v12188_v45  ;;  %v8703_v45 = vpop.f32.mrf.mxu0 }
 0x348   :  { %9085 = vmatpush3.msra.mxu1 %v12200_v55 }
 0x349   :  { %v2701_v24 = vmax.f32 %v2698_v48, 0.0  ;;  %9086 = vmatprep.subr.mxu1 %v12212_v21  ;;  %v8704_v39 = vpop.f32.mrf.mxu0 }
 0x34a   :  { %9087 = vmatpush3.msra.mxu1 %v12319_v5  ;;  %v8705_v38 = vadd.f32 %v8704_v39, %v8703_v45  ;;  %v7284_v45 = vld [vmem:[%s13074_s5 + $0xf8] sm:$0xff] }
 0x34b   :  { %v2709_v63 = vrot.slane %v2701_v24, %v12274_v13  ;;  %6964 = vmatmul.mubr.f32.vlgmr.msra.gmra.mxu1 %v12395_v16  ;;  %v7268_v39 = vld [vmem:[%s13074_s5 + $0x78] sm:$0xff]  ;;  %9091 = vmatprep.subr.mxu0 %v7284_v45 }
 0x34c   :  { %v3339_v27 = vadd.f32 %v8705_v38, %v12260_v9  ;;  %v7267_v38 = vld [vmem:[%s13074_s5 + $0x70] sm:$0xff]  ;;  %9092 = vmatpush3.msra.mxu0 %v7268_v39 }
 0x34d   :  { %v2710_v53 = vcombine.high %v2709_v63, %v2709_v63  ;;  %v2717_v50 = vrot.slane %v2709_v63, %v12274_v13 }
 0x34f   :  { %v2724_v61 = vrot.slane %v2710_v53, %v12274_v13  ;;  %2727 = vst.msk [vmem:[#allocation5 + $0x2] sm:$0x1] %vm1304_vm11, %v2717_v50 }
 0x351   :  { %2728 = vst.msk [vmem:[#allocation5 + $0xe] sm:$0x1] %vm1304_vm11, %v2724_v61 }
 0x356   :  { %v8361_v5 = vld.sshfl [vmem:[#allocation5 + $0x2] sm:$0x1 pattern:$0x76325410] }
 0x358   :  { %v8362_v55 = vld.sshfl [vmem:[#allocation5 + $0xe] sm:$0x1 pattern:$0x76325410] }
 0x359   :  { %v7076_v21 = vrot.slane %v8362_v55, 7  ;;  %v7283_v55 = vld [vmem:[%s13074_s5 + $0xf0] sm:$0xff] }
 0x35a   :  { %9093 = vmatprep.subr.mxu0 %v7283_v55 }
 0x35b   :  { %v7077_v57 = vsel %vm602_vm3, %v7076_v21, %v8361_v5  ;;  %v7300_v5 = vld [vmem:[%s13074_s5 + $0x178] sm:$0xff]  ;;  %9094 = vmatpush3.msra.mxu0 %v7267_v38 }
 0x35c   :  { %v7078_v35 = vsel %vm604_vm4, %v7076_v21, %v7077_v57  ;;  %v8773_v6 = vpop.f32.mrf.mxu0  ;;  %v7315_v57 = vld [vmem:[%s13074_s5 + $0x1f0] sm:$0xff] }
 0x35d   :  { %v7079_v54 = vsel %vm606_vm5, %v7076_v21, %v7078_v35  ;;  %v7299_v35 = vld [vmem:[%s13074_s5 + $0x170] sm:$0xff] }
 0x35e   :  { %v7080_v52 = vsel %vm608_vm6, %v7076_v21, %v7079_v54  ;;  %v8774_v49 = vpop.f32.mrf.mxu0  ;;  %v7316_v21 = vld [vmem:[%s13074_s5 + $0x1f8] sm:$0xff]  ;;  %v7265_v54 = vld [vmem:[%s13074_s5 + $0x60] sm:$0xff] }
 0x35f   :  { %7082 = vst.msk [vmem:[#allocation6 + $0x2] sm:$0x3] %vm7024_vm12, %v7080_v52  ;;  %v8775_v11 = vadd.f32 %v8774_v49, %v8773_v6  ;;  %9126 = vmatprep.subr.mxu1 %v7316_v21  ;;  %v7298_v52 = vld [vmem:[%s13074_s5 + $0x168] sm:$0xff] }
 0x360   :  { %9127 = vmatpush3.msra.mxu1 %v7300_v5 }
 0x361   :  { %v4051_v51 = vadd.f32 %v8775_v11, %v12260_v9  ;;  %9128 = vmatprep.subr.mxu1 %v7315_v57  ;;  %v7278_v11 = vld [vmem:[%s13074_s5 + $0xc8] sm:$0xff] }
 0x362   :  { %9129 = vmatpush3.msra.mxu1 %v7299_v35 }
 0x364   :  { %v8738_v26 = vpop.f32.mrf.mxu1 }
 0x366   :  { %v8739_v42 = vpop.f32.mrf.mxu1 }
 0x367   :  { %v8740_v43 = vadd.f32 %v8739_v42, %v8738_v26  ;;  %v7282_v26 = vld [vmem:[%s13074_s5 + $0xe8] sm:$0xff] }
 0x368   :  { %v7266_v42 = vld [vmem:[%s13074_s5 + $0x68] sm:$0xff]  ;;  %9095 = vmatprep.subr.mxu0 %v7282_v26 }
 0x369   :  { %v3409_v20 = vadd.f32 %v8740_v43, %v3339_v27  ;;  %v7281_v27 = vld [vmem:[%s13074_s5 + $0xe0] sm:$0xff]  ;;  %v7314_v43 = vld [vmem:[%s13074_s5 + $0x1e8] sm:$0xff]  ;;  %9096 = vmatpush3.msra.mxu0 %v7266_v42 }
 0x36a   :  { %9130 = vmatprep.subr.mxu1 %v7314_v43  ;;  %9097 = vmatprep.subr.mxu0 %v7281_v27 }
 0x36b   :  { %v3412_v4 = vmax.f32 %v3409_v20, 0.0  ;;  %v7313_v20 = vld [vmem:[%s13074_s5 + $0x1e0] sm:$0xff]  ;;  %9131 = vmatpush3.msra.mxu1 %v7298_v52  ;;  %9098 = vmatpush3.msra.mxu0 %v7265_v54 }
 0x36c   :  { %9132 = vmatprep.subr.mxu1 %v7313_v20 }
 0x36d   :  { %v3420_v30 = vrot.slane %v3412_v4, %v12274_v13 }
 0x36f   :  { %v3421_v15 = vcombine.high %v3420_v30, %v3420_v30  ;;  %v3428_v2 = vrot.slane %v3420_v30, %v12274_v13  ;;  %v7280_v30 = vld [vmem:[%s13074_s5 + $0xd8] sm:$0xff] }
 0x370   :  { %9099 = vmatprep.subr.mxu0 %v7280_v30 }
 0x371   :  { %v3435_v1 = vrot.slane %v3421_v15, %v12274_v13  ;;  %3439 = vst.msk [vmem:[#allocation5 + $0x4] sm:$0x1] %vm1304_vm11, %v3428_v2  ;;  %v7297_v15 = vld [vmem:[%s13074_s5 + $0x160] sm:$0xff] }
 0x372   :  { %9133 = vmatpush3.msra.mxu1 %v7297_v15  ;;  %v7274_v15 = vld [vmem:[%s13074_s5 + $0xa8] sm:$0xff] }
 0x373   :  { %3440 = vst.msk [vmem:[#allocation5 + $0x10] sm:$0x1] %vm1304_vm11, %v3435_v1  ;;  %v7264_v1 = vld [vmem:[%s13074_s5 + $0x58] sm:$0xff] }
 0x374   :  { %9100 = vmatpush3.msra.mxu0 %v7264_v1  ;;  %v7258_v1 = vld [vmem:[%s13074_s5 + $0x28] sm:$0xff] }
 0x378   :  { %v8363_v17 = vld.sshfl [vmem:[#allocation5 + $0x4] sm:$0x1 pattern:$0x76325410] }
 0x37a   :  { %v8364_v23 = vld.sshfl [vmem:[#allocation5 + $0x10] sm:$0x1 pattern:$0x76325410] }
 0x37b   :  { %v7103_v14 = vrot.slane %v8364_v23, 7  ;;  %v7312_v23 = vld [vmem:[%s13074_s5 + $0x1d8] sm:$0xff] }
 0x37c   :  { %9134 = vmatprep.subr.mxu1 %v7312_v23  ;;  %v7307_v23 = vld [vmem:[%s13074_s5 + $0x1b0] sm:$0xff] }
 0x37d   :  { %v7104_v47 = vsel %vm602_vm3, %v7103_v14, %v8363_v17  ;;  %v7279_v17 = vld [vmem:[%s13074_s5 + $0xd0] sm:$0xff] }
 0x37e   :  { %v7105_v60 = vsel %vm604_vm4, %v7103_v14, %v7104_v47  ;;  %v8843_v59 = vpop.f32.mrf.mxu0  ;;  %v7296_v47 = vld [vmem:[%s13074_s5 + $0x158] sm:$0xff]  ;;  %9101 = vmatprep.subr.mxu0 %v7279_v17  ;;  %v7291_v17 = vld [vmem:[%s13074_s5 + $0x130] sm:$0xff] }
 0x37f   :  { %v7106_v0 = vsel %vm606_vm5, %v7103_v14, %v7105_v60  ;;  %v7263_v60 = vld [vmem:[%s13074_s5 + $0x50] sm:$0xff]  ;;  %9135 = vmatpush3.msra.mxu1 %v7296_v47  ;;  %v7257_v47 = vld [vmem:[%s13074_s5 + $0x20] sm:$0xff] }
 0x380   :  { %v7107_v28 = vsel %vm608_vm6, %v7103_v14, %v7106_v0  ;;  %v8844_v31 = vpop.f32.mrf.mxu0  ;;  %v7311_v0 = vld [vmem:[%s13074_s5 + $0x1d0] sm:$0xff]  ;;  %9102 = vmatpush3.msra.mxu0 %v7263_v60  ;;  %v7272_v60 = vld [vmem:[%s13074_s5 + $0x98] sm:$0xff] }
 0x381   :  { %7108 = vrot.lane.b32.xlu1 %v7107_v28, %s9294_s21  ;;  %v8845_v10 = vadd.f32 %v8844_v31, %v8843_v59  ;;  %9136 = vmatprep.subr.mxu1 %v7311_v0  ;;  %v7309_v59 = vld [vmem:[%s13074_s5 + $0x1c0] sm:$0xff]  ;;  %v7275_v31 = vld [vmem:[%s13074_s5 + $0xb0] sm:$0xff]  ;;  %v7290_v0 = vld [vmem:[%s13074_s5 + $0x128] sm:$0xff] }
 0x382   :  { %9103 = vmatprep.subr.mxu0 %v7278_v11  ;;  %v7271_v11 = vld [vmem:[%s13074_s5 + $0x90] sm:$0xff] }
 0x383   :  { %v4762_v8 = vadd.f32 %v8845_v10, %v12260_v9 }
 0x386   :  { %v8808_v25 = vpop.f32.mrf.mxu1 }
 0x388   :  { %v8809_v16 = vpop.f32.mrf.mxu1 }
 0x389   :  { %v8810_v34 = vadd.f32 %v8809_v16, %v8808_v25  ;;  %v7262_v16 = vld [vmem:[%s13074_s5 + $0x48] sm:$0xff] }
 0x38a   :  { %9104 = vmatpush3.msra.mxu0 %v7262_v16  ;;  %v7255_v16 = vld [vmem:[%s13074_s5 + $0x10] sm:$0xff] }
 0x38b   :  { %v4121_v29 = vadd.f32 %v8810_v34, %v4051_v51  ;;  %v7295_v51 = vld [vmem:[%s13074_s5 + $0x150] sm:$0xff] }
 0x38c   :  { %9137 = vmatpush3.msra.mxu1 %v7295_v51  ;;  %v7304_v51 = vld [vmem:[%s13074_s5 + $0x198] sm:$0xff] }
 0x38d   :  { %v4124_v33 = vmax.f32 %v4121_v29, 0.0  ;;  %v7277_v29 = vld [vmem:[%s13074_s5 + $0xc0] sm:$0xff] }
 0x38e   :  { %9105 = vmatprep.subr.mxu0 %v7277_v29  ;;  %v7270_v29 = vld [vmem:[%s13074_s5 + $0x88] sm:$0xff] }
 0x38f   :  { %v4132_v7 = vrot.slane %v4124_v33, %v12274_v13  ;;  %v7310_v33 = vld [vmem:[%s13074_s5 + $0x1c8] sm:$0xff] }
 0x390   :  { %9138 = vmatprep.subr.mxu1 %v7310_v33  ;;  %v7288_v33 = vld [vmem:[%s13074_s5 + $0x118] sm:$0xff] }
 0x391   :  { %v4133_v3 = vcombine.high %v4132_v7, %v4132_v7  ;;  %v4140_v12 = vrot.slane %v4132_v7, %v12274_v13  ;;  %v7261_v7 = vld [vmem:[%s13074_s5 + $0x40] sm:$0xff] }
 0x392   :  { %9106 = vmatpush3.msra.mxu0 %v7261_v7 }
 0x393   :  { %v4147_v46 = vrot.slane %v4133_v3, %v12274_v13  ;;  %4150 = vst.msk [vmem:[#allocation5 + $0x5] sm:$0x1] %vm1304_vm11, %v4140_v12  ;;  %v7294_v3 = vld [vmem:[%s13074_s5 + $0x148] sm:$0xff] }
 0x394   :  { %9139 = vmatpush3.msra.mxu1 %v7294_v3  ;;  %v7254_v3 = vld [vmem:[%s13074_s5 + $0x8] sm:$0xff] }
 0x395   :  { %4151 = vst.msk [vmem:[#allocation5 + $0x11] sm:$0x1] %vm1304_vm11, %v4147_v46  ;;  %v7276_v46 = vld [vmem:[%s13074_s5 + $0xb8] sm:$0xff]  ;;  %9140 = vmatprep.subr.mxu1 %v7309_v59 }
 0x396   :  { %9107 = vmatprep.subr.mxu0 %v7276_v46 }
 0x39a   :  { %v8365_v36 = vld.sshfl [vmem:[#allocation5 + $0x5] sm:$0x1 pattern:$0x76325410] }
 0x39c   :  { %v8366_v56 = vld.sshfl [vmem:[#allocation5 + $0x11] sm:$0x1 pattern:$0x76325410] }
 0x39d   :  { %v7132_v32 = vrot.slane %v8366_v56, 7  ;;  %v7260_v56 = vld [vmem:[%s13074_s5 + $0x38] sm:$0xff] }
 0x39e   :  { %9108 = vmatpush3.msra.mxu0 %v7260_v56  ;;  %v7269_v56 = vld [vmem:[%s13074_s5 + $0x80] sm:$0xff] }
 0x39f   :  { %v7133_v37 = vsel %vm602_vm3, %v7132_v32, %v8365_v36  ;;  %v7308_v36 = vld [vmem:[%s13074_s5 + $0x1b8] sm:$0xff]  ;;  %9109 = vmatprep.subr.mxu0 %v7275_v31 }
 0x3a0   :  { %v7134_v44 = vsel %vm604_vm4, %v7132_v32, %v7133_v37  ;;  %v8913_v28 = vpop.f32.mrf.mxu0 }
 0x3a1   :  { %v7135_v41 = vsel %vm606_vm5, %v7132_v32, %v7134_v44  ;;  %v7259_v44 = vld [vmem:[%s13074_s5 + $0x30] sm:$0xff] }
 0x3a2   :  { %v7136_v18 = vsel %vm608_vm6, %v7132_v32, %v7135_v41  ;;  %v8914_v12 = vpop.f32.mrf.mxu0  ;;  %v7293_v32 = vld [vmem:[%s13074_s5 + $0x140] sm:$0xff]  ;;  %9110 = vmatpush3.msra.mxu0 %v7259_v44 }
 0x3a3   :  { %7138 = vst.msk [vmem:[#allocation6 + $0x4] sm:$0x3] %vm7024_vm12, %v7136_v18  ;;  %v8915_v37 = vadd.f32 %v8914_v12, %v8913_v28  ;;  %9141 = vmatpush3.msra.mxu1 %v7293_v32  ;;  %9111 = vmatprep.subr.mxu0 %v7274_v15  ;;  %v7256_v28 = vld [vmem:[%s13074_s5 + $0x18] sm:$0xff]  ;;  %v7303_v12 = vld [vmem:[%s13074_s5 + $0x190] sm:$0xff] }
 0x3a4   :  { %9142 = vmatprep.subr.mxu1 %v7308_v36  ;;  %9112 = vmatpush3.msra.mxu0 %v7258_v1  ;;  %v7287_v32 = vld [vmem:[%s13074_s5 + $0x110] sm:$0xff]  ;;  %v7253_v36 = vld [vmem:[%s13074_s5] sm:$0xff] }
 0x3a5   :  { %v7321_v1 = vld [vmem:[%s13074_s5 + $0x220] sm:$0xff] }
 0x3a8   :  { %v8878_v40 = vpop.f32.mrf.mxu1 }
 0x3aa   :  { %v8879_v62 = vpop.f32.mrf.mxu1 }
 0x3ab   :  { %v8880_v22 = vadd.f32 %v8879_v62, %v8878_v40  ;;  %v5473_v40 = vadd.f32 %v8915_v37, %v12260_v9  ;;  %v7302_v37 = vld [vmem:[%s13074_s5 + $0x188] sm:$0xff] }
 0x3ad   :  { %v4832_v19 = vadd.f32 %v8880_v22, %v4762_v8 }
 0x3ae   :  { %v7052_v48 = vpop.permute.xlu0 %7051 }
 0x3af   :  { %v4835_v24 = vmax.f32 %v4832_v19, 0.0  ;;  %7055 = vst.msk [vmem:[#allocation6] sm:$0x3] %vm7054_vm13, %v7052_v48 }
 0x3b1   :  { %v4843_v63 = vrot.slane %v4835_v24, %v12274_v13 }
 0x3b3   :  { %v4844_v53 = vcombine.high %v4843_v63, %v4843_v63  ;;  %v4851_v50 = vrot.slane %v4843_v63, %v12274_v13 }
 0x3b5   :  { %v4858_v61 = vrot.slane %v4844_v53, %v12274_v13  ;;  %4861 = vst.msk [vmem:[#allocation5 + $0x6] sm:$0x1] %vm1304_vm11, %v4851_v50 }
 0x3b7   :  { %4862 = vst.msk [vmem:[#allocation5 + $0x12] sm:$0x1] %vm1304_vm11, %v4858_v61 }
 0x3bc   :  { %v8367_v14 = vld.sshfl [vmem:[#allocation5 + $0x6] sm:$0x1 pattern:$0x76325410] }
 0x3be   :  { %v8368_v4 = vld.sshfl [vmem:[#allocation5 + $0x12] sm:$0x1 pattern:$0x76325410] }
 0x3bf   :  { %v7159_v2 = vrot.slane %v8368_v4, 7 }
 0x3c1   :  { %v7160_v6 = vsel %vm602_vm3, %v7159_v2, %v8367_v14  ;;  %v7273_v14 = vld [vmem:[%s13074_s5 + $0xa0] sm:$0xff] }
 0x3c2   :  { %v7161_v49 = vsel %vm604_vm4, %v7159_v2, %v7160_v6  ;;  %v8983_v61 = vpop.f32.mrf.mxu0  ;;  %v7306_v6 = vld [vmem:[%s13074_s5 + $0x1a8] sm:$0xff]  ;;  %9113 = vmatprep.subr.mxu0 %v7273_v14  ;;  %v7319_v14 = vld [vmem:[%s13074_s5 + $0x210] sm:$0xff] }
 0x3c3   :  { %v7162_v25 = vsel %vm606_vm5, %v7159_v2, %v7161_v49  ;;  %v7305_v49 = vld [vmem:[%s13074_s5 + $0x1a0] sm:$0xff]  ;;  %9114 = vmatpush3.msra.mxu0 %v7257_v47 }
 0x3c4   :  { %v7163_v34 = vsel %vm608_vm6, %v7159_v2, %v7162_v25  ;;  %v8984_v21 = vpop.f32.mrf.mxu0  ;;  %v7292_v2 = vld [vmem:[%s13074_s5 + $0x138] sm:$0xff]  ;;  %v7289_v25 = vld [vmem:[%s13074_s5 + $0x120] sm:$0xff]  ;;  %9115 = vmatprep.subr.mxu0 %v7272_v60  ;;  %v7605_v60 = vld [vmem:[%s13076_s7 + $0xe8] sm:$0xff] }
 0x3c5   :  { %7164 = vrot.lane.b32.xlu0 %v7163_v34, %s9294_s21  ;;  %v8985_v26 = vadd.f32 %v8984_v21, %v8983_v61  ;;  %9143 = vmatpush3.msra.mxu1 %v7292_v2  ;;  %v7323_v2 = vld [vmem:[%s13074_s5 + $0x230] sm:$0xff]  ;;  %v7317_v47 = vld [vmem:[%s13074_s5 + $0x200] sm:$0xff] }
 0x3c6   :  { %9144 = vmatprep.subr.mxu1 %v7307_v23  ;;  %9116 = vmatpush3.msra.mxu0 %v7256_v28  ;;  %v7320_v23 = vld [vmem:[%s13074_s5 + $0x218] sm:$0xff]  ;;  %v7604_v28 = vld [vmem:[%s13076_s7 + $0xe0] sm:$0xff] }
 0x3c7   :  { %v6185_v42 = vadd.f32 %v8985_v26, %v12260_v9  ;;  %9145 = vmatpush3.msra.mxu1 %v7291_v17  ;;  %9117 = vmatprep.subr.mxu0 %v7271_v11  ;;  %v7318_v17 = vld [vmem:[%s13074_s5 + $0x208] sm:$0xff] }
 0x3c8   :  { %9146 = vmatprep.subr.mxu1 %v7306_v6  ;;  %9118 = vmatpush3.msra.mxu0 %v7255_v16  ;;  %v7601_v11 = vld [vmem:[%s13076_s7 + $0xc8] sm:$0xff]  ;;  %v7600_v16 = vld [vmem:[%s13076_s7 + $0xc0] sm:$0xff] }
 0x3c9   :  { %9147 = vmatpush3.msra.mxu1 %v7290_v0  ;;  %9119 = vmatprep.subr.mxu0 %v7270_v29  ;;  %v7607_v0 = vld [vmem:[%s13076_s7 + $0xf8] sm:$0xff] }
 0x3ca   :  { %v8948_v10 = vpop.f32.mrf.mxu1  ;;  %9148 = vmatprep.subr.mxu1 %v7305_v49  ;;  %9120 = vmatpush3.msra.mxu0 %v7254_v3  ;;  %v7606_v49 = vld [vmem:[%s13076_s7 + $0xf0] sm:$0xff]  ;;  %v7599_v29 = vld [vmem:[%s13076_s7 + $0xb8] sm:$0xff]  ;;  %v7593_v3 = vld [vmem:[%s13076_s7 + $0x88] sm:$0xff] }
 0x3cb   :  { %9149 = vmatpush3.msra.mxu1 %v7289_v25  ;;  %9121 = vmatprep.subr.mxu0 %v7269_v56  ;;  %v7603_v25 = vld [vmem:[%s13076_s7 + $0xd8] sm:$0xff]  ;;  %v7589_v56 = vld [vmem:[%s13076_s7 + $0x68] sm:$0xff] }
 0x3cc   :  { %v8949_v41 = vpop.f32.mrf.mxu1  ;;  %9150 = vmatprep.subr.mxu1 %v7304_v51  ;;  %9122 = vmatpush3.msra.mxu0 %v7253_v36  ;;  %v7602_v51 = vld [vmem:[%s13076_s7 + $0xd0] sm:$0xff] }
 0x3cd   :  { %v8950_v18 = vadd.f32 %v8949_v41, %v8948_v10  ;;  %9151 = vmatpush3.msra.mxu1 %v7288_v33  ;;  %v7596_v33 = vld [vmem:[%s13076_s7 + $0xa0] sm:$0xff]  ;;  %v7590_v36 = vld [vmem:[%s13076_s7 + $0x70] sm:$0xff] }
 0x3ce   :  { %9152 = vmatprep.subr.mxu1 %v7303_v12  ;;  %v7595_v12 = vld [vmem:[%s13076_s7 + $0x98] sm:$0xff] }
 0x3cf   :  { %v5543_v62 = vadd.f32 %v8950_v18, %v5473_v40  ;;  %9153 = vmatpush3.msra.mxu1 %v7287_v32  ;;  %v7286_v18 = vld [vmem:[%s13074_s5 + $0x108] sm:$0xff]  ;;  %v7591_v32 = vld [vmem:[%s13076_s7 + $0x78] sm:$0xff] }
 0x3d0   :  { %9154 = vmatprep.subr.mxu1 %v7302_v37  ;;  %v7585_v37 = vld [vmem:[%s13076_s7 + $0x48] sm:$0xff] }
 0x3d1   :  { %v5546_v8 = vmax.f32 %v5543_v62, 0.0  ;;  %9155 = vmatpush3.msra.mxu1 %v7286_v18  ;;  %v7301_v62 = vld [vmem:[%s13074_s5 + $0x180] sm:$0xff]  ;;  %v7583_v18 = vld [vmem:[%s13076_s7 + $0x38] sm:$0xff] }
 0x3d2   :  { %9156 = vmatprep.subr.mxu1 %v7301_v62  ;;  %v7580_v62 = vld [vmem:[%s13076_s7 + $0x20] sm:$0xff] }
 0x3d3   :  { %v5554_v22 = vrot.slane %v5546_v8, %v12274_v13  ;;  %v9299_v8 = vmov 0.0  }
 0x3d4   :  { %9240 = vmatprep.subr.mxu0 %v9299_v8 }
 0x3d5   :  { %v5555_v19 = vcombine.high %v5554_v22, %v5554_v22  ;;  %v5562_v48 = vrot.slane %v5554_v22, %v12274_v13  ;;  %v7285_v22 = vld [vmem:[%s13074_s5 + $0x100] sm:$0xff] }
 0x3d6   :  { %9157 = vmatpush3.msra.mxu1 %v7285_v22  ;;  %v7577_v22 = vld [vmem:[%s13076_s7 + $0x8] sm:$0xff] }
 0x3d7   :  { %v5569_v24 = vrot.slane %v5555_v19, %v12274_v13  ;;  %5573 = vst.msk [vmem:[#allocation5 + $0x8] sm:$0x1] %vm1304_vm11, %v5562_v48  ;;  %7649 = vmatprep.subr.mxu1 %v7605_v60  ;;  %v7790_v60 = vld [vmem:[%s13078_s9 + $0x58] sm:$0xff] }
 0x3d9   :  { %5574 = vst.msk [vmem:[#allocation5 + $0x14] sm:$0x1] %vm1304_vm11, %v5569_v24 }
 0x3de   :  { %v8369_v50 = vld.sshfl [vmem:[#allocation5 + $0x8] sm:$0x1 pattern:$0x76325410] }
 0x3e0   :  { %v8370_v63 = vld.sshfl [vmem:[#allocation5 + $0x14] sm:$0x1 pattern:$0x76325410] }
 0x3e1   :  { %v7188_v53 = vrot.slane %v8370_v63, 7 }
 0x3e3   :  { %v7189_v45 = vsel %vm602_vm3, %v7188_v53, %v8369_v50 }
 0x3e4   :  { %v7190_v39 = vsel %vm604_vm4, %v7188_v53, %v7189_v45  ;;  %v9053_v46 = vpop.f32.mrf.mxu0 }
 0x3e5   :  { %v7191_v55 = vsel %vm606_vm5, %v7188_v53, %v7190_v39 }
 0x3e6   :  { %v7192_v38 = vsel %vm608_vm6, %v7188_v53, %v7191_v55  ;;  %v9054_v41 = vpop.f32.mrf.mxu0 }
 0x3e7   :  { %7194 = vst.msk [vmem:[#allocation6 + $0x6] sm:$0x3] %vm7024_vm12, %v7192_v38  ;;  %v9055_v19 = vadd.f32 %v9054_v41, %v9053_v46  ;;  %v7592_v46 = vld [vmem:[%s13076_s7 + $0x80] sm:$0xff]  ;;  %v7586_v41 = vld [vmem:[%s13076_s7 + $0x50] sm:$0xff] }
 0x3e9   :  { %v6896_v63 = vadd.f32 %v9055_v19, %v12260_v9  ;;  %v7579_v19 = vld [vmem:[%s13076_s7 + $0x18] sm:$0xff] }
 0x3eb   :  { %v9018_v5 = vpop.f32.mrf.mxu1 }
 0x3ed   :  { %v9019_v57 = vpop.f32.mrf.mxu1 }
 0x3ee   :  { %v9020_v35 = vadd.f32 %v9019_v57, %v9018_v5 }
 0x3f0   :  { %v6255_v27 = vadd.f32 %v9020_v35, %v6185_v42 }
 0x3f2   :  { %v6258_v43 = vmax.f32 %v6255_v27, 0.0 }
 0x3f3   :  { %v7109_v54 = vpop.permute.xlu1 %7108 }
 0x3f4   :  { %v6266_v52 = vrot.slane %v6258_v43, %v12274_v13  ;;  %7111 = vst.msk [vmem:[#allocation6 + $0x2] sm:$0x3] %vm7054_vm13, %v7109_v54 }
 0x3f6   :  { %v6267_v20 = vcombine.high %v6266_v52, %v6266_v52  ;;  %v6274_v4 = vrot.slane %v6266_v52, %v12274_v13 }
 0x3f8   :  { %v6281_v30 = vrot.slane %v6267_v20, %v12274_v13  ;;  %6284 = vst.msk [vmem:[#allocation5 + $0x9] sm:$0x1] %vm1304_vm11, %v6274_v4 }
 0x3fa   :  { %6285 = vst.msk [vmem:[#allocation5 + $0x15] sm:$0x1] %vm1304_vm11, %v6281_v30  ;;  %v7324_v30 = vld [vmem:[%s13074_s5 + $0x238] sm:$0xff] }
 0x3ff   :  { %v8371_v59 = vld.sshfl [vmem:[#allocation5 + $0x9] sm:$0x1 pattern:$0x76325410] }
 0x401   :  { %v8372_v34 = vld.sshfl [vmem:[#allocation5 + $0x15] sm:$0x1 pattern:$0x76325410] }
 0x402   :  { %v7215_v7 = vrot.slane %v8372_v34, 7  ;;  %v7597_v34 = vld [vmem:[%s13076_s7 + $0xa8] sm:$0xff] }
 0x404   :  { %v7216_v31 = vsel %vm602_vm3, %v7215_v7, %v8371_v59  ;;  %v7594_v59 = vld [vmem:[%s13076_s7 + $0x90] sm:$0xff] }
 0x405   :  { %v7217_v44 = vsel %vm604_vm4, %v7215_v7, %v7216_v31  ;;  %v7588_v31 = vld [vmem:[%s13076_s7 + $0x60] sm:$0xff] }
 0x406   :  { %v7218_v10 = vsel %vm606_vm5, %v7215_v7, %v7217_v44  ;;  %v7587_v44 = vld [vmem:[%s13076_s7 + $0x58] sm:$0xff] }
 0x407   :  { %v7219_v40 = vsel %vm608_vm6, %v7215_v7, %v7218_v10  ;;  %v7598_v7 = vld [vmem:[%s13076_s7 + $0xb0] sm:$0xff]  ;;  %v7584_v10 = vld [vmem:[%s13076_s7 + $0x40] sm:$0xff] }
 0x408   :  { %7220 = vrot.lane.b32.xlu1 %v7219_v40, %s9294_s21  ;;  %v7581_v40 = vld [vmem:[%s13076_s7 + $0x28] sm:$0xff] }
 0x40b   :  { %v9088_v48 = vpop.f32.mrf.mxu1 }
 0x40d   :  { %v9089_v24 = vpop.f32.mrf.mxu1 }
 0x40e   :  { %v9090_v53 = vadd.f32 %v9089_v24, %v9088_v48  ;;  %v7576_v48 = vld [vmem:[%s13076_s7] sm:$0xff]  ;;  %v7578_v24 = vld [vmem:[%s13076_s7 + $0x10] sm:$0xff] }
 0x410   :  { %v6966_v50 = vadd.f32 %v9090_v53, %v6896_v63  ;;  %v7810_v63 = vld [vmem:[%s13078_s9 + $0xf8] sm:$0xff] }
 0x411   :  { %v7842_v53 = vld [vmem:[%s13078_s9 + $0x1f8] sm:$0xff] }
 0x412   :  { %v6969_v61 = vmax.f32 %v6966_v50, 0.0 }
 0x414   :  { %v6977_v45 = vrot.slane %v6969_v61, %v12274_v13 }
 0x416   :  { %v6978_v39 = vcombine.high %v6977_v45, %v6977_v45  ;;  %v6985_v55 = vrot.slane %v6977_v45, %v12274_v13 }
 0x418   :  { %v6992_v38 = vrot.slane %v6978_v39, %v12274_v13  ;;  %6995 = vst.msk [vmem:[#allocation5 + $0xa] sm:$0x1] %vm1304_vm11, %v6985_v55  ;;  %v8375_v55 = vld [vmem:[%s13075_s6] ss:$0 sm:$0xff] }
 0x41a   :  { %6996 = vst.msk [vmem:[#allocation5 + $0x16] sm:$0x1] %vm1304_vm11, %v6992_v38 }
 0x41f   :  { %v8373_v5 = vld.sshfl [vmem:[#allocation5 + $0xa] sm:$0x1 pattern:$0x76325410] }
 0x421   :  { %v8374_v21 = vld.sshfl [vmem:[#allocation5 + $0x16] sm:$0x1 pattern:$0x76325410] }
 0x422   :  { %v7244_v26 = vrot.slane %v8374_v21, 7 }
 0x424   :  { %v7245_v57 = vsel %vm602_vm3, %v7244_v26, %v8373_v5 }
 0x425   :  { %v7246_v9 = vsel %vm604_vm4, %v7244_v26, %v7245_v57 }
 0x426   :  { %v7247_v42 = vsel %vm606_vm5, %v7244_v26, %v7246_v9 }
 0x427   :  { %v7248_v35 = vsel %vm608_vm6, %v7244_v26, %v7247_v42 }
 0x428   :  { %7250 = vst.msk [vmem:[#allocation6 + $0x8] sm:$0x3] %vm7024_vm12, %v7248_v35 }
 0x42f   :  { %v8376_v6 = vld.sshfl [vmem:[#allocation6 + $0x8] sm:$0x3 pattern:$0x76325410] }
 0x437   :  { %v7165_v27 = vpop.permute.xlu0 %7164 }
 0x438   :  { %7167 = vst.msk [vmem:[#allocation6 + $0x4] sm:$0x3] %vm7054_vm13, %v7165_v27  ;;  %v7794_v27 = vld [vmem:[%s13078_s9 + $0x78] sm:$0xff] }
 0x47a   :  { %v7221_v13 = vpop.permute.xlu1 %7220 }
 0x47b   :  { %7223 = vst.msk [vmem:[#allocation6 + $0x6] sm:$0x3] %vm7054_vm13, %v7221_v13  ;;  %v7826_v13 = vld [vmem:[%s13078_s9 + $0x178] sm:$0xff] }
 0x482   :  { %v7251_v43 = vld [vmem:[#allocation6] sm:$0xff] }
 0x483   :  { %v7340_v54 = vrot.slane %v7251_v43, %v10333_v58  ;;  %v7333_v52 = vcombine.high %v7251_v43, %v7251_v43 }
 0x485   :  { %v7348_v20 = vcombine.high %v7340_v54, %v7340_v54  ;;  %v7347_v4 = vrot.slane %v7333_v52, %v10333_v58  ;;  %v7322_v58 = vld [vmem:[%s13074_s5 + $0x228] sm:$0xff]  ;;  %v7841_v52 = vld [vmem:[%s13078_s9 + $0x1f0] sm:$0xff] }
 0x487   :  { %7427 = vmatprep.mubr.f32.mxu0 %v7348_v20  ;;  %v7349_v15 = vcombine.high %v7347_v4, %v7347_v4  ;;  %v7793_v20 = vld [vmem:[%s13078_s9 + $0x70] sm:$0xff] }
 0x488   :  { %7428 = vmatmul.mubr.f32.vlgmr.msra.gmra.mxu0 %v7340_v54  ;;  %v7809_v54 = vld [vmem:[%s13078_s9 + $0xf0] sm:$0xff] }
 0x489   :  { %9241 = vmatpush3.msra.mxu0 %v7324_v30  ;;  %7497 = vmatprep.mubr.f32.mxu1 %v7349_v15  ;;  %v7808_v30 = vld [vmem:[%s13078_s9 + $0xe8] sm:$0xff] }
 0x48a   :  { %9242 = vmatprep.subr.mxu0 %v9299_v8  ;;  %7498 = vmatmul.mubr.f32.vlgmr.msra.gmra.mxu1 %v7347_v4  ;;  %v7825_v4 = vld [vmem:[%s13078_s9 + $0x170] sm:$0xff]  ;;  %v7840_v15 = vld [vmem:[%s13078_s9 + $0x1e8] sm:$0xff] }
 0x48b   :  { %9243 = vmatpush3.msra.mxu0 %v7323_v2  ;;  %9256 = vmatprep.mubr.msk.f32.mxu0 %vm9300_vm14, %v9299_v8  ;;  %v7792_v2 = vld [vmem:[%s13078_s9 + $0x68] sm:$0xff] }
 0x48c   :  { %9244 = vmatprep.subr.mxu0 %v9299_v8  ;;  %7697 = vmatprep.mubr.f32.mxu1 %v9299_v8 }
 0x48d   :  { %9245 = vmatpush3.msra.mxu0 %v7322_v58  ;;  %7650 = vmatpush1.msra.mxu1 %v7604_v28  ;;  %v7824_v58 = vld [vmem:[%s13078_s9 + $0x168] sm:$0xff]  ;;  %v7805_v28 = vld [vmem:[%s13078_s9 + $0xd0] sm:$0xff] }
 0x48e   :  { %9246 = vmatprep.subr.mxu0 %v9299_v8  ;;  %7651 = vmatprep.subr.mxu1 %v7601_v11  ;;  %v7789_v11 = vld [vmem:[%s13078_s9 + $0x50] sm:$0xff] }
 0x48f   :  { %9247 = vmatpush3.msra.mxu0 %v7321_v1  ;;  %7652 = vmatpush1.msra.mxu1 %v7600_v16  ;;  %v7807_v1 = vld [vmem:[%s13078_s9 + $0xe0] sm:$0xff]  ;;  %v7804_v16 = vld [vmem:[%s13078_s9 + $0xc8] sm:$0xff] }
 0x490   :  { %9248 = vmatprep.subr.mxu0 %v9299_v8  ;;  %7653 = vmatprep.subr.mxu1 %v7597_v34  ;;  %v7788_v34 = vld [vmem:[%s13078_s9 + $0x48] sm:$0xff] }
 0x491   :  { %9249 = vmatpush3.msra.mxu0 %v7320_v23  ;;  %7654 = vmatpush1.msra.mxu1 %v7596_v33  ;;  %v7839_v23 = vld [vmem:[%s13078_s9 + $0x1e0] sm:$0xff] }
 0x492   :  { %9250 = vmatprep.subr.mxu0 %v9299_v8  ;;  %7655 = vmatprep.subr.mxu1 %v7593_v3  ;;  %v7803_v33 = vld [vmem:[%s13078_s9 + $0xc0] sm:$0xff] }
 0x493   :  { %9251 = vmatpush3.msra.mxu0 %v7319_v14  ;;  %7656 = vmatpush1.msra.mxu1 %v7592_v46  ;;  %v7791_v14 = vld [vmem:[%s13078_s9 + $0x60] sm:$0xff]  ;;  %v7802_v46 = vld [vmem:[%s13078_s9 + $0xb8] sm:$0xff] }
 0x494   :  { %9252 = vmatprep.subr.mxu0 %v9299_v8  ;;  %7657 = vmatprep.subr.mxu1 %v7589_v56  ;;  %v7787_v3 = vld [vmem:[%s13078_s9 + $0x40] sm:$0xff]  ;;  %v7786_v56 = vld [vmem:[%s13078_s9 + $0x38] sm:$0xff] }
 0x495   :  { %9253 = vmatpush3.msra.mxu0 %v7318_v17  ;;  %7658 = vmatpush1.msra.mxu1 %v7588_v31  ;;  %v7823_v17 = vld [vmem:[%s13078_s9 + $0x160] sm:$0xff]  ;;  %v7801_v31 = vld [vmem:[%s13078_s9 + $0xb0] sm:$0xff] }
 0x496   :  { %9254 = vmatprep.subr.mxu0 %v9299_v8  ;;  %7659 = vmatprep.subr.mxu1 %v7585_v37  ;;  %v7785_v37 = vld [vmem:[%s13078_s9 + $0x30] sm:$0xff] }
 0x497   :  { %9255 = vmatpush3.msra.mxu0 %v7317_v47  ;;  %7660 = vmatpush1.msra.mxu1 %v7584_v10  ;;  %v7806_v47 = vld [vmem:[%s13078_s9 + $0xd8] sm:$0xff]  ;;  %v7800_v10 = vld [vmem:[%s13078_s9 + $0xa8] sm:$0xff] }
 0x498   :  { %9257 = vmatmul.mubr.msk.f32.vlgmr.msra.gmra.mxu0 %vm40_vm0, %v8376_v6  ;;  %7720 = vmatprep.subr.mxu0 %v7607_v0  ;;  %v7838_v6 = vld [vmem:[%s13078_s9 + $0x1d8] sm:$0xff] }
 0x499   :  { %7768 = vmatprep.mubr.f32.mxu0 %v9299_v8  ;;  %7721 = vmatpush1.msra.mxu0 %v7606_v49  ;;  %v7582_v8 = vld [vmem:[%s13076_s7 + $0x30] sm:$0xff]  ;;  %v7822_v0 = vld [vmem:[%s13078_s9 + $0x158] sm:$0xff] }
 0x49a   :  { %7722 = vmatprep.subr.mxu0 %v7603_v25  ;;  %7661 = vmatprep.subr.mxu1 %v7581_v40  ;;  %v7837_v49 = vld [vmem:[%s13078_s9 + $0x1d0] sm:$0xff]  ;;  %v7784_v40 = vld [vmem:[%s13078_s9 + $0x28] sm:$0xff] }
 0x49b   :  { %7723 = vmatpush1.msra.mxu0 %v7602_v51  ;;  %7662 = vmatpush1.msra.mxu1 %v7580_v62  ;;  %v7821_v25 = vld [vmem:[%s13078_s9 + $0x150] sm:$0xff]  ;;  %v7836_v51 = vld [vmem:[%s13078_s9 + $0x1c8] sm:$0xff]  ;;  %v7799_v62 = vld [vmem:[%s13078_s9 + $0xa0] sm:$0xff] }
 0x49c   :  { %7724 = vmatprep.subr.mxu0 %v7599_v29  ;;  %7663 = vmatprep.subr.mxu1 %v7577_v22  ;;  %v7820_v29 = vld [vmem:[%s13078_s9 + $0x148] sm:$0xff]  ;;  %v7783_v22 = vld [vmem:[%s13078_s9 + $0x20] sm:$0xff] }
 0x49d   :  { %7725 = vmatpush1.msra.mxu0 %v7598_v7  ;;  %7664 = vmatpush1.msra.mxu1 %v7576_v48  ;;  %v7835_v7 = vld [vmem:[%s13078_s9 + $0x1c0] sm:$0xff]  ;;  %v7798_v48 = vld [vmem:[%s13078_s9 + $0x98] sm:$0xff] }
 0x49e   :  { %7726 = vmatprep.subr.mxu0 %v7595_v12  ;;  %9170 = vmatprep.subr.mxu1 %v7810_v63  ;;  %v7819_v12 = vld [vmem:[%s13078_s9 + $0x140] sm:$0xff]  ;;  %v7782_v63 = vld [vmem:[%s13078_s9 + $0x18] sm:$0xff] }
 0x49f   :  { %7727 = vmatpush1.msra.mxu0 %v7594_v59  ;;  %v7834_v59 = vld [vmem:[%s13078_s9 + $0x1b8] sm:$0xff] }
 0x4a0   :  { %7728 = vmatprep.subr.mxu0 %v7591_v32  ;;  %v7818_v32 = vld [vmem:[%s13078_s9 + $0x138] sm:$0xff] }
 0x4a1   :  { %7729 = vmatpush1.msra.mxu0 %v7590_v36  ;;  %v7833_v36 = vld [vmem:[%s13078_s9 + $0x1b0] sm:$0xff] }
 0x4a2   :  { %7730 = vmatprep.subr.mxu0 %v7587_v44  ;;  %v7817_v44 = vld [vmem:[%s13078_s9 + $0x130] sm:$0xff] }
 0x4a3   :  { %7731 = vmatpush1.msra.mxu0 %v7586_v41  ;;  %v7832_v41 = vld [vmem:[%s13078_s9 + $0x1a8] sm:$0xff] }
 0x4a4   :  { %7732 = vmatprep.subr.mxu0 %v7583_v18  ;;  %v7816_v18 = vld [vmem:[%s13078_s9 + $0x128] sm:$0xff] }
 0x4a5   :  { %7733 = vmatpush1.msra.mxu0 %v7582_v8  ;;  %v7831_v8 = vld [vmem:[%s13078_s9 + $0x1a0] sm:$0xff] }
 0x4a6   :  { %7734 = vmatprep.subr.mxu0 %v7579_v19  ;;  %v7815_v19 = vld [vmem:[%s13078_s9 + $0x120] sm:$0xff] }
 0x4a7   :  { %7735 = vmatpush1.msra.mxu0 %v7578_v24  ;;  %v7830_v24 = vld [vmem:[%s13078_s9 + $0x198] sm:$0xff] }
 0x4a8   :  { %9205 = vmatprep.subr.mxu0 %v7842_v53  ;;  %v7814_v53 = vld [vmem:[%s13078_s9 + $0x118] sm:$0xff] }
 0x548   :  { %v9123_v50 = vpop.f32.mrf.mxu0 }
 0x54a   :  { %v9124_v61 = vpop.f32.mrf.mxu0  ;;  %v9158_v45 = vpop.f32.mrf.mxu1 }
 0x54b   :  { %v9125_v39 = vadd.f32 %v9124_v61, %v9123_v50  ;;  %v7797_v50 = vld [vmem:[%s13078_s9 + $0x90] sm:$0xff] }
 0x54c   :  { %v9159_v38 = vpop.f32.mrf.mxu1  ;;  %v7829_v61 = vld [vmem:[%s13078_s9 + $0x190] sm:$0xff] }
 0x54d   :  { %v7430_v21 = vadd.f32 %v9125_v39, %v8375_v55  ;;  %v9160_v26 = vadd.f32 %v9159_v38, %v9158_v45  ;;  %v7781_v45 = vld [vmem:[%s13078_s9 + $0x10] sm:$0xff]  ;;  %v7796_v55 = vld [vmem:[%s13078_s9 + $0x88] sm:$0xff] }
 0x54e   :  { %v7813_v39 = vld [vmem:[%s13078_s9 + $0x110] sm:$0xff]  ;;  %v7828_v38 = vld [vmem:[%s13078_s9 + $0x188] sm:$0xff] }
 0x54f   :  { %v7500_v5 = vadd.f32 %v9160_v26, %v7430_v21  ;;  %v7780_v21 = vld [vmem:[%s13078_s9 + $0x8] sm:$0xff] }
 0x550   :  { %v7812_v26 = vld [vmem:[%s13078_s9 + $0x108] sm:$0xff] }
 0x558   :  { %v7569_v57 = vpop.f32.mrf.mxu0 }
 0x559   :  { %v7570_v9 = vadd.f32 %v7569_v57, %v7500_v5  ;;  %v7795_v5 = vld [vmem:[%s13078_s9 + $0x80] sm:$0xff] }
 0x55a   :  { %v9258_v42 = vpop.f32.mrf.mxu0  ;;  %v7827_v57 = vld [vmem:[%s13078_s9 + $0x180] sm:$0xff] }
 0x55b   :  { %v7573_v35 = vmax.f32 %v7570_v9, 0.0  ;;  %v7779_v9 = vld [vmem:[%s13078_s9] sm:$0xff] }
 0x55c   :  { %v7811_v42 = vld [vmem:[%s13078_s9 + $0x100] sm:$0xff] }
 0x55d   :  { %7574 = vst.msk [vmem:[#allocation7] sm:$0x3] %vm7024_vm12, %v7573_v35  ;;  %v13262_v35 = vld [vmem:[#allocation17_spill] sm:$0xff] }
 0x564   :  { %v7575_v43 = vld [vmem:[#allocation7] sm:$0x3] }
 0x565   :  { %8378 = vmatmul.mubr.msk.f32.vlgmr.msra.gmra.mxu1 %vm40_vm0, %v7575_v43  ;;  %8379 = vmatmul.mubr.msk.f32.vlgmr.msra.gmra.mxu0 %vm40_vm0, %v7575_v43  ;;  %v7608_v43 = vld [vmem:[%s13077_s8] sm:$0xf] }
 0x566   :  { %9171 = vmatpush3.msra.mxu1 %v7794_v27  ;;  %9206 = vmatpush3.msra.mxu0 %v7826_v13  ;;  %v7612_v27 = vsub.s32 0, %v13262_v35  ;;  %v7620_v13 = vsub.s32 2, %v13262_v35 }
 0x567   :  { %9172 = vmatprep.subr.mxu1 %v7809_v54  ;;  %9207 = vmatprep.subr.mxu0 %v7841_v52  ;;  %v7616_v54 = vsub.s32 1, %v13262_v35  ;;  %v7624_v52 = vsub.s32 3, %v13262_v35 }
 0x568   :  { %9173 = vmatpush3.msra.mxu1 %v7793_v20  ;;  %9208 = vmatpush3.msra.mxu0 %v7825_v4  ;;  %v7613_v20 = vrot.slane %v7608_v43, %v7612_v27  ;;  %v7621_v4 = vrot.slane %v7608_v43, %v7620_v13 }
 0x569   :  { %9174 = vmatprep.subr.mxu1 %v7808_v30  ;;  %9209 = vmatprep.subr.mxu0 %v7840_v15  ;;  %v7617_v30 = vrot.slane %v7608_v43, %v7616_v54  ;;  %v7625_v15 = vrot.slane %v7608_v43, %v7624_v52 }
 0x56a   :  { %9175 = vmatpush3.msra.mxu1 %v7792_v2  ;;  %9210 = vmatpush3.msra.mxu0 %v7824_v58 }
 0x56b   :  { %9176 = vmatprep.subr.mxu1 %v7807_v1  ;;  %9211 = vmatprep.subr.mxu0 %v7839_v23 }
 0x56c   :  { %9177 = vmatpush3.msra.mxu1 %v7791_v14  ;;  %9212 = vmatpush3.msra.mxu0 %v7823_v17 }
 0x56d   :  { %9178 = vmatprep.subr.mxu1 %v7806_v47  ;;  %9213 = vmatprep.subr.mxu0 %v7838_v6 }
 0x56e   :  { %9179 = vmatpush3.msra.mxu1 %v7790_v60  ;;  %9214 = vmatpush3.msra.mxu0 %v7822_v0 }
 0x56f   :  { %9180 = vmatprep.subr.mxu1 %v7805_v28  ;;  %9215 = vmatprep.subr.mxu0 %v7837_v49 }
 0x570   :  { %9181 = vmatpush3.msra.mxu1 %v7789_v11  ;;  %9216 = vmatpush3.msra.mxu0 %v7821_v25 }
 0x571   :  { %9182 = vmatprep.subr.mxu1 %v7804_v16  ;;  %9217 = vmatprep.subr.mxu0 %v7836_v51  ;;  %v8380_v16 = vld [vmem:[%s13079_s10] ss:$0 sm:$0xff] }
 0x572   :  { %9183 = vmatpush3.msra.mxu1 %v7788_v34  ;;  %9218 = vmatpush3.msra.mxu0 %v7820_v29 }
 0x573   :  { %9184 = vmatprep.subr.mxu1 %v7803_v33  ;;  %9219 = vmatprep.subr.mxu0 %v7835_v7 }
 0x574   :  { %9185 = vmatpush3.msra.mxu1 %v7787_v3  ;;  %9220 = vmatpush3.msra.mxu0 %v7819_v12 }
 0x575   :  { %9186 = vmatprep.subr.mxu1 %v7802_v46  ;;  %9221 = vmatprep.subr.mxu0 %v7834_v59 }
 0x576   :  { %9187 = vmatpush3.msra.mxu1 %v7786_v56  ;;  %9222 = vmatpush3.msra.mxu0 %v7818_v32 }
 0x577   :  { %9188 = vmatprep.subr.mxu1 %v7801_v31  ;;  %9223 = vmatprep.subr.mxu0 %v7833_v36 }
 0x578   :  { %9189 = vmatpush3.msra.mxu1 %v7785_v37  ;;  %9224 = vmatpush3.msra.mxu0 %v7817_v44 }
 0x579   :  { %9190 = vmatprep.subr.mxu1 %v7800_v10  ;;  %9225 = vmatprep.subr.mxu0 %v7832_v41 }
 0x57a   :  { %9191 = vmatpush3.msra.mxu1 %v7784_v40  ;;  %9226 = vmatpush3.msra.mxu0 %v7816_v18 }
 0x57b   :  { %9192 = vmatprep.subr.mxu1 %v7799_v62  ;;  %9227 = vmatprep.subr.mxu0 %v7831_v8 }
 0x57c   :  { %9193 = vmatpush3.msra.mxu1 %v7783_v22  ;;  %9228 = vmatpush3.msra.mxu0 %v7815_v19 }
 0x57d   :  { %9194 = vmatprep.subr.mxu1 %v7798_v48  ;;  %9229 = vmatprep.subr.mxu0 %v7830_v24 }
 0x57e   :  { %9195 = vmatpush3.msra.mxu1 %v7782_v63  ;;  %9230 = vmatpush3.msra.mxu0 %v7814_v53 }
 0x57f   :  { %9196 = vmatprep.subr.mxu1 %v7797_v50  ;;  %9231 = vmatprep.subr.mxu0 %v7829_v61 }
 0x580   :  { %9197 = vmatpush3.msra.mxu1 %v7781_v45  ;;  %9232 = vmatpush3.msra.mxu0 %v7813_v39 }
 0x581   :  { %9198 = vmatprep.subr.mxu1 %v7796_v55  ;;  %9233 = vmatprep.subr.mxu0 %v7828_v38 }
 0x582   :  { %9199 = vmatpush3.msra.mxu1 %v7780_v21  ;;  %9234 = vmatpush3.msra.mxu0 %v7812_v26 }
 0x583   :  { %9200 = vmatprep.subr.mxu1 %v7795_v5  ;;  %9235 = vmatprep.subr.mxu0 %v7827_v57 }
 0x584   :  { %9201 = vmatpush3.msra.mxu1 %v7779_v9  ;;  %9236 = vmatpush3.msra.mxu0 %v7811_v42 }
 0x625   :  { %v7699_v2 = vpop.f32.mrf.mxu1  ;;  %v7770_v58 = vpop.f32.mrf.mxu0 }
 0x626   :  { %v7700_v1 = vadd.f32 %v7699_v2, %v7613_v20  ;;  %v7771_v23 = vadd.f32 %v7770_v58, %v7621_v4 }
 0x627   :  { %v7701_v14 = vpop.f32.mrf.mxu1  ;;  %v7772_v17 = vpop.f32.mrf.mxu0 }
 0x628   :  { %v7702_v47 = vadd.f32 %v7701_v14, %v7617_v30  ;;  %v7773_v6 = vadd.f32 %v7772_v17, %v7625_v15  ;;  %v7775_v28 = vmax.f32 %v7700_v1, 0.0  ;;  %v7777_v49 = vmax.f32 %v7771_v23, 0.0 }
 0x62a   :  { %v7776_v60 = vmax.f32 %v7702_v47, 0.0  ;;  %v7778_v0 = vmax.f32 %v7773_v6, 0.0 }
 0x62c   :  { %7914 = vmatprep.mubr.f32.mxu1 %v7776_v60  ;;  %7984 = vmatprep.mubr.f32.mxu0 %v7778_v0 }
 0x62d   :  { %7915 = vmatmul.mubr.f32.vlgmr.msra.gmra.mxu1 %v7775_v28  ;;  %7985 = vmatmul.mubr.f32.vlgmr.msra.gmra.mxu0 %v7777_v49 }
 0x6ed   :  { %v9202_v11 = vpop.f32.mrf.mxu1  ;;  %v9237_v25 = vpop.f32.mrf.mxu0 }
 0x6ef   :  { %v9203_v51 = vpop.f32.mrf.mxu1  ;;  %v9238_v34 = vpop.f32.mrf.mxu0 }
 0x6f0   :  { %v9204_v29 = vadd.f32 %v9203_v51, %v9202_v11  ;;  %v9239_v7 = vadd.f32 %v9238_v34, %v9237_v25 }
 0x6f2   :  { %v7917_v33 = vadd.f32 %v9204_v29, %v8380_v16 }
 0x6f4   :  { %v7987_v3 = vadd.f32 %v9239_v7, %v7917_v33 }
 0x6f6   :  { %7990 = vst [vmem:[#allocation8] sm:$0x3] %v7987_v3 }
 0x6f7   :  { %9283 = shalt.err (!%p9280_p4)
}
 0x6f8   :  { %8000 = dma.vmem_to_hbm [thread:$0]  %s7998_s28, 32, %s13080_s11, [#allocation9]  }
 0x6f9   :  { %9292 = dma.done.wait [#allocation9], 32  }
 0x6fa   :  { %9293 = vsyncadd [#allocation9], 4294967264 }
 0x6fb   :  { %8004 = vsyncpa [#allocation9], 1 }

</bundles_post_ra>
